<compile_context>
chip_gen: v5e
topology: v5e:2x2
jax: 0.10.0
libtpu: 0.0.40
codegen_flags: <defaults>
</compile_context>

<pallas_src>
import functools
import numpy as np

import jax
import jax.numpy as jnp
from jax.experimental import pallas as pl
from jax.experimental.pallas import tpu as pltpu

LANE = 128
KH = 5  # both convs are 5x5


# ----------------------------- fused Pallas kernel -----------------------------

def _lenet_kernel(x_ref, b1_ref, b2_ref, wfc1_ref, wfc2_ref, wfc3_ref,
                  bias_ref, out_ref, *, B):
    """Whole Net forward for one block of B samples (grid axis = batch blocks).

    x_ref   : (4, 8*B, 128) bf16  x[m, a*B + b, :] = image row 4a+m of sample b;
                                  lanes = w*3 + ci (96 used, padded to 128).
    b1_ref  : (2, 640, 128) bf16  conv1 banded weights: [dx, ky*128 + win*3+ci, pw*6+co].
    b2_ref  : (2, 640, 128) bf16  conv2 banded weights: [dx, ky*128 + win*6+ci, pw*16+co].
    wfc1_ref: (640, 128) bf16     fc1 weights, rows = h*128 + w*16 + c.
    wfc2_ref, wfc3_ref : (128, 128) bf16
    bias_ref: (5, 128) f32        rows: conv1, conv2, fc1, fc2, fc3 (tiled/padded).
    out_ref : (B, 128) f32        logits, row b = sample b (first 10 lanes used).
    """
    f32 = jnp.float32
    bf16 = jnp.bfloat16

    b_conv1 = bias_ref[0:1, :]
    b_conv2 = bias_ref[1:2, :]
    b_fc1 = bias_ref[2:3, :]
    b_fc2 = bias_ref[3:4, :]
    b_fc3 = bias_ref[4:5, :]

    # ---- conv1 (5x5, 3->6) + ReLU + 2x2/2 maxpool ----
    # pooled1[p][q*B + b, pw*6+co] = pooled feature of sample b at pooled row
    # 2q+p (14 pooled rows), pooled col pw, channel co.  For phase (dy, dx) and
    # tap ky the image rows needed are 4q + (2p+dy+ky), q = 0..6, which is one
    # contiguous (7B, 128) slice in the row%4 layout.  The 5 ky taps are
    # lane-concatenated so the tap accumulation happens inside a single
    # (7B, 640) @ (640, 128) MXU matmul per (p, dy, dx) phase (8 dots total).
    pooled1 = []
    for p in (0, 1):
        best = None
        for dy in (0, 1):
            slabs = []
            for ky in range(KH):
                s = 2 * p + dy + ky                      # 0..7
                lo = (s // 4) * B
                slabs.append(x_ref[s % 4, lo:lo + 7 * B, :])
            lhs = jnp.concatenate(slabs, axis=-1)        # (7B, 640) bf16
            for dx in (0, 1):
                d = jnp.dot(lhs, b1_ref[dx], preferred_element_type=f32)
                best = d if best is None else jnp.maximum(best, d)
        # bias + ReLU commute with the phase max (bias constant, relu monotone).
        pooled1.append(jnp.maximum(best + b_conv1, 0.0).astype(bf16))

    # ---- conv2 (5x5, 6->16) + ReLU + 2x2/2 maxpool ----
    # Output rows indexed (h, b); conv2 tap ky at output row 2h+dy reads
    # pooled1 row 2h + (dy+ky) = pooled1[(dy+ky) % 2] rows h + (dy+ky)//2,
    # i.e. again a contiguous (5B, 128) slice.  4 dots of (5B,640)@(640,128).
    best = None
    for dy in (0, 1):
        slabs = []
        for ky in range(KH):
            t = dy + ky                                  # 0..5
            lo = (t // 2) * B
            slabs.append(pooled1[t % 2][lo:lo + 5 * B, :])
        lhs = jnp.concatenate(slabs, axis=-1)            # (5B, 640) bf16
        for dx in (0, 1):
            d = jnp.dot(lhs, b2_ref[dx], preferred_element_type=f32)
            best = d if best is None else jnp.maximum(best, d)
    pooled2 = jnp.maximum(best + b_conv2, 0.0).astype(bf16)   # (5B, 128)

    # ---- fc1 (400 -> 120) + ReLU as ONE (B, 640) @ (640, 128) matmul ----
    rows = [pooled2[h * B:(h + 1) * B, :] for h in range(5)]
    lhs = jnp.concatenate(rows, axis=-1)                 # (B, 640) bf16
    h1 = jnp.maximum(
        jnp.dot(lhs, wfc1_ref[...], preferred_element_type=f32) + b_fc1, 0.0)

    # ---- fc2 (120 -> 84) + ReLU ----
    h2 = jnp.maximum(
        jnp.dot(h1.astype(bf16), wfc2_ref[...],
                preferred_element_type=f32) + b_fc2, 0.0)

    # ---- fc3 (84 -> 10) ----
    out_ref[...] = (jnp.dot(h2.astype(bf16), wfc3_ref[...],
                            preferred_element_type=f32) + b_fc3)


# ------------------------- one-time weight preprocessing -------------------------

def init_params(key):
    def uniform(key, shape, fan_in):
        bound = 1.0 / jnp.sqrt(jnp.float32(fan_in))
        return jax.random.uniform(key, shape, jnp.float32, -bound, bound)

    ks = jax.random.split(key, 10)
    return {
        "conv1_w": uniform(ks[0], (6, 3, 5, 5), 3 * 5 * 5),
        "conv1_b": uniform(ks[1], (6,), 3 * 5 * 5),
        "conv2_w": uniform(ks[2], (16, 6, 5, 5), 6 * 5 * 5),
        "conv2_b": uniform(ks[3], (16,), 6 * 5 * 5),
        "fc1_w": uniform(ks[4], (120, 400), 400),
        "fc1_b": uniform(ks[5], (120,), 400),
        "fc2_w": uniform(ks[6], (84, 120), 120),
        "fc2_b": uniform(ks[7], (84,), 120),
        "fc3_w": uniform(ks[8], (10, 84), 84),
        "fc3_b": uniform(ks[9], (10,), 84),
    }


def _banded_conv_weights_cat(w, out_w, lane=LANE):
    """Build band[dx] of shape (kh*lane, lane) so that for an activation row
    laid out as row[w_in*Cin + ci] and LHS lanes ky*lane + w_in*Cin + ci (the 5
    ky-shifted slices lane-concatenated), (lhs @ band[dx])[pw*Cout + co] is the
    FULL conv (all taps) evaluated at output column ow = 2*pw + dx (the two
    horizontal 2x2-pool phases).  Unused rows/cols stay zero."""
    cout, cin, kh, kw = w.shape
    w = np.asarray(w, np.float32)
    band = np.zeros((2, kh * lane, lane), np.float32)
    for dx in range(2):
        for ky in range(kh):
            for pw in range(out_w):
                for kx in range(kw):
                    w_in = 2 * pw + dx + kx
                    band[dx,
                         ky * lane + w_in * cin: ky * lane + (w_in + 1) * cin,
                         pw * cout:(pw + 1) * cout] = w[:, :, ky, kx].T
    return band


def prepare_params(params, lane=LANE):
    """Hoisted, one-time conversion of PyTorch-layout weights into kernel-ready
    128-lane-padded bf16 matrices (weights) and f32 bias rows."""
    p = {k: np.asarray(v, np.float32) for k, v in params.items()}

    B1 = _banded_conv_weights_cat(p["conv1_w"], out_w=14, lane=lane)  # in_w=32
    B2 = _banded_conv_weights_cat(p["conv2_w"], out_w=5, lane=lane)   # in_w=14

    # PyTorch flattens the (16, 5, 5) NCHW activation in (c, h, w) order; our
    # pooled2 lanes are (w*16 + c) lane-concatenated over h, so build one
    # (5*128, 128) fc1 matrix with rows h*128 + w*16 + c.
    Wfc1 = np.zeros((5 * lane, lane), np.float32)
    for h in range(5):
        for w_ in range(5):
            for c in range(16):
                Wfc1[h * lane + w_ * 16 + c, :120] = \
                    p["fc1_w"][:, c * 25 + h * 5 + w_]

    Wfc2 = np.zeros((lane, lane), np.float32)
    Wfc2[:120, :84] = p["fc2_w"].T
    Wfc3 = np.zeros((lane, lane), np.float32)
    Wfc3[:84, :10] = p["fc3_w"].T

    biases = np.zeros((5, lane), np.float32)
    biases[0, :14 * 6] = np.tile(p["conv1_b"], 14)   # lanes pw*6 + co
    biases[1, :5 * 16] = np.tile(p["conv2_b"], 5)    # lanes pw*16 + co
    biases[2, :120] = p["fc1_b"]
    biases[3, :84] = p["fc2_b"]
    biases[4, :10] = p["fc3_b"]

    bf16 = jnp.bfloat16
    return {
        "B1": jnp.asarray(B1, bf16),
        "B2": jnp.asarray(B2, bf16),
        "Wfc1": jnp.asarray(Wfc1, bf16),
        "Wfc2": jnp.asarray(Wfc2, bf16),
        "Wfc3": jnp.asarray(Wfc3, bf16),
        "biases": jnp.asarray(biases, jnp.float32),
    }


# --------------------------------- forward pass ---------------------------------

@functools.partial(jax.jit, static_argnames=("block_batch",))
def net_forward(prepped, x_nchw, block_batch=32):
    """Net forward for NCHW float32 input (N, 3, 32, 32) -> (N, 10) logits.

    block_batch samples are processed per grid step, stacked along the matmul
    M/sublane dimension.  Must be a multiple of 16 so every bf16 slice in the
    kernel stays (16, 128)-tile aligned.  ~32 fills v5e's 128-row MXU for the
    conv-phase dots; prefer 64+ on v6e/v7x, and on v7x size it so the grid has
    >= 2 steps so both TensorCores get a block.  VMEM stays ~1-3 MB regardless.
    """
    assert block_batch % 16 == 0, "block_batch must be a multiple of 16"
    n = x_nchw.shape[0]
    B = block_batch
    n_blocks = pl.cdiv(n, B)
    n_pad = n_blocks * B

    # Cheap fused glue on the tiny input only: NCHW -> NHWC, merge (W, C) into
    # the lane dim (w*3 + c), zero-pad 96 -> 128 lanes, pad the batch to a
    # multiple of B, and interleave to x[blk, m, a*B + b, :] = image row 4a+m
    # of sample blk*B+b so every in-kernel access is one contiguous slice.
    x = jnp.transpose(x_nchw, (0, 2, 3, 1)).reshape(n, 32, 96)
    x = jnp.pad(x, ((0, n_pad - n), (0, 0), (0, LANE - 96)))
    x = x.reshape(n_blocks, B, 8, 4, LANE).transpose(0, 3, 2, 1, 4)
    x = x.reshape(n_blocks, 4, 8 * B, LANE).astype(jnp.bfloat16)

    out = pl.pallas_call(
        functools.partial(_lenet_kernel, B=B),
        out_shape=jax.ShapeDtypeStruct((n_pad, LANE), jnp.float32),
        grid=(n_blocks,),
        in_specs=[
            pl.BlockSpec((None, 4, 8 * B, LANE), lambda i: (i, 0, 0, 0)),
            # Weights/biases: constant index maps -> fetched once and kept
            # VMEM-resident (~1 MB total) across the whole batch grid.
            pl.BlockSpec((2, 5 * LANE, LANE), lambda i: (0, 0, 0)),
            pl.BlockSpec((2, 5 * LANE, LANE), lambda i: (0, 0, 0)),
            pl.BlockSpec((5 * LANE, LANE), lambda i: (0, 0)),
            pl.BlockSpec((LANE, LANE), lambda i: (0, 0)),
            pl.BlockSpec((LANE, LANE), lambda i: (0, 0)),
            pl.BlockSpec((5, LANE), lambda i: (0, 0)),
        ],
        out_specs=pl.BlockSpec((B, LANE), lambda i: (i, 0)),
        compiler_params=pltpu.CompilerParams(
            dimension_semantics=("parallel",)),
    )(x, prepped["B1"], prepped["B2"], prepped["Wfc1"], prepped["Wfc2"],
      prepped["Wfc3"], prepped["biases"])

    return out[:n, :10]


# --------------------------- reference (pure JAX, f32) ---------------------------

def reference_forward(params, x):
    def conv(x, w, b):
        y = jax.lax.conv_general_dilated(
            x, w, window_strides=(1, 1), padding="VALID",
            dimension_numbers=("NCHW", "OIHW", "NCHW"))
        return jax.nn.relu(y + b[None, :, None, None])

    def pool(x):
        n, c, h, w = x.shape
        return jnp.max(x.reshape(n, c, h // 2, 2, w // 2, 2), axis=(3, 5))

    x = pool(conv(x, params["conv1_w"], params["conv1_b"]))
    x = pool(conv(x, params["conv2_w"], params["conv2_b"]))
    x = x.reshape(x.shape[0], -1)
    x = jax.nn.relu(x @ params["fc1_w"].T + params["fc1_b"])
    x = jax.nn.relu(x @ params["fc2_w"].T + params["fc2_b"])
    return x @ params["fc3_w"].T + params["fc3_b"]


# ------------------------------------- main -------------------------------------

if __name__ == "__main__":
    key = jax.random.PRNGKey(0)
    pkey, xkey = jax.random.split(key)
    params = init_params(pkey)
    prepped = prepare_params(params)          # one-time weight preprocessing

    # Input shape fixed by the module (3x32x32 -> 16*5*5 flatten); batch = 2.
    x = jax.random.normal(xkey, (2, 3, 32, 32), dtype=jnp.float32)

    out = jax.block_until_ready(net_forward(prepped, x, block_batch=32))
    assert out.shape == (2, 10), out.shape

    ref = jax.block_until_ready(reference_forward(params, x))
    # bf16 MXU operands with f32 accumulation -> allow a small numeric slack.
    assert jnp.allclose(out, ref, atol=2e-2, rtol=2e-2), (
        "Pallas output mismatch vs pure-JAX reference: "
        f"max abs err {jnp.max(jnp.abs(out - ref)):.3e}")

    print("KERNEL_OK")
</pallas_src>

<mosaic_0001>
module attributes {stable_mosaic.version = 11 : i64} {
  func.func @_lenet_kernel(%arg0: i32, %arg1: memref<1x4x256x128xbf16, #tpu.memory_space<vmem>>, %arg2: memref<2x640x128xbf16, #tpu.memory_space<vmem>>, %arg3: memref<2x640x128xbf16, #tpu.memory_space<vmem>>, %arg4: memref<640x128xbf16, #tpu.memory_space<vmem>>, %arg5: memref<128x128xbf16, #tpu.memory_space<vmem>>, %arg6: memref<128x128xbf16, #tpu.memory_space<vmem>>, %arg7: memref<5x128xf32, #tpu.memory_space<vmem>>, %arg8: memref<32x128xf32, #tpu.memory_space<vmem>>) attributes {dimension_semantics = [#tpu.dimension_semantics<parallel>], iteration_bounds = array<i64: 1>, scalar_prefetch = 0 : i64, scratch_operands = 0 : i64, tpu.core_type = #tpu.core_type<tc>, window_params = [{transform_indices = @transform_0, window_bounds = array<i64: 1, 4, 256, 128>}, {pipeline_mode = #tpu.pipeline_mode<synchronous>, transform_indices = @transform_1, window_bounds = array<i64: 2, 640, 128>}, {pipeline_mode = #tpu.pipeline_mode<synchronous>, transform_indices = @transform_2, window_bounds = array<i64: 2, 640, 128>}, {pipeline_mode = #tpu.pipeline_mode<synchronous>, transform_indices = @transform_3, window_bounds = array<i64: 640, 128>}, {pipeline_mode = #tpu.pipeline_mode<synchronous>, transform_indices = @transform_4, window_bounds = array<i64: 128, 128>}, {pipeline_mode = #tpu.pipeline_mode<synchronous>, transform_indices = @transform_5, window_bounds = array<i64: 128, 128>}, {pipeline_mode = #tpu.pipeline_mode<synchronous>, transform_indices = @transform_6, window_bounds = array<i64: 5, 128>}, {transform_indices = @transform_7, window_bounds = array<i64: 32, 128>}]} {
    %c0 = arith.constant 0 : index
    %c0_0 = arith.constant 0 : index
    %0 = vector.load %arg7[%c0, %c0_0] : memref<5x128xf32, #tpu.memory_space<vmem>>, vector<1x128xf32>
    %c1 = arith.constant 1 : index
    %c0_1 = arith.constant 0 : index
    %1 = vector.load %arg7[%c1, %c0_1] : memref<5x128xf32, #tpu.memory_space<vmem>>, vector<1x128xf32>
    %c2 = arith.constant 2 : index
    %c0_2 = arith.constant 0 : index
    %2 = vector.load %arg7[%c2, %c0_2] : memref<5x128xf32, #tpu.memory_space<vmem>>, vector<1x128xf32>
    %c3 = arith.constant 3 : index
    %c0_3 = arith.constant 0 : index
    %3 = vector.load %arg7[%c3, %c0_3] : memref<5x128xf32, #tpu.memory_space<vmem>>, vector<1x128xf32>
    %c4 = arith.constant 4 : index
    %c0_4 = arith.constant 0 : index
    %4 = vector.load %arg7[%c4, %c0_4] : memref<5x128xf32, #tpu.memory_space<vmem>>, vector<1x128xf32>
    %c0_5 = arith.constant 0 : index
    %c0_6 = arith.constant 0 : index
    %c0_7 = arith.constant 0 : index
    %c0_8 = arith.constant 0 : index
    %5 = vector.load %arg1[%c0_5, %c0_6, %c0_7, %c0_8] : memref<1x4x256x128xbf16, #tpu.memory_space<vmem>>, vector<1x1x224x128xbf16>
    %6 = vector.shape_cast %5 : vector<1x1x224x128xbf16> to vector<224x128xbf16>
    %c0_9 = arith.constant 0 : index
    %c1_10 = arith.constant 1 : index
    %c0_11 = arith.constant 0 : index
    %c0_12 = arith.constant 0 : index
    %7 = vector.load %arg1[%c0_9, %c1_10, %c0_11, %c0_12] : memref<1x4x256x128xbf16, #tpu.memory_space<vmem>>, vector<1x1x224x128xbf16>
    %8 = vector.shape_cast %7 : vector<1x1x224x128xbf16> to vector<224x128xbf16>
    %c0_13 = arith.constant 0 : index
    %c2_14 = arith.constant 2 : index
    %c0_15 = arith.constant 0 : index
    %c0_16 = arith.constant 0 : index
    %9 = vector.load %arg1[%c0_13, %c2_14, %c0_15, %c0_16] : memref<1x4x256x128xbf16, #tpu.memory_space<vmem>>, vector<1x1x224x128xbf16>
    %10 = vector.shape_cast %9 : vector<1x1x224x128xbf16> to vector<224x128xbf16>
    %c0_17 = arith.constant 0 : index
    %c3_18 = arith.constant 3 : index
    %c0_19 = arith.constant 0 : index
    %c0_20 = arith.constant 0 : index
    %11 = vector.load %arg1[%c0_17, %c3_18, %c0_19, %c0_20] : memref<1x4x256x128xbf16, #tpu.memory_space<vmem>>, vector<1x1x224x128xbf16>
    %12 = vector.shape_cast %11 : vector<1x1x224x128xbf16> to vector<224x128xbf16>
    %c0_21 = arith.constant 0 : index
    %c0_22 = arith.constant 0 : index
    %c32 = arith.constant 32 : index
    %c0_23 = arith.constant 0 : index
    %13 = vector.load %arg1[%c0_21, %c0_22, %c32, %c0_23] : memref<1x4x256x128xbf16, #tpu.memory_space<vmem>>, vector<1x1x224x128xbf16>
    %14 = vector.shape_cast %13 : vector<1x1x224x128xbf16> to vector<224x128xbf16>
    %15 = tpu.concatenate %6, %8, %10, %12, %14 in 1 : vector<224x128xbf16>, vector<224x128xbf16>, vector<224x128xbf16>, vector<224x128xbf16>, vector<224x128xbf16> -> vector<224x640xbf16>
    %c0_24 = arith.constant 0 : index
    %c0_25 = arith.constant 0 : index
    %c0_26 = arith.constant 0 : index
    %16 = vector.load %arg2[%c0_24, %c0_25, %c0_26] : memref<2x640x128xbf16, #tpu.memory_space<vmem>>, vector<1x640x128xbf16>
    %17 = vector.shape_cast %16 : vector<1x640x128xbf16> to vector<640x128xbf16>
    %cst = arith.constant dense<0.000000e+00> : vector<224x128xf32>
    %18 = tpu.matmul %15, %17, %cst {dimension_numbers = #tpu.dot_dimension_numbers<[1], [0], [0], [1], [0, 0, 1, 1], [], []>} : vector<224x640xbf16>, vector<640x128xbf16>, vector<224x128xf32> -> vector<224x128xf32>
    %c1_27 = arith.constant 1 : index
    %c0_28 = arith.constant 0 : index
    %c0_29 = arith.constant 0 : index
    %19 = vector.load %arg2[%c1_27, %c0_28, %c0_29] : memref<2x640x128xbf16, #tpu.memory_space<vmem>>, vector<1x640x128xbf16>
    %20 = vector.shape_cast %19 : vector<1x640x128xbf16> to vector<640x128xbf16>
    %cst_30 = arith.constant dense<0.000000e+00> : vector<224x128xf32>
    %21 = tpu.matmul %15, %20, %cst_30 {dimension_numbers = #tpu.dot_dimension_numbers<[1], [0], [0], [1], [0, 0, 1, 1], [], []>} : vector<224x640xbf16>, vector<640x128xbf16>, vector<224x128xf32> -> vector<224x128xf32>
    %22 = arith.maximumf %18, %21 : vector<224x128xf32>
    %c0_31 = arith.constant 0 : index
    %c1_32 = arith.constant 1 : index
    %c0_33 = arith.constant 0 : index
    %c0_34 = arith.constant 0 : index
    %23 = vector.load %arg1[%c0_31, %c1_32, %c0_33, %c0_34] : memref<1x4x256x128xbf16, #tpu.memory_space<vmem>>, vector<1x1x224x128xbf16>
    %24 = vector.shape_cast %23 : vector<1x1x224x128xbf16> to vector<224x128xbf16>
    %c0_35 = arith.constant 0 : index
    %c2_36 = arith.constant 2 : index
    %c0_37 = arith.constant 0 : index
    %c0_38 = arith.constant 0 : index
    %25 = vector.load %arg1[%c0_35, %c2_36, %c0_37, %c0_38] : memref<1x4x256x128xbf16, #tpu.memory_space<vmem>>, vector<1x1x224x128xbf16>
    %26 = vector.shape_cast %25 : vector<1x1x224x128xbf16> to vector<224x128xbf16>
    %c0_39 = arith.constant 0 : index
    %c3_40 = arith.constant 3 : index
    %c0_41 = arith.constant 0 : index
    %c0_42 = arith.constant 0 : index
    %27 = vector.load %arg1[%c0_39, %c3_40, %c0_41, %c0_42] : memref<1x4x256x128xbf16, #tpu.memory_space<vmem>>, vector<1x1x224x128xbf16>
    %28 = vector.shape_cast %27 : vector<1x1x224x128xbf16> to vector<224x128xbf16>
    %c0_43 = arith.constant 0 : index
    %c0_44 = arith.constant 0 : index
    %c32_45 = arith.constant 32 : index
    %c0_46 = arith.constant 0 : index
    %29 = vector.load %arg1[%c0_43, %c0_44, %c32_45, %c0_46] : memref<1x4x256x128xbf16, #tpu.memory_space<vmem>>, vector<1x1x224x128xbf16>
    %30 = vector.shape_cast %29 : vector<1x1x224x128xbf16> to vector<224x128xbf16>
    %c0_47 = arith.constant 0 : index
    %c1_48 = arith.constant 1 : index
    %c32_49 = arith.constant 32 : index
    %c0_50 = arith.constant 0 : index
    %31 = vector.load %arg1[%c0_47, %c1_48, %c32_49, %c0_50] : memref<1x4x256x128xbf16, #tpu.memory_space<vmem>>, vector<1x1x224x128xbf16>
    %32 = vector.shape_cast %31 : vector<1x1x224x128xbf16> to vector<224x128xbf16>
    %33 = tpu.concatenate %24, %26, %28, %30, %32 in 1 : vector<224x128xbf16>, vector<224x128xbf16>, vector<224x128xbf16>, vector<224x128xbf16>, vector<224x128xbf16> -> vector<224x640xbf16>
    %c0_51 = arith.constant 0 : index
    %c0_52 = arith.constant 0 : index
    %c0_53 = arith.constant 0 : index
    %34 = vector.load %arg2[%c0_51, %c0_52, %c0_53] : memref<2x640x128xbf16, #tpu.memory_space<vmem>>, vector<1x640x128xbf16>
    %35 = vector.shape_cast %34 : vector<1x640x128xbf16> to vector<640x128xbf16>
    %cst_54 = arith.constant dense<0.000000e+00> : vector<224x128xf32>
    %36 = tpu.matmul %33, %35, %cst_54 {dimension_numbers = #tpu.dot_dimension_numbers<[1], [0], [0], [1], [0, 0, 1, 1], [], []>} : vector<224x640xbf16>, vector<640x128xbf16>, vector<224x128xf32> -> vector<224x128xf32>
    %37 = arith.maximumf %22, %36 : vector<224x128xf32>
    %c1_55 = arith.constant 1 : index
    %c0_56 = arith.constant 0 : index
    %c0_57 = arith.constant 0 : index
    %38 = vector.load %arg2[%c1_55, %c0_56, %c0_57] : memref<2x640x128xbf16, #tpu.memory_space<vmem>>, vector<1x640x128xbf16>
    %39 = vector.shape_cast %38 : vector<1x640x128xbf16> to vector<640x128xbf16>
    %cst_58 = arith.constant dense<0.000000e+00> : vector<224x128xf32>
    %40 = tpu.matmul %33, %39, %cst_58 {dimension_numbers = #tpu.dot_dimension_numbers<[1], [0], [0], [1], [0, 0, 1, 1], [], []>} : vector<224x640xbf16>, vector<640x128xbf16>, vector<224x128xf32> -> vector<224x128xf32>
    %41 = arith.maximumf %37, %40 : vector<224x128xf32>
    %42 = vector.broadcast %0 : vector<1x128xf32> to vector<224x128xf32>
    %43 = arith.addf %41, %42 : vector<224x128xf32>
    %cst_59 = arith.constant 0.000000e+00 : f32
    %44 = vector.broadcast %cst_59 : f32 to vector<224x128xf32>
    %45 = arith.maximumf %43, %44 : vector<224x128xf32>
    %46 = arith.truncf %45 : vector<224x128xf32> to vector<224x128xbf16>
    %c0_60 = arith.constant 0 : index
    %c2_61 = arith.constant 2 : index
    %c0_62 = arith.constant 0 : index
    %c0_63 = arith.constant 0 : index
    %47 = vector.load %arg1[%c0_60, %c2_61, %c0_62, %c0_63] : memref<1x4x256x128xbf16, #tpu.memory_space<vmem>>, vector<1x1x224x128xbf16>
    %48 = vector.shape_cast %47 : vector<1x1x224x128xbf16> to vector<224x128xbf16>
    %c0_64 = arith.constant 0 : index
    %c3_65 = arith.constant 3 : index
    %c0_66 = arith.constant 0 : index
    %c0_67 = arith.constant 0 : index
    %49 = vector.load %arg1[%c0_64, %c3_65, %c0_66, %c0_67] : memref<1x4x256x128xbf16, #tpu.memory_space<vmem>>, vector<1x1x224x128xbf16>
    %50 = vector.shape_cast %49 : vector<1x1x224x128xbf16> to vector<224x128xbf16>
    %c0_68 = arith.constant 0 : index
    %c0_69 = arith.constant 0 : index
    %c32_70 = arith.constant 32 : index
    %c0_71 = arith.constant 0 : index
    %51 = vector.load %arg1[%c0_68, %c0_69, %c32_70, %c0_71] : memref<1x4x256x128xbf16, #tpu.memory_space<vmem>>, vector<1x1x224x128xbf16>
    %52 = vector.shape_cast %51 : vector<1x1x224x128xbf16> to vector<224x128xbf16>
    %c0_72 = arith.constant 0 : index
    %c1_73 = arith.constant 1 : index
    %c32_74 = arith.constant 32 : index
    %c0_75 = arith.constant 0 : index
    %53 = vector.load %arg1[%c0_72, %c1_73, %c32_74, %c0_75] : memref<1x4x256x128xbf16, #tpu.memory_space<vmem>>, vector<1x1x224x128xbf16>
    %54 = vector.shape_cast %53 : vector<1x1x224x128xbf16> to vector<224x128xbf16>
    %c0_76 = arith.constant 0 : index
    %c2_77 = arith.constant 2 : index
    %c32_78 = arith.constant 32 : index
    %c0_79 = arith.constant 0 : index
    %55 = vector.load %arg1[%c0_76, %c2_77, %c32_78, %c0_79] : memref<1x4x256x128xbf16, #tpu.memory_space<vmem>>, vector<1x1x224x128xbf16>
    %56 = vector.shape_cast %55 : vector<1x1x224x128xbf16> to vector<224x128xbf16>
    %57 = tpu.concatenate %48, %50, %52, %54, %56 in 1 : vector<224x128xbf16>, vector<224x128xbf16>, vector<224x128xbf16>, vector<224x128xbf16>, vector<224x128xbf16> -> vector<224x640xbf16>
    %c0_80 = arith.constant 0 : index
    %c0_81 = arith.constant 0 : index
    %c0_82 = arith.constant 0 : index
    %58 = vector.load %arg2[%c0_80, %c0_81, %c0_82] : memref<2x640x128xbf16, #tpu.memory_space<vmem>>, vector<1x640x128xbf16>
    %59 = vector.shape_cast %58 : vector<1x640x128xbf16> to vector<640x128xbf16>
    %cst_83 = arith.constant dense<0.000000e+00> : vector<224x128xf32>
    %60 = tpu.matmul %57, %59, %cst_83 {dimension_numbers = #tpu.dot_dimension_numbers<[1], [0], [0], [1], [0, 0, 1, 1], [], []>} : vector<224x640xbf16>, vector<640x128xbf16>, vector<224x128xf32> -> vector<224x128xf32>
    %c1_84 = arith.constant 1 : index
    %c0_85 = arith.constant 0 : index
    %c0_86 = arith.constant 0 : index
    %61 = vector.load %arg2[%c1_84, %c0_85, %c0_86] : memref<2x640x128xbf16, #tpu.memory_space<vmem>>, vector<1x640x128xbf16>
    %62 = vector.shape_cast %61 : vector<1x640x128xbf16> to vector<640x128xbf16>
    %cst_87 = arith.constant dense<0.000000e+00> : vector<224x128xf32>
    %63 = tpu.matmul %57, %62, %cst_87 {dimension_numbers = #tpu.dot_dimension_numbers<[1], [0], [0], [1], [0, 0, 1, 1], [], []>} : vector<224x640xbf16>, vector<640x128xbf16>, vector<224x128xf32> -> vector<224x128xf32>
    %64 = arith.maximumf %60, %63 : vector<224x128xf32>
    %c0_88 = arith.constant 0 : index
    %c3_89 = arith.constant 3 : index
    %c0_90 = arith.constant 0 : index
    %c0_91 = arith.constant 0 : index
    %65 = vector.load %arg1[%c0_88, %c3_89, %c0_90, %c0_91] : memref<1x4x256x128xbf16, #tpu.memory_space<vmem>>, vector<1x1x224x128xbf16>
    %66 = vector.shape_cast %65 : vector<1x1x224x128xbf16> to vector<224x128xbf16>
    %c0_92 = arith.constant 0 : index
    %c0_93 = arith.constant 0 : index
    %c32_94 = arith.constant 32 : index
    %c0_95 = arith.constant 0 : index
    %67 = vector.load %arg1[%c0_92, %c0_93, %c32_94, %c0_95] : memref<1x4x256x128xbf16, #tpu.memory_space<vmem>>, vector<1x1x224x128xbf16>
    %68 = vector.shape_cast %67 : vector<1x1x224x128xbf16> to vector<224x128xbf16>
    %c0_96 = arith.constant 0 : index
    %c1_97 = arith.constant 1 : index
    %c32_98 = arith.constant 32 : index
    %c0_99 = arith.constant 0 : index
    %69 = vector.load %arg1[%c0_96, %c1_97, %c32_98, %c0_99] : memref<1x4x256x128xbf16, #tpu.memory_space<vmem>>, vector<1x1x224x128xbf16>
    %70 = vector.shape_cast %69 : vector<1x1x224x128xbf16> to vector<224x128xbf16>
    %c0_100 = arith.constant 0 : index
    %c2_101 = arith.constant 2 : index
    %c32_102 = arith.constant 32 : index
    %c0_103 = arith.constant 0 : index
    %71 = vector.load %arg1[%c0_100, %c2_101, %c32_102, %c0_103] : memref<1x4x256x128xbf16, #tpu.memory_space<vmem>>, vector<1x1x224x128xbf16>
    %72 = vector.shape_cast %71 : vector<1x1x224x128xbf16> to vector<224x128xbf16>
    %c0_104 = arith.constant 0 : index
    %c3_105 = arith.constant 3 : index
    %c32_106 = arith.constant 32 : index
    %c0_107 = arith.constant 0 : index
    %73 = vector.load %arg1[%c0_104, %c3_105, %c32_106, %c0_107] : memref<1x4x256x128xbf16, #tpu.memory_space<vmem>>, vector<1x1x224x128xbf16>
    %74 = vector.shape_cast %73 : vector<1x1x224x128xbf16> to vector<224x128xbf16>
    %75 = tpu.concatenate %66, %68, %70, %72, %74 in 1 : vector<224x128xbf16>, vector<224x128xbf16>, vector<224x128xbf16>, vector<224x128xbf16>, vector<224x128xbf16> -> vector<224x640xbf16>
    %c0_108 = arith.constant 0 : index
    %c0_109 = arith.constant 0 : index
    %c0_110 = arith.constant 0 : index
    %76 = vector.load %arg2[%c0_108, %c0_109, %c0_110] : memref<2x640x128xbf16, #tpu.memory_space<vmem>>, vector<1x640x128xbf16>
    %77 = vector.shape_cast %76 : vector<1x640x128xbf16> to vector<640x128xbf16>
    %cst_111 = arith.constant dense<0.000000e+00> : vector<224x128xf32>
    %78 = tpu.matmul %75, %77, %cst_111 {dimension_numbers = #tpu.dot_dimension_numbers<[1], [0], [0], [1], [0, 0, 1, 1], [], []>} : vector<224x640xbf16>, vector<640x128xbf16>, vector<224x128xf32> -> vector<224x128xf32>
    %79 = arith.maximumf %64, %78 : vector<224x128xf32>
    %c1_112 = arith.constant 1 : index
    %c0_113 = arith.constant 0 : index
    %c0_114 = arith.constant 0 : index
    %80 = vector.load %arg2[%c1_112, %c0_113, %c0_114] : memref<2x640x128xbf16, #tpu.memory_space<vmem>>, vector<1x640x128xbf16>
    %81 = vector.shape_cast %80 : vector<1x640x128xbf16> to vector<640x128xbf16>
    %cst_115 = arith.constant dense<0.000000e+00> : vector<224x128xf32>
    %82 = tpu.matmul %75, %81, %cst_115 {dimension_numbers = #tpu.dot_dimension_numbers<[1], [0], [0], [1], [0, 0, 1, 1], [], []>} : vector<224x640xbf16>, vector<640x128xbf16>, vector<224x128xf32> -> vector<224x128xf32>
    %83 = arith.maximumf %79, %82 : vector<224x128xf32>
    %84 = vector.broadcast %0 : vector<1x128xf32> to vector<224x128xf32>
    %85 = arith.addf %83, %84 : vector<224x128xf32>
    %cst_116 = arith.constant 0.000000e+00 : f32
    %86 = vector.broadcast %cst_116 : f32 to vector<224x128xf32>
    %87 = arith.maximumf %85, %86 : vector<224x128xf32>
    %88 = arith.truncf %87 : vector<224x128xf32> to vector<224x128xbf16>
    %89 = vector.extract_strided_slice %46 {offsets = [0, 0], sizes = [160, 128], strides = [1, 1]} : vector<224x128xbf16> to vector<160x128xbf16>
    %90 = vector.extract_strided_slice %88 {offsets = [0, 0], sizes = [160, 128], strides = [1, 1]} : vector<224x128xbf16> to vector<160x128xbf16>
    %91 = vector.extract_strided_slice %46 {offsets = [32, 0], sizes = [160, 128], strides = [1, 1]} : vector<224x128xbf16> to vector<160x128xbf16>
    %92 = vector.extract_strided_slice %88 {offsets = [32, 0], sizes = [160, 128], strides = [1, 1]} : vector<224x128xbf16> to vector<160x128xbf16>
    %93 = vector.extract_strided_slice %46 {offsets = [64, 0], sizes = [160, 128], strides = [1, 1]} : vector<224x128xbf16> to vector<160x128xbf16>
    %94 = tpu.concatenate %89, %90, %91, %92, %93 in 1 : vector<160x128xbf16>, vector<160x128xbf16>, vector<160x128xbf16>, vector<160x128xbf16>, vector<160x128xbf16> -> vector<160x640xbf16>
    %c0_117 = arith.constant 0 : index
    %c0_118 = arith.constant 0 : index
    %c0_119 = arith.constant 0 : index
    %95 = vector.load %arg3[%c0_117, %c0_118, %c0_119] : memref<2x640x128xbf16, #tpu.memory_space<vmem>>, vector<1x640x128xbf16>
    %96 = vector.shape_cast %95 : vector<1x640x128xbf16> to vector<640x128xbf16>
    %cst_120 = arith.constant dense<0.000000e+00> : vector<160x128xf32>
    %97 = tpu.matmul %94, %96, %cst_120 {dimension_numbers = #tpu.dot_dimension_numbers<[1], [0], [0], [1], [0, 0, 1, 1], [], []>} : vector<160x640xbf16>, vector<640x128xbf16>, vector<160x128xf32> -> vector<160x128xf32>
    %c1_121 = arith.constant 1 : index
    %c0_122 = arith.constant 0 : index
    %c0_123 = arith.constant 0 : index
    %98 = vector.load %arg3[%c1_121, %c0_122, %c0_123] : memref<2x640x128xbf16, #tpu.memory_space<vmem>>, vector<1x640x128xbf16>
    %99 = vector.shape_cast %98 : vector<1x640x128xbf16> to vector<640x128xbf16>
    %cst_124 = arith.constant dense<0.000000e+00> : vector<160x128xf32>
    %100 = tpu.matmul %94, %99, %cst_124 {dimension_numbers = #tpu.dot_dimension_numbers<[1], [0], [0], [1], [0, 0, 1, 1], [], []>} : vector<160x640xbf16>, vector<640x128xbf16>, vector<160x128xf32> -> vector<160x128xf32>
    %101 = arith.maximumf %97, %100 : vector<160x128xf32>
    %102 = vector.extract_strided_slice %88 {offsets = [0, 0], sizes = [160, 128], strides = [1, 1]} : vector<224x128xbf16> to vector<160x128xbf16>
    %103 = vector.extract_strided_slice %46 {offsets = [32, 0], sizes = [160, 128], strides = [1, 1]} : vector<224x128xbf16> to vector<160x128xbf16>
    %104 = vector.extract_strided_slice %88 {offsets = [32, 0], sizes = [160, 128], strides = [1, 1]} : vector<224x128xbf16> to vector<160x128xbf16>
    %105 = vector.extract_strided_slice %46 {offsets = [64, 0], sizes = [160, 128], strides = [1, 1]} : vector<224x128xbf16> to vector<160x128xbf16>
    %106 = vector.extract_strided_slice %88 {offsets = [64, 0], sizes = [160, 128], strides = [1, 1]} : vector<224x128xbf16> to vector<160x128xbf16>
    %107 = tpu.concatenate %102, %103, %104, %105, %106 in 1 : vector<160x128xbf16>, vector<160x128xbf16>, vector<160x128xbf16>, vector<160x128xbf16>, vector<160x128xbf16> -> vector<160x640xbf16>
    %c0_125 = arith.constant 0 : index
    %c0_126 = arith.constant 0 : index
    %c0_127 = arith.constant 0 : index
    %108 = vector.load %arg3[%c0_125, %c0_126, %c0_127] : memref<2x640x128xbf16, #tpu.memory_space<vmem>>, vector<1x640x128xbf16>
    %109 = vector.shape_cast %108 : vector<1x640x128xbf16> to vector<640x128xbf16>
    %cst_128 = arith.constant dense<0.000000e+00> : vector<160x128xf32>
    %110 = tpu.matmul %107, %109, %cst_128 {dimension_numbers = #tpu.dot_dimension_numbers<[1], [0], [0], [1], [0, 0, 1, 1], [], []>} : vector<160x640xbf16>, vector<640x128xbf16>, vector<160x128xf32> -> vector<160x128xf32>
    %111 = arith.maximumf %101, %110 : vector<160x128xf32>
    %c1_129 = arith.constant 1 : index
    %c0_130 = arith.constant 0 : index
    %c0_131 = arith.constant 0 : index
    %112 = vector.load %arg3[%c1_129, %c0_130, %c0_131] : memref<2x640x128xbf16, #tpu.memory_space<vmem>>, vector<1x640x128xbf16>
    %113 = vector.shape_cast %112 : vector<1x640x128xbf16> to vector<640x128xbf16>
    %cst_132 = arith.constant dense<0.000000e+00> : vector<160x128xf32>
    %114 = tpu.matmul %107, %113, %cst_132 {dimension_numbers = #tpu.dot_dimension_numbers<[1], [0], [0], [1], [0, 0, 1, 1], [], []>} : vector<160x640xbf16>, vector<640x128xbf16>, vector<160x128xf32> -> vector<160x128xf32>
    %115 = arith.maximumf %111, %114 : vector<160x128xf32>
    %116 = vector.broadcast %1 : vector<1x128xf32> to vector<160x128xf32>
    %117 = arith.addf %115, %116 : vector<160x128xf32>
    %cst_133 = arith.constant 0.000000e+00 : f32
    %118 = vector.broadcast %cst_133 : f32 to vector<160x128xf32>
    %119 = arith.maximumf %117, %118 : vector<160x128xf32>
    %120 = arith.truncf %119 : vector<160x128xf32> to vector<160x128xbf16>
    %121 = vector.extract_strided_slice %120 {offsets = [0, 0], sizes = [32, 128], strides = [1, 1]} : vector<160x128xbf16> to vector<32x128xbf16>
    %122 = vector.extract_strided_slice %120 {offsets = [32, 0], sizes = [32, 128], strides = [1, 1]} : vector<160x128xbf16> to vector<32x128xbf16>
    %123 = vector.extract_strided_slice %120 {offsets = [64, 0], sizes = [32, 128], strides = [1, 1]} : vector<160x128xbf16> to vector<32x128xbf16>
    %124 = vector.extract_strided_slice %120 {offsets = [96, 0], sizes = [32, 128], strides = [1, 1]} : vector<160x128xbf16> to vector<32x128xbf16>
    %125 = vector.extract_strided_slice %120 {offsets = [128, 0], sizes = [32, 128], strides = [1, 1]} : vector<160x128xbf16> to vector<32x128xbf16>
    %126 = tpu.concatenate %121, %122, %123, %124, %125 in 1 : vector<32x128xbf16>, vector<32x128xbf16>, vector<32x128xbf16>, vector<32x128xbf16>, vector<32x128xbf16> -> vector<32x640xbf16>
    %c0_134 = arith.constant 0 : index
    %c0_135 = arith.constant 0 : index
    %127 = vector.load %arg4[%c0_134, %c0_135] : memref<640x128xbf16, #tpu.memory_space<vmem>>, vector<640x128xbf16>
    %cst_136 = arith.constant dense<0.000000e+00> : vector<32x128xf32>
    %128 = tpu.matmul %126, %127, %cst_136 {dimension_numbers = #tpu.dot_dimension_numbers<[1], [0], [0], [1], [0, 0, 1, 1], [], []>} : vector<32x640xbf16>, vector<640x128xbf16>, vector<32x128xf32> -> vector<32x128xf32>
    %129 = vector.broadcast %2 : vector<1x128xf32> to vector<32x128xf32>
    %130 = arith.addf %128, %129 : vector<32x128xf32>
    %cst_137 = arith.constant 0.000000e+00 : f32
    %131 = vector.broadcast %cst_137 : f32 to vector<32x128xf32>
    %132 = arith.maximumf %130, %131 : vector<32x128xf32>
    %133 = arith.truncf %132 : vector<32x128xf32> to vector<32x128xbf16>
    %c0_138 = arith.constant 0 : index
    %c0_139 = arith.constant 0 : index
    %134 = vector.load %arg5[%c0_138, %c0_139] : memref<128x128xbf16, #tpu.memory_space<vmem>>, vector<128x128xbf16>
    %cst_140 = arith.constant dense<0.000000e+00> : vector<32x128xf32>
    %135 = tpu.matmul %133, %134, %cst_140 {dimension_numbers = #tpu.dot_dimension_numbers<[1], [0], [0], [1], [0, 0, 1, 1], [], []>} : vector<32x128xbf16>, vector<128x128xbf16>, vector<32x128xf32> -> vector<32x128xf32>
    %136 = vector.broadcast %3 : vector<1x128xf32> to vector<32x128xf32>
    %137 = arith.addf %135, %136 : vector<32x128xf32>
    %cst_141 = arith.constant 0.000000e+00 : f32
    %138 = vector.broadcast %cst_141 : f32 to vector<32x128xf32>
    %139 = arith.maximumf %137, %138 : vector<32x128xf32>
    %140 = arith.truncf %139 : vector<32x128xf32> to vector<32x128xbf16>
    %c0_142 = arith.constant 0 : index
    %c0_143 = arith.constant 0 : index
    %141 = vector.load %arg6[%c0_142, %c0_143] : memref<128x128xbf16, #tpu.memory_space<vmem>>, vector<128x128xbf16>
    %cst_144 = arith.constant dense<0.000000e+00> : vector<32x128xf32>
    %142 = tpu.matmul %140, %141, %cst_144 {dimension_numbers = #tpu.dot_dimension_numbers<[1], [0], [0], [1], [0, 0, 1, 1], [], []>} : vector<32x128xbf16>, vector<128x128xbf16>, vector<32x128xf32> -> vector<32x128xf32>
    %143 = vector.broadcast %4 : vector<1x128xf32> to vector<32x128xf32>
    %144 = arith.addf %142, %143 : vector<32x128xf32>
    %c0_145 = arith.constant 0 : index
    %c0_146 = arith.constant 0 : index
    %145 = vector.load %arg8[%c0_145, %c0_146] : memref<32x128xf32, #tpu.memory_space<vmem>>, vector<32x128xf32>
    tpu.vector_store %arg8[%c0_145, %c0_146], %144 {strides = array<i32>} : memref<32x128xf32, #tpu.memory_space<vmem>>, vector<32x128xf32>,
    return
  }
  func.func @transform_0(%arg0: i32) -> (i32, i32, i32, i32) {
    %c0_i32 = arith.constant 0 : i32
    %c0_i32_0 = arith.constant 0 : i32
    %c0_i32_1 = arith.constant 0 : i32
    %c0_i32_2 = arith.constant 0 : i32
    return %arg0, %c0_i32, %c0_i32_0, %c0_i32_1 : i32, i32, i32, i32
  }
  func.func @transform_1(%arg0: i32) -> (i32, i32, i32) {
    %c0_i32 = arith.constant 0 : i32
    %c0_i32_0 = arith.constant 0 : i32
    %c0_i32_1 = arith.constant 0 : i32
    %c0_i32_2 = arith.constant 0 : i32
    return %c0_i32, %c0_i32_0, %c0_i32_1 : i32, i32, i32
  }
  func.func @transform_2(%arg0: i32) -> (i32, i32, i32) {
    %c0_i32 = arith.constant 0 : i32
    %c0_i32_0 = arith.constant 0 : i32
    %c0_i32_1 = arith.constant 0 : i32
    %c0_i32_2 = arith.constant 0 : i32
    return %c0_i32, %c0_i32_0, %c0_i32_1 : i32, i32, i32
  }
  func.func @transform_3(%arg0: i32) -> (i32, i32) {
    %c0_i32 = arith.constant 0 : i32
    %c0_i32_0 = arith.constant 0 : i32
    %c0_i32_1 = arith.constant 0 : i32
    return %c0_i32, %c0_i32_0 : i32, i32
  }
  func.func @transform_4(%arg0: i32) -> (i32, i32) {
    %c0_i32 = arith.constant 0 : i32
    %c0_i32_0 = arith.constant 0 : i32
    %c0_i32_1 = arith.constant 0 : i32
    return %c0_i32, %c0_i32_0 : i32, i32
  }
  func.func @transform_5(%arg0: i32) -> (i32, i32) {
    %c0_i32 = arith.constant 0 : i32
    %c0_i32_0 = arith.constant 0 : i32
    %c0_i32_1 = arith.constant 0 : i32
    return %c0_i32, %c0_i32_0 : i32, i32
  }
  func.func @transform_6(%arg0: i32) -> (i32, i32) {
    %c0_i32 = arith.constant 0 : i32
    %c0_i32_0 = arith.constant 0 : i32
    %c0_i32_1 = arith.constant 0 : i32
    return %c0_i32, %c0_i32_0 : i32, i32
  }
  func.func @transform_7(%arg0: i32) -> (i32, i32) {
    %c0_i32 = arith.constant 0 : i32
    %c0_i32_0 = arith.constant 0 : i32
    return %arg0, %c0_i32 : i32, i32
  }
}

</mosaic_0001>

<bundles_post_ra>
// kernel: net_forward.1
= control target key start
LH: loop header
LB: loop body
LE: loop exit
PB: predicated region body
PF: predicated region fallthrough
CT: control target
= control target key end

     0   :  { %s15932_s1 = inlined_call_operand.vmem [shape: bf16[2,640,128], index: 1, kind: input, shape index: {}]   ;;  %s15933_s0 = inlined_call_operand.vmem [shape: bf16[1,4,256,128], index: 0, kind: input, shape index: {}]   ;;  %s15934_s6 = inlined_call_operand.vmem [shape: f32[5,128], index: 6, kind: input, shape index: {}]   ;;  %s15935_s2 = inlined_call_operand.vmem [shape: bf16[2,640,128], index: 2, kind: input, shape index: {}]   ;;  %s15936_s3 = inlined_call_operand.vmem [shape: bf16[640,128], index: 3, kind: input, shape index: {}]   ;;  %s15937_s4 = inlined_call_operand.vmem [shape: bf16[128,128], index: 4, kind: input, shape index: {}]   ;;  %s15938_s5 = inlined_call_operand.vmem [shape: bf16[128,128], index: 5, kind: input, shape index: {}]   ;;  %s15939_s7 = inlined_call_operand.vmem [shape: f32[32,128], index: 7, kind: output, shape index: {}]  }
   0x1   :  { %v10146_v0 = vld [vmem:[%s15932_s1 + $0x38] sm:$0xff]  ;;  %v10164_v4 = vld [vmem:[%s15932_s1 + $0x30] sm:$0xff]  ;;  %v10182_v8 = vld [vmem:[%s15932_s1 + $0x28] sm:$0xff] }
   0x2   :  { %v10151_v1 = vld [vmem:[%s15932_s1 + $0x78] sm:$0xff]  ;;  %818 = vmatpush.bf16.msra.mxu0 %v10146_v0  ;;  %v10169_v5 = vld [vmem:[%s15932_s1 + $0x70] sm:$0xff]  ;;  %v10187_v9 = vld [vmem:[%s15932_s1 + $0x68] sm:$0xff] }
   0x3   :  { %v9419_v2 = vld [vmem:[%s15932_s1 + $0xb8] sm:$0xff]  ;;  %897 = vmatpush.bf16.msra.mxu1 %v10151_v1  ;;  %v9418_v6 = vld [vmem:[%s15932_s1 + $0xb0] sm:$0xff]  ;;  %v9417_v10 = vld [vmem:[%s15932_s1 + $0xa8] sm:$0xff] }
   0x4   :  { %v9427_v3 = vld [vmem:[%s15932_s1 + $0xf8] sm:$0xff]  ;;  %976 = vmatpush.bf16.msra.mxu2 %v9419_v2  ;;  %v9426_v7 = vld [vmem:[%s15932_s1 + $0xf0] sm:$0xff]  ;;  %v9425_v11 = vld [vmem:[%s15932_s1 + $0xe8] sm:$0xff] }
   0x5   :  { %1055 = vmatpush.bf16.msra.mxu3 %v9427_v3  ;;  %v10200_v12 = vld [vmem:[%s15932_s1 + $0x20] sm:$0xff]  ;;  %v10218_v16 = vld [vmem:[%s15932_s1 + $0x18] sm:$0xff]  ;;  %v10236_v20 = vld [vmem:[%s15932_s1 + $0x10] sm:$0xff] }
   0x6   :  { %819 = vmatpush.bf16.msra.mxu0 %v10164_v4  ;;  %v10205_v13 = vld [vmem:[%s15932_s1 + $0x60] sm:$0xff]  ;;  %v10223_v17 = vld [vmem:[%s15932_s1 + $0x58] sm:$0xff]  ;;  %v10241_v21 = vld [vmem:[%s15932_s1 + $0x50] sm:$0xff] }
   0x7   :  { %898 = vmatpush.bf16.msra.mxu1 %v10169_v5  ;;  %v9416_v14 = vld [vmem:[%s15932_s1 + $0xa0] sm:$0xff]  ;;  %v9415_v18 = vld [vmem:[%s15932_s1 + $0x98] sm:$0xff]  ;;  %v9414_v22 = vld [vmem:[%s15932_s1 + $0x90] sm:$0xff] }
   0x8   :  { %977 = vmatpush.bf16.msra.mxu2 %v9418_v6  ;;  %v9424_v15 = vld [vmem:[%s15932_s1 + $0xe0] sm:$0xff]  ;;  %v9423_v19 = vld [vmem:[%s15932_s1 + $0xd8] sm:$0xff]  ;;  %v9422_v23 = vld [vmem:[%s15932_s1 + $0xd0] sm:$0xff] }
   0x9   :  { %1056 = vmatpush.bf16.msra.mxu3 %v9426_v7  ;;  %v10254_v24 = vld [vmem:[%s15932_s1 + $0x8] sm:$0xff]  ;;  %v10272_v28 = vld [vmem:[%s15932_s1] sm:$0xff]  ;;  %v9451_v32 = vld [vmem:[%s15932_s1 + $0x1b8] sm:$0xff] }
   0xa   :  { %820 = vmatpush.bf16.msra.mxu0 %v10182_v8  ;;  %v10259_v25 = vld [vmem:[%s15932_s1 + $0x48] sm:$0xff]  ;;  %v10277_v29 = vld [vmem:[%s15932_s1 + $0x40] sm:$0xff]  ;;  %v10291_v33 = vld [vmem:[%s15932_s1 + $0x138] sm:$0xff] }
   0xb   :  { %899 = vmatpush.bf16.msra.mxu1 %v10187_v9  ;;  %v9413_v26 = vld [vmem:[%s15932_s1 + $0x88] sm:$0xff]  ;;  %v9412_v30 = vld [vmem:[%s15932_s1 + $0x80] sm:$0xff]  ;;  %v9459_v38 = vld [vmem:[%s15932_s1 + $0x1f8] sm:$0xff] }
   0xc   :  { %978 = vmatpush.bf16.msra.mxu2 %v9417_v10  ;;  %v9421_v27 = vld [vmem:[%s15932_s1 + $0xc8] sm:$0xff]  ;;  %v9420_v31 = vld [vmem:[%s15932_s1 + $0xc0] sm:$0xff]  ;;  %v10319_v39 = vld [vmem:[%s15932_s1 + $0x178] sm:$0xff] }
   0xd   :  { %1057 = vmatpush.bf16.msra.mxu3 %v9425_v11  ;;  %v10296_v34 = vld [vmem:[%s15933_s0] sm:$0xff]  ;;  %v9450_v40 = vld [vmem:[%s15932_s1 + $0x1b0] sm:$0xff]  ;;  %v10347_v44 = vld [vmem:[%s15933_s0 + $0x8] sm:$0xff] }
   0xe   :  { %821 = vmatpush.bf16.msra.mxu0 %v10200_v12  ;;  %v10301_v35 = vld [vmem:[%s15933_s0 + $0x80] sm:$0xff]  ;;  %v10328_v41 = vld [vmem:[%s15932_s1 + $0x130] sm:$0xff]  ;;  %v10352_v45 = vld [vmem:[%s15933_s0 + $0x88] sm:$0xff] }
   0xf   :  { %900 = vmatpush.bf16.msra.mxu1 %v10205_v13  ;;  %v10308_v36 = vld [vmem:[%s15933_s0 + $0x100] sm:$0xff]  ;;  %v9458_v42 = vld [vmem:[%s15932_s1 + $0x1f0] sm:$0xff]  ;;  %v10357_v46 = vld [vmem:[%s15933_s0 + $0x108] sm:$0xff] }
  0x10   :  { %979 = vmatpush.bf16.msra.mxu2 %v9416_v14  ;;  %v9380_v37 = vld [vmem:[%s15933_s0 + $0x180] sm:$0xff]  ;;  %v10340_v43 = vld [vmem:[%s15932_s1 + $0x170] sm:$0xff]  ;;  %v9381_v47 = vld [vmem:[%s15933_s0 + $0x188] sm:$0xff] }
  0x11   :  { %1058 = vmatpush.bf16.msra.mxu3 %v9424_v15  ;;  %v9449_v48 = vld [vmem:[%s15932_s1 + $0x1a8] sm:$0xff]  ;;  %v10386_v52 = vld [vmem:[%s15933_s0 + $0x10] sm:$0xff]  ;;  %v10407_v56 = vld [vmem:[%s15933_s0 + $0x18] sm:$0xff] }
  0x12   :  { %822 = vmatpush.bf16.msra.mxu0 %v10218_v16  ;;  %v10371_v49 = vld [vmem:[%s15932_s1 + $0x128] sm:$0xff]  ;;  %v10391_v53 = vld [vmem:[%s15933_s0 + $0x90] sm:$0xff]  ;;  %v10412_v57 = vld [vmem:[%s15933_s0 + $0x98] sm:$0xff] }
  0x13   :  { %901 = vmatpush.bf16.msra.mxu1 %v10223_v17  ;;  %v9457_v50 = vld [vmem:[%s15932_s1 + $0x1e8] sm:$0xff]  ;;  %v10396_v54 = vld [vmem:[%s15933_s0 + $0x110] sm:$0xff]  ;;  %v10417_v58 = vld [vmem:[%s15933_s0 + $0x118] sm:$0xff] }
  0x14   :  { %980 = vmatpush.bf16.msra.mxu2 %v9415_v18  ;;  %v10379_v51 = vld [vmem:[%s15932_s1 + $0x168] sm:$0xff]  ;;  %v9382_v55 = vld [vmem:[%s15933_s0 + $0x190] sm:$0xff]  ;;  %v9383_v59 = vld [vmem:[%s15933_s0 + $0x198] sm:$0xff] }
  0x15   :  { %1059 = vmatpush.bf16.msra.mxu3 %v9423_v19  ;;  %v9448_v60 = vld [vmem:[%s15932_s1 + $0x1a0] sm:$0xff]  ;;  %v10467_v10 = vld [vmem:[%s15933_s0 + $0x28] sm:$0xff]  ;;  %v9447_v18 = vld [vmem:[%s15932_s1 + $0x198] sm:$0xff] }
  0x16   :  { %823 = vmatpush.bf16.msra.mxu0 %v10236_v20  ;;  %v10431_v61 = vld [vmem:[%s15932_s1 + $0x120] sm:$0xff]  ;;  %v10472_v11 = vld [vmem:[%s15933_s0 + $0xa8] sm:$0xff]  ;;  %v10491_v19 = vld [vmem:[%s15932_s1 + $0x118] sm:$0xff] }
  0x17   :  { %902 = vmatpush.bf16.msra.mxu1 %v10241_v21  ;;  %v9456_v62 = vld [vmem:[%s15932_s1 + $0x1e0] sm:$0xff]  ;;  %16240 = vst [vmem:[#allocation2_spill] sm:$0xff] %v10472_v11  ;;  %v10477_v14 = vld [vmem:[%s15933_s0 + $0x128] sm:$0xff] }
  0x18   :  { %981 = vmatpush.bf16.msra.mxu2 %v9414_v22  ;;  %v10439_v63 = vld [vmem:[%s15932_s1 + $0x160] sm:$0xff]  ;;  %16241 = vst [vmem:[#allocation3_spill] sm:$0xff] %v10477_v14  ;;  %v9385_v15 = vld [vmem:[%s15933_s0 + $0x1a8] sm:$0xff]  ;;  %v9455_v22 = vld [vmem:[%s15932_s1 + $0x1d8] sm:$0xff] }
  0x19   :  { %1060 = vmatpush.bf16.msra.mxu3 %v9422_v23  ;;  %v10446_v2 = vld [vmem:[%s15933_s0 + $0x20] sm:$0xff]  ;;  %v10499_v23 = vld [vmem:[%s15932_s1 + $0x158] sm:$0xff] }
  0x1a   :  { %824 = vmatpush.bf16.msra.mxu0 %v10254_v24  ;;  %v10451_v3 = vld [vmem:[%s15933_s0 + $0xa0] sm:$0xff] }
  0x1b   :  { %903 = vmatpush.bf16.msra.mxu1 %v10259_v25  ;;  %v10456_v6 = vld [vmem:[%s15933_s0 + $0x120] sm:$0xff] }
  0x1c   :  { %982 = vmatpush.bf16.msra.mxu2 %v9413_v26  ;;  %v9384_v7 = vld [vmem:[%s15933_s0 + $0x1a0] sm:$0xff]  ;;  %v10506_v26 = vld [vmem:[%s15933_s0 + $0x30] sm:$0xff] }
  0x1d   :  { %1061 = vmatpush.bf16.msra.mxu3 %v9421_v27  ;;  %v10511_v27 = vld [vmem:[%s15933_s0 + $0xb0] sm:$0xff] }
  0x1e   :  { %825 = vmatpush.bf16.msra.mxu0 %v10272_v28  ;;  %16242 = vst [vmem:[#allocation4_spill] sm:$0xff] %v10511_v27 }
  0x1f   :  { %904 = vmatpush.bf16.msra.mxu1 %v10277_v29 }
  0x20   :  { %983 = vmatpush.bf16.msra.mxu2 %v9412_v30  ;;  %v10516_v30 = vld [vmem:[%s15933_s0 + $0x130] sm:$0xff] }
  0x21   :  { %1062 = vmatpush.bf16.msra.mxu3 %v9420_v31  ;;  %826 = vmatmul.bf16.vlgmr.msra.gmra.mxu0 %v10296_v34  ;;  %16243 = vst [vmem:[#allocation5_spill] sm:$0xff] %v10516_v30  ;;  %v9386_v31 = vld [vmem:[%s15933_s0 + $0x1b0] sm:$0xff] }
  0x22   :  { %1134 = vmatpush.bf16.msrb.mxu0 %v10291_v33  ;;  %905 = vmatmul.bf16.vlgmr.msra.gmra.mxu1 %v10301_v35 }
  0x23   :  { %984 = vmatmul.bf16.vlgmr.msra.gmra.mxu2 %v10308_v36  ;;  %1534 = vmatpush.bf16.msrb.mxu1 %v10319_v39 }
  0x24   :  { %1613 = vmatpush.bf16.msrb.mxu2 %v9451_v32  ;;  %1063 = vmatmul.bf16.vlgmr.msra.gmra.mxu3 %v9380_v37  ;;  %v10527_v32 = vld [vmem:[%s15933_s0 + $0x38] sm:$0xff] }
  0x25   :  { %1692 = vmatpush.bf16.msrb.mxu3 %v9459_v38  ;;  %16244 = vst [vmem:[#allocation6_spill] sm:$0xff] %v10527_v32  ;;  %v10532_v37 = vld [vmem:[%s15933_s0 + $0xb8] sm:$0xff] }
  0x26   :  { %1135 = vmatpush.bf16.msrb.mxu0 %v10328_v41  ;;  %16245 = vst [vmem:[#allocation7_spill] sm:$0xff] %v10532_v37  ;;  %v10537_v38 = vld [vmem:[%s15933_s0 + $0x138] sm:$0xff] }
  0x27   :  { %1535 = vmatpush.bf16.msrb.mxu1 %v10340_v43  ;;  %16246 = vst [vmem:[#allocation8_spill] sm:$0xff] %v10537_v38 }
  0x28   :  { %1614 = vmatpush.bf16.msrb.mxu2 %v9450_v40  ;;  %v9387_v40 = vld [vmem:[%s15933_s0 + $0x1b8] sm:$0xff] }
  0x29   :  { %1693 = vmatpush.bf16.msrb.mxu3 %v9458_v42  ;;  %v9446_v42 = vld [vmem:[%s15932_s1 + $0x190] sm:$0xff] }
  0x2a   :  { %1136 = vmatpush.bf16.msrb.mxu0 %v10371_v49 }
  0x2b   :  { %1536 = vmatpush.bf16.msrb.mxu1 %v10379_v51 }
  0x2c   :  { %1615 = vmatpush.bf16.msrb.mxu2 %v9449_v48  ;;  %v9454_v48 = vld [vmem:[%s15932_s1 + $0x1d0] sm:$0xff] }
  0x2d   :  { %1694 = vmatpush.bf16.msrb.mxu3 %v9457_v50  ;;  %v10559_v50 = vld [vmem:[%s15932_s1 + $0x150] sm:$0xff] }
  0x2e   :  { %1137 = vmatpush.bf16.msrb.mxu0 %v10431_v61 }
  0x2f   :  { %1537 = vmatpush.bf16.msrb.mxu1 %v10439_v63 }
  0x30   :  { %1616 = vmatpush.bf16.msrb.mxu2 %v9448_v60 }
  0x31   :  { %831 = vmatmul.bf16.gmra.mxu0 %v10347_v44  ;;  %1695 = vmatpush.bf16.msrb.mxu3 %v9456_v62 }
  0x32   :  { %910 = vmatmul.bf16.gmra.mxu1 %v10352_v45  ;;  %1138 = vmatpush.bf16.msrb.mxu0 %v10491_v19 }
  0x33   :  { %989 = vmatmul.bf16.gmra.mxu2 %v10357_v46  ;;  %1538 = vmatpush.bf16.msrb.mxu1 %v10499_v23 }
  0x34   :  { %1068 = vmatmul.bf16.gmra.mxu3 %v9381_v47  ;;  %1617 = vmatpush.bf16.msrb.mxu2 %v9447_v18  ;;  %v10548_v47 = vld [vmem:[%s15932_s1 + $0x110] sm:$0xff] }
  0x35   :  { %1696 = vmatpush.bf16.msrb.mxu3 %v9455_v22 }
  0x36   :  { %1139 = vmatpush.bf16.msrb.mxu0 %v10548_v47 }
  0x37   :  { %1539 = vmatpush.bf16.msrb.mxu1 %v10559_v50 }
  0x38   :  { %1618 = vmatpush.bf16.msrb.mxu2 %v9446_v42 }
  0x39   :  { %1697 = vmatpush.bf16.msrb.mxu3 %v9454_v48 }
  0x41   :  { %836 = vmatmul.bf16.gmra.mxu0 %v10386_v52 }
  0x42   :  { %915 = vmatmul.bf16.gmra.mxu1 %v10391_v53 }
  0x43   :  { %994 = vmatmul.bf16.gmra.mxu2 %v10396_v54 }
  0x44   :  { %1073 = vmatmul.bf16.gmra.mxu3 %v9382_v55  ;;  %v10566_v55 = vld [vmem:[%s15933_s0 + $0x40] sm:$0xff] }
  0x45   :  { %16247 = vst [vmem:[#allocation9_spill] sm:$0xff] %v10566_v55 }
  0x51   :  { %841 = vmatmul.bf16.gmra.mxu0 %v10407_v56 }
  0x52   :  { %920 = vmatmul.bf16.gmra.mxu1 %v10412_v57 }
  0x53   :  { %999 = vmatmul.bf16.gmra.mxu2 %v10417_v58 }
  0x54   :  { %1078 = vmatmul.bf16.gmra.mxu3 %v9383_v59  ;;  %v10571_v59 = vld [vmem:[%s15933_s0 + $0xc0] sm:$0xff] }
  0x55   :  { %16248 = vst [vmem:[#allocation10_spill] sm:$0xff] %v10571_v59 }
  0x61   :  { %846 = vmatmul.bf16.gmra.mxu0 %v10446_v2 }
  0x62   :  { %925 = vmatmul.bf16.gmra.mxu1 %v10451_v3 }
  0x63   :  { %1004 = vmatmul.bf16.gmra.mxu2 %v10456_v6 }
  0x64   :  { %1083 = vmatmul.bf16.gmra.mxu3 %v9384_v7  ;;  %v10576_v7 = vld [vmem:[%s15933_s0 + $0x140] sm:$0xff] }
  0x65   :  { %16249 = vst [vmem:[#allocation11_spill] sm:$0xff] %v10576_v7 }
  0x71   :  { %851 = vmatmul.bf16.gmra.mxu0 %v10467_v10 }
  0x72   :  { %930 = vmatmul.bf16.gmra.mxu1 %v10472_v11 }
  0x73   :  { %1009 = vmatmul.bf16.gmra.mxu2 %v10477_v14 }
  0x74   :  { %1088 = vmatmul.bf16.gmra.mxu3 %v9385_v15  ;;  %v9388_v15 = vld [vmem:[%s15933_s0 + $0x1c0] sm:$0xff] }
  0x81   :  { %856 = vmatmul.bf16.gmra.mxu0 %v10506_v26 }
  0x82   :  { %935 = vmatmul.bf16.gmra.mxu1 %v10511_v27 }
  0x83   :  { %1014 = vmatmul.bf16.gmra.mxu2 %v10516_v30  ;;  %v9445_v30 = vld [vmem:[%s15932_s1 + $0x188] sm:$0xff] }
  0x84   :  { %1093 = vmatmul.bf16.gmra.mxu3 %v9386_v31  ;;  %1619 = vmatpush.bf16.msrb.mxu2 %v9445_v30  ;;  %v10611_v30 = vld [vmem:[%s15933_s0 + $0x148] sm:$0xff] }
  0x85   :  { %16253 = vst [vmem:[#allocation15_spill] sm:$0xff] %v10611_v30 }
  0x91   :  { %861 = vmatmul.bf16.gmra.mxu0 %v10527_v32 }
  0x92   :  { %940 = vmatmul.bf16.gmra.mxu1 %v10532_v37 }
  0x93   :  { %1019 = vmatmul.bf16.gmra.mxu2 %v10537_v38 }
  0x94   :  { %1098 = vmatmul.bf16.gmra.mxu3 %v9387_v40 }
  0x9e   :  { %v827_v60 = vpop.f32.mrf.mxu0 }
  0x9f   :  { %v906_v62 = vpop.f32.mrf.mxu1 }
  0xa0   :  { %v907_v18 = vadd.f32 %v906_v62, %v827_v60  ;;  %v10592_v60 = vld [vmem:[%s15932_s1 + $0x108] sm:$0xff] }
  0xa1   :  { %866 = vmatmul.bf16.gmra.mxu0 %v10566_v55  ;;  %v9453_v62 = vld [vmem:[%s15932_s1 + $0x1c8] sm:$0xff] }
  0xa2   :  { %945 = vmatmul.bf16.gmra.mxu1 %v10571_v59  ;;  %1140 = vmatpush.bf16.msrb.mxu0 %v10592_v60 }
  0xa3   :  { %1024 = vmatmul.bf16.gmra.mxu2 %v10576_v7  ;;  %1698 = vmatpush.bf16.msrb.mxu3 %v9453_v62  ;;  %v9389_v62 = vld [vmem:[%s15933_s0 + $0x1c8] sm:$0xff] }
  0xa4   :  { %1103 = vmatmul.bf16.gmra.mxu3 %v9388_v15 }
  0xa6   :  { %v985_v22 = vpop.f32.mrf.mxu2  ;;  %v829_v42 = vpop.f32.mrf.mxu0 }
  0xa7   :  { %v1064_v31 = vpop.f32.mrf.mxu3  ;;  %v986_v40 = vadd.f32 %v985_v22, %v907_v18  ;;  %v908_v48 = vpop.f32.mrf.mxu1  ;;  %v10601_v22 = vld [vmem:[%s15933_s0 + $0x48] sm:$0xff] }
  0xa8   :  { %v909_v38 = vadd.f32 %v908_v48, %v829_v42  ;;  %16251 = vst [vmem:[#allocation13_spill] sm:$0xff] %v10601_v22 }
  0xa9   :  { %v10584_v37 = vadd.f32 %v1064_v31, %v986_v40  ;;  %v10606_v31 = vld [vmem:[%s15933_s0 + $0xc8] sm:$0xff] }
  0xaa   :  { %16252 = vst [vmem:[#allocation14_spill] sm:$0xff] %v10606_v31 }
  0xab   :  { %16250 = vst [vmem:[#allocation12_spill] sm:$0xff] %v10584_v37  ;;  %v10621_v37 = vld [vmem:[%s15932_s1 + $0x148] sm:$0xff] }
  0xac   :  { %1540 = vmatpush.bf16.msrb.mxu1 %v10621_v37 }
  0xae   :  { %v987_v15 = vpop.f32.mrf.mxu2  ;;  %v832_v42 = vpop.f32.mrf.mxu0 }
  0xaf   :  { %v1066_v18 = vpop.f32.mrf.mxu3  ;;  %v988_v40 = vadd.f32 %v987_v15, %v909_v38  ;;  %v911_v48 = vpop.f32.mrf.mxu1 }
  0xb0   :  { %v912_v7 = vadd.f32 %v911_v48, %v832_v42 }
  0xb1   :  { %v10616_v59 = vadd.f32 %v1066_v18, %v988_v40  ;;  %871 = vmatmul.bf16.gmra.mxu0 %v10601_v22  ;;  %v10632_v22 = vld [vmem:[%s15933_s0 + $0x50] sm:$0xff] }
  0xb2   :  { %950 = vmatmul.bf16.gmra.mxu1 %v10606_v31 }
  0xb3   :  { %16254 = vst [vmem:[#allocation16_spill] sm:$0xff] %v10616_v59  ;;  %1029 = vmatmul.bf16.gmra.mxu2 %v10611_v30 }
  0xb4   :  { %1108 = vmatmul.bf16.gmra.mxu3 %v9389_v62  ;;  %v10637_v62 = vld [vmem:[%s15933_s0 + $0xd0] sm:$0xff] }
  0xb6   :  { %v990_v38 = vpop.f32.mrf.mxu2  ;;  %v834_v42 = vpop.f32.mrf.mxu0 }
  0xb7   :  { %v1069_v15 = vpop.f32.mrf.mxu3  ;;  %v991_v27 = vadd.f32 %v990_v38, %v912_v7  ;;  %v913_v18 = vpop.f32.mrf.mxu1  ;;  %v9390_v38 = vld [vmem:[%s15933_s0 + $0x1d0] sm:$0xff] }
  0xb8   :  { %v914_v40 = vadd.f32 %v913_v18, %v834_v42 }
  0xb9   :  { %v10627_v48 = vadd.f32 %v1069_v15, %v991_v27  ;;  %v10642_v27 = vld [vmem:[%s15933_s0 + $0x150] sm:$0xff] }
  0xbb   :  { %16255 = vst [vmem:[#allocation17_spill] sm:$0xff] %v10627_v48 }
  0xbe   :  { %v992_v59 = vpop.f32.mrf.mxu2  ;;  %v837_v31 = vpop.f32.mrf.mxu0 }
  0xbf   :  { %v1071_v55 = vpop.f32.mrf.mxu3  ;;  %v993_v30 = vadd.f32 %v992_v59, %v914_v40  ;;  %v916_v7 = vpop.f32.mrf.mxu1 }
  0xc0   :  { %v917_v15 = vadd.f32 %v916_v7, %v837_v31  ;;  %v10662_v31 = vld [vmem:[%s15932_s1 + $0x100] sm:$0xff] }
  0xc1   :  { %v10647_v42 = vadd.f32 %v1071_v55, %v993_v30  ;;  %876 = vmatmul.bf16.gmra.mxu0 %v10632_v22  ;;  %v10657_v55 = vld [vmem:[%s15932_s1 + $0x180] sm:$0xff] }
  0xc2   :  { %955 = vmatmul.bf16.gmra.mxu1 %v10637_v62  ;;  %16256 = vst [vmem:[#allocation18_spill] sm:$0xff] %v10657_v55  ;;  %v10667_v30 = vld [vmem:[%s15932_s1 + $0x1c0] sm:$0xff]  ;;  %1620 = vmatpush.bf16.msrb.mxu2 %v10657_v55 }
  0xc3   :  { %1034 = vmatmul.bf16.gmra.mxu2 %v10642_v27  ;;  %16257 = vst [vmem:[#allocation19_spill] sm:$0xff] %v10667_v30  ;;  %1141 = vmatpush.bf16.msrb.mxu0 %v10662_v31 }
  0xc4   :  { %1113 = vmatmul.bf16.gmra.mxu3 %v9390_v38  ;;  %v10683_v38 = vld [vmem:[%s15933_s0 + $0x58] sm:$0xff] }
  0xc5   :  { %1699 = vmatpush.bf16.msrb.mxu3 %v10667_v30 }
  0xc6   :  { %v995_v59 = vpop.f32.mrf.mxu2  ;;  %v839_v48 = vpop.f32.mrf.mxu0  ;;  %2069 = vmatpush.bf16.msra.mxu2 %v10146_v0  ;;  %v10693_v0 = vld [vmem:[%s15933_s0 + $0x158] sm:$0xff] }
  0xc7   :  { %v1074_v18 = vpop.f32.mrf.mxu3  ;;  %v996_v40 = vadd.f32 %v995_v59, %v917_v15  ;;  %v918_v14 = vpop.f32.mrf.mxu1  ;;  %v10688_v15 = vld [vmem:[%s15933_s0 + $0xd8] sm:$0xff] }
  0xc8   :  { %v919_v11 = vadd.f32 %v918_v14, %v839_v48  ;;  %v10672_v14 = vld [vmem:[%s15932_s1 + $0x140] sm:$0xff] }
  0xc9   :  { %v10652_v32 = vadd.f32 %v1074_v18, %v996_v40  ;;  %1541 = vmatpush.bf16.msrb.mxu1 %v10672_v14  ;;  %2148 = vmatpush.bf16.msra.mxu3 %v10151_v1  ;;  %v9391_v1 = vld [vmem:[%s15933_s0 + $0x1d8] sm:$0xff] }
  0xca   :  { %2070 = vmatpush.bf16.msra.mxu2 %v10164_v4 }
  0xcd   :  { %2149 = vmatpush.bf16.msra.mxu3 %v10169_v5 }
  0xce   :  { %v997_v48 = vpop.f32.mrf.mxu2  ;;  %v842_v18 = vpop.f32.mrf.mxu0  ;;  %2071 = vmatpush.bf16.msra.mxu2 %v10182_v8 }
  0xcf   :  { %v1076_v7 = vpop.f32.mrf.mxu3  ;;  %v998_v59 = vadd.f32 %v997_v48, %v919_v11  ;;  %v921_v40 = vpop.f32.mrf.mxu1 }
  0xd0   :  { %v922_v30 = vadd.f32 %v921_v40, %v842_v18 }
  0xd1   :  { %v10698_v55 = vadd.f32 %v1076_v7, %v998_v59  ;;  %881 = vmatmul.bf16.gmra.mxu0 %v10683_v38  ;;  %2150 = vmatpush.bf16.msra.mxu3 %v10187_v9  ;;  %v10716_v9 = vld [vmem:[%s15933_s0 + $0x60] sm:$0xff] }
  0xd2   :  { %960 = vmatmul.bf16.gmra.mxu1 %v10688_v15  ;;  %2072 = vmatpush.bf16.msra.mxu2 %v10200_v12 }
  0xd3   :  { %1039 = vmatmul.bf16.gmra.mxu2 %v10693_v0 }
  0xd4   :  { %1118 = vmatmul.bf16.gmra.mxu3 %v9391_v1 }
  0xd5   :  { %2151 = vmatpush.bf16.msra.mxu3 %v10205_v13  ;;  %v10726_v13 = vld [vmem:[%s15933_s0 + $0x160] sm:$0xff] }
  0xd6   :  { %v1000_v11 = vpop.f32.mrf.mxu2  ;;  %v844_v7 = vpop.f32.mrf.mxu0  ;;  %2073 = vmatpush.bf16.msra.mxu2 %v10218_v16  ;;  %16259 = vst [vmem:[#allocation21_spill] sm:$0xff] %v10726_v13  ;;  %v9392_v16 = vld [vmem:[%s15933_s0 + $0x1e0] sm:$0xff] }
  0xd7   :  { %v1079_v48 = vpop.f32.mrf.mxu3  ;;  %v1001_v18 = vadd.f32 %v1000_v11, %v922_v30  ;;  %v923_v59 = vpop.f32.mrf.mxu1  ;;  %v10721_v30 = vld [vmem:[%s15933_s0 + $0xe0] sm:$0xff] }
  0xd8   :  { %v924_v40 = vadd.f32 %v923_v59, %v844_v7  ;;  %16258 = vst [vmem:[#allocation20_spill] sm:$0xff] %v10721_v30 }
  0xd9   :  { %v10707_v4 = vadd.f32 %v1079_v48, %v1001_v18  ;;  %2152 = vmatpush.bf16.msra.mxu3 %v10223_v17  ;;  %v10741_v18 = vld [vmem:[%s15932_s1 + $0x238] sm:$0xff] }
  0xda   :  { %2074 = vmatpush.bf16.msra.mxu2 %v10236_v20  ;;  %16260 = vst [vmem:[#allocation22_spill] sm:$0xff] %v10741_v18  ;;  %1771 = vmatpush.bf16.msra.mxu0 %v10741_v18 }
  0xdd   :  { %2153 = vmatpush.bf16.msra.mxu3 %v10241_v21 }
  0xde   :  { %v1002_v5 = vpop.f32.mrf.mxu2  ;;  %v847_v12 = vpop.f32.mrf.mxu0  ;;  %2075 = vmatpush.bf16.msra.mxu2 %v10254_v24 }
  0xdf   :  { %v1081_v8 = vpop.f32.mrf.mxu3  ;;  %v1003_v1 = vadd.f32 %v1002_v5, %v924_v40  ;;  %v926_v11 = vpop.f32.mrf.mxu1 }
  0xe0   :  { %v927_v17 = vadd.f32 %v926_v11, %v847_v12  ;;  %v10764_v11 = vld [vmem:[%s15933_s0 + $0xe8] sm:$0xff] }
  0xe1   :  { %v10731_v48 = vadd.f32 %v1081_v8, %v1003_v1  ;;  %886 = vmatmul.bf16.gmra.mxu0 %v10716_v9  ;;  %2154 = vmatpush.bf16.msra.mxu3 %v10259_v25  ;;  %v10751_v1 = vld [vmem:[%s15932_s1 + $0x278] sm:$0xff]  ;;  %v10759_v25 = vld [vmem:[%s15933_s0 + $0x68] sm:$0xff] }
  0xe2   :  { %965 = vmatmul.bf16.gmra.mxu1 %v10721_v30  ;;  %16262 = vst [vmem:[#allocation24_spill] sm:$0xff] %v10751_v1  ;;  %2076 = vmatpush.bf16.msra.mxu2 %v10272_v28  ;;  %v10769_v28 = vld [vmem:[%s15933_s0 + $0x168] sm:$0xff] }
  0xe3   :  { %1044 = vmatmul.bf16.gmra.mxu2 %v10726_v13  ;;  %1850 = vmatpush.bf16.msra.mxu1 %v10751_v1 }
  0xe4   :  { %1123 = vmatmul.bf16.gmra.mxu3 %v9392_v16 }
  0xe5   :  { %2155 = vmatpush.bf16.msra.mxu3 %v10277_v29  ;;  %v9393_v29 = vld [vmem:[%s15933_s0 + $0x1e8] sm:$0xff] }
  0xe6   :  { %v1005_v7 = vpop.f32.mrf.mxu2  ;;  %v849_v59 = vpop.f32.mrf.mxu0 }
  0xe7   :  { %v1084_v20 = vpop.f32.mrf.mxu3  ;;  %v1006_v21 = vadd.f32 %v1005_v7, %v927_v17  ;;  %v928_v40 = vpop.f32.mrf.mxu1 }
  0xe8   :  { %v929_v5 = vadd.f32 %v928_v40, %v849_v59 }
  0xe9   :  { %v10746_v8 = vadd.f32 %v1084_v20, %v1006_v21 }
  0xeb   :  { %16261 = vst [vmem:[#allocation23_spill] sm:$0xff] %v10746_v8 }
  0xee   :  { %v1007_v24 = vpop.f32.mrf.mxu2  ;;  %v852_v17 = vpop.f32.mrf.mxu0 }
  0xef   :  { %v1086_v12 = vpop.f32.mrf.mxu3  ;;  %v1008_v16 = vadd.f32 %v1007_v24, %v929_v5  ;;  %v931_v7 = vpop.f32.mrf.mxu1 }
  0xf0   :  { %v932_v20 = vadd.f32 %v931_v7, %v852_v17 }
  0xf1   :  { %v10774_v21 = vadd.f32 %v1086_v12, %v1008_v16  ;;  %891 = vmatmul.bf16.gmra.mxu0 %v10759_v25 }
  0xf2   :  { %970 = vmatmul.bf16.gmra.mxu1 %v10764_v11 }
  0xf3   :  { %16263 = vst [vmem:[#allocation25_spill] sm:$0xff] %v10774_v21  ;;  %1049 = vmatmul.bf16.gmra.mxu2 %v10769_v28 }
  0xf4   :  { %1128 = vmatmul.bf16.gmra.mxu3 %v9393_v29  ;;  %v10786_v29 = vld [vmem:[%s15932_s1 + $0x230] sm:$0xff] }
  0xf5   :  { %1772 = vmatpush.bf16.msra.mxu0 %v10786_v29 }
  0xf6   :  { %v1010_v59 = vpop.f32.mrf.mxu2  ;;  %v854_v24 = vpop.f32.mrf.mxu0 }
  0xf7   :  { %v1089_v40 = vpop.f32.mrf.mxu3  ;;  %v1011_v5 = vadd.f32 %v1010_v59, %v932_v20  ;;  %v933_v1 = vpop.f32.mrf.mxu1 }
  0xf8   :  { %v934_v18 = vadd.f32 %v933_v1, %v854_v24 }
  0xf9   :  { %v10779_v13 = vadd.f32 %v1089_v40, %v1011_v5 }
  0xfe   :  { %v1012_v30 = vpop.f32.mrf.mxu2  ;;  %v857_v12 = vpop.f32.mrf.mxu0 }
  0xff   :  { %v1091_v8 = vpop.f32.mrf.mxu3  ;;  %v1013_v17 = vadd.f32 %v1012_v30, %v934_v18  ;;  %v936_v16 = vpop.f32.mrf.mxu1  ;;  %v10795_v30 = vld [vmem:[%s15932_s1 + $0x270] sm:$0xff] }
 0x100   :  { %v937_v7 = vadd.f32 %v936_v16, %v857_v12  ;;  %1851 = vmatpush.bf16.msra.mxu1 %v10795_v30 }
 0x101   :  { %v10781_v21 = vadd.f32 %v1091_v8, %v1013_v17  ;;  %1142 = vmatmul.bf16.vlgmr.msrb.gmra.mxu0 %v10386_v52 }
 0x102   :  { %1542 = vmatmul.bf16.vlgmr.msrb.gmra.mxu1 %v10296_v34 }
 0x103   :  { %1621 = vmatmul.bf16.vlgmr.msrb.gmra.mxu2 %v10301_v35 }
 0x104   :  { %1700 = vmatmul.bf16.vlgmr.msrb.gmra.mxu3 %v10308_v36  ;;  %2385 = vmatpush.bf16.msrb.mxu2 %v10291_v33 }
 0x105   :  { %2492 = vmatpush.bf16.msrb.mxu3 %v10319_v39 }
 0x106   :  { %v1015_v18 = vpop.f32.mrf.mxu2  ;;  %v859_v1 = vpop.f32.mrf.mxu0 }
 0x107   :  { %v1094_v8 = vpop.f32.mrf.mxu3  ;;  %v1016_v34 = vadd.f32 %v1015_v18, %v937_v7  ;;  %v938_v35 = vpop.f32.mrf.mxu1 }
 0x108   :  { %v939_v20 = vadd.f32 %v938_v35, %v859_v1  ;;  %2386 = vmatpush.bf16.msrb.mxu2 %v10328_v41 }
 0x109   :  { %v10802_v36 = vadd.f32 %v1094_v8, %v1016_v34  ;;  %2493 = vmatpush.bf16.msrb.mxu3 %v10340_v43 }
 0x10c   :  { %2387 = vmatpush.bf16.msrb.mxu2 %v10371_v49 }
 0x10d   :  { %2494 = vmatpush.bf16.msrb.mxu3 %v10379_v51 }
 0x10e   :  { %v1017_v33 = vpop.f32.mrf.mxu2  ;;  %v862_v39 = vpop.f32.mrf.mxu0 }
 0x10f   :  { %v1096_v59 = vpop.f32.mrf.mxu3  ;;  %v1018_v40 = vadd.f32 %v1017_v33, %v939_v20  ;;  %v941_v5 = vpop.f32.mrf.mxu1 }
 0x110   :  { %v942_v24 = vadd.f32 %v941_v5, %v862_v39  ;;  %2388 = vmatpush.bf16.msrb.mxu2 %v10431_v61 }
 0x111   :  { %v10808_v17 = vadd.f32 %v1096_v59, %v1018_v40  ;;  %2495 = vmatpush.bf16.msrb.mxu3 %v10439_v63  ;;  %1147 = vmatmul.bf16.gmra.mxu0 %v10407_v56 }
 0x112   :  { %1547 = vmatmul.bf16.gmra.mxu1 %v10347_v44  ;;  %v10823_v44 = vld [vmem:[%s15932_s1 + $0x228] sm:$0xff] }
 0x113   :  { %1626 = vmatmul.bf16.gmra.mxu2 %v10352_v45  ;;  %1773 = vmatpush.bf16.msra.mxu0 %v10823_v44 }
 0x114   :  { %1705 = vmatmul.bf16.gmra.mxu3 %v10357_v46  ;;  %2389 = vmatpush.bf16.msrb.mxu2 %v10491_v19 }
 0x115   :  { %2496 = vmatpush.bf16.msrb.mxu3 %v10499_v23 }
 0x116   :  { %v1020_v41 = vpop.f32.mrf.mxu2  ;;  %v864_v51 = vpop.f32.mrf.mxu0 }
 0x117   :  { %v1099_v43 = vpop.f32.mrf.mxu3  ;;  %v1021_v49 = vadd.f32 %v1020_v41, %v942_v24  ;;  %v943_v61 = vpop.f32.mrf.mxu1 }
 0x118   :  { %v944_v12 = vadd.f32 %v943_v61, %v864_v51  ;;  %2390 = vmatpush.bf16.msrb.mxu2 %v10548_v47 }
 0x119   :  { %v10818_v63 = vadd.f32 %v1099_v43, %v1021_v49  ;;  %2497 = vmatpush.bf16.msrb.mxu3 %v10559_v50  ;;  %v10835_v50 = vld [vmem:[%s15932_s1 + $0x268] sm:$0xff]  ;;  %v10856_v49 = vld [vmem:[%s15932_s1 + $0x220] sm:$0xff] }
 0x11a   :  { %1852 = vmatpush.bf16.msra.mxu1 %v10835_v50  ;;  %1774 = vmatpush.bf16.msra.mxu0 %v10856_v49 }
 0x11c   :  { %2391 = vmatpush.bf16.msrb.mxu2 %v10592_v60 }
 0x11d   :  { %2498 = vmatpush.bf16.msrb.mxu3 %v10621_v37 }
 0x11e   :  { %v1022_v45 = vpop.f32.mrf.mxu2  ;;  %v867_v23 = vpop.f32.mrf.mxu0 }
 0x11f   :  { %v1101_v46 = vpop.f32.mrf.mxu3  ;;  %v1023_v19 = vadd.f32 %v1022_v45, %v944_v12  ;;  %v946_v47 = vpop.f32.mrf.mxu1 }
 0x120   :  { %v947_v16 = vadd.f32 %v946_v47, %v867_v23  ;;  %2392 = vmatpush.bf16.msrb.mxu2 %v10662_v31 }
 0x121   :  { %v10830_v7 = vadd.f32 %v1101_v46, %v1023_v19  ;;  %2499 = vmatpush.bf16.msrb.mxu3 %v10672_v14  ;;  %1152 = vmatmul.bf16.gmra.mxu0 %v10446_v2 }
 0x122   :  { %1552 = vmatmul.bf16.gmra.mxu1 %v10386_v52 }
 0x123   :  { %1631 = vmatmul.bf16.gmra.mxu2 %v10391_v53 }
 0x124   :  { %1710 = vmatmul.bf16.gmra.mxu3 %v10396_v54 }
 0x126   :  { %v1025_v37 = vpop.f32.mrf.mxu2  ;;  %v869_v18 = vpop.f32.mrf.mxu0 }
 0x127   :  { %v1104_v60 = vpop.f32.mrf.mxu3  ;;  %v1026_v31 = vadd.f32 %v1025_v37, %v947_v16  ;;  %v948_v8 = vpop.f32.mrf.mxu1 }
 0x128   :  { %v949_v34 = vadd.f32 %v948_v8, %v869_v18 }
 0x129   :  { %v10843_v1 = vadd.f32 %v1104_v60, %v1026_v31 }
 0x12e   :  { %v1027_v35 = vpop.f32.mrf.mxu2  ;;  %v872_v33 = vpop.f32.mrf.mxu0 }
 0x12f   :  { %v1106_v14 = vpop.f32.mrf.mxu3  ;;  %v1028_v20 = vadd.f32 %v1027_v35, %v949_v34  ;;  %v951_v59 = vpop.f32.mrf.mxu1 }
 0x130   :  { %v952_v52 = vadd.f32 %v951_v59, %v872_v33  ;;  %v10882_v59 = vld [vmem:[%s15932_s1 + $0x218] sm:$0xff] }
 0x131   :  { %v10845_v40 = vadd.f32 %v1106_v14, %v1028_v20  ;;  %1157 = vmatmul.bf16.gmra.mxu0 %v10467_v10 }
 0x132   :  { %1557 = vmatmul.bf16.gmra.mxu1 %v10407_v56  ;;  %v10861_v56 = vld [vmem:[%s15932_s1 + $0x260] sm:$0xff]  ;;  %1775 = vmatpush.bf16.msra.mxu0 %v10882_v59 }
 0x133   :  { %1636 = vmatmul.bf16.gmra.mxu2 %v10412_v57  ;;  %1853 = vmatpush.bf16.msra.mxu1 %v10861_v56 }
 0x134   :  { %1715 = vmatmul.bf16.gmra.mxu3 %v10417_v58 }
 0x136   :  { %v1030_v53 = vpop.f32.mrf.mxu2  ;;  %v874_v5 = vpop.f32.mrf.mxu0 }
 0x137   :  { %v1109_v54 = vpop.f32.mrf.mxu3  ;;  %v1031_v39 = vadd.f32 %v1030_v53, %v952_v52  ;;  %v953_v24 = vpop.f32.mrf.mxu1 }
 0x138   :  { %v954_v41 = vadd.f32 %v953_v24, %v874_v5 }
 0x139   :  { %v10851_v43 = vadd.f32 %v1109_v54, %v1031_v39 }
 0x13e   :  { %v1032_v57 = vpop.f32.mrf.mxu2  ;;  %v877_v61 = vpop.f32.mrf.mxu0 }
 0x13f   :  { %v1111_v58 = vpop.f32.mrf.mxu3  ;;  %v1033_v51 = vadd.f32 %v1032_v57, %v954_v41  ;;  %v956_v12 = vpop.f32.mrf.mxu1 }
 0x140   :  { %v957_v45 = vadd.f32 %v956_v12, %v877_v61 }
 0x141   :  { %v10865_v46 = vadd.f32 %v1111_v58, %v1033_v51  ;;  %1162 = vmatmul.bf16.gmra.mxu0 %v10506_v26 }
 0x142   :  { %1562 = vmatmul.bf16.gmra.mxu1 %v10446_v2  ;;  %v16264_v2 = vld [vmem:[#allocation6_spill] sm:$0xff] }
 0x143   :  { %1641 = vmatmul.bf16.gmra.mxu2 %v10451_v3  ;;  %v16265_v3 = vld [vmem:[#allocation2_spill] sm:$0xff] }
 0x144   :  { %1720 = vmatmul.bf16.gmra.mxu3 %v10456_v6  ;;  %v16266_v6 = vld [vmem:[#allocation3_spill] sm:$0xff] }
 0x146   :  { %v1035_v19 = vpop.f32.mrf.mxu2  ;;  %v879_v16 = vpop.f32.mrf.mxu0 }
 0x147   :  { %v1114_v23 = vpop.f32.mrf.mxu3  ;;  %v1036_v47 = vadd.f32 %v1035_v19, %v957_v45  ;;  %v958_v37 = vpop.f32.mrf.mxu1 }
 0x148   :  { %v959_v60 = vadd.f32 %v958_v37, %v879_v16  ;;  %v16269_v16 = vld [vmem:[#allocation5_spill] sm:$0xff] }
 0x149   :  { %v10871_v31 = vadd.f32 %v1114_v23, %v1036_v47  ;;  %v16267_v23 = vld [vmem:[#allocation9_spill] sm:$0xff]  ;;  %v16268_v47 = vld [vmem:[#allocation4_spill] sm:$0xff] }
 0x14e   :  { %v1037_v18 = vpop.f32.mrf.mxu2  ;;  %v882_v35 = vpop.f32.mrf.mxu0 }
 0x14f   :  { %v1116_v8 = vpop.f32.mrf.mxu3  ;;  %v1038_v34 = vadd.f32 %v1037_v18, %v959_v60  ;;  %v961_v14 = vpop.f32.mrf.mxu1 }
 0x150   :  { %v962_v20 = vadd.f32 %v961_v14, %v882_v35 }
 0x151   :  { %v10873_v33 = vadd.f32 %v1116_v8, %v1038_v34  ;;  %1167 = vmatmul.bf16.gmra.mxu0 %v16264_v2 }
 0x152   :  { %1567 = vmatmul.bf16.gmra.mxu1 %v10467_v10  ;;  %v10890_v10 = vld [vmem:[%s15932_s1 + $0x258] sm:$0xff] }
 0x153   :  { %1646 = vmatmul.bf16.gmra.mxu2 %v16265_v3  ;;  %1854 = vmatpush.bf16.msra.mxu1 %v10890_v10 }
 0x154   :  { %1725 = vmatmul.bf16.gmra.mxu3 %v16266_v6 }
 0x156   :  { %v1040_v52 = vpop.f32.mrf.mxu2  ;;  %v884_v39 = vpop.f32.mrf.mxu0 }
 0x157   :  { %v1119_v53 = vpop.f32.mrf.mxu3  ;;  %v1041_v54 = vadd.f32 %v1040_v52, %v962_v20  ;;  %v963_v5 = vpop.f32.mrf.mxu1 }
 0x158   :  { %v964_v24 = vadd.f32 %v963_v5, %v884_v39  ;;  %v16270_v5 = vld [vmem:[#allocation13_spill] sm:$0xff] }
 0x159   :  { %v10885_v41 = vadd.f32 %v1119_v53, %v1041_v54 }
 0x15e   :  { %v1042_v57 = vpop.f32.mrf.mxu2  ;;  %v887_v61 = vpop.f32.mrf.mxu0 }
 0x15f   :  { %v1121_v58 = vpop.f32.mrf.mxu3  ;;  %v1043_v51 = vadd.f32 %v1042_v57, %v964_v24  ;;  %v966_v12 = vpop.f32.mrf.mxu1  ;;  %v16271_v24 = vld [vmem:[#allocation7_spill] sm:$0xff]  ;;  %v16272_v57 = vld [vmem:[#allocation8_spill] sm:$0xff] }
 0x160   :  { %v967_v45 = vadd.f32 %v966_v12, %v887_v61 }
 0x161   :  { %v10893_v19 = vadd.f32 %v1121_v58, %v1043_v51  ;;  %1172 = vmatmul.bf16.gmra.mxu0 %v16267_v23  ;;  %v10915_v58 = vld [vmem:[%s15932_s1 + $0x250] sm:$0xff] }
 0x162   :  { %1572 = vmatmul.bf16.gmra.mxu1 %v10506_v26  ;;  %v10906_v26 = vld [vmem:[%s15932_s1 + $0x210] sm:$0xff] }
 0x163   :  { %1651 = vmatmul.bf16.gmra.mxu2 %v16268_v47  ;;  %1776 = vmatpush.bf16.msra.mxu0 %v10906_v26 }
 0x164   :  { %1730 = vmatmul.bf16.gmra.mxu3 %v16269_v16  ;;  %1855 = vmatpush.bf16.msra.mxu1 %v10915_v58 }
 0x166   :  { %v1045_v37 = vpop.f32.mrf.mxu2  ;;  %v889_v8 = vpop.f32.mrf.mxu0 }
 0x167   :  { %v1124_v60 = vpop.f32.mrf.mxu3  ;;  %v1046_v18 = vadd.f32 %v1045_v37, %v967_v45  ;;  %v968_v34 = vpop.f32.mrf.mxu1 }
 0x168   :  { %v969_v35 = vadd.f32 %v968_v34, %v889_v8 }
 0x169   :  { %v10899_v14 = vadd.f32 %v1124_v60, %v1046_v18 }
 0x16e   :  { %v1047_v20 = vpop.f32.mrf.mxu2  ;;  %v892_v52 = vpop.f32.mrf.mxu0 }
 0x16f   :  { %v1126_v3 = vpop.f32.mrf.mxu3  ;;  %v1048_v6 = vadd.f32 %v1047_v20, %v969_v35  ;;  %v971_v53 = vpop.f32.mrf.mxu1  ;;  %v16273_v35 = vld [vmem:[#allocation12_spill] sm:$0xff] }
 0x170   :  { %v972_v54 = vadd.f32 %v971_v53, %v892_v52  ;;  %v16275_v52 = vld [vmem:[#allocation11_spill] sm:$0xff] }
 0x171   :  { %v10901_v39 = vadd.f32 %v1126_v3, %v1048_v6  ;;  %1177 = vmatmul.bf16.gmra.mxu0 %v16270_v5  ;;  %v16274_v6 = vld [vmem:[#allocation10_spill] sm:$0xff] }
 0x172   :  { %1577 = vmatmul.bf16.gmra.mxu1 %v16264_v2 }
 0x173   :  { %1656 = vmatmul.bf16.gmra.mxu2 %v16271_v24 }
 0x174   :  { %1735 = vmatmul.bf16.gmra.mxu3 %v16272_v57 }
 0x176   :  { %v1050_v51 = vpop.f32.mrf.mxu2  ;;  %v894_v45 = vpop.f32.mrf.mxu0 }
 0x177   :  { %v1129_v61 = vpop.f32.mrf.mxu3  ;;  %v1051_v12 = vadd.f32 %v1050_v51, %v972_v54  ;;  %v973_v47 = vpop.f32.mrf.mxu1 }
 0x178   :  { %v974_v16 = vadd.f32 %v973_v47, %v894_v45  ;;  %v10938_v47 = vld [vmem:[%s15932_s1 + $0x208] sm:$0xff] }
 0x179   :  { %v10919_v2 = vadd.f32 %v1129_v61, %v1051_v12  ;;  %v16276_v61 = vld [vmem:[#allocation16_spill] sm:$0xff]  ;;  %1777 = vmatpush.bf16.msra.mxu0 %v10938_v47 }
 0x17e   :  { %v1052_v37 = vpop.f32.mrf.mxu2  ;;  %v1143_v8 = vpop.f32.mrf.mxu0 }
 0x17f   :  { %v1131_v60 = vpop.f32.mrf.mxu3  ;;  %v1053_v18 = vadd.f32 %v1052_v37, %v974_v16  ;;  %v1543_v34 = vpop.f32.mrf.mxu1  ;;  %v10922_v20 = vadd.f32 %v1143_v8, %v16273_v35  ;;  %v16278_v8 = vld [vmem:[#allocation17_spill] sm:$0xff] }
 0x181   :  { %v10924_v3 = vadd.f32 %v1131_v60, %v1053_v18  ;;  %1182 = vmatmul.bf16.gmra.mxu0 %v10632_v22 }
 0x182   :  { %1582 = vmatmul.bf16.gmra.mxu1 %v16267_v23 }
 0x183   :  { %1661 = vmatmul.bf16.gmra.mxu2 %v16274_v6  ;;  %v10949_v6 = vld [vmem:[%s15932_s1 + $0x248] sm:$0xff] }
 0x184   :  { %1740 = vmatmul.bf16.gmra.mxu3 %v16275_v52  ;;  %v16280_v52 = vld [vmem:[#allocation14_spill] sm:$0xff]  ;;  %1856 = vmatpush.bf16.msra.mxu1 %v10949_v6 }
 0x186   :  { %v1622_v53 = vpop.f32.mrf.mxu2  ;;  %v1145_v57 = vpop.f32.mrf.mxu0 }
 0x187   :  { %v1701_v54 = vpop.f32.mrf.mxu3  ;;  %v1623_v24 = vadd.f32 %v1622_v53, %v1543_v34  ;;  %v1545_v51 = vpop.f32.mrf.mxu1  ;;  %v10931_v12 = vadd.f32 %v1145_v57, %v16276_v61  ;;  %v16281_v53 = vld [vmem:[#allocation15_spill] sm:$0xff] }
 0x189   :  { %16277 = vst [vmem:[#allocation6_spill] sm:$0xff] %v10931_v12  ;;  %v10933_v45 = vadd.f32 %v1701_v54, %v1623_v24 }
 0x18e   :  { %v1624_v23 = vpop.f32.mrf.mxu2  ;;  %v1148_v60 = vpop.f32.mrf.mxu0 }
 0x18f   :  { %v1703_v16 = vpop.f32.mrf.mxu3  ;;  %v1625_v37 = vadd.f32 %v1624_v23, %v1545_v51  ;;  %v1548_v18 = vpop.f32.mrf.mxu1  ;;  %v10942_v34 = vadd.f32 %v1148_v60, %v16278_v8 }
 0x191   :  { %16279 = vst [vmem:[#allocation2_spill] sm:$0xff] %v10942_v34  ;;  %v10944_v35 = vadd.f32 %v1703_v16, %v1625_v37  ;;  %1187 = vmatmul.bf16.gmra.mxu0 %v10683_v38 }
 0x192   :  { %1587 = vmatmul.bf16.gmra.mxu1 %v16270_v5 }
 0x193   :  { %1666 = vmatmul.bf16.gmra.mxu2 %v16280_v52 }
 0x194   :  { %1745 = vmatmul.bf16.gmra.mxu3 %v16281_v53 }
 0x196   :  { %v1627_v54 = vpop.f32.mrf.mxu2  ;;  %v1150_v51 = vpop.f32.mrf.mxu0 }
 0x197   :  { %v1706_v24 = vpop.f32.mrf.mxu3  ;;  %v1628_v57 = vadd.f32 %v1627_v54, %v1548_v18  ;;  %v1550_v61 = vpop.f32.mrf.mxu1  ;;  %v10957_v23 = vadd.f32 %v1150_v51, %v10647_v42 }
 0x199   :  { %v10959_v16 = vadd.f32 %v1706_v24, %v1628_v57 }
 0x19e   :  { %v1629_v37 = vpop.f32.mrf.mxu2  ;;  %v1153_v5 = vpop.f32.mrf.mxu0 }
 0x19f   :  { %v1708_v60 = vpop.f32.mrf.mxu3  ;;  %v1630_v8 = vadd.f32 %v1629_v37, %v1550_v61  ;;  %v1553_v34 = vpop.f32.mrf.mxu1  ;;  %v10962_v52 = vadd.f32 %v1153_v5, %v10652_v32  ;;  %v10978_v61 = vld [vmem:[%s15932_s1 + $0x200] sm:$0xff] }
 0x1a0   :  { %1778 = vmatpush.bf16.msra.mxu0 %v10978_v61 }
 0x1a1   :  { %v10964_v53 = vadd.f32 %v1708_v60, %v1630_v8  ;;  %1192 = vmatmul.bf16.gmra.mxu0 %v10716_v9 }
 0x1a2   :  { %1592 = vmatmul.bf16.gmra.mxu1 %v10632_v22  ;;  %v10983_v22 = vld [vmem:[%s15932_s1 + $0x240] sm:$0xff] }
 0x1a3   :  { %1671 = vmatmul.bf16.gmra.mxu2 %v10637_v62  ;;  %1857 = vmatpush.bf16.msra.mxu1 %v10983_v22  ;;  %v10990_v62 = vld [vmem:[%s15932_s1 + $0xb8] sm:$0xff] }
 0x1a4   :  { %1750 = vmatmul.bf16.gmra.mxu3 %v10642_v27  ;;  %16282 = vst [vmem:[#allocation3_spill] sm:$0xff] %v10990_v62  ;;  %2227 = vmatpush.bf16.msrb.mxu0 %v10990_v62  ;;  %v10996_v27 = vld [vmem:[%s15932_s1 + $0xf8] sm:$0xff] }
 0x1a5   :  { %16283 = vst [vmem:[#allocation9_spill] sm:$0xff] %v10996_v27 }
 0x1a6   :  { %v1632_v42 = vpop.f32.mrf.mxu2  ;;  %v1155_v24 = vpop.f32.mrf.mxu0 }
 0x1a7   :  { %v1711_v18 = vpop.f32.mrf.mxu3  ;;  %v1633_v54 = vadd.f32 %v1632_v42, %v1553_v34  ;;  %v1555_v57 = vpop.f32.mrf.mxu1  ;;  %v10971_v51 = vadd.f32 %v1155_v24, %v10698_v55  ;;  %2306 = vmatpush.bf16.msrb.mxu1 %v10996_v27  ;;  %v11005_v42 = vld [vmem:[%s15932_s1 + $0xb0] sm:$0xff]  ;;  %v11029_v24 = vld [vmem:[%s15932_s1 + $0xe8] sm:$0xff]  ;;  %v11105_v27 = vld [vmem:[%s15932_s1 + $0x80] sm:$0xff] }
 0x1a8   :  { %16285 = vst [vmem:[#allocation5_spill] sm:$0xff] %v11005_v42  ;;  %2228 = vmatpush.bf16.msrb.mxu0 %v11005_v42 }
 0x1a9   :  { %v10973_v32 = vadd.f32 %v1711_v18, %v1633_v54  ;;  %v11011_v18 = vld [vmem:[%s15932_s1 + $0xf0] sm:$0xff]  ;;  %16288 = vst [vmem:[#allocation8_spill] sm:$0xff] %v11029_v24 }
 0x1aa   :  { %16286 = vst [vmem:[#allocation13_spill] sm:$0xff] %v11011_v18 }
 0x1ab   :  { %2307 = vmatpush.bf16.msrb.mxu1 %v11011_v18  ;;  %16305 = vst [vmem:[#allocation27_spill] sm:$0xff] %v11105_v27 }
 0x1ae   :  { %v1634_v55 = vpop.f32.mrf.mxu2  ;;  %v1158_v60 = vpop.f32.mrf.mxu0 }
 0x1af   :  { %v1713_v34 = vpop.f32.mrf.mxu3  ;;  %v1635_v37 = vadd.f32 %v1634_v55, %v1555_v57  ;;  %v1558_v8 = vpop.f32.mrf.mxu1  ;;  %v11000_v5 = vadd.f32 %v1158_v60, %v10707_v4  ;;  %v11023_v4 = vld [vmem:[%s15932_s1 + $0xa8] sm:$0xff]  ;;  %2308 = vmatpush.bf16.msrb.mxu1 %v11029_v24  ;;  %v11044_v60 = vld [vmem:[%s15932_s1 + $0xe0] sm:$0xff] }
 0x1b0   :  { %16287 = vst [vmem:[#allocation7_spill] sm:$0xff] %v11023_v4  ;;  %2229 = vmatpush.bf16.msrb.mxu0 %v11023_v4  ;;  %v16295_v4 = vld [vmem:[#allocation23_spill] sm:$0xff] }
 0x1b1   :  { %16284 = vst [vmem:[#allocation4_spill] sm:$0xff] %v11000_v5  ;;  %v11014_v54 = vadd.f32 %v1713_v34, %v1635_v37  ;;  %1197 = vmatmul.bf16.gmra.mxu0 %v10759_v25  ;;  %v11038_v37 = vld [vmem:[%s15932_s1 + $0xa0] sm:$0xff] }
 0x1b2   :  { %1597 = vmatmul.bf16.gmra.mxu1 %v10683_v38  ;;  %16290 = vst [vmem:[#allocation10_spill] sm:$0xff] %v11038_v37 }
 0x1b3   :  { %1676 = vmatmul.bf16.gmra.mxu2 %v10688_v15  ;;  %16291 = vst [vmem:[#allocation11_spill] sm:$0xff] %v11044_v60  ;;  %2309 = vmatpush.bf16.msrb.mxu1 %v11044_v60 }
 0x1b4   :  { %1755 = vmatmul.bf16.gmra.mxu3 %v10693_v0  ;;  %2230 = vmatpush.bf16.msrb.mxu0 %v11038_v37 }
 0x1b6   :  { %v1637_v57 = vpop.f32.mrf.mxu2  ;;  %v1160_v15 = vpop.f32.mrf.mxu0 }
 0x1b7   :  { %v1716_v38 = vpop.f32.mrf.mxu3  ;;  %v1638_v55 = vadd.f32 %v1637_v57, %v1558_v8  ;;  %v1560_v34 = vpop.f32.mrf.mxu1  ;;  %v11033_v0 = vadd.f32 %v1160_v15, %v10731_v48  ;;  %v11052_v48 = vld [vmem:[%s15932_s1 + $0x98] sm:$0xff] }
 0x1b8   :  { %16292 = vst [vmem:[#allocation16_spill] sm:$0xff] %v11052_v48  ;;  %2231 = vmatpush.bf16.msrb.mxu0 %v11052_v48  ;;  %v11058_v57 = vld [vmem:[%s15932_s1 + $0xd8] sm:$0xff]  ;;  %v11072_v48 = vld [vmem:[%s15932_s1 + $0x90] sm:$0xff] }
 0x1b9   :  { %16289 = vst [vmem:[#allocation12_spill] sm:$0xff] %v11033_v0  ;;  %v11047_v8 = vadd.f32 %v1716_v38, %v1638_v55  ;;  %2310 = vmatpush.bf16.msrb.mxu1 %v11058_v57  ;;  %v11064_v38 = vld [vmem:[%s15933_s0 + $0x70] sm:$0xff] }
 0x1ba   :  { %16293 = vst [vmem:[#allocation17_spill] sm:$0xff] %v11058_v57  ;;  %v11078_v57 = vld [vmem:[%s15932_s1 + $0xd0] sm:$0xff] }
 0x1bb   :  { %16294 = vst [vmem:[#allocation14_spill] sm:$0xff] %v11064_v38 }
 0x1bc   :  { %16297 = vst [vmem:[#allocation23_spill] sm:$0xff] %v11072_v48  ;;  %2232 = vmatpush.bf16.msrb.mxu0 %v11072_v48 }
 0x1bd   :  { %16298 = vst [vmem:[#allocation26_spill] sm:$0xff] %v11078_v57  ;;  %2311 = vmatpush.bf16.msrb.mxu1 %v11078_v57 }
 0x1be   :  { %v1639_v15 = vpop.f32.mrf.mxu2  ;;  %v1163_v60 = vpop.f32.mrf.mxu0 }
 0x1bf   :  { %v1718_v37 = vpop.f32.mrf.mxu3  ;;  %v1640_v55 = vadd.f32 %v1639_v15, %v1560_v34  ;;  %v1563_v24 = vpop.f32.mrf.mxu1  ;;  %v11067_v18 = vadd.f32 %v1163_v60, %v16295_v4  ;;  %v16299_v4 = vld [vmem:[#allocation20_spill] sm:$0xff]  ;;  %v16300_v60 = vld [vmem:[#allocation21_spill] sm:$0xff]  ;;  %v11090_v15 = vld [vmem:[%s15932_s1 + $0x88] sm:$0xff] }
 0x1c0   :  { %16301 = vst [vmem:[#allocation20_spill] sm:$0xff] %v11090_v15  ;;  %2233 = vmatpush.bf16.msrb.mxu0 %v11090_v15  ;;  %v11111_v15 = vld [vmem:[%s15932_s1 + $0xc0] sm:$0xff] }
 0x1c1   :  { %16296 = vst [vmem:[#allocation15_spill] sm:$0xff] %v11067_v18  ;;  %v11081_v34 = vadd.f32 %v1718_v37, %v1640_v55  ;;  %1202 = vmatmul.bf16.gmra.mxu0 %v11064_v38  ;;  %v11096_v37 = vld [vmem:[%s15932_s1 + $0xc8] sm:$0xff] }
 0x1c2   :  { %1602 = vmatmul.bf16.gmra.mxu1 %v10716_v9  ;;  %16302 = vst [vmem:[#allocation21_spill] sm:$0xff] %v11096_v37 }
 0x1c3   :  { %1681 = vmatmul.bf16.gmra.mxu2 %v16299_v4  ;;  %2312 = vmatpush.bf16.msrb.mxu1 %v11096_v37  ;;  %16306 = vst [vmem:[#allocation28_spill] sm:$0xff] %v11111_v15 }
 0x1c4   :  { %1760 = vmatmul.bf16.gmra.mxu3 %v16300_v60  ;;  %v16303_v60 = vld [vmem:[#allocation25_spill] sm:$0xff]  ;;  %2234 = vmatpush.bf16.msrb.mxu0 %v11105_v27 }
 0x1c6   :  { %v1642_v55 = vpop.f32.mrf.mxu2  ;;  %v1165_v4 = vpop.f32.mrf.mxu0 }
 0x1c7   :  { %v1721_v9 = vpop.f32.mrf.mxu3  ;;  %v1643_v57 = vadd.f32 %v1642_v55, %v1563_v24  ;;  %v1565_v48 = vpop.f32.mrf.mxu1  ;;  %v11100_v42 = vadd.f32 %v1165_v4, %v16303_v60  ;;  %2313 = vmatpush.bf16.msrb.mxu1 %v11111_v15  ;;  %v11119_v4 = vld [vmem:[%s15933_s0 + $0x78] sm:$0xff] }
 0x1c8   :  { %16307 = vst [vmem:[#allocation29_spill] sm:$0xff] %v11119_v4 }
 0x1c9   :  { %16304 = vst [vmem:[#allocation25_spill] sm:$0xff] %v11100_v42  ;;  %v11114_v24 = vadd.f32 %v1721_v9, %v1643_v57 }
 0x1ce   :  { %v1644_v55 = vpop.f32.mrf.mxu2  ;;  %v1168_v62 = vpop.f32.mrf.mxu0 }
 0x1cf   :  { %v1723_v37 = vpop.f32.mrf.mxu3  ;;  %v1645_v60 = vadd.f32 %v1644_v55, %v1565_v48  ;;  %v1568_v42 = vpop.f32.mrf.mxu1  ;;  %v11122_v27 = vadd.f32 %v1168_v62, %v10779_v13 }
 0x1d1   :  { %16308 = vst [vmem:[#allocation30_spill] sm:$0xff] %v11122_v27  ;;  %v11124_v18 = vadd.f32 %v1723_v37, %v1645_v60  ;;  %1207 = vmatmul.bf16.gmra.mxu0 %v11119_v4 }
 0x1d2   :  { %1607 = vmatmul.bf16.gmra.mxu1 %v10759_v25 }
 0x1d3   :  { %1686 = vmatmul.bf16.gmra.mxu2 %v10764_v11 }
 0x1d4   :  { %1765 = vmatmul.bf16.gmra.mxu3 %v10769_v28  ;;  %v11143_v28 = vld [vmem:[%s15933_s0 + $0x180] sm:$0xff] }
 0x1d6   :  { %v1647_v57 = vpop.f32.mrf.mxu2  ;;  %v1170_v38 = vpop.f32.mrf.mxu0 }
 0x1d7   :  { %v1726_v9 = vpop.f32.mrf.mxu3  ;;  %v1648_v15 = vadd.f32 %v1647_v57, %v1568_v42  ;;  %v1570_v48 = vpop.f32.mrf.mxu1  ;;  %v11131_v55 = vadd.f32 %v1170_v38, %v10781_v21  ;;  %v11149_v21 = vld [vmem:[%s15933_s0 + $0x10] sm:$0xff]  ;;  %v16309_v42 = vld [vmem:[#allocation22_spill] sm:$0xff]  ;;  %v9687_v38 = vld [vmem:[%s15932_s1 + $0x1b8] sm:$0xff] }
 0x1d8   :  { %v9688_v57 = vld [vmem:[%s15932_s1 + $0x1f8] sm:$0xff] }
 0x1d9   :  { %v11133_v13 = vadd.f32 %v1726_v9, %v1648_v15  ;;  %v16310_v15 = vld [vmem:[#allocation24_spill] sm:$0xff] }
 0x1de   :  { %v1649_v62 = vpop.f32.mrf.mxu2  ;;  %v1173_v27 = vpop.f32.mrf.mxu0 }
 0x1df   :  { %v1728_v37 = vpop.f32.mrf.mxu3  ;;  %v1650_v60 = vadd.f32 %v1649_v62, %v1570_v48  ;;  %v1573_v4 = vpop.f32.mrf.mxu1  ;;  %v11136_v25 = vadd.f32 %v1173_v27, %v10802_v36  ;;  %v11155_v36 = vld [vmem:[%s15933_s0 + $0x80] sm:$0xff] }
 0x1e0   :  { %v9686_v27 = vld [vmem:[%s15933_s0 + $0x100] sm:$0xff] }
 0x1e1   :  { %v11138_v11 = vadd.f32 %v1728_v37, %v1650_v60  ;;  %1779 = vmatmul.bf16.vlgmr.msra.gmra.mxu0 %v11143_v28 }
 0x1e2   :  { %1858 = vmatmul.bf16.vlgmr.msra.gmra.mxu1 %v11149_v21  ;;  %2571 = vmatpush.bf16.msra.mxu0 %v9687_v38 }
 0x1e3   :  { %2077 = vmatmul.bf16.vlgmr.msra.gmra.mxu2 %v11155_v36  ;;  %2650 = vmatpush.bf16.msra.mxu1 %v9688_v57 }
 0x1e4   :  { %2156 = vmatmul.bf16.vlgmr.msra.gmra.mxu3 %v9686_v27  ;;  %2729 = vmatpush.bf16.msra.mxu2 %v16309_v42  ;;  %v9689_v42 = vld [vmem:[%s15932_s1 + $0x1b0] sm:$0xff] }
 0x1e5   :  { %2808 = vmatpush.bf16.msra.mxu3 %v16310_v15 }
 0x1e6   :  { %v1652_v9 = vpop.f32.mrf.mxu2  ;;  %v1175_v37 = vpop.f32.mrf.mxu0  ;;  %2572 = vmatpush.bf16.msra.mxu0 %v9689_v42  ;;  %v9699_v42 = vld [vmem:[%s15932_s1 + $0x198] sm:$0xff] }
 0x1e7   :  { %v1731_v48 = vpop.f32.mrf.mxu3  ;;  %v1653_v62 = vadd.f32 %v1652_v9, %v1573_v4  ;;  %v1575_v60 = vpop.f32.mrf.mxu1  ;;  %v11170_v27 = vadd.f32 %v1175_v37, %v10808_v17  ;;  %v9690_v4 = vld [vmem:[%s15932_s1 + $0x1f0] sm:$0xff]  ;;  %v9692_v17 = vld [vmem:[%s15932_s1 + $0x1e8] sm:$0xff]  ;;  %v9694_v37 = vld [vmem:[%s15932_s1 + $0x1e0] sm:$0xff] }
 0x1e8   :  { %2730 = vmatpush.bf16.msra.mxu2 %v10786_v29  ;;  %2651 = vmatpush.bf16.msra.mxu1 %v9690_v4  ;;  %v9691_v29 = vld [vmem:[%s15932_s1 + $0x1a8] sm:$0xff]  ;;  %v9700_v4 = vld [vmem:[%s15932_s1 + $0x1d8] sm:$0xff] }
 0x1e9   :  { %v11176_v38 = vadd.f32 %v1731_v48, %v1653_v62  ;;  %2809 = vmatpush.bf16.msra.mxu3 %v10795_v30 }
 0x1ea   :  { %2573 = vmatpush.bf16.msra.mxu0 %v9691_v29 }
 0x1ec   :  { %2731 = vmatpush.bf16.msra.mxu2 %v10823_v44  ;;  %2652 = vmatpush.bf16.msra.mxu1 %v9692_v17  ;;  %v9693_v44 = vld [vmem:[%s15932_s1 + $0x1a0] sm:$0xff] }
 0x1ed   :  { %2810 = vmatpush.bf16.msra.mxu3 %v10835_v50 }
 0x1ee   :  { %v1654_v30 = vpop.f32.mrf.mxu2  ;;  %v1178_v9 = vpop.f32.mrf.mxu0  ;;  %2574 = vmatpush.bf16.msra.mxu0 %v9693_v44 }
 0x1ef   :  { %v1733_v15 = vpop.f32.mrf.mxu3  ;;  %v1655_v57 = vadd.f32 %v1654_v30, %v1575_v60  ;;  %v1578_v48 = vpop.f32.mrf.mxu1  ;;  %v11191_v62 = vadd.f32 %v1178_v9, %v10818_v63  ;;  %v11206_v63 = vld [vmem:[%s15933_s0 + $0x188] sm:$0xff] }
 0x1f0   :  { %2732 = vmatpush.bf16.msra.mxu2 %v10856_v49  ;;  %2653 = vmatpush.bf16.msra.mxu1 %v9694_v37  ;;  %v11212_v49 = vld [vmem:[%s15933_s0 + $0x18] sm:$0xff]  ;;  %v9698_v60 = vld [vmem:[%s15933_s0 + $0x108] sm:$0xff] }
 0x1f1   :  { %v11197_v50 = vadd.f32 %v1733_v15, %v1655_v57  ;;  %2811 = vmatpush.bf16.msra.mxu3 %v10861_v56  ;;  %1784 = vmatmul.bf16.gmra.mxu0 %v11206_v63  ;;  %v11218_v56 = vld [vmem:[%s15933_s0 + $0x88] sm:$0xff] }
 0x1f2   :  { %1863 = vmatmul.bf16.gmra.mxu1 %v11212_v49  ;;  %2575 = vmatpush.bf16.msra.mxu0 %v9699_v42 }
 0x1f3   :  { %2082 = vmatmul.bf16.gmra.mxu2 %v11218_v56 }
 0x1f4   :  { %2161 = vmatmul.bf16.gmra.mxu3 %v9698_v60  ;;  %2733 = vmatpush.bf16.msra.mxu2 %v10882_v59  ;;  %v9701_v59 = vld [vmem:[%s15932_s1 + $0x190] sm:$0xff] }
 0x1f5   :  { %2812 = vmatpush.bf16.msra.mxu3 %v10890_v10  ;;  %2654 = vmatpush.bf16.msra.mxu1 %v9700_v4 }
 0x1f6   :  { %v1657_v29 = vpop.f32.mrf.mxu2  ;;  %v1180_v15 = vpop.f32.mrf.mxu0  ;;  %2576 = vmatpush.bf16.msra.mxu0 %v9701_v59 }
 0x1f7   :  { %v1736_v17 = vpop.f32.mrf.mxu3  ;;  %v1658_v30 = vadd.f32 %v1657_v29, %v1578_v48  ;;  %v1580_v57 = vpop.f32.mrf.mxu1  ;;  %v11233_v9 = vadd.f32 %v1180_v15, %v10830_v7  ;;  %v9702_v48 = vld [vmem:[%s15932_s1 + $0x1d0] sm:$0xff]  ;;  %v9703_v7 = vld [vmem:[%s15932_s1 + $0x188] sm:$0xff] }
 0x1f8   :  { %2734 = vmatpush.bf16.msra.mxu2 %v10906_v26  ;;  %v9704_v26 = vld [vmem:[%s15932_s1 + $0x1c8] sm:$0xff] }
 0x1f9   :  { %v11239_v10 = vadd.f32 %v1736_v17, %v1658_v30  ;;  %2813 = vmatpush.bf16.msra.mxu3 %v10915_v58  ;;  %2655 = vmatpush.bf16.msra.mxu1 %v9702_v48  ;;  %v11265_v17 = vld [vmem:[%s15933_s0 + $0x190] sm:$0xff] }
 0x1fa   :  { %2577 = vmatpush.bf16.msra.mxu0 %v9703_v7 }
 0x1fc   :  { %2735 = vmatpush.bf16.msra.mxu2 %v10938_v47  ;;  %v16312_v47 = vld [vmem:[#allocation18_spill] sm:$0xff] }
 0x1fd   :  { %2814 = vmatpush.bf16.msra.mxu3 %v10949_v6  ;;  %2656 = vmatpush.bf16.msra.mxu1 %v9704_v26  ;;  %v16313_v6 = vld [vmem:[#allocation19_spill] sm:$0xff] }
 0x1fe   :  { %v1659_v58 = vpop.f32.mrf.mxu2  ;;  %v1183_v60 = vpop.f32.mrf.mxu0  ;;  %2578 = vmatpush.bf16.msra.mxu0 %v16312_v47 }
 0x1ff   :  { %v1738_v44 = vpop.f32.mrf.mxu3  ;;  %v1660_v37 = vadd.f32 %v1659_v58, %v1580_v57  ;;  %v1583_v42 = vpop.f32.mrf.mxu1  ;;  %v11254_v4 = vadd.f32 %v1183_v60, %v10843_v1  ;;  %v11271_v1 = vld [vmem:[%s15933_s0 + $0x20] sm:$0xff] }
 0x200   :  { %2736 = vmatpush.bf16.msra.mxu2 %v10978_v61  ;;  %v11277_v61 = vld [vmem:[%s15933_s0 + $0x90] sm:$0xff] }
 0x201   :  { %16311 = vst [vmem:[#allocation22_spill] sm:$0xff] %v11254_v4  ;;  %v11258_v29 = vadd.f32 %v1738_v44, %v1660_v37  ;;  %2815 = vmatpush.bf16.msra.mxu3 %v10983_v22  ;;  %2657 = vmatpush.bf16.msra.mxu1 %v16313_v6  ;;  %v9708_v22 = vld [vmem:[%s15933_s0 + $0x110] sm:$0xff] }
 0x202   :  { %1789 = vmatmul.bf16.gmra.mxu0 %v11265_v17  ;;  %1868 = vmatmul.bf16.gmra.mxu1 %v11271_v1 }
 0x203   :  { %2087 = vmatmul.bf16.gmra.mxu2 %v11277_v61 }
 0x204   :  { %2166 = vmatmul.bf16.gmra.mxu3 %v9708_v22  ;;  %v9712_v22 = vld [vmem:[%s15933_s0 + $0x118] sm:$0xff] }
 0x206   :  { %v1662_v30 = vpop.f32.mrf.mxu2  ;;  %v1185_v59 = vpop.f32.mrf.mxu0 }
 0x207   :  { %v1741_v15 = vpop.f32.mrf.mxu3  ;;  %v1663_v57 = vadd.f32 %v1662_v30, %v1583_v42  ;;  %v1585_v48 = vpop.f32.mrf.mxu1  ;;  %v11284_v7 = vadd.f32 %v1185_v59, %v10845_v40  ;;  %v11296_v42 = vld [vmem:[%s15933_s0 + $0x198] sm:$0xff]  ;;  %v11302_v40 = vld [vmem:[%s15933_s0 + $0x28] sm:$0xff] }
 0x208   :  { %16316 = vst [vmem:[#allocation19_spill] sm:$0xff] %v11296_v42 }
 0x209   :  { %16314 = vst [vmem:[#allocation24_spill] sm:$0xff] %v11284_v7  ;;  %v11286_v26 = vadd.f32 %v1741_v15, %v1663_v57 }
 0x20a   :  { %16317 = vst [vmem:[#allocation31_spill] sm:$0xff] %v11302_v40 }
 0x20e   :  { %v1664_v58 = vpop.f32.mrf.mxu2  ;;  %v1188_v60 = vpop.f32.mrf.mxu0 }
 0x20f   :  { %v1743_v44 = vpop.f32.mrf.mxu3  ;;  %v1665_v37 = vadd.f32 %v1664_v58, %v1585_v48  ;;  %v1588_v47 = vpop.f32.mrf.mxu1  ;;  %v11289_v6 = vadd.f32 %v1188_v60, %v10851_v43  ;;  %v11308_v43 = vld [vmem:[%s15933_s0 + $0x98] sm:$0xff] }
 0x210   :  { %16318 = vst [vmem:[#allocation32_spill] sm:$0xff] %v11308_v43 }
 0x211   :  { %16315 = vst [vmem:[#allocation18_spill] sm:$0xff] %v11289_v6  ;;  %v11291_v4 = vadd.f32 %v1743_v44, %v1665_v37 }
 0x212   :  { %1794 = vmatmul.bf16.gmra.mxu0 %v11296_v42  ;;  %1873 = vmatmul.bf16.gmra.mxu1 %v11302_v40 }
 0x213   :  { %2092 = vmatmul.bf16.gmra.mxu2 %v11308_v43 }
 0x214   :  { %2171 = vmatmul.bf16.gmra.mxu3 %v9712_v22 }
 0x216   :  { %v1667_v30 = vpop.f32.mrf.mxu2  ;;  %v1190_v59 = vpop.f32.mrf.mxu0 }
 0x217   :  { %v1746_v15 = vpop.f32.mrf.mxu3  ;;  %v1668_v57 = vadd.f32 %v1667_v30, %v1588_v47  ;;  %v1590_v48 = vpop.f32.mrf.mxu1  ;;  %v11315_v58 = vadd.f32 %v1190_v59, %v10865_v46  ;;  %v11327_v47 = vld [vmem:[%s15933_s0 + $0x1a0] sm:$0xff]  ;;  %v11333_v46 = vld [vmem:[%s15933_s0 + $0x30] sm:$0xff] }
 0x218   :  { %16321 = vst [vmem:[#allocation35_spill] sm:$0xff] %v11327_v47 }
 0x219   :  { %16319 = vst [vmem:[#allocation33_spill] sm:$0xff] %v11315_v58  ;;  %v11317_v44 = vadd.f32 %v1746_v15, %v1668_v57 }
 0x21a   :  { %16322 = vst [vmem:[#allocation36_spill] sm:$0xff] %v11333_v46 }
 0x21e   :  { %v1669_v37 = vpop.f32.mrf.mxu2  ;;  %v1193_v40 = vpop.f32.mrf.mxu0 }
 0x21f   :  { %v1748_v60 = vpop.f32.mrf.mxu3  ;;  %v1670_v6 = vadd.f32 %v1669_v37, %v1590_v48  ;;  %v1593_v43 = vpop.f32.mrf.mxu1  ;;  %v11320_v42 = vadd.f32 %v1193_v40, %v10871_v31  ;;  %v11339_v31 = vld [vmem:[%s15933_s0 + $0xa0] sm:$0xff] }
 0x220   :  { %16323 = vst [vmem:[#allocation37_spill] sm:$0xff] %v11339_v31 }
 0x221   :  { %16320 = vst [vmem:[#allocation34_spill] sm:$0xff] %v11320_v42  ;;  %v11322_v7 = vadd.f32 %v1748_v60, %v1670_v6  ;;  %v9716_v6 = vld [vmem:[%s15933_s0 + $0x120] sm:$0xff] }
 0x222   :  { %1799 = vmatmul.bf16.gmra.mxu0 %v11327_v47  ;;  %1878 = vmatmul.bf16.gmra.mxu1 %v11333_v46 }
 0x223   :  { %2097 = vmatmul.bf16.gmra.mxu2 %v11339_v31 }
 0x224   :  { %2176 = vmatmul.bf16.gmra.mxu3 %v9716_v6 }
 0x226   :  { %v1672_v40 = vpop.f32.mrf.mxu2  ;;  %v1195_v15 = vpop.f32.mrf.mxu0 }
 0x227   :  { %v1751_v22 = vpop.f32.mrf.mxu3  ;;  %v1673_v30 = vadd.f32 %v1672_v40, %v1593_v43  ;;  %v1595_v57 = vpop.f32.mrf.mxu1  ;;  %v11346_v59 = vadd.f32 %v1195_v15, %v10873_v33  ;;  %v11358_v43 = vld [vmem:[%s15933_s0 + $0x1a8] sm:$0xff]  ;;  %v11364_v33 = vld [vmem:[%s15933_s0 + $0x38] sm:$0xff] }
 0x228   :  { %16326 = vst [vmem:[#allocation40_spill] sm:$0xff] %v11358_v43 }
 0x229   :  { %16324 = vst [vmem:[#allocation38_spill] sm:$0xff] %v11346_v59  ;;  %v11348_v48 = vadd.f32 %v1751_v22, %v1673_v30 }
 0x22a   :  { %16327 = vst [vmem:[#allocation41_spill] sm:$0xff] %v11364_v33 }
 0x22e   :  { %v1674_v37 = vpop.f32.mrf.mxu2  ;;  %v1198_v46 = vpop.f32.mrf.mxu0 }
 0x22f   :  { %v1753_v60 = vpop.f32.mrf.mxu3  ;;  %v1675_v42 = vadd.f32 %v1674_v37, %v1595_v57  ;;  %v1598_v31 = vpop.f32.mrf.mxu1  ;;  %v11351_v47 = vadd.f32 %v1198_v46, %v10885_v41  ;;  %v11370_v41 = vld [vmem:[%s15933_s0 + $0xa8] sm:$0xff] }
 0x230   :  { %16328 = vst [vmem:[#allocation42_spill] sm:$0xff] %v11370_v41 }
 0x231   :  { %16325 = vst [vmem:[#allocation39_spill] sm:$0xff] %v11351_v47  ;;  %v11353_v58 = vadd.f32 %v1753_v60, %v1675_v42  ;;  %v9720_v42 = vld [vmem:[%s15933_s0 + $0x128] sm:$0xff] }
 0x232   :  { %1804 = vmatmul.bf16.gmra.mxu0 %v11358_v43  ;;  %1883 = vmatmul.bf16.gmra.mxu1 %v11364_v33 }
 0x233   :  { %2102 = vmatmul.bf16.gmra.mxu2 %v11370_v41 }
 0x234   :  { %2181 = vmatmul.bf16.gmra.mxu3 %v9720_v42 }
 0x236   :  { %v1677_v46 = vpop.f32.mrf.mxu2  ;;  %v1200_v22 = vpop.f32.mrf.mxu0 }
 0x237   :  { %v1756_v6 = vpop.f32.mrf.mxu3  ;;  %v1678_v40 = vadd.f32 %v1677_v46, %v1598_v31  ;;  %v1600_v30 = vpop.f32.mrf.mxu1  ;;  %v11377_v15 = vadd.f32 %v1200_v22, %v10893_v19  ;;  %v11389_v31 = vld [vmem:[%s15933_s0 + $0x1b0] sm:$0xff]  ;;  %v11395_v19 = vld [vmem:[%s15933_s0 + $0x40] sm:$0xff] }
 0x238   :  { %16331 = vst [vmem:[#allocation45_spill] sm:$0xff] %v11389_v31 }
 0x239   :  { %16329 = vst [vmem:[#allocation43_spill] sm:$0xff] %v11377_v15  ;;  %v11379_v57 = vadd.f32 %v1756_v6, %v1678_v40 }
 0x23a   :  { %16332 = vst [vmem:[#allocation46_spill] sm:$0xff] %v11395_v19 }
 0x23e   :  { %v1679_v37 = vpop.f32.mrf.mxu2  ;;  %v1203_v33 = vpop.f32.mrf.mxu0 }
 0x23f   :  { %v1758_v60 = vpop.f32.mrf.mxu3  ;;  %v1680_v47 = vadd.f32 %v1679_v37, %v1600_v30  ;;  %v1603_v41 = vpop.f32.mrf.mxu1  ;;  %v11382_v43 = vadd.f32 %v1203_v33, %v10899_v14  ;;  %v11401_v14 = vld [vmem:[%s15933_s0 + $0xb0] sm:$0xff] }
 0x240   :  { %16333 = vst [vmem:[#allocation47_spill] sm:$0xff] %v11401_v14 }
 0x241   :  { %16330 = vst [vmem:[#allocation44_spill] sm:$0xff] %v11382_v43  ;;  %v11384_v59 = vadd.f32 %v1758_v60, %v1680_v47  ;;  %v9724_v47 = vld [vmem:[%s15933_s0 + $0x130] sm:$0xff] }
 0x242   :  { %1809 = vmatmul.bf16.gmra.mxu0 %v11389_v31  ;;  %1888 = vmatmul.bf16.gmra.mxu1 %v11395_v19 }
 0x243   :  { %2107 = vmatmul.bf16.gmra.mxu2 %v11401_v14 }
 0x244   :  { %2186 = vmatmul.bf16.gmra.mxu3 %v9724_v47 }
 0x246   :  { %v1682_v33 = vpop.f32.mrf.mxu2  ;;  %v1205_v6 = vpop.f32.mrf.mxu0 }
 0x247   :  { %v1761_v42 = vpop.f32.mrf.mxu3  ;;  %v1683_v46 = vadd.f32 %v1682_v33, %v1603_v41  ;;  %v1605_v40 = vpop.f32.mrf.mxu1  ;;  %v11408_v22 = vadd.f32 %v1205_v6, %v10901_v39  ;;  %v11420_v41 = vld [vmem:[%s15933_s0 + $0x1b8] sm:$0xff]  ;;  %v11426_v39 = vld [vmem:[%s15933_s0 + $0x48] sm:$0xff] }
 0x248   :  { %16336 = vst [vmem:[#allocation50_spill] sm:$0xff] %v11420_v41 }
 0x249   :  { %16334 = vst [vmem:[#allocation48_spill] sm:$0xff] %v11408_v22  ;;  %v11410_v30 = vadd.f32 %v1761_v42, %v1683_v46 }
 0x24a   :  { %16337 = vst [vmem:[#allocation51_spill] sm:$0xff] %v11426_v39 }
 0x24e   :  { %v1684_v37 = vpop.f32.mrf.mxu2  ;;  %v1208_v19 = vpop.f32.mrf.mxu0 }
 0x24f   :  { %v1763_v60 = vpop.f32.mrf.mxu3  ;;  %v1685_v43 = vadd.f32 %v1684_v37, %v1605_v40  ;;  %v1608_v14 = vpop.f32.mrf.mxu1  ;;  %v11413_v31 = vadd.f32 %v1208_v19, %v10919_v2  ;;  %v11432_v2 = vld [vmem:[%s15933_s0 + $0xb8] sm:$0xff] }
 0x250   :  { %16338 = vst [vmem:[#allocation52_spill] sm:$0xff] %v11432_v2 }
 0x251   :  { %16335 = vst [vmem:[#allocation49_spill] sm:$0xff] %v11413_v31  ;;  %v11415_v15 = vadd.f32 %v1763_v60, %v1685_v43  ;;  %v9728_v43 = vld [vmem:[%s15933_s0 + $0x138] sm:$0xff] }
 0x252   :  { %1814 = vmatmul.bf16.gmra.mxu0 %v11420_v41  ;;  %1893 = vmatmul.bf16.gmra.mxu1 %v11426_v39 }
 0x253   :  { %2112 = vmatmul.bf16.gmra.mxu2 %v11432_v2 }
 0x254   :  { %2191 = vmatmul.bf16.gmra.mxu3 %v9728_v43 }
 0x256   :  { %v1687_v19 = vpop.f32.mrf.mxu2  ;;  %v1210_v42 = vpop.f32.mrf.mxu0 }
 0x257   :  { %v1766_v47 = vpop.f32.mrf.mxu3  ;;  %v1688_v33 = vadd.f32 %v1687_v19, %v1608_v14  ;;  %v1610_v46 = vpop.f32.mrf.mxu1  ;;  %v11439_v6 = vadd.f32 %v1210_v42, %v10924_v3  ;;  %v11451_v14 = vld [vmem:[%s15933_s0 + $0x1c0] sm:$0xff]  ;;  %v11457_v3 = vld [vmem:[%s15933_s0 + $0x50] sm:$0xff] }
 0x258   :  { %16341 = vst [vmem:[#allocation55_spill] sm:$0xff] %v11451_v14 }
 0x259   :  { %16339 = vst [vmem:[#allocation53_spill] sm:$0xff] %v11439_v6  ;;  %v11441_v40 = vadd.f32 %v1766_v47, %v1688_v33 }
 0x25a   :  { %16342 = vst [vmem:[#allocation56_spill] sm:$0xff] %v11457_v3 }
 0x25e   :  { %v1689_v37 = vpop.f32.mrf.mxu2  ;;  %v1780_v39 = vpop.f32.mrf.mxu0 }
 0x25f   :  { %v1768_v60 = vpop.f32.mrf.mxu3  ;;  %v1690_v31 = vadd.f32 %v1689_v37, %v1610_v46  ;;  %v1859_v2 = vpop.f32.mrf.mxu1  ;;  %v1781_v41 = vadd.f32 %v1780_v39, %v10933_v45  ;;  %v11463_v45 = vld [vmem:[%s15933_s0 + $0xc0] sm:$0xff] }
 0x260   :  { %16343 = vst [vmem:[#allocation57_spill] sm:$0xff] %v11463_v45 }
 0x261   :  { %v11444_v22 = vadd.f32 %v1768_v60, %v1690_v31  ;;  %v11446_v43 = vadd.f32 %v1859_v2, %v1781_v41  ;;  %v9732_v31 = vld [vmem:[%s15933_s0 + $0x140] sm:$0xff] }
 0x262   :  { %1819 = vmatmul.bf16.gmra.mxu0 %v11451_v14  ;;  %1898 = vmatmul.bf16.gmra.mxu1 %v11457_v3 }
 0x263   :  { %16340 = vst [vmem:[#allocation54_spill] sm:$0xff] %v11446_v43  ;;  %2117 = vmatmul.bf16.gmra.mxu2 %v11463_v45 }
 0x264   :  { %2196 = vmatmul.bf16.gmra.mxu3 %v9732_v31 }
 0x266   :  { %v2078_v39 = vpop.f32.mrf.mxu2  ;;  %v1782_v47 = vpop.f32.mrf.mxu0 }
 0x267   :  { %v2157_v2 = vpop.f32.mrf.mxu3  ;;  %v1861_v33 = vpop.f32.mrf.mxu1  ;;  %v1783_v42 = vadd.f32 %v1782_v47, %v10944_v35  ;;  %v11492_v35 = vld [vmem:[%s15933_s0 + $0x58] sm:$0xff] }
 0x268   :  { %v11471_v19 = vadd.f32 %v2157_v2, %v2078_v39  ;;  %v11486_v39 = vld [vmem:[%s15933_s0 + $0x1c8] sm:$0xff]  ;;  %16347 = vst [vmem:[#allocation61_spill] sm:$0xff] %v11492_v35 }
 0x269   :  { %v11474_v46 = vadd.f32 %v1861_v33, %v1783_v42  ;;  %16346 = vst [vmem:[#allocation60_spill] sm:$0xff] %v11486_v39 }
 0x26b   :  { %16344 = vst [vmem:[#allocation58_spill] sm:$0xff] %v11474_v46 }
 0x26e   :  { %v2080_v60 = vpop.f32.mrf.mxu2  ;;  %v1785_v31 = vpop.f32.mrf.mxu0 }
 0x26f   :  { %v2159_v45 = vpop.f32.mrf.mxu3  ;;  %v1864_v14 = vpop.f32.mrf.mxu1  ;;  %v1786_v41 = vadd.f32 %v1785_v31, %v10959_v16  ;;  %v11498_v16 = vld [vmem:[%s15933_s0 + $0xc8] sm:$0xff] }
 0x270   :  { %v11478_v3 = vadd.f32 %v2159_v45, %v2080_v60  ;;  %16348 = vst [vmem:[#allocation62_spill] sm:$0xff] %v11498_v16  ;;  %v16349_v45 = vld [vmem:[#allocation2_spill] sm:$0xff] }
 0x271   :  { %v11481_v43 = vadd.f32 %v1864_v14, %v1786_v41  ;;  %v9736_v14 = vld [vmem:[%s15933_s0 + $0x148] sm:$0xff] }
 0x272   :  { %1824 = vmatmul.bf16.gmra.mxu0 %v11486_v39  ;;  %1903 = vmatmul.bf16.gmra.mxu1 %v11492_v35 }
 0x273   :  { %16345 = vst [vmem:[#allocation59_spill] sm:$0xff] %v11481_v43  ;;  %2122 = vmatmul.bf16.gmra.mxu2 %v11498_v16 }
 0x274   :  { %2201 = vmatmul.bf16.gmra.mxu3 %v9736_v14 }
 0x276   :  { %v2083_v2 = vpop.f32.mrf.mxu2  ;;  %v1787_v42 = vpop.f32.mrf.mxu0 }
 0x277   :  { %v2162_v47 = vpop.f32.mrf.mxu3  ;;  %v1866_v60 = vpop.f32.mrf.mxu1  ;;  %v1788_v31 = vadd.f32 %v1787_v42, %v10964_v53  ;;  %v11527_v53 = vld [vmem:[%s15933_s0 + $0x60] sm:$0xff] }
 0x278   :  { %v11506_v33 = vadd.f32 %v2162_v47, %v2083_v2  ;;  %v11521_v2 = vld [vmem:[%s15933_s0 + $0x1d0] sm:$0xff]  ;;  %16353 = vst [vmem:[#allocation65_spill] sm:$0xff] %v11527_v53 }
 0x279   :  { %v11509_v37 = vadd.f32 %v1866_v60, %v1788_v31  ;;  %16352 = vst [vmem:[#allocation64_spill] sm:$0xff] %v11521_v2 }
 0x27b   :  { %16350 = vst [vmem:[#allocation2_spill] sm:$0xff] %v11509_v37 }
 0x27e   :  { %v2085_v35 = vpop.f32.mrf.mxu2 }
 0x27f   :  { %v2164_v39 = vpop.f32.mrf.mxu3  ;;  %v1790_v14 = vpop.f32.mrf.mxu0 }
 0x280   :  { %v11513_v46 = vadd.f32 %v2164_v39, %v2085_v35  ;;  %v1869_v12 = vpop.f32.mrf.mxu1  ;;  %v1791_v41 = vadd.f32 %v1790_v14, %v10973_v32  ;;  %v11533_v32 = vld [vmem:[%s15933_s0 + $0xd0] sm:$0xff] }
 0x281   :  { %16354 = vst [vmem:[#allocation66_spill] sm:$0xff] %v11533_v32 }
 0x282   :  { %v11516_v43 = vadd.f32 %v1869_v12, %v1791_v41  ;;  %1829 = vmatmul.bf16.gmra.mxu0 %v11521_v2  ;;  %1908 = vmatmul.bf16.gmra.mxu1 %v11527_v53  ;;  %v9740_v12 = vld [vmem:[%s15933_s0 + $0x150] sm:$0xff] }
 0x283   :  { %2127 = vmatmul.bf16.gmra.mxu2 %v11533_v32 }
 0x284   :  { %16351 = vst [vmem:[#allocation63_spill] sm:$0xff] %v11516_v43  ;;  %2206 = vmatmul.bf16.gmra.mxu3 %v9740_v12 }
 0x286   :  { %v2088_v35 = vpop.f32.mrf.mxu2 }
 0x287   :  { %v2167_v41 = vpop.f32.mrf.mxu3  ;;  %v1792_v42 = vpop.f32.mrf.mxu0 }
 0x288   :  { %v11541_v47 = vadd.f32 %v2167_v41, %v2088_v35  ;;  %v1871_v60 = vpop.f32.mrf.mxu1  ;;  %v1793_v31 = vadd.f32 %v1792_v42, %v11014_v54  ;;  %v11556_v35 = vld [vmem:[%s15933_s0 + $0x1d8] sm:$0xff]  ;;  %v11562_v54 = vld [vmem:[%s15933_s0 + $0x68] sm:$0xff] }
 0x289   :  { %16357 = vst [vmem:[#allocation69_spill] sm:$0xff] %v11556_v35 }
 0x28a   :  { %v11544_v14 = vadd.f32 %v1871_v60, %v1793_v31  ;;  %16358 = vst [vmem:[#allocation70_spill] sm:$0xff] %v11562_v54 }
 0x28c   :  { %16355 = vst [vmem:[#allocation67_spill] sm:$0xff] %v11544_v14 }
 0x28e   :  { %v2090_v32 = vpop.f32.mrf.mxu2 }
 0x28f   :  { %v2169_v53 = vpop.f32.mrf.mxu3  ;;  %v1795_v12 = vpop.f32.mrf.mxu0 }
 0x290   :  { %v11548_v2 = vadd.f32 %v2169_v53, %v2090_v32  ;;  %v1874_v37 = vpop.f32.mrf.mxu1  ;;  %v1796_v39 = vadd.f32 %v1795_v12, %v11047_v8  ;;  %v11568_v8 = vld [vmem:[%s15933_s0 + $0xd8] sm:$0xff] }
 0x291   :  { %16359 = vst [vmem:[#allocation71_spill] sm:$0xff] %v11568_v8 }
 0x292   :  { %v11551_v43 = vadd.f32 %v1874_v37, %v1796_v39  ;;  %1834 = vmatmul.bf16.gmra.mxu0 %v11556_v35  ;;  %1913 = vmatmul.bf16.gmra.mxu1 %v11562_v54  ;;  %v9744_v37 = vld [vmem:[%s15933_s0 + $0x158] sm:$0xff] }
 0x293   :  { %2132 = vmatmul.bf16.gmra.mxu2 %v11568_v8 }
 0x294   :  { %16356 = vst [vmem:[#allocation68_spill] sm:$0xff] %v11551_v43  ;;  %2211 = vmatmul.bf16.gmra.mxu3 %v9744_v37 }
 0x296   :  { %v2093_v32 = vpop.f32.mrf.mxu2 }
 0x297   :  { %v2172_v39 = vpop.f32.mrf.mxu3  ;;  %v1797_v42 = vpop.f32.mrf.mxu0 }
 0x298   :  { %v11576_v41 = vadd.f32 %v2172_v39, %v2093_v32  ;;  %v1876_v60 = vpop.f32.mrf.mxu1  ;;  %v1798_v31 = vadd.f32 %v1797_v42, %v11081_v34  ;;  %v11591_v32 = vld [vmem:[%s15933_s0 + $0x1e0] sm:$0xff] }
 0x299   :  { %16362 = vst [vmem:[#allocation74_spill] sm:$0xff] %v11591_v32  ;;  %v16363_v34 = vld [vmem:[#allocation14_spill] sm:$0xff] }
 0x29a   :  { %v11579_v12 = vadd.f32 %v1876_v60, %v1798_v31 }
 0x29c   :  { %16360 = vst [vmem:[#allocation72_spill] sm:$0xff] %v11579_v12 }
 0x29e   :  { %v2095_v8 = vpop.f32.mrf.mxu2 }
 0x29f   :  { %v2174_v54 = vpop.f32.mrf.mxu3  ;;  %v1800_v37 = vpop.f32.mrf.mxu0 }
 0x2a0   :  { %v11583_v35 = vadd.f32 %v2174_v54, %v2095_v8  ;;  %v1879_v14 = vpop.f32.mrf.mxu1  ;;  %v1801_v53 = vadd.f32 %v1800_v37, %v11114_v24  ;;  %v11598_v54 = vld [vmem:[%s15933_s0 + $0xe0] sm:$0xff] }
 0x2a1   :  { %16364 = vst [vmem:[#allocation14_spill] sm:$0xff] %v11598_v54  ;;  %v9747_v24 = vld [vmem:[%s15933_s0 + $0x160] sm:$0xff] }
 0x2a2   :  { %v11586_v43 = vadd.f32 %v1879_v14, %v1801_v53  ;;  %1839 = vmatmul.bf16.gmra.mxu0 %v11591_v32  ;;  %1918 = vmatmul.bf16.gmra.mxu1 %v16363_v34  ;;  %v16365_v14 = vld [vmem:[#allocation15_spill] sm:$0xff] }
 0x2a3   :  { %2137 = vmatmul.bf16.gmra.mxu2 %v11598_v54 }
 0x2a4   :  { %16361 = vst [vmem:[#allocation73_spill] sm:$0xff] %v11586_v43  ;;  %2216 = vmatmul.bf16.gmra.mxu3 %v9747_v24 }
 0x2a6   :  { %v2098_v53 = vpop.f32.mrf.mxu2 }
 0x2a7   :  { %v2177_v39 = vpop.f32.mrf.mxu3  ;;  %v1802_v60 = vpop.f32.mrf.mxu0 }
 0x2a8   :  { %v11606_v42 = vadd.f32 %v2177_v39, %v2098_v53  ;;  %v1881_v31 = vpop.f32.mrf.mxu1  ;;  %v1803_v37 = vadd.f32 %v1802_v60, %v11124_v18  ;;  %v11621_v53 = vld [vmem:[%s15933_s0 + $0x1e8] sm:$0xff]  ;;  %v16369_v18 = vld [vmem:[#allocation29_spill] sm:$0xff] }
 0x2a9   :  { %16368 = vst [vmem:[#allocation75_spill] sm:$0xff] %v11621_v53 }
 0x2aa   :  { %v11609_v34 = vadd.f32 %v1881_v31, %v1803_v37 }
 0x2ac   :  { %16366 = vst [vmem:[#allocation15_spill] sm:$0xff] %v11609_v34 }
 0x2ae   :  { %v2100_v32 = vpop.f32.mrf.mxu2 }
 0x2af   :  { %v2179_v12 = vpop.f32.mrf.mxu3  ;;  %v1805_v24 = vpop.f32.mrf.mxu0 }
 0x2b0   :  { %v11613_v0 = vadd.f32 %v2179_v12, %v2100_v32  ;;  %v1884_v5 = vpop.f32.mrf.mxu1  ;;  %v1806_v8 = vadd.f32 %v1805_v24, %v11133_v13  ;;  %v11628_v12 = vld [vmem:[%s15933_s0 + $0xe8] sm:$0xff]  ;;  %v16371_v13 = vld [vmem:[#allocation30_spill] sm:$0xff] }
 0x2b1   :  { %16370 = vst [vmem:[#allocation29_spill] sm:$0xff] %v11628_v12 }
 0x2b2   :  { %v11616_v43 = vadd.f32 %v1884_v5, %v1806_v8  ;;  %1844 = vmatmul.bf16.gmra.mxu0 %v11621_v53  ;;  %1923 = vmatmul.bf16.gmra.mxu1 %v16369_v18  ;;  %v9750_v5 = vld [vmem:[%s15933_s0 + $0x168] sm:$0xff] }
 0x2b3   :  { %2142 = vmatmul.bf16.gmra.mxu2 %v11628_v12 }
 0x2b4   :  { %2221 = vmatmul.bf16.gmra.mxu3 %v9750_v5 }
 0x2b6   :  { %v2103_v8 = vpop.f32.mrf.mxu2 }
 0x2b7   :  { %v2182_v39 = vpop.f32.mrf.mxu3  ;;  %v1807_v31 = vpop.f32.mrf.mxu0 }
 0x2b8   :  { %v11636_v60 = vadd.f32 %v2182_v39, %v2103_v8  ;;  %v1886_v37 = vpop.f32.mrf.mxu1  ;;  %v1808_v24 = vadd.f32 %v1807_v31, %v11138_v11  ;;  %v11648_v8 = vld [vmem:[%s15933_s0 + $0x90] sm:$0xff] }
 0x2ba   :  { %v11639_v18 = vadd.f32 %v1886_v37, %v1808_v24 }
 0x2be   :  { %v2105_v12 = vpop.f32.mrf.mxu2 }
 0x2bf   :  { %v2184_v53 = vpop.f32.mrf.mxu3  ;;  %v1810_v5 = vpop.f32.mrf.mxu0 }
 0x2c0   :  { %v11643_v34 = vadd.f32 %v2184_v53, %v2105_v12  ;;  %v1889_v16 = vpop.f32.mrf.mxu1  ;;  %v1811_v39 = vadd.f32 %v1810_v5, %v11176_v38  ;;  %v16372_v53 = vld [vmem:[#allocation3_spill] sm:$0xff]  ;;  %v9751_v12 = vld [vmem:[%s15932_s1 + $0x38] sm:$0xff] }
 0x2c1   :  { %v16373_v38 = vld [vmem:[#allocation9_spill] sm:$0xff] }
 0x2c2   :  { %v11651_v32 = vadd.f32 %v1889_v16, %v1811_v39  ;;  %2235 = vmatmul.bf16.vlgmr.msrb.gmra.mxu0 %v11143_v28  ;;  %2314 = vmatmul.bf16.vlgmr.msrb.gmra.mxu1 %v11149_v21  ;;  %v9752_v28 = vld [vmem:[%s15932_s1 + $0x78] sm:$0xff]  ;;  %v9753_v39 = vld [vmem:[%s15932_s1 + $0x30] sm:$0xff] }
 0x2c3   :  { %2393 = vmatmul.bf16.vlgmr.msrb.gmra.mxu2 %v11648_v8  ;;  %3112 = vmatpush.bf16.msrb.mxu0 %v9751_v12  ;;  %v16374_v5 = vld [vmem:[#allocation5_spill] sm:$0xff]  ;;  %v9754_v12 = vld [vmem:[%s15932_s1 + $0x70] sm:$0xff] }
 0x2c4   :  { %2500 = vmatmul.bf16.vlgmr.msrb.gmra.mxu3 %v11155_v36  ;;  %3270 = vmatpush.bf16.msrb.mxu2 %v16372_v53  ;;  %v16375_v53 = vld [vmem:[#allocation13_spill] sm:$0xff] }
 0x2c5   :  { %3349 = vmatpush.bf16.msrb.mxu3 %v16373_v38  ;;  %3191 = vmatpush.bf16.msrb.mxu1 %v9752_v28 }
 0x2c6   :  { %v2108_v21 = vpop.f32.mrf.mxu2 }
 0x2c7   :  { %v2187_v16 = vpop.f32.mrf.mxu3  ;;  %v1812_v31 = vpop.f32.mrf.mxu0  ;;  %3113 = vmatpush.bf16.msrb.mxu0 %v9753_v39 }
 0x2c8   :  { %v11667_v36 = vadd.f32 %v2187_v16, %v2108_v21  ;;  %v1891_v37 = vpop.f32.mrf.mxu1  ;;  %v1813_v24 = vadd.f32 %v1812_v31, %v11197_v50  ;;  %3271 = vmatpush.bf16.msrb.mxu2 %v16374_v5  ;;  %v16376_v50 = vld [vmem:[#allocation7_spill] sm:$0xff]  ;;  %v16377_v16 = vld [vmem:[#allocation8_spill] sm:$0xff] }
 0x2c9   :  { %3350 = vmatpush.bf16.msrb.mxu3 %v16375_v53  ;;  %3192 = vmatpush.bf16.msrb.mxu1 %v9754_v12  ;;  %v9755_v21 = vld [vmem:[%s15932_s1 + $0x28] sm:$0xff]  ;;  %v11695_v12 = vld [vmem:[%s15933_s0 + $0x98] sm:$0xff] }
 0x2ca   :  { %v11678_v38 = vadd.f32 %v1891_v37, %v1813_v24  ;;  %v9756_v31 = vld [vmem:[%s15932_s1 + $0x68] sm:$0xff] }
 0x2cb   :  { %3114 = vmatpush.bf16.msrb.mxu0 %v9755_v21  ;;  %v16378_v21 = vld [vmem:[#allocation10_spill] sm:$0xff] }
 0x2cc   :  { %3272 = vmatpush.bf16.msrb.mxu2 %v16376_v50 }
 0x2cd   :  { %3351 = vmatpush.bf16.msrb.mxu3 %v16377_v16  ;;  %3193 = vmatpush.bf16.msrb.mxu1 %v9756_v31  ;;  %v9757_v16 = vld [vmem:[%s15932_s1 + $0x20] sm:$0xff]  ;;  %v16379_v31 = vld [vmem:[#allocation11_spill] sm:$0xff] }
 0x2ce   :  { %v2110_v5 = vpop.f32.mrf.mxu2 }
 0x2cf   :  { %v2189_v37 = vpop.f32.mrf.mxu3  ;;  %v1815_v39 = vpop.f32.mrf.mxu0  ;;  %3115 = vmatpush.bf16.msrb.mxu0 %v9757_v16 }
 0x2d0   :  { %v11690_v24 = vadd.f32 %v2189_v37, %v2110_v5  ;;  %v1894_v53 = vpop.f32.mrf.mxu1  ;;  %v1816_v50 = vadd.f32 %v1815_v39, %v11239_v10  ;;  %3273 = vmatpush.bf16.msrb.mxu2 %v16378_v21  ;;  %v9758_v5 = vld [vmem:[%s15932_s1 + $0x60] sm:$0xff]  ;;  %v16380_v39 = vld [vmem:[#allocation16_spill] sm:$0xff]  ;;  %v9759_v21 = vld [vmem:[%s15932_s1 + $0x18] sm:$0xff] }
 0x2d1   :  { %3352 = vmatpush.bf16.msrb.mxu3 %v16379_v31  ;;  %3194 = vmatpush.bf16.msrb.mxu1 %v9758_v5  ;;  %v16388_v10 = vld [vmem:[#allocation27_spill] sm:$0xff] }
 0x2d2   :  { %v11706_v37 = vadd.f32 %v1894_v53, %v1816_v50  ;;  %2240 = vmatmul.bf16.gmra.mxu0 %v11206_v63  ;;  %2319 = vmatmul.bf16.gmra.mxu1 %v11212_v49  ;;  %v16381_v53 = vld [vmem:[#allocation17_spill] sm:$0xff] }
 0x2d3   :  { %2398 = vmatmul.bf16.gmra.mxu2 %v11695_v12  ;;  %3116 = vmatpush.bf16.msrb.mxu0 %v9759_v21  ;;  %v9760_v63 = vld [vmem:[%s15932_s1 + $0x58] sm:$0xff]  ;;  %v9761_v21 = vld [vmem:[%s15932_s1 + $0x10] sm:$0xff] }
 0x2d4   :  { %2505 = vmatmul.bf16.gmra.mxu3 %v11218_v56  ;;  %3274 = vmatpush.bf16.msrb.mxu2 %v16380_v39  ;;  %v16382_v39 = vld [vmem:[#allocation23_spill] sm:$0xff] }
 0x2d5   :  { %3353 = vmatpush.bf16.msrb.mxu3 %v16381_v53  ;;  %3195 = vmatpush.bf16.msrb.mxu1 %v9760_v63  ;;  %v16383_v53 = vld [vmem:[#allocation26_spill] sm:$0xff]  ;;  %v9762_v63 = vld [vmem:[%s15932_s1 + $0x50] sm:$0xff] }
 0x2d6   :  { %v2113_v49 = vpop.f32.mrf.mxu2 }
 0x2d7   :  { %v2192_v50 = vpop.f32.mrf.mxu3  ;;  %v1817_v16 = vpop.f32.mrf.mxu0  ;;  %3117 = vmatpush.bf16.msrb.mxu0 %v9761_v21  ;;  %v9764_v21 = vld [vmem:[%s15932_s1 + $0x48] sm:$0xff] }
 0x2d8   :  { %v11722_v56 = vadd.f32 %v2192_v50, %v2113_v49  ;;  %v1896_v31 = vpop.f32.mrf.mxu1  ;;  %v1818_v5 = vadd.f32 %v1817_v16, %v11258_v29  ;;  %3275 = vmatpush.bf16.msrb.mxu2 %v16382_v39  ;;  %v16385_v29 = vld [vmem:[#allocation20_spill] sm:$0xff]  ;;  %v9763_v16 = vld [vmem:[%s15932_s1 + $0x8] sm:$0xff]  ;;  %v16386_v39 = vld [vmem:[#allocation21_spill] sm:$0xff] }
 0x2d9   :  { %3354 = vmatpush.bf16.msrb.mxu3 %v16383_v53  ;;  %3196 = vmatpush.bf16.msrb.mxu1 %v9762_v63 }
 0x2da   :  { %v11733_v49 = vadd.f32 %v1896_v31, %v1818_v5 }
 0x2db   :  { %3118 = vmatpush.bf16.msrb.mxu0 %v9763_v16 }
 0x2dc   :  { %16384 = vst [vmem:[#allocation30_spill] sm:$0xff] %v11733_v49  ;;  %3276 = vmatpush.bf16.msrb.mxu2 %v16385_v29  ;;  %v11750_v29 = vld [vmem:[%s15933_s0 + $0xa0] sm:$0xff] }
 0x2dd   :  { %3355 = vmatpush.bf16.msrb.mxu3 %v16386_v39  ;;  %3197 = vmatpush.bf16.msrb.mxu1 %v9764_v21  ;;  %16387 = vst [vmem:[#allocation3_spill] sm:$0xff] %v11750_v29  ;;  %v9765_v39 = vld [vmem:[%s15932_s1] sm:$0xff]  ;;  %v16389_v21 = vld [vmem:[#allocation28_spill] sm:$0xff] }
 0x2de   :  { %v2115_v53 = vpop.f32.mrf.mxu2 }
 0x2df   :  { %v2194_v31 = vpop.f32.mrf.mxu3  ;;  %v1820_v63 = vpop.f32.mrf.mxu0  ;;  %3119 = vmatpush.bf16.msrb.mxu0 %v9765_v39 }
 0x2e0   :  { %v11745_v5 = vadd.f32 %v2194_v31, %v2115_v53  ;;  %v1899_v50 = vpop.f32.mrf.mxu1  ;;  %v1821_v16 = vadd.f32 %v1820_v63, %v11286_v26  ;;  %3277 = vmatpush.bf16.msrb.mxu2 %v16388_v10  ;;  %v9766_v53 = vld [vmem:[%s15932_s1 + $0x40] sm:$0xff] }
 0x2e1   :  { %3356 = vmatpush.bf16.msrb.mxu3 %v16389_v21  ;;  %3198 = vmatpush.bf16.msrb.mxu1 %v9766_v53 }
 0x2e2   :  { %v11761_v31 = vadd.f32 %v1899_v50, %v1821_v16  ;;  %2245 = vmatmul.bf16.gmra.mxu0 %v11265_v17  ;;  %2324 = vmatmul.bf16.gmra.mxu1 %v11271_v1 }
 0x2e3   :  { %2403 = vmatmul.bf16.gmra.mxu2 %v11750_v29 }
 0x2e4   :  { %16390 = vst [vmem:[#allocation9_spill] sm:$0xff] %v11761_v31  ;;  %2510 = vmatmul.bf16.gmra.mxu3 %v11277_v61 }
 0x2e6   :  { %v2118_v63 = vpop.f32.mrf.mxu2 }
 0x2e7   :  { %v2197_v39 = vpop.f32.mrf.mxu3  ;;  %v1822_v28 = vpop.f32.mrf.mxu0 }
 0x2e8   :  { %v11769_v21 = vadd.f32 %v2197_v39, %v2118_v63  ;;  %v1901_v11 = vpop.f32.mrf.mxu1  ;;  %v1823_v50 = vadd.f32 %v1822_v28, %v11291_v4  ;;  %v11781_v63 = vld [vmem:[%s15933_s0 + $0xa8] sm:$0xff]  ;;  %v16398_v28 = vld [vmem:[#allocation32_spill] sm:$0xff] }
 0x2e9   :  { %16394 = vst [vmem:[#allocation13_spill] sm:$0xff] %v11781_v63  ;;  %v16396_v4 = vld [vmem:[#allocation19_spill] sm:$0xff] }
 0x2ea   :  { %v11772_v16 = vadd.f32 %v1901_v11, %v1823_v50  ;;  %v16397_v11 = vld [vmem:[#allocation31_spill] sm:$0xff] }
 0x2ec   :  { %16392 = vst [vmem:[#allocation5_spill] sm:$0xff] %v11772_v16 }
 0x2ee   :  { %v2120_v53 = vpop.f32.mrf.mxu2 }
 0x2ef   :  { %v2199_v54 = vpop.f32.mrf.mxu3  ;;  %v1825_v61 = vpop.f32.mrf.mxu0 }
 0x2f0   :  { %v11776_v29 = vadd.f32 %v2199_v54, %v2120_v53  ;;  %v1904_v49 = vpop.f32.mrf.mxu1  ;;  %v1826_v39 = vadd.f32 %v1825_v61, %v11317_v44 }
 0x2f2   :  { %v11784_v10 = vadd.f32 %v1904_v49, %v1826_v39  ;;  %2250 = vmatmul.bf16.gmra.mxu0 %v16396_v4  ;;  %2329 = vmatmul.bf16.gmra.mxu1 %v16397_v11 }
 0x2f3   :  { %2408 = vmatmul.bf16.gmra.mxu2 %v11781_v63 }
 0x2f4   :  { %16395 = vst [vmem:[#allocation7_spill] sm:$0xff] %v11784_v10  ;;  %2515 = vmatmul.bf16.gmra.mxu3 %v16398_v28 }
 0x2f6   :  { %v2123_v53 = vpop.f32.mrf.mxu2 }
 0x2f7   :  { %v2202_v1 = vpop.f32.mrf.mxu3  ;;  %v1827_v17 = vpop.f32.mrf.mxu0 }
 0x2f8   :  { %v11792_v16 = vadd.f32 %v2202_v1, %v2123_v53  ;;  %v1906_v31 = vpop.f32.mrf.mxu1  ;;  %v1828_v44 = vadd.f32 %v1827_v17, %v11322_v7  ;;  %v11804_v1 = vld [vmem:[%s15933_s0 + $0xb0] sm:$0xff]  ;;  %v16404_v7 = vld [vmem:[#allocation35_spill] sm:$0xff]  ;;  %v16406_v17 = vld [vmem:[#allocation37_spill] sm:$0xff] }
 0x2f9   :  { %16402 = vst [vmem:[#allocation10_spill] sm:$0xff] %v11804_v1 }
 0x2fa   :  { %v11795_v49 = vadd.f32 %v1906_v31, %v1828_v44  ;;  %v16405_v31 = vld [vmem:[#allocation36_spill] sm:$0xff] }
 0x2fc   :  { %16400 = vst [vmem:[#allocation8_spill] sm:$0xff] %v11795_v49 }
 0x2fe   :  { %v2125_v4 = vpop.f32.mrf.mxu2 }
 0x2ff   :  { %v2204_v11 = vpop.f32.mrf.mxu3  ;;  %v1830_v28 = vpop.f32.mrf.mxu0 }
 0x300   :  { %v11799_v63 = vadd.f32 %v2204_v11, %v2125_v4  ;;  %v1909_v26 = vpop.f32.mrf.mxu1  ;;  %v1831_v53 = vadd.f32 %v1830_v28, %v11348_v48 }
 0x302   :  { %v11807_v50 = vadd.f32 %v1909_v26, %v1831_v53  ;;  %2255 = vmatmul.bf16.gmra.mxu0 %v16404_v7  ;;  %2334 = vmatmul.bf16.gmra.mxu1 %v16405_v31 }
 0x303   :  { %2413 = vmatmul.bf16.gmra.mxu2 %v11804_v1 }
 0x304   :  { %16403 = vst [vmem:[#allocation11_spill] sm:$0xff] %v11807_v50  ;;  %2520 = vmatmul.bf16.gmra.mxu3 %v16406_v17 }
 0x306   :  { %v2128_v11 = vpop.f32.mrf.mxu2 }
 0x307   :  { %v2207_v39 = vpop.f32.mrf.mxu3  ;;  %v1832_v61 = vpop.f32.mrf.mxu0 }
 0x308   :  { %v11815_v49 = vadd.f32 %v2207_v39, %v2128_v11  ;;  %v1911_v10 = vpop.f32.mrf.mxu1  ;;  %v1833_v48 = vadd.f32 %v1832_v61, %v11353_v58  ;;  %v11827_v39 = vld [vmem:[%s15933_s0 + $0xb8] sm:$0xff]  ;;  %v16412_v58 = vld [vmem:[#allocation40_spill] sm:$0xff]  ;;  %v16414_v61 = vld [vmem:[#allocation42_spill] sm:$0xff] }
 0x309   :  { %16410 = vst [vmem:[#allocation17_spill] sm:$0xff] %v11827_v39 }
 0x30a   :  { %v11818_v26 = vadd.f32 %v1911_v10, %v1833_v48  ;;  %v16413_v10 = vld [vmem:[#allocation41_spill] sm:$0xff] }
 0x30c   :  { %16408 = vst [vmem:[#allocation16_spill] sm:$0xff] %v11818_v26 }
 0x30e   :  { %v2130_v7 = vpop.f32.mrf.mxu2 }
 0x30f   :  { %v2209_v31 = vpop.f32.mrf.mxu3  ;;  %v1835_v17 = vpop.f32.mrf.mxu0 }
 0x310   :  { %v11822_v1 = vadd.f32 %v2209_v31, %v2130_v7  ;;  %v1914_v54 = vpop.f32.mrf.mxu1  ;;  %v1836_v11 = vadd.f32 %v1835_v17, %v11379_v57 }
 0x312   :  { %v11830_v4 = vadd.f32 %v1914_v54, %v1836_v11  ;;  %2260 = vmatmul.bf16.gmra.mxu0 %v16412_v58  ;;  %2339 = vmatmul.bf16.gmra.mxu1 %v16413_v10 }
 0x313   :  { %2418 = vmatmul.bf16.gmra.mxu2 %v11827_v39 }
 0x314   :  { %16411 = vst [vmem:[#allocation23_spill] sm:$0xff] %v11830_v4  ;;  %2525 = vmatmul.bf16.gmra.mxu3 %v16414_v61 }
 0x316   :  { %v2133_v31 = vpop.f32.mrf.mxu2 }
 0x317   :  { %v2212_v53 = vpop.f32.mrf.mxu3  ;;  %v1837_v28 = vpop.f32.mrf.mxu0 }
 0x318   :  { %v11838_v26 = vadd.f32 %v2212_v53, %v2133_v31  ;;  %v1916_v50 = vpop.f32.mrf.mxu1  ;;  %v1838_v57 = vadd.f32 %v1837_v28, %v11384_v59  ;;  %v11850_v53 = vld [vmem:[%s15933_s0 + $0xc0] sm:$0xff]  ;;  %v16420_v59 = vld [vmem:[#allocation45_spill] sm:$0xff]  ;;  %v16422_v28 = vld [vmem:[#allocation47_spill] sm:$0xff] }
 0x319   :  { %16418 = vst [vmem:[#allocation20_spill] sm:$0xff] %v11850_v53 }
 0x31a   :  { %v11841_v54 = vadd.f32 %v1916_v50, %v1838_v57  ;;  %v16421_v50 = vld [vmem:[#allocation46_spill] sm:$0xff]  ;;  %v16423_v57 = vld [vmem:[#allocation44_spill] sm:$0xff] }
 0x31c   :  { %16416 = vst [vmem:[#allocation26_spill] sm:$0xff] %v11841_v54 }
 0x31e   :  { %v2135_v58 = vpop.f32.mrf.mxu2 }
 0x31f   :  { %v2214_v10 = vpop.f32.mrf.mxu3  ;;  %v1840_v61 = vpop.f32.mrf.mxu0 }
 0x320   :  { %v11845_v39 = vadd.f32 %v2214_v10, %v2135_v58  ;;  %v1919_v44 = vpop.f32.mrf.mxu1  ;;  %v1841_v31 = vadd.f32 %v1840_v61, %v11410_v30 }
 0x322   :  { %v11853_v7 = vadd.f32 %v1919_v44, %v1841_v31  ;;  %2265 = vmatmul.bf16.gmra.mxu0 %v16420_v59  ;;  %2344 = vmatmul.bf16.gmra.mxu1 %v16421_v50 }
 0x323   :  { %2423 = vmatmul.bf16.gmra.mxu2 %v11850_v53 }
 0x324   :  { %16419 = vst [vmem:[#allocation21_spill] sm:$0xff] %v11853_v7  ;;  %2530 = vmatmul.bf16.gmra.mxu3 %v16422_v28 }
 0x326   :  { %v2138_v10 = vpop.f32.mrf.mxu2 }
 0x327   :  { %v2217_v11 = vpop.f32.mrf.mxu3  ;;  %v1842_v17 = vpop.f32.mrf.mxu0 }
 0x328   :  { %v11861_v54 = vadd.f32 %v2217_v11, %v2138_v10  ;;  %v1921_v4 = vpop.f32.mrf.mxu1  ;;  %v1843_v30 = vadd.f32 %v1842_v17, %v11415_v15  ;;  %v11873_v11 = vld [vmem:[%s15933_s0 + $0xc8] sm:$0xff]  ;;  %v16428_v15 = vld [vmem:[#allocation50_spill] sm:$0xff]  ;;  %v16430_v17 = vld [vmem:[#allocation52_spill] sm:$0xff] }
 0x329   :  { %16426 = vst [vmem:[#allocation28_spill] sm:$0xff] %v11873_v11 }
 0x32a   :  { %v11864_v44 = vadd.f32 %v1921_v4, %v1843_v30  ;;  %v16429_v4 = vld [vmem:[#allocation51_spill] sm:$0xff]  ;;  %v16431_v30 = vld [vmem:[#allocation49_spill] sm:$0xff] }
 0x32c   :  { %16424 = vst [vmem:[#allocation27_spill] sm:$0xff] %v11864_v44 }
 0x32e   :  { %v2140_v59 = vpop.f32.mrf.mxu2 }
 0x32f   :  { %v2219_v50 = vpop.f32.mrf.mxu3  ;;  %v1845_v28 = vpop.f32.mrf.mxu0 }
 0x330   :  { %v11868_v53 = vadd.f32 %v2219_v50, %v2140_v59  ;;  %v1924_v48 = vpop.f32.mrf.mxu1  ;;  %v1846_v10 = vadd.f32 %v1845_v28, %v11441_v40 }
 0x332   :  { %v11876_v58 = vadd.f32 %v1924_v48, %v1846_v10  ;;  %2270 = vmatmul.bf16.gmra.mxu0 %v16428_v15  ;;  %2349 = vmatmul.bf16.gmra.mxu1 %v16429_v4 }
 0x333   :  { %2428 = vmatmul.bf16.gmra.mxu2 %v11873_v11 }
 0x334   :  { %16427 = vst [vmem:[#allocation19_spill] sm:$0xff] %v11876_v58  ;;  %2535 = vmatmul.bf16.gmra.mxu3 %v16430_v17  ;;  %v16438_v58 = vld [vmem:[#allocation54_spill] sm:$0xff] }
 0x336   :  { %v2143_v50 = vpop.f32.mrf.mxu2 }
 0x337   :  { %v2222_v31 = vpop.f32.mrf.mxu3  ;;  %v1847_v61 = vpop.f32.mrf.mxu0 }
 0x338   :  { %v11884_v44 = vadd.f32 %v2222_v31, %v2143_v50  ;;  %v1926_v7 = vpop.f32.mrf.mxu1  ;;  %v1848_v40 = vadd.f32 %v1847_v61, %v11444_v22  ;;  %v11896_v31 = vld [vmem:[%s15933_s0 + $0xd0] sm:$0xff]  ;;  %v16434_v22 = vld [vmem:[#allocation55_spill] sm:$0xff]  ;;  %v16436_v61 = vld [vmem:[#allocation57_spill] sm:$0xff] }
 0x339   :  { %16433 = vst [vmem:[#allocation32_spill] sm:$0xff] %v11896_v31 }
 0x33a   :  { %v11887_v48 = vadd.f32 %v1926_v7, %v1848_v40  ;;  %v16435_v7 = vld [vmem:[#allocation56_spill] sm:$0xff] }
 0x33c   :  { %16432 = vst [vmem:[#allocation31_spill] sm:$0xff] %v11887_v48 }
 0x33e   :  { %v2145_v10 = vpop.f32.mrf.mxu2 }
 0x33f   :  { %v2224_v15 = vpop.f32.mrf.mxu3  ;;  %v2236_v17 = vpop.f32.mrf.mxu0 }
 0x340   :  { %v11891_v4 = vadd.f32 %v2224_v15, %v2145_v10  ;;  %v2315_v11 = vpop.f32.mrf.mxu1  ;;  %v2237_v50 = vadd.f32 %v2236_v17, %v11471_v19  ;;  %v16439_v19 = vmax.f32 %v10922_v20, %v16438_v58 }
 0x342   :  { %v2316_v59 = vadd.f32 %v2315_v11, %v2237_v50  ;;  %2275 = vmatmul.bf16.gmra.mxu0 %v16434_v22  ;;  %2354 = vmatmul.bf16.gmra.mxu1 %v16435_v7 }
 0x343   :  { %2433 = vmatmul.bf16.gmra.mxu2 %v11896_v31 }
 0x344   :  { %2540 = vmatmul.bf16.gmra.mxu3 %v16436_v61 }
 0x346   :  { %v2394_v40 = vpop.f32.mrf.mxu2 }
 0x347   :  { %v11903_v10 = vpop.f32.mrf.mxu3  ;;  %v2395_v15 = vadd.f32 %v2394_v40, %v2316_v59  ;;  %v2238_v28 = vpop.f32.mrf.mxu0  ;;  %v11916_v59 = vld [vmem:[%s15933_s0 + $0xd8] sm:$0xff] }
 0x348   :  { %16437 = vst [vmem:[#allocation35_spill] sm:$0xff] %v11903_v10  ;;  %v2317_v48 = vpop.f32.mrf.mxu1  ;;  %v2239_v6 = vadd.f32 %v2238_v28, %v11478_v3  ;;  %v16441_v3 = vld [vmem:[#allocation6_spill] sm:$0xff] }
 0x349   :  { %v11909_v11 = vmax.f32 %v16439_v19, %v2395_v15  ;;  %v16442_v28 = vld [vmem:[#allocation58_spill] sm:$0xff] }
 0x34a   :  { %v2318_v17 = vadd.f32 %v2317_v48, %v2239_v6  ;;  %v16443_v10 = vmax.f32 %v16441_v3, %v16442_v28  ;;  %v16444_v6 = vld [vmem:[#allocation60_spill] sm:$0xff]  ;;  %v16445_v48 = vld [vmem:[#allocation61_spill] sm:$0xff]  ;;  %v16446_v15 = vld [vmem:[#allocation62_spill] sm:$0xff] }
 0x34b   :  { %16440 = vst [vmem:[#allocation36_spill] sm:$0xff] %v11909_v11 }
 0x34e   :  { %v2396_v50 = vpop.f32.mrf.mxu2 }
 0x34f   :  { %v11911_v22 = vpop.f32.mrf.mxu3  ;;  %v2397_v7 = vadd.f32 %v2396_v50, %v2318_v17  ;;  %v2241_v31 = vpop.f32.mrf.mxu0 }
 0x350   :  { %v2320_v61 = vpop.f32.mrf.mxu1  ;;  %v2242_v40 = vadd.f32 %v2241_v31, %v11506_v33 }
 0x351   :  { %v11922_v20 = vmax.f32 %v16443_v10, %v2397_v7  ;;  %v16447_v10 = vld [vmem:[#allocation59_spill] sm:$0xff] }
 0x352   :  { %v2321_v58 = vadd.f32 %v2320_v61, %v2242_v40  ;;  %2280 = vmatmul.bf16.gmra.mxu0 %v16444_v6  ;;  %2359 = vmatmul.bf16.gmra.mxu1 %v16445_v48  ;;  %v16448_v7 = vmax.f32 %v16349_v45, %v16447_v10  ;;  %v16454_v10 = vld [vmem:[#allocation66_spill] sm:$0xff] }
 0x353   :  { %2438 = vmatmul.bf16.gmra.mxu2 %v11916_v59 }
 0x354   :  { %2545 = vmatmul.bf16.gmra.mxu3 %v16446_v15 }
 0x356   :  { %v2399_v19 = vpop.f32.mrf.mxu2 }
 0x357   :  { %v11928_v17 = vpop.f32.mrf.mxu3  ;;  %v2400_v50 = vadd.f32 %v2399_v19, %v2321_v58  ;;  %v2243_v11 = vpop.f32.mrf.mxu0  ;;  %v11941_v58 = vld [vmem:[%s15933_s0 + $0xe0] sm:$0xff] }
 0x358   :  { %v2322_v33 = vpop.f32.mrf.mxu1  ;;  %v2244_v31 = vadd.f32 %v2243_v11, %v11513_v46  ;;  %v16450_v46 = vld [vmem:[#allocation2_spill] sm:$0xff] }
 0x359   :  { %v11934_v61 = vmax.f32 %v16448_v7, %v2400_v50  ;;  %v16451_v11 = vmax.f32 %v10957_v23, %v16450_v46  ;;  %v16455_v23 = vld [vmem:[#allocation63_spill] sm:$0xff] }
 0x35a   :  { %v2323_v40 = vadd.f32 %v2322_v33, %v2244_v31  ;;  %v16452_v33 = vld [vmem:[#allocation64_spill] sm:$0xff]  ;;  %v16453_v31 = vld [vmem:[#allocation65_spill] sm:$0xff] }
 0x35b   :  { %16449 = vst [vmem:[#allocation37_spill] sm:$0xff] %v11934_v61 }
 0x35e   :  { %v2401_v3 = vpop.f32.mrf.mxu2 }
 0x35f   :  { %v11936_v28 = vpop.f32.mrf.mxu3  ;;  %v2402_v6 = vadd.f32 %v2401_v3, %v2323_v40  ;;  %v2246_v48 = vpop.f32.mrf.mxu0 }
 0x360   :  { %v2325_v15 = vpop.f32.mrf.mxu1  ;;  %v2247_v19 = vadd.f32 %v2246_v48, %v11541_v47 }
 0x361   :  { %v11947_v45 = vmax.f32 %v16451_v11, %v2402_v6  ;;  %v16456_v6 = vmax.f32 %v10962_v52, %v16455_v23  ;;  %v16464_v23 = vld [vmem:[#allocation71_spill] sm:$0xff] }
 0x362   :  { %v2326_v50 = vadd.f32 %v2325_v15, %v2247_v19  ;;  %2285 = vmatmul.bf16.gmra.mxu0 %v16452_v33  ;;  %2364 = vmatmul.bf16.gmra.mxu1 %v16453_v31 }
 0x363   :  { %2443 = vmatmul.bf16.gmra.mxu2 %v11941_v58 }
 0x364   :  { %2550 = vmatmul.bf16.gmra.mxu3 %v16454_v10 }
 0x366   :  { %v2404_v7 = vpop.f32.mrf.mxu2 }
 0x367   :  { %v11953_v40 = vpop.f32.mrf.mxu3  ;;  %v2405_v3 = vadd.f32 %v2404_v7, %v2326_v50  ;;  %v2248_v61 = vpop.f32.mrf.mxu0  ;;  %v11966_v50 = vld [vmem:[%s15933_s0 + $0xe8] sm:$0xff] }
 0x368   :  { %v2327_v47 = vpop.f32.mrf.mxu1  ;;  %v2249_v48 = vadd.f32 %v2248_v61, %v11548_v2  ;;  %16458 = vst [vmem:[#allocation41_spill] sm:$0xff] %v11966_v50  ;;  %v16459_v2 = vld [vmem:[#allocation67_spill] sm:$0xff] }
 0x369   :  { %v11959_v15 = vmax.f32 %v16456_v6, %v2405_v3  ;;  %v16460_v61 = vmax.f32 %v10971_v51, %v16459_v2  ;;  %v16465_v51 = vld [vmem:[#allocation4_spill] sm:$0xff] }
 0x36a   :  { %v2328_v19 = vadd.f32 %v2327_v47, %v2249_v48  ;;  %v16462_v47 = vld [vmem:[#allocation69_spill] sm:$0xff]  ;;  %v16463_v48 = vld [vmem:[#allocation70_spill] sm:$0xff] }
 0x36b   :  { %16457 = vst [vmem:[#allocation40_spill] sm:$0xff] %v11959_v15 }
 0x36e   :  { %v2406_v46 = vpop.f32.mrf.mxu2 }
 0x36f   :  { %v11961_v11 = vpop.f32.mrf.mxu3  ;;  %v2407_v33 = vadd.f32 %v2406_v46, %v2328_v19  ;;  %v2251_v31 = vpop.f32.mrf.mxu0 }
 0x370   :  { %v2330_v10 = vpop.f32.mrf.mxu1  ;;  %v2252_v7 = vadd.f32 %v2251_v31, %v11576_v41 }
 0x371   :  { %v11972_v52 = vmax.f32 %v16460_v61, %v2407_v33  ;;  %v16466_v33 = vld [vmem:[#allocation68_spill] sm:$0xff] }
 0x372   :  { %v2331_v3 = vadd.f32 %v2330_v10, %v2252_v7  ;;  %2290 = vmatmul.bf16.gmra.mxu0 %v16462_v47  ;;  %2369 = vmatmul.bf16.gmra.mxu1 %v16463_v48  ;;  %v16467_v2 = vmax.f32 %v16465_v51, %v16466_v33  ;;  %v16475_v33 = vld [vmem:[#allocation14_spill] sm:$0xff] }
 0x373   :  { %16461 = vst [vmem:[#allocation42_spill] sm:$0xff] %v11972_v52  ;;  %2448 = vmatmul.bf16.gmra.mxu2 %v11966_v50 }
 0x374   :  { %2555 = vmatmul.bf16.gmra.mxu3 %v16464_v23 }
 0x376   :  { %v2409_v6 = vpop.f32.mrf.mxu2 }
 0x377   :  { %v11978_v19 = vpop.f32.mrf.mxu3  ;;  %v2410_v46 = vadd.f32 %v2409_v6, %v2331_v3  ;;  %v2253_v15 = vpop.f32.mrf.mxu0  ;;  %v11991_v3 = vld [vmem:[%s15933_s0 + $0xf0] sm:$0xff] }
 0x378   :  { %v2332_v41 = vpop.f32.mrf.mxu1  ;;  %v2254_v31 = vadd.f32 %v2253_v15, %v11583_v35  ;;  %16468 = vst [vmem:[#allocation45_spill] sm:$0xff] %v11991_v3  ;;  %v16469_v35 = vld [vmem:[#allocation12_spill] sm:$0xff] }
 0x379   :  { %v11984_v10 = vmax.f32 %v16467_v2, %v2410_v46  ;;  %v16470_v15 = vld [vmem:[#allocation72_spill] sm:$0xff] }
 0x37a   :  { %v2333_v7 = vadd.f32 %v2332_v41, %v2254_v31  ;;  %v16471_v52 = vmax.f32 %v16469_v35, %v16470_v15  ;;  %v16473_v41 = vld [vmem:[#allocation74_spill] sm:$0xff]  ;;  %v12003_v31 = vld [vmem:[%s15933_s0 + $0x70] sm:$0xff] }
 0x37b   :  { %16474 = vst [vmem:[#allocation47_spill] sm:$0xff] %v12003_v31 }
 0x37e   :  { %v2411_v61 = vpop.f32.mrf.mxu2 }
 0x37f   :  { %v11986_v47 = vpop.f32.mrf.mxu3  ;;  %v2412_v48 = vadd.f32 %v2411_v61, %v2333_v7  ;;  %v2256_v50 = vpop.f32.mrf.mxu0 }
 0x380   :  { %v2335_v23 = vpop.f32.mrf.mxu1  ;;  %v2257_v6 = vadd.f32 %v2256_v50, %v11606_v42 }
 0x381   :  { %v11997_v51 = vmax.f32 %v16471_v52, %v2412_v48  ;;  %v16476_v48 = vld [vmem:[#allocation73_spill] sm:$0xff] }
 0x382   :  { %v2336_v46 = vadd.f32 %v2335_v23, %v2257_v6  ;;  %2295 = vmatmul.bf16.gmra.mxu0 %v16473_v41  ;;  %2374 = vmatmul.bf16.gmra.mxu1 %v12003_v31  ;;  %v16477_v23 = vmax.f32 %v16365_v14, %v16476_v48  ;;  %v16484_v48 = vld [vmem:[#allocation29_spill] sm:$0xff] }
 0x383   :  { %16472 = vst [vmem:[#allocation46_spill] sm:$0xff] %v11997_v51  ;;  %2453 = vmatmul.bf16.gmra.mxu2 %v11991_v3 }
 0x384   :  { %2560 = vmatmul.bf16.gmra.mxu3 %v16475_v33 }
 0x386   :  { %v2414_v42 = vpop.f32.mrf.mxu2 }
 0x387   :  { %v12008_v50 = vpop.f32.mrf.mxu3  ;;  %v2415_v2 = vadd.f32 %v2414_v42, %v2336_v46  ;;  %v2258_v52 = vpop.f32.mrf.mxu0  ;;  %v12021_v46 = vld [vmem:[%s15933_s0 + $0xf8] sm:$0xff] }
 0x388   :  { %v2337_v7 = vpop.f32.mrf.mxu1  ;;  %v2259_v61 = vadd.f32 %v2258_v52, %v11613_v0  ;;  %16478 = vst [vmem:[#allocation44_spill] sm:$0xff] %v12021_v46  ;;  %v16479_v0 = vld [vmem:[#allocation25_spill] sm:$0xff]  ;;  %v16480_v52 = vld [vmem:[#allocation15_spill] sm:$0xff] }
 0x389   :  { %v12014_v6 = vmax.f32 %v16477_v23, %v2415_v2  ;;  %v16481_v51 = vmax.f32 %v16479_v0, %v16480_v52 }
 0x38a   :  { %v2338_v35 = vadd.f32 %v2337_v7, %v2259_v61  ;;  %v16482_v7 = vld [vmem:[#allocation75_spill] sm:$0xff]  ;;  %v12033_v61 = vld [vmem:[%s15933_s0 + $0x78] sm:$0xff] }
 0x38b   :  { %16483 = vst [vmem:[#allocation50_spill] sm:$0xff] %v12033_v61 }
 0x38e   :  { %v2416_v15 = vpop.f32.mrf.mxu2 }
 0x38f   :  { %v12016_v41 = vpop.f32.mrf.mxu3  ;;  %v2417_v3 = vadd.f32 %v2416_v15, %v2338_v35  ;;  %v2261_v31 = vpop.f32.mrf.mxu0  ;;  %v16485_v15 = vmax.f32 %v16371_v13, %v11616_v43  ;;  %v12057_v43 = vld [vmem:[%s15933_s0 + $0x100] sm:$0xff] }
 0x390   :  { %v2340_v33 = vpop.f32.mrf.mxu1  ;;  %v2262_v42 = vadd.f32 %v2261_v31, %v11636_v60  ;;  %v12063_v13 = vld [vmem:[%s15933_s0 + $0x180] sm:$0xff] }
 0x391   :  { %v12027_v14 = vmax.f32 %v16481_v51, %v2417_v3 }
 0x392   :  { %v2341_v2 = vadd.f32 %v2340_v33, %v2262_v42  ;;  %2300 = vmatmul.bf16.gmra.mxu0 %v16482_v7  ;;  %2379 = vmatmul.bf16.gmra.mxu1 %v12033_v61 }
 0x393   :  { %2458 = vmatmul.bf16.gmra.mxu2 %v12021_v46 }
 0x394   :  { %2565 = vmatmul.bf16.gmra.mxu3 %v16484_v48 }
 0x396   :  { %v2419_v60 = vpop.f32.mrf.mxu2 }
 0x397   :  { %v12038_v31 = vpop.f32.mrf.mxu3  ;;  %v2420_v23 = vadd.f32 %v2419_v60, %v2341_v2  ;;  %v2263_v3 = vpop.f32.mrf.mxu0  ;;  %v16486_v2 = vmax.f32 %v11131_v55, %v11639_v18  ;;  %v12069_v55 = vld [vmem:[%s15933_s0 + $0x10] sm:$0xff]  ;;  %v9772_v18 = vld [vmem:[%s15932_s1 + $0x1b8] sm:$0xff] }
 0x398   :  { %v2342_v51 = vpop.f32.mrf.mxu1  ;;  %v2264_v35 = vadd.f32 %v2263_v3, %v11643_v34 }
 0x399   :  { %v12044_v33 = vmax.f32 %v16485_v15, %v2420_v23 }
 0x39a   :  { %v2343_v42 = vadd.f32 %v2342_v51, %v2264_v35 }
 0x39e   :  { %v2421_v0 = vpop.f32.mrf.mxu2 }
 0x39f   :  { %v12046_v52 = vpop.f32.mrf.mxu3  ;;  %v2422_v7 = vadd.f32 %v2421_v0, %v2343_v42  ;;  %v2266_v46 = vpop.f32.mrf.mxu0  ;;  %v9776_v42 = vld [vmem:[%s15932_s1 + $0x1b0] sm:$0xff] }
 0x3a0   :  { %v2345_v48 = vpop.f32.mrf.mxu1  ;;  %v2267_v61 = vadd.f32 %v2266_v46, %v11667_v36  ;;  %v9773_v36 = vld [vmem:[%s15932_s1 + $0x138] sm:$0xff]  ;;  %v9777_v0 = vld [vmem:[%s15932_s1 + $0x130] sm:$0xff] }
 0x3a1   :  { %v12052_v60 = vmax.f32 %v16486_v2, %v2422_v7  ;;  %v9774_v46 = vld [vmem:[%s15932_s1 + $0x1f8] sm:$0xff]  ;;  %v16487_v7 = vmax.f32 %v11136_v25, %v11651_v32  ;;  %v9778_v2 = vld [vmem:[%s15932_s1 + $0x1f0] sm:$0xff]  ;;  %v9781_v25 = vld [vmem:[%s15932_s1 + $0x128] sm:$0xff] }
 0x3a2   :  { %v2346_v34 = vadd.f32 %v2345_v48, %v2267_v61  ;;  %2579 = vmatmul.bf16.vlgmr.msra.gmra.mxu0 %v12057_v43  ;;  %2658 = vmatmul.bf16.vlgmr.msra.gmra.mxu1 %v12063_v13  ;;  %v9775_v61 = vld [vmem:[%s15932_s1 + $0x178] sm:$0xff]  ;;  %v9782_v32 = vld [vmem:[%s15932_s1 + $0x1e8] sm:$0xff] }
 0x3a3   :  { %2737 = vmatmul.bf16.vlgmr.msra.gmra.mxu2 %v12069_v55  ;;  %3428 = vmatpush.bf16.msra.mxu0 %v9773_v36  ;;  %v9783_v36 = vld [vmem:[%s15932_s1 + $0x168] sm:$0xff] }
 0x3a4   :  { %2816 = vmatmul.bf16.vlgmr.msra.gmra.mxu3 %v11648_v8  ;;  %3586 = vmatpush.bf16.msra.mxu2 %v9772_v18  ;;  %v9780_v18 = vld [vmem:[%s15932_s1 + $0x1a8] sm:$0xff] }
 0x3a5   :  { %3665 = vmatpush.bf16.msra.mxu3 %v9774_v46  ;;  %3507 = vmatpush.bf16.msra.mxu1 %v9775_v61 }
 0x3a6   :  { %v2424_v8 = vpop.f32.mrf.mxu2 }
 0x3a7   :  { %v12085_v23 = vpop.f32.mrf.mxu3  ;;  %v2425_v3 = vadd.f32 %v2424_v8, %v2346_v34  ;;  %v2268_v51 = vpop.f32.mrf.mxu0  ;;  %3429 = vmatpush.bf16.msra.mxu0 %v9777_v0  ;;  %v16488_v0 = vmax.f32 %v11170_v27, %v11678_v38  ;;  %v12146_v27 = vld [vmem:[%s15933_s0 + $0x188] sm:$0xff]  ;;  %v12152_v38 = vld [vmem:[%s15933_s0 + $0x18] sm:$0xff] }
 0x3a8   :  { %v2347_v35 = vpop.f32.mrf.mxu1  ;;  %v2269_v15 = vadd.f32 %v2268_v51, %v11690_v24  ;;  %3587 = vmatpush.bf16.msra.mxu2 %v9776_v42  ;;  %v9779_v24 = vld [vmem:[%s15932_s1 + $0x170] sm:$0xff]  ;;  %v9785_v42 = vld [vmem:[%s15932_s1 + $0x120] sm:$0xff] }
 0x3a9   :  { %v12097_v48 = vmax.f32 %v16487_v7, %v2425_v3  ;;  %3666 = vmatpush.bf16.msra.mxu3 %v9778_v2  ;;  %3508 = vmatpush.bf16.msra.mxu1 %v9779_v24  ;;  %v9786_v2 = vld [vmem:[%s15932_s1 + $0x1e0] sm:$0xff] }
 0x3aa   :  { %v2348_v34 = vadd.f32 %v2347_v35, %v2269_v15  ;;  %v9784_v15 = vld [vmem:[%s15932_s1 + $0x1a0] sm:$0xff] }
 0x3ab   :  { %3430 = vmatpush.bf16.msra.mxu0 %v9781_v25  ;;  %v9792_v25 = vld [vmem:[%s15932_s1 + $0x118] sm:$0xff] }
 0x3ac   :  { %3588 = vmatpush.bf16.msra.mxu2 %v9780_v18  ;;  %v9791_v18 = vld [vmem:[%s15932_s1 + $0x198] sm:$0xff] }
 0x3ad   :  { %3667 = vmatpush.bf16.msra.mxu3 %v9782_v32  ;;  %3509 = vmatpush.bf16.msra.mxu1 %v9783_v36  ;;  %v9793_v32 = vld [vmem:[%s15932_s1 + $0x1d8] sm:$0xff] }
 0x3ae   :  { %v2426_v46 = vpop.f32.mrf.mxu2  ;;  %v9794_v36 = vld [vmem:[%s15932_s1 + $0x158] sm:$0xff] }
 0x3af   :  { %v12117_v61 = vpop.f32.mrf.mxu3  ;;  %v2427_v8 = vadd.f32 %v2426_v46, %v2348_v34  ;;  %v2271_v3 = vpop.f32.mrf.mxu0  ;;  %3431 = vmatpush.bf16.msra.mxu0 %v9785_v42  ;;  %v12140_v34 = vld [vmem:[%s15933_s0 + $0x108] sm:$0xff]  ;;  %v9796_v42 = vld [vmem:[%s15932_s1 + $0x110] sm:$0xff] }
 0x3b0   :  { %v2350_v51 = vpop.f32.mrf.mxu1  ;;  %v2272_v35 = vadd.f32 %v2271_v3, %v11722_v56  ;;  %3589 = vmatpush.bf16.msra.mxu2 %v9784_v15  ;;  %v9787_v56 = vld [vmem:[%s15932_s1 + $0x160] sm:$0xff]  ;;  %v9795_v15 = vld [vmem:[%s15932_s1 + $0x190] sm:$0xff] }
 0x3b1   :  { %v12129_v7 = vmax.f32 %v16488_v0, %v2427_v8  ;;  %3668 = vmatpush.bf16.msra.mxu3 %v9786_v2  ;;  %3510 = vmatpush.bf16.msra.mxu1 %v9787_v56  ;;  %v16489_v0 = vmax.f32 %v11191_v62, %v11706_v37  ;;  %v9797_v56 = vld [vmem:[%s15932_s1 + $0x1d0] sm:$0xff]  ;;  %v9800_v62 = vld [vmem:[%s15932_s1 + $0x108] sm:$0xff] }
 0x3b2   :  { %v2351_v24 = vadd.f32 %v2350_v51, %v2272_v35  ;;  %2584 = vmatmul.bf16.gmra.mxu0 %v12140_v34  ;;  %2663 = vmatmul.bf16.gmra.mxu1 %v12146_v27  ;;  %v9801_v37 = vld [vmem:[%s15932_s1 + $0x1c8] sm:$0xff] }
 0x3b3   :  { %2742 = vmatmul.bf16.gmra.mxu2 %v12152_v38  ;;  %3432 = vmatpush.bf16.msra.mxu0 %v9792_v25  ;;  %v9802_v25 = vld [vmem:[%s15932_s1 + $0x148] sm:$0xff] }
 0x3b4   :  { %2821 = vmatmul.bf16.gmra.mxu3 %v11695_v12  ;;  %3590 = vmatpush.bf16.msra.mxu2 %v9791_v18  ;;  %v9799_v18 = vld [vmem:[%s15932_s1 + $0x188] sm:$0xff] }
 0x3b5   :  { %3669 = vmatpush.bf16.msra.mxu3 %v9793_v32  ;;  %3511 = vmatpush.bf16.msra.mxu1 %v9794_v36 }
 0x3b6   :  { %v2429_v12 = vpop.f32.mrf.mxu2 }
 0x3b7   :  { %v12168_v46 = vpop.f32.mrf.mxu3  ;;  %v2430_v8 = vadd.f32 %v2429_v12, %v2351_v24  ;;  %v2273_v3 = vpop.f32.mrf.mxu0  ;;  %3433 = vmatpush.bf16.msra.mxu0 %v9796_v42  ;;  %v16491_v42 = vld [vmem:[#allocation30_spill] sm:$0xff] }
 0x3b8   :  { %v2352_v51 = vpop.f32.mrf.mxu1  ;;  %v2274_v35 = vadd.f32 %v2273_v3, %v11745_v5  ;;  %3591 = vmatpush.bf16.msra.mxu2 %v9795_v15  ;;  %v9798_v5 = vld [vmem:[%s15932_s1 + $0x150] sm:$0xff]  ;;  %v9804_v15 = vld [vmem:[%s15932_s1 + $0x100] sm:$0xff] }
 0x3b9   :  { %v12180_v2 = vmax.f32 %v16489_v0, %v2430_v8  ;;  %3670 = vmatpush.bf16.msra.mxu3 %v9797_v56  ;;  %3512 = vmatpush.bf16.msra.mxu1 %v9798_v5  ;;  %v16492_v0 = vmax.f32 %v11233_v9, %v16491_v42  ;;  %v9805_v5 = vld [vmem:[%s15932_s1 + $0x1c0] sm:$0xff]  ;;  %v12229_v9 = vld [vmem:[%s15933_s0 + $0x190] sm:$0xff] }
 0x3ba   :  { %v2353_v24 = vadd.f32 %v2352_v51, %v2274_v35  ;;  %v9803_v35 = vld [vmem:[%s15932_s1 + $0x180] sm:$0xff]  ;;  %16495 = vst [vmem:[#allocation55_spill] sm:$0xff] %v12229_v9 }
 0x3bb   :  { %16490 = vst [vmem:[#allocation51_spill] sm:$0xff] %v12180_v2  ;;  %3434 = vmatpush.bf16.msra.mxu0 %v9800_v62  ;;  %v12235_v62 = vld [vmem:[%s15933_s0 + $0x20] sm:$0xff] }
 0x3bc   :  { %3592 = vmatpush.bf16.msra.mxu2 %v9799_v18  ;;  %v12223_v18 = vld [vmem:[%s15933_s0 + $0x110] sm:$0xff]  ;;  %16496 = vst [vmem:[#allocation56_spill] sm:$0xff] %v12235_v62 }
 0x3bd   :  { %3671 = vmatpush.bf16.msra.mxu3 %v9801_v37  ;;  %3513 = vmatpush.bf16.msra.mxu1 %v9802_v25  ;;  %16494 = vst [vmem:[#allocation49_spill] sm:$0xff] %v12223_v18  ;;  %v16497_v37 = vld [vmem:[#allocation3_spill] sm:$0xff] }
 0x3be   :  { %v2431_v32 = vpop.f32.mrf.mxu2 }
 0x3bf   :  { %v12200_v36 = vpop.f32.mrf.mxu3  ;;  %v2432_v12 = vadd.f32 %v2431_v32, %v2353_v24  ;;  %v2276_v8 = vpop.f32.mrf.mxu0  ;;  %3435 = vmatpush.bf16.msra.mxu0 %v9804_v15  ;;  %v16500_v15 = vld [vmem:[#allocation9_spill] sm:$0xff] }
 0x3c0   :  { %v2355_v3 = vpop.f32.mrf.mxu1  ;;  %v2277_v51 = vadd.f32 %v2276_v8, %v11769_v21  ;;  %3593 = vmatpush.bf16.msra.mxu2 %v9803_v35  ;;  %v9806_v21 = vld [vmem:[%s15932_s1 + $0x140] sm:$0xff] }
 0x3c1   :  { %v12212_v56 = vmax.f32 %v16492_v0, %v2432_v12  ;;  %3672 = vmatpush.bf16.msra.mxu3 %v9805_v5  ;;  %3514 = vmatpush.bf16.msra.mxu1 %v9806_v21  ;;  %v16499_v35 = vld [vmem:[#allocation22_spill] sm:$0xff] }
 0x3c2   :  { %v2356_v24 = vadd.f32 %v2355_v3, %v2277_v51  ;;  %2589 = vmatmul.bf16.gmra.mxu0 %v12223_v18  ;;  %2668 = vmatmul.bf16.gmra.mxu1 %v12229_v9  ;;  %v16501_v42 = vmax.f32 %v16499_v35, %v16500_v15  ;;  %v16511_v15 = vld [vmem:[#allocation18_spill] sm:$0xff] }
 0x3c3   :  { %16493 = vst [vmem:[#allocation52_spill] sm:$0xff] %v12212_v56  ;;  %2747 = vmatmul.bf16.gmra.mxu2 %v12235_v62 }
 0x3c4   :  { %2826 = vmatmul.bf16.gmra.mxu3 %v16497_v37 }
 0x3c6   :  { %v2434_v25 = vpop.f32.mrf.mxu2 }
 0x3c7   :  { %v12239_v32 = vpop.f32.mrf.mxu3  ;;  %v2435_v12 = vadd.f32 %v2434_v25, %v2356_v24  ;;  %v2278_v8 = vpop.f32.mrf.mxu0  ;;  %v16503_v24 = vld [vmem:[#allocation5_spill] sm:$0xff] }
 0x3c8   :  { %16498 = vst [vmem:[#allocation57_spill] sm:$0xff] %v12239_v32  ;;  %v2357_v3 = vpop.f32.mrf.mxu1  ;;  %v2279_v51 = vadd.f32 %v2278_v8, %v11776_v29  ;;  %v16502_v32 = vld [vmem:[#allocation24_spill] sm:$0xff]  ;;  %v12264_v8 = vld [vmem:[%s15933_s0 + $0x198] sm:$0xff] }
 0x3c9   :  { %v12245_v0 = vmax.f32 %v16501_v42, %v2435_v12  ;;  %v16504_v25 = vmax.f32 %v16502_v32, %v16503_v24  ;;  %v12258_v12 = vld [vmem:[%s15933_s0 + $0x118] sm:$0xff]  ;;  %16507 = vst [vmem:[#allocation58_spill] sm:$0xff] %v12264_v8  ;;  %v16512_v42 = vld [vmem:[#allocation7_spill] sm:$0xff] }
 0x3ca   :  { %v2358_v5 = vadd.f32 %v2357_v3, %v2279_v51  ;;  %16506 = vst [vmem:[#allocation6_spill] sm:$0xff] %v12258_v12 }
 0x3ce   :  { %v2436_v21 = vpop.f32.mrf.mxu2 }
 0x3cf   :  { %v12247_v56 = vpop.f32.mrf.mxu3  ;;  %v2437_v62 = vadd.f32 %v2436_v21, %v2358_v5  ;;  %v2281_v9 = vpop.f32.mrf.mxu0  ;;  %v16513_v5 = vmax.f32 %v16511_v15, %v16512_v42  ;;  %v16523_v42 = vld [vmem:[#allocation34_spill] sm:$0xff] }
 0x3d0   :  { %v2360_v37 = vpop.f32.mrf.mxu1  ;;  %v2282_v18 = vadd.f32 %v2281_v9, %v11792_v16  ;;  %v12270_v16 = vld [vmem:[%s15933_s0 + $0x28] sm:$0xff] }
 0x3d1   :  { %v12253_v2 = vmax.f32 %v16504_v25, %v2437_v62  ;;  %16508 = vst [vmem:[#allocation60_spill] sm:$0xff] %v12270_v16 }
 0x3d2   :  { %v2361_v29 = vadd.f32 %v2360_v37, %v2282_v18  ;;  %2594 = vmatmul.bf16.gmra.mxu0 %v12258_v12  ;;  %2673 = vmatmul.bf16.gmra.mxu1 %v12264_v8  ;;  %v16509_v18 = vld [vmem:[#allocation13_spill] sm:$0xff] }
 0x3d3   :  { %16505 = vst [vmem:[#allocation54_spill] sm:$0xff] %v12253_v2  ;;  %2752 = vmatmul.bf16.gmra.mxu2 %v12270_v16  ;;  %v16514_v12 = vld [vmem:[#allocation33_spill] sm:$0xff] }
 0x3d4   :  { %2831 = vmatmul.bf16.gmra.mxu3 %v16509_v18 }
 0x3d6   :  { %v2439_v9 = vpop.f32.mrf.mxu2 }
 0x3d7   :  { %v12274_v62 = vpop.f32.mrf.mxu3  ;;  %v2440_v32 = vadd.f32 %v2439_v9, %v2361_v29  ;;  %v2283_v3 = vpop.f32.mrf.mxu0  ;;  %v16515_v29 = vld [vmem:[#allocation8_spill] sm:$0xff] }
 0x3d8   :  { %16510 = vst [vmem:[#allocation61_spill] sm:$0xff] %v12274_v62  ;;  %v2362_v51 = vpop.f32.mrf.mxu1  ;;  %v2284_v35 = vadd.f32 %v2283_v3, %v11799_v63  ;;  %v16516_v9 = vmax.f32 %v16514_v12, %v16515_v29  ;;  %v12299_v3 = vld [vmem:[%s15933_s0 + $0x1a0] sm:$0xff] }
 0x3d9   :  { %v12280_v21 = vmax.f32 %v16513_v5, %v2440_v32  ;;  %v12293_v32 = vld [vmem:[%s15933_s0 + $0x120] sm:$0xff]  ;;  %16519 = vst [vmem:[#allocation2_spill] sm:$0xff] %v12299_v3  ;;  %v16524_v5 = vld [vmem:[#allocation11_spill] sm:$0xff] }
 0x3da   :  { %v2363_v37 = vadd.f32 %v2362_v51, %v2284_v35  ;;  %16518 = vst [vmem:[#allocation59_spill] sm:$0xff] %v12293_v32 }
 0x3de   :  { %v2441_v24 = vpop.f32.mrf.mxu2 }
 0x3df   :  { %v12282_v25 = vpop.f32.mrf.mxu3  ;;  %v2442_v16 = vadd.f32 %v2441_v24, %v2363_v37  ;;  %v2286_v2 = vpop.f32.mrf.mxu0  ;;  %v16525_v37 = vmax.f32 %v16523_v42, %v16524_v5  ;;  %v16535_v5 = vld [vmem:[#allocation39_spill] sm:$0xff] }
 0x3e0   :  { %v2365_v18 = vpop.f32.mrf.mxu1  ;;  %v2287_v8 = vadd.f32 %v2286_v2, %v11815_v49  ;;  %v12305_v49 = vld [vmem:[%s15933_s0 + $0x30] sm:$0xff]  ;;  %v16521_v2 = vld [vmem:[#allocation10_spill] sm:$0xff] }
 0x3e1   :  { %v12288_v62 = vmax.f32 %v16516_v9, %v2442_v16  ;;  %16520 = vst [vmem:[#allocation64_spill] sm:$0xff] %v12305_v49 }
 0x3e2   :  { %v2366_v63 = vadd.f32 %v2365_v18, %v2287_v8  ;;  %2599 = vmatmul.bf16.gmra.mxu0 %v12293_v32  ;;  %2678 = vmatmul.bf16.gmra.mxu1 %v12299_v3  ;;  %v16526_v32 = vld [vmem:[#allocation38_spill] sm:$0xff] }
 0x3e3   :  { %16517 = vst [vmem:[#allocation62_spill] sm:$0xff] %v12288_v62  ;;  %2757 = vmatmul.bf16.gmra.mxu2 %v12305_v49 }
 0x3e4   :  { %2836 = vmatmul.bf16.gmra.mxu3 %v16521_v2 }
 0x3e6   :  { %v2444_v12 = vpop.f32.mrf.mxu2 }
 0x3e7   :  { %v12309_v8 = vpop.f32.mrf.mxu3  ;;  %v2445_v16 = vadd.f32 %v2444_v12, %v2366_v63  ;;  %v2288_v51 = vpop.f32.mrf.mxu0  ;;  %v16527_v63 = vld [vmem:[#allocation16_spill] sm:$0xff] }
 0x3e8   :  { %16522 = vst [vmem:[#allocation65_spill] sm:$0xff] %v12309_v8  ;;  %v2367_v35 = vpop.f32.mrf.mxu1  ;;  %v2289_v15 = vadd.f32 %v2288_v51, %v11822_v1  ;;  %v16528_v12 = vmax.f32 %v16526_v32, %v16527_v63  ;;  %v12334_v51 = vld [vmem:[%s15933_s0 + $0x1a8] sm:$0xff] }
 0x3e9   :  { %v12315_v24 = vmax.f32 %v16525_v37, %v2445_v16  ;;  %v12328_v16 = vld [vmem:[%s15933_s0 + $0x128] sm:$0xff]  ;;  %16531 = vst [vmem:[#allocation67_spill] sm:$0xff] %v12334_v51 }
 0x3ea   :  { %v2368_v18 = vadd.f32 %v2367_v35, %v2289_v15  ;;  %16530 = vst [vmem:[#allocation63_spill] sm:$0xff] %v12328_v16  ;;  %v16536_v37 = vld [vmem:[#allocation23_spill] sm:$0xff] }
 0x3ee   :  { %v2446_v29 = vpop.f32.mrf.mxu2 }
 0x3ef   :  { %v12317_v9 = vpop.f32.mrf.mxu3  ;;  %v2447_v49 = vadd.f32 %v2446_v29, %v2368_v18  ;;  %v2291_v62 = vpop.f32.mrf.mxu0  ;;  %v16537_v18 = vmax.f32 %v16535_v5, %v16536_v37  ;;  %v16546_v37 = vld [vmem:[#allocation21_spill] sm:$0xff] }
 0x3f0   :  { %v2370_v2 = vpop.f32.mrf.mxu1  ;;  %v2292_v3 = vadd.f32 %v2291_v62, %v11838_v26  ;;  %v12340_v26 = vld [vmem:[%s15933_s0 + $0x38] sm:$0xff] }
 0x3f1   :  { %v12323_v8 = vmax.f32 %v16528_v12, %v2447_v49  ;;  %16532 = vst [vmem:[#allocation69_spill] sm:$0xff] %v12340_v26  ;;  %v16533_v62 = vld [vmem:[#allocation17_spill] sm:$0xff] }
 0x3f2   :  { %v2371_v1 = vadd.f32 %v2370_v2, %v2292_v3  ;;  %2604 = vmatmul.bf16.gmra.mxu0 %v12328_v16  ;;  %2683 = vmatmul.bf16.gmra.mxu1 %v12334_v51  ;;  %v16538_v16 = vld [vmem:[#allocation43_spill] sm:$0xff] }
 0x3f3   :  { %16529 = vst [vmem:[#allocation66_spill] sm:$0xff] %v12323_v8  ;;  %2762 = vmatmul.bf16.gmra.mxu2 %v12340_v26 }
 0x3f4   :  { %2841 = vmatmul.bf16.gmra.mxu3 %v16533_v62 }
 0x3f6   :  { %v2449_v32 = vpop.f32.mrf.mxu2 }
 0x3f7   :  { %v12344_v3 = vpop.f32.mrf.mxu3  ;;  %v2450_v49 = vadd.f32 %v2449_v32, %v2371_v1  ;;  %v2293_v35 = vpop.f32.mrf.mxu0  ;;  %v16539_v1 = vld [vmem:[#allocation26_spill] sm:$0xff] }
 0x3f8   :  { %16534 = vst [vmem:[#allocation70_spill] sm:$0xff] %v12344_v3  ;;  %v2372_v15 = vpop.f32.mrf.mxu1  ;;  %v2294_v42 = vadd.f32 %v2293_v35, %v11845_v39  ;;  %v16540_v32 = vmax.f32 %v16538_v16, %v16539_v1  ;;  %v12369_v35 = vld [vmem:[%s15933_s0 + $0x1b0] sm:$0xff] }
 0x3f9   :  { %v12350_v29 = vmax.f32 %v16537_v18, %v2450_v49  ;;  %v12363_v49 = vld [vmem:[%s15933_s0 + $0x130] sm:$0xff]  ;;  %16543 = vst [vmem:[#allocation68_spill] sm:$0xff] %v12369_v35  ;;  %v16547_v18 = vmax.f32 %v16423_v57, %v16546_v37  ;;  %v12398_v57 = vld [vmem:[%s15933_s0 + $0x138] sm:$0xff] }
 0x3fa   :  { %v2373_v2 = vadd.f32 %v2372_v15, %v2294_v42  ;;  %16542 = vst [vmem:[#allocation4_spill] sm:$0xff] %v12363_v49 }
 0x3fb   :  { %16552 = vst [vmem:[#allocation74_spill] sm:$0xff] %v12398_v57 }
 0x3fe   :  { %v2451_v63 = vpop.f32.mrf.mxu2 }
 0x3ff   :  { %v12352_v12 = vpop.f32.mrf.mxu3  ;;  %v2452_v26 = vadd.f32 %v2451_v63, %v2373_v2  ;;  %v2296_v8 = vpop.f32.mrf.mxu0 }
 0x400   :  { %v2375_v62 = vpop.f32.mrf.mxu1  ;;  %v2297_v51 = vadd.f32 %v2296_v8, %v11861_v54  ;;  %v12375_v54 = vld [vmem:[%s15933_s0 + $0x40] sm:$0xff]  ;;  %v16545_v8 = vld [vmem:[#allocation20_spill] sm:$0xff] }
 0x401   :  { %v12358_v3 = vmax.f32 %v16540_v32, %v2452_v26  ;;  %16544 = vst [vmem:[#allocation12_spill] sm:$0xff] %v12375_v54 }
 0x402   :  { %v2376_v39 = vadd.f32 %v2375_v62, %v2297_v51  ;;  %2609 = vmatmul.bf16.gmra.mxu0 %v12363_v49  ;;  %2688 = vmatmul.bf16.gmra.mxu1 %v12369_v35  ;;  %v16548_v35 = vld [vmem:[#allocation48_spill] sm:$0xff] }
 0x403   :  { %16541 = vst [vmem:[#allocation71_spill] sm:$0xff] %v12358_v3  ;;  %2767 = vmatmul.bf16.gmra.mxu2 %v12375_v54 }
 0x404   :  { %2846 = vmatmul.bf16.gmra.mxu3 %v16545_v8 }
 0x406   :  { %v2454_v16 = vpop.f32.mrf.mxu2 }
 0x407   :  { %v12379_v51 = vpop.f32.mrf.mxu3  ;;  %v2455_v26 = vadd.f32 %v2454_v16, %v2376_v39  ;;  %v2298_v15 = vpop.f32.mrf.mxu0  ;;  %v16549_v39 = vld [vmem:[#allocation27_spill] sm:$0xff] }
 0x408   :  { %v2377_v42 = vpop.f32.mrf.mxu1  ;;  %v2299_v5 = vadd.f32 %v2298_v15, %v11868_v53  ;;  %v16550_v16 = vmax.f32 %v16548_v35, %v16549_v39 }
 0x409   :  { %v12385_v2 = vmax.f32 %v16547_v18, %v2455_v26  ;;  %v12404_v26 = vld [vmem:[%s15933_s0 + $0x1b8] sm:$0xff]  ;;  %v16557_v18 = vld [vmem:[#allocation19_spill] sm:$0xff] }
 0x40a   :  { %v2378_v63 = vadd.f32 %v2377_v42, %v2299_v5  ;;  %16553 = vst [vmem:[#allocation14_spill] sm:$0xff] %v12404_v26 }
 0x40e   :  { %v2456_v62 = vpop.f32.mrf.mxu2 }
 0x40f   :  { %v12387_v1 = vpop.f32.mrf.mxu3  ;;  %v2457_v32 = vadd.f32 %v2456_v62, %v2378_v63  ;;  %v2301_v54 = vpop.f32.mrf.mxu0  ;;  %v16558_v63 = vmax.f32 %v16431_v30, %v16557_v18  ;;  %v12433_v30 = vld [vmem:[%s15933_s0 + $0x140] sm:$0xff] }
 0x410   :  { %v2380_v8 = vpop.f32.mrf.mxu1  ;;  %v2302_v3 = vadd.f32 %v2301_v54, %v11884_v44  ;;  %v12410_v44 = vld [vmem:[%s15933_s0 + $0x48] sm:$0xff]  ;;  %16565 = vst [vmem:[#allocation29_spill] sm:$0xff] %v12433_v30 }
 0x411   :  { %v12393_v49 = vmax.f32 %v16550_v16, %v2457_v32  ;;  %16554 = vst [vmem:[#allocation73_spill] sm:$0xff] %v12410_v44 }
 0x412   :  { %v2381_v53 = vadd.f32 %v2380_v8, %v2302_v3  ;;  %2614 = vmatmul.bf16.gmra.mxu0 %v12398_v57  ;;  %2693 = vmatmul.bf16.gmra.mxu1 %v12404_v26  ;;  %v16555_v3 = vld [vmem:[#allocation28_spill] sm:$0xff]  ;;  %v16561_v57 = vld [vmem:[#allocation53_spill] sm:$0xff] }
 0x413   :  { %16551 = vst [vmem:[#allocation72_spill] sm:$0xff] %v12393_v49  ;;  %2772 = vmatmul.bf16.gmra.mxu2 %v12410_v44  ;;  %v16560_v49 = vld [vmem:[#allocation35_spill] sm:$0xff] }
 0x414   :  { %2851 = vmatmul.bf16.gmra.mxu3 %v16555_v3 }
 0x416   :  { %v2459_v35 = vpop.f32.mrf.mxu2 }
 0x417   :  { %v12414_v54 = vpop.f32.mrf.mxu3  ;;  %v2460_v15 = vadd.f32 %v2459_v35, %v2381_v53  ;;  %v2303_v42 = vpop.f32.mrf.mxu0  ;;  %v16562_v53 = vld [vmem:[#allocation31_spill] sm:$0xff] }
 0x418   :  { %16556 = vst [vmem:[#allocation25_spill] sm:$0xff] %v12414_v54  ;;  %v2382_v5 = vpop.f32.mrf.mxu1  ;;  %v2304_v37 = vadd.f32 %v2303_v42, %v11891_v4  ;;  %v16563_v35 = vmax.f32 %v16561_v57, %v16562_v53  ;;  %v16568_v57 = vld [vmem:[#allocation32_spill] sm:$0xff] }
 0x419   :  { %v12420_v62 = vmax.f32 %v16558_v63, %v2460_v15  ;;  %v12439_v15 = vld [vmem:[%s15933_s0 + $0x1c0] sm:$0xff] }
 0x41a   :  { %v2383_v32 = vadd.f32 %v2382_v5, %v2304_v37  ;;  %16566 = vst [vmem:[#allocation30_spill] sm:$0xff] %v12439_v15 }
 0x41b   :  { %16559 = vst [vmem:[#allocation15_spill] sm:$0xff] %v12420_v62 }
 0x41e   :  { %v2461_v8 = vpop.f32.mrf.mxu2 }
 0x41f   :  { %v12422_v39 = vpop.f32.mrf.mxu3  ;;  %v2462_v16 = vadd.f32 %v2461_v8, %v2383_v32  ;;  %v2580_v44 = vpop.f32.mrf.mxu0  ;;  %v16569_v8 = vld [vmem:[#allocation36_spill] sm:$0xff] }
 0x420   :  { %v2659_v3 = vpop.f32.mrf.mxu1  ;;  %v2581_v26 = vadd.f32 %v2580_v44, %v16560_v49  ;;  %v12445_v49 = vld [vmem:[%s15933_s0 + $0x50] sm:$0xff] }
 0x421   :  { %v12428_v54 = vmax.f32 %v16563_v35, %v2462_v16  ;;  %16567 = vst [vmem:[#allocation3_spill] sm:$0xff] %v12445_v49 }
 0x422   :  { %v2660_v4 = vadd.f32 %v2659_v3, %v2581_v26  ;;  %2619 = vmatmul.bf16.gmra.mxu0 %v12433_v30  ;;  %2698 = vmatmul.bf16.gmra.mxu1 %v12439_v15  ;;  %v12454_v3 = vld [vmem:[%s15934_s6] ss:$0 sm:$0xff] }
 0x423   :  { %16564 = vst [vmem:[#allocation75_spill] sm:$0xff] %v12428_v54  ;;  %2777 = vmatmul.bf16.gmra.mxu2 %v12445_v49 }
 0x424   :  { %2856 = vmatmul.bf16.gmra.mxu3 %v16568_v57 }
 0x426   :  { %v2738_v26 = vpop.f32.mrf.mxu2 }
 0x427   :  { %v2817_v44 = vpop.f32.mrf.mxu3  ;;  %v2739_v42 = vadd.f32 %v2738_v26, %v2660_v4  ;;  %v2582_v5 = vpop.f32.mrf.mxu0 }
 0x428   :  { %v2661_v37 = vpop.f32.mrf.mxu1  ;;  %v2583_v18 = vadd.f32 %v2582_v5, %v11911_v22 }
 0x429   :  { %v2818_v63 = vadd.f32 %v2817_v44, %v2739_v42  ;;  %v12461_v44 = vld [vmem:[%s15933_s0 + $0x148] sm:$0xff] }
 0x42a   :  { %v2662_v32 = vadd.f32 %v2661_v37, %v2583_v18  ;;  %16570 = vst [vmem:[#allocation22_spill] sm:$0xff] %v12461_v44  ;;  %v12467_v42 = vld [vmem:[%s15933_s0 + $0x1c8] sm:$0xff] }
 0x42b   :  { %v2887_v16 = vmax.f32 %v16569_v8, %v2818_v63  ;;  %16571 = vst [vmem:[#allocation9_spill] sm:$0xff] %v12467_v42 }
 0x42d   :  { %v2916_v57 = vadd.f32 %v12454_v3, %v2887_v16 }
 0x42e   :  { %v2740_v53 = vpop.f32.mrf.mxu2 }
 0x42f   :  { %v2819_v35 = vpop.f32.mrf.mxu3  ;;  %v2741_v49 = vadd.f32 %v2740_v53, %v2662_v32  ;;  %v2585_v54 = vpop.f32.mrf.mxu0  ;;  %v2944_v5 = vmax.f32 %v2916_v57, 0.0 }
 0x430   :  { %v2664_v4 = vpop.f32.mrf.mxu1  ;;  %v2586_v26 = vadd.f32 %v2585_v54, %v11928_v17  ;;  %v12474_v17 = vld [vmem:[%s15933_s0 + $0x58] sm:$0xff] }
 0x431   :  { %v2820_v15 = vadd.f32 %v2819_v35, %v2741_v49  ;;  %16572 = vst [vmem:[#allocation24_spill] sm:$0xff] %v12474_v17  ;;  %v2972_v63 = vpack.c.bf16 %v2944_v5, %v2944_v5 }
 0x432   :  { %v2665_v22 = vadd.f32 %v2664_v4, %v2586_v26  ;;  %2624 = vmatmul.bf16.gmra.mxu0 %v12461_v44  ;;  %2703 = vmatmul.bf16.gmra.mxu1 %v12467_v42  ;;  %v16573_v42 = vld [vmem:[#allocation37_spill] sm:$0xff] }
 0x433   :  { %v2888_v37 = vmax.f32 %v11922_v20, %v2820_v15  ;;  %2782 = vmatmul.bf16.gmra.mxu2 %v12474_v17  ;;  %v4992_v4 = vunpack.c.l.b16 %v2972_v63 }
 0x434   :  { %2861 = vmatmul.bf16.gmra.mxu3 %v11916_v59 }
 0x435   :  { %v2917_v54 = vadd.f32 %v12454_v3, %v2888_v37 }
 0x436   :  { %v2743_v49 = vpop.f32.mrf.mxu2 }
 0x437   :  { %v2822_v18 = vpop.f32.mrf.mxu3  ;;  %v2945_v32 = vmax.f32 %v2917_v54, 0.0  ;;  %v2744_v8 = vadd.f32 %v2743_v49, %v2665_v22  ;;  %v2587_v16 = vpop.f32.mrf.mxu0 }
 0x438   :  { %v2666_v53 = vpop.f32.mrf.mxu1  ;;  %v2588_v20 = vadd.f32 %v2587_v16, %v11936_v28 }
 0x439   :  { %v2973_v15 = vpack.c.bf16 %v2945_v32, %v2945_v32  ;;  %v2823_v35 = vadd.f32 %v2822_v18, %v2744_v8  ;;  %v12488_v18 = vld [vmem:[%s15933_s0 + $0x150] sm:$0xff] }
 0x43a   :  { %v2667_v57 = vadd.f32 %v2666_v53, %v2588_v20 }
 0x43b   :  { %v4993_v26 = vunpack.c.l.b16 %v2973_v15  ;;  %v2889_v17 = vmax.f32 %v16573_v42, %v2823_v35  ;;  %v12494_v42 = vld [vmem:[%s15933_s0 + $0x1d0] sm:$0xff] }
 0x43d   :  { %v12481_v44 = vpack.c.b16 %v4993_v26, %v4992_v4  ;;  %v2918_v30 = vadd.f32 %v12454_v3, %v2889_v17  ;;  %v16575_v26 = vld [vmem:[#allocation40_spill] sm:$0xff] }
 0x43e   :  { %v2745_v59 = vpop.f32.mrf.mxu2 }
 0x43f   :  { %16574 = vst [vmem:[#allocation5_spill] sm:$0xff] %v12481_v44  ;;  %v2824_v37 = vpop.f32.mrf.mxu3  ;;  %v2746_v5 = vadd.f32 %v2745_v59, %v2667_v57  ;;  %v2590_v54 = vpop.f32.mrf.mxu0  ;;  %v2946_v17 = vmax.f32 %v2918_v30, 0.0 }
 0x440   :  { %v2669_v22 = vpop.f32.mrf.mxu1  ;;  %v2591_v49 = vadd.f32 %v2590_v54, %v11953_v40  ;;  %v12501_v40 = vld [vmem:[%s15933_s0 + $0x60] sm:$0xff] }
 0x441   :  { %v2825_v62 = vadd.f32 %v2824_v37, %v2746_v5  ;;  %v2974_v53 = vpack.c.bf16 %v2946_v17, %v2946_v17 }
 0x442   :  { %v2670_v28 = vadd.f32 %v2669_v22, %v2591_v49  ;;  %2629 = vmatmul.bf16.gmra.mxu0 %v12488_v18  ;;  %2708 = vmatmul.bf16.gmra.mxu1 %v12494_v42 }
 0x443   :  { %v2890_v63 = vmax.f32 %v11947_v45, %v2825_v62  ;;  %2787 = vmatmul.bf16.gmra.mxu2 %v12501_v40  ;;  %v4994_v37 = vunpack.c.l.b16 %v2974_v53  ;;  %v12521_v53 = vld [vmem:[%s15933_s0 + $0x1d8] sm:$0xff] }
 0x444   :  { %2866 = vmatmul.bf16.gmra.mxu3 %v11941_v58 }
 0x445   :  { %v2919_v32 = vadd.f32 %v12454_v3, %v2890_v63 }
 0x446   :  { %v2748_v8 = vpop.f32.mrf.mxu2 }
 0x447   :  { %v2827_v16 = vpop.f32.mrf.mxu3  ;;  %v2947_v20 = vmax.f32 %v2919_v32, 0.0  ;;  %v2749_v15 = vadd.f32 %v2748_v8, %v2670_v28  ;;  %v2592_v35 = vpop.f32.mrf.mxu0 }
 0x448   :  { %v2671_v30 = vpop.f32.mrf.mxu1  ;;  %v2593_v45 = vadd.f32 %v2592_v35, %v11961_v11 }
 0x449   :  { %v2828_v62 = vadd.f32 %v2827_v16, %v2749_v15  ;;  %v2975_v57 = vpack.c.bf16 %v2947_v20, %v2947_v20  ;;  %v12515_v16 = vld [vmem:[%s15933_s0 + $0x158] sm:$0xff]  ;;  %v16577_v15 = vld [vmem:[#allocation42_spill] sm:$0xff] }
 0x44a   :  { %v2672_v4 = vadd.f32 %v2671_v30, %v2593_v45  ;;  %v16578_v30 = vld [vmem:[#allocation41_spill] sm:$0xff] }
 0x44b   :  { %v2891_v59 = vmax.f32 %v16575_v26, %v2828_v62  ;;  %v4995_v5 = vunpack.c.l.b16 %v2975_v57 }
 0x44d   :  { %v12508_v54 = vpack.c.b16 %v4995_v5, %v4994_v37  ;;  %v2920_v49 = vadd.f32 %v12454_v3, %v2891_v59 }
 0x44e   :  { %v2750_v58 = vpop.f32.mrf.mxu2 }
 0x44f   :  { %16576 = vst [vmem:[#allocation13_spill] sm:$0xff] %v12508_v54  ;;  %v2829_v22 = vpop.f32.mrf.mxu3  ;;  %v2751_v17 = vadd.f32 %v2750_v58, %v2672_v4  ;;  %v2595_v63 = vpop.f32.mrf.mxu0  ;;  %v2948_v20 = vmax.f32 %v2920_v49, 0.0 }
 0x450   :  { %v2674_v28 = vpop.f32.mrf.mxu1  ;;  %v2596_v32 = vadd.f32 %v2595_v63, %v11978_v19  ;;  %v12528_v19 = vld [vmem:[%s15933_s0 + $0x68] sm:$0xff] }
 0x451   :  { %v2830_v8 = vadd.f32 %v2829_v22, %v2751_v17  ;;  %v2976_v4 = vpack.c.bf16 %v2948_v20, %v2948_v20 }
 0x452   :  { %v2675_v11 = vadd.f32 %v2674_v28, %v2596_v32  ;;  %2634 = vmatmul.bf16.gmra.mxu0 %v12515_v16  ;;  %2713 = vmatmul.bf16.gmra.mxu1 %v12521_v53 }
 0x453   :  { %v2892_v35 = vmax.f32 %v16577_v15, %v2830_v8  ;;  %2792 = vmatmul.bf16.gmra.mxu2 %v12528_v19  ;;  %v4996_v63 = vunpack.c.l.b16 %v2976_v4 }
 0x454   :  { %2871 = vmatmul.bf16.gmra.mxu3 %v16578_v30 }
 0x455   :  { %v2921_v45 = vadd.f32 %v12454_v3, %v2892_v35 }
 0x456   :  { %v2753_v62 = vpop.f32.mrf.mxu2 }
 0x457   :  { %v2832_v57 = vpop.f32.mrf.mxu3  ;;  %v2949_v26 = vmax.f32 %v2921_v45, 0.0  ;;  %v2754_v59 = vadd.f32 %v2753_v62, %v2675_v11  ;;  %v2597_v37 = vpop.f32.mrf.mxu0 }
 0x458   :  { %v2676_v5 = vpop.f32.mrf.mxu1  ;;  %v2598_v58 = vadd.f32 %v2597_v37, %v11986_v47  ;;  %v16582_v37 = vld [vmem:[#allocation45_spill] sm:$0xff] }
 0x459   :  { %v2977_v22 = vpack.c.bf16 %v2949_v26, %v2949_v26  ;;  %v2833_v49 = vadd.f32 %v2832_v57, %v2754_v59  ;;  %v12542_v57 = vld [vmem:[%s15933_s0 + $0x160] sm:$0xff] }
 0x45a   :  { %v2677_v17 = vadd.f32 %v2676_v5, %v2598_v58  ;;  %v16580_v26 = vld [vmem:[#allocation46_spill] sm:$0xff] }
 0x45b   :  { %v4997_v28 = vunpack.c.l.b16 %v2977_v22  ;;  %v2893_v32 = vmax.f32 %v11984_v10, %v2833_v49  ;;  %v12548_v10 = vld [vmem:[%s15933_s0 + $0x1e0] sm:$0xff] }
 0x45d   :  { %v12535_v8 = vpack.c.b16 %v4997_v28, %v4996_v63  ;;  %v2922_v30 = vadd.f32 %v12454_v3, %v2893_v32 }
 0x45e   :  { %v2755_v15 = vpop.f32.mrf.mxu2 }
 0x45f   :  { %16579 = vst [vmem:[#allocation18_spill] sm:$0xff] %v12535_v8  ;;  %v2834_v35 = vpop.f32.mrf.mxu3  ;;  %v2756_v20 = vadd.f32 %v2755_v15, %v2677_v17  ;;  %v2600_v45 = vpop.f32.mrf.mxu0  ;;  %v2950_v4 = vmax.f32 %v2922_v30, 0.0 }
 0x460   :  { %v2679_v11 = vpop.f32.mrf.mxu1  ;;  %v2601_v62 = vadd.f32 %v2600_v45, %v12008_v50  ;;  %v16581_v50 = vld [vmem:[#allocation47_spill] sm:$0xff] }
 0x461   :  { %v2835_v54 = vadd.f32 %v2834_v35, %v2756_v20  ;;  %v2978_v49 = vpack.c.bf16 %v2950_v4, %v2950_v4 }
 0x462   :  { %v2680_v47 = vadd.f32 %v2679_v11, %v2601_v62  ;;  %2639 = vmatmul.bf16.gmra.mxu0 %v12542_v57  ;;  %2718 = vmatmul.bf16.gmra.mxu1 %v12548_v10 }
 0x463   :  { %v2894_v59 = vmax.f32 %v16580_v26, %v2835_v54  ;;  %2797 = vmatmul.bf16.gmra.mxu2 %v16581_v50  ;;  %v4998_v45 = vunpack.c.l.b16 %v2978_v49 }
 0x464   :  { %2876 = vmatmul.bf16.gmra.mxu3 %v16582_v37 }
 0x465   :  { %v2923_v5 = vadd.f32 %v12454_v3, %v2894_v59 }
 0x466   :  { %v2758_v58 = vpop.f32.mrf.mxu2 }
 0x467   :  { %v2837_v22 = vpop.f32.mrf.mxu3  ;;  %v2951_v17 = vmax.f32 %v2923_v5, 0.0  ;;  %v2759_v63 = vadd.f32 %v2758_v58, %v2680_v47  ;;  %v2602_v28 = vpop.f32.mrf.mxu0 }
 0x468   :  { %v2681_v32 = vpop.f32.mrf.mxu1  ;;  %v2603_v15 = vadd.f32 %v2602_v28, %v12016_v41 }
 0x469   :  { %v2979_v35 = vpack.c.bf16 %v2951_v17, %v2951_v17  ;;  %v2838_v20 = vadd.f32 %v2837_v22, %v2759_v63  ;;  %v12564_v22 = vld [vmem:[%s15933_s0 + $0x168] sm:$0xff]  ;;  %v16585_v63 = vld [vmem:[#allocation44_spill] sm:$0xff] }
 0x46a   :  { %v2682_v30 = vadd.f32 %v2681_v32, %v2603_v15 }
 0x46b   :  { %v4999_v54 = vunpack.c.l.b16 %v2979_v35  ;;  %v2895_v11 = vmax.f32 %v12014_v6, %v2838_v20  ;;  %v12570_v6 = vld [vmem:[%s15933_s0 + $0x1e8] sm:$0xff] }
 0x46d   :  { %v12557_v62 = vpack.c.b16 %v4999_v54, %v4998_v45  ;;  %v2924_v50 = vadd.f32 %v12454_v3, %v2895_v11 }
 0x46e   :  { %v2760_v26 = vpop.f32.mrf.mxu2 }
 0x46f   :  { %16583 = vst [vmem:[#allocation7_spill] sm:$0xff] %v12557_v62  ;;  %v2839_v59 = vpop.f32.mrf.mxu3  ;;  %v2761_v4 = vadd.f32 %v2760_v26, %v2682_v30  ;;  %v2605_v37 = vpop.f32.mrf.mxu0  ;;  %v2952_v49 = vmax.f32 %v2924_v50, 0.0 }
 0x470   :  { %v2684_v47 = vpop.f32.mrf.mxu1  ;;  %v2606_v5 = vadd.f32 %v2605_v37, %v12038_v31  ;;  %v16584_v31 = vld [vmem:[#allocation50_spill] sm:$0xff] }
 0x471   :  { %v2840_v58 = vadd.f32 %v2839_v59, %v2761_v4  ;;  %v2980_v35 = vpack.c.bf16 %v2952_v49, %v2952_v49 }
 0x472   :  { %v2685_v41 = vadd.f32 %v2684_v47, %v2606_v5  ;;  %2644 = vmatmul.bf16.gmra.mxu0 %v12564_v22  ;;  %2723 = vmatmul.bf16.gmra.mxu1 %v12570_v6 }
 0x473   :  { %v2896_v17 = vmax.f32 %v12027_v14, %v2840_v58  ;;  %2802 = vmatmul.bf16.gmra.mxu2 %v16584_v31  ;;  %v5000_v4 = vunpack.c.l.b16 %v2980_v35 }
 0x474   :  { %2881 = vmatmul.bf16.gmra.mxu3 %v16585_v63 }
 0x475   :  { %v2925_v28 = vadd.f32 %v12454_v3, %v2896_v17 }
 0x476   :  { %v2763_v32 = vpop.f32.mrf.mxu2 }
 0x477   :  { %v2842_v15 = vpop.f32.mrf.mxu3  ;;  %v2953_v20 = vmax.f32 %v2925_v28, 0.0  ;;  %v2764_v30 = vadd.f32 %v2763_v32, %v2685_v41  ;;  %v2607_v45 = vpop.f32.mrf.mxu0 }
 0x478   :  { %v2686_v54 = vpop.f32.mrf.mxu1  ;;  %v2608_v11 = vadd.f32 %v2607_v45, %v12046_v52 }
 0x479   :  { %v2981_v26 = vpack.c.bf16 %v2953_v20, %v2953_v20  ;;  %v2843_v59 = vadd.f32 %v2842_v15, %v2764_v30  ;;  %v9841_v15 = vld [vmem:[%s15933_s0 + $0x90] sm:$0xff] }
 0x47a   :  { %v2687_v50 = vadd.f32 %v2686_v54, %v2608_v11 }
 0x47b   :  { %v5001_v14 = vunpack.c.l.b16 %v2981_v26  ;;  %v2897_v37 = vmax.f32 %v12044_v33, %v2843_v59 }
 0x47d   :  { %v12579_v47 = vpack.c.b16 %v5001_v14, %v5000_v4  ;;  %v2926_v17 = vadd.f32 %v12454_v3, %v2897_v37  ;;  %v9847_v4 = vld [vmem:[%s15932_s1 + $0x230] sm:$0xff] }
 0x47e   :  { %v2765_v5 = vpop.f32.mrf.mxu2 }
 0x47f   :  { %16586 = vst [vmem:[#allocation33_spill] sm:$0xff] %v12579_v47  ;;  %v2844_v58 = vpop.f32.mrf.mxu3  ;;  %v2766_v49 = vadd.f32 %v2765_v5, %v2687_v50  ;;  %v2610_v31 = vpop.f32.mrf.mxu0  ;;  %v2954_v32 = vmax.f32 %v2926_v17, 0.0  ;;  %v9846_v50 = vld [vmem:[%s15932_s1 + $0x30] sm:$0xff] }
 0x480   :  { %v2689_v41 = vpop.f32.mrf.mxu1  ;;  %v2611_v63 = vadd.f32 %v2610_v31, %v12085_v23  ;;  %v9842_v23 = vld [vmem:[%s15932_s1 + $0x38] sm:$0xff]  ;;  %v9848_v5 = vld [vmem:[%s15932_s1 + $0x70] sm:$0xff] }
 0x481   :  { %v2845_v28 = vadd.f32 %v2844_v58, %v2766_v49  ;;  %v2982_v30 = vpack.c.bf16 %v2954_v32, %v2954_v32 }
 0x482   :  { %v2690_v52 = vadd.f32 %v2689_v41, %v2611_v63  ;;  %3120 = vmatmul.bf16.vlgmr.msrb.gmra.mxu0 %v12057_v43  ;;  %3199 = vmatmul.bf16.vlgmr.msrb.gmra.mxu1 %v12063_v13  ;;  %v9843_v43 = vld [vmem:[%s15932_s1 + $0x238] sm:$0xff]  ;;  %v9850_v41 = vld [vmem:[%s15932_s1 + $0x28] sm:$0xff] }
 0x483   :  { %v2898_v33 = vmax.f32 %v12052_v60, %v2845_v28  ;;  %3278 = vmatmul.bf16.vlgmr.msrb.gmra.mxu2 %v12069_v55  ;;  %3744 = vmatpush.bf16.msrb.mxu0 %v9843_v43  ;;  %v9844_v60 = vld [vmem:[%s15932_s1 + $0x78] sm:$0xff]  ;;  %v5002_v17 = vunpack.c.l.b16 %v2982_v30  ;;  %v9851_v63 = vld [vmem:[%s15932_s1 + $0x228] sm:$0xff]  ;;  %v9856_v30 = vld [vmem:[%s15932_s1 + $0x60] sm:$0xff] }
 0x484   :  { %3357 = vmatmul.bf16.vlgmr.msrb.gmra.mxu3 %v9841_v15  ;;  %4042 = vmatpush.bf16.msrb.mxu2 %v9842_v23  ;;  %v9845_v55 = vld [vmem:[%s15932_s1 + $0x278] sm:$0xff] }
 0x485   :  { %v2927_v13 = vadd.f32 %v12454_v3, %v2898_v33  ;;  %4121 = vmatpush.bf16.msrb.mxu3 %v9844_v60  ;;  %3823 = vmatpush.bf16.msrb.mxu1 %v9845_v55  ;;  %v9854_v55 = vld [vmem:[%s15932_s1 + $0x20] sm:$0xff] }
 0x486   :  { %v2768_v35 = vpop.f32.mrf.mxu2 }
 0x487   :  { %v2847_v20 = vpop.f32.mrf.mxu3  ;;  %v2955_v45 = vmax.f32 %v2927_v13, 0.0  ;;  %v2769_v54 = vadd.f32 %v2768_v35, %v2690_v52  ;;  %v2612_v11 = vpop.f32.mrf.mxu0  ;;  %3745 = vmatpush.bf16.msrb.mxu0 %v9847_v4  ;;  %v9852_v52 = vld [vmem:[%s15932_s1 + $0x68] sm:$0xff]  ;;  %v9855_v35 = vld [vmem:[%s15932_s1 + $0x220] sm:$0xff] }
 0x488   :  { %v2691_v26 = vpop.f32.mrf.mxu1  ;;  %v2613_v59 = vadd.f32 %v2612_v11, %v12117_v61  ;;  %4043 = vmatpush.bf16.msrb.mxu2 %v9846_v50  ;;  %v9849_v61 = vld [vmem:[%s15932_s1 + $0x270] sm:$0xff] }
 0x489   :  { %v2983_v14 = vpack.c.bf16 %v2955_v45, %v2955_v45  ;;  %v2848_v37 = vadd.f32 %v2847_v20, %v2769_v54  ;;  %4122 = vmatpush.bf16.msrb.mxu3 %v9848_v5  ;;  %3824 = vmatpush.bf16.msrb.mxu1 %v9849_v61 }
 0x48a   :  { %v2692_v58 = vadd.f32 %v2691_v26, %v2613_v59  ;;  %v9858_v26 = vld [vmem:[%s15933_s0 + $0x98] sm:$0xff] }
 0x48b   :  { %v5003_v49 = vunpack.c.l.b16 %v2983_v14  ;;  %v2899_v31 = vmax.f32 %v12097_v48, %v2848_v37  ;;  %3746 = vmatpush.bf16.msrb.mxu0 %v9851_v63  ;;  %v9853_v48 = vld [vmem:[%s15932_s1 + $0x268] sm:$0xff]  ;;  %v9859_v59 = vld [vmem:[%s15932_s1 + $0x18] sm:$0xff] }
 0x48c   :  { %4044 = vmatpush.bf16.msrb.mxu2 %v9850_v41 }
 0x48d   :  { %v12623_v28 = vpack.c.b16 %v5003_v49, %v5002_v17  ;;  %4123 = vmatpush.bf16.msrb.mxu3 %v9852_v52  ;;  %3825 = vmatpush.bf16.msrb.mxu1 %v9853_v48  ;;  %v2928_v15 = vadd.f32 %v12454_v3, %v2899_v31  ;;  %v9863_v49 = vld [vmem:[%s15932_s1 + $0x10] sm:$0xff] }
 0x48e   :  { %v2770_v32 = vpop.f32.mrf.mxu2  ;;  %v9864_v31 = vld [vmem:[%s15932_s1 + $0x210] sm:$0xff] }
 0x48f   :  { %16587 = vst [vmem:[#allocation8_spill] sm:$0xff] %v12623_v28  ;;  %v2849_v33 = vpop.f32.mrf.mxu3  ;;  %v2771_v23 = vadd.f32 %v2770_v32, %v2692_v58  ;;  %v2615_v43 = vpop.f32.mrf.mxu0  ;;  %3747 = vmatpush.bf16.msrb.mxu0 %v9855_v35  ;;  %v2956_v54 = vmax.f32 %v2928_v15, 0.0  ;;  %v9865_v52 = vld [vmem:[%s15932_s1 + $0x50] sm:$0xff]  ;;  %v16588_v15 = vld [vmem:[#allocation51_spill] sm:$0xff] }
 0x490   :  { %v2694_v13 = vpop.f32.mrf.mxu1  ;;  %v2616_v60 = vadd.f32 %v2615_v43, %v12168_v46  ;;  %4045 = vmatpush.bf16.msrb.mxu2 %v9854_v55  ;;  %v9857_v46 = vld [vmem:[%s15932_s1 + $0x260] sm:$0xff]  ;;  %v9867_v43 = vld [vmem:[%s15932_s1 + $0x8] sm:$0xff] }
 0x491   :  { %v2850_v20 = vadd.f32 %v2849_v33, %v2771_v23  ;;  %4124 = vmatpush.bf16.msrb.mxu3 %v9856_v30  ;;  %3826 = vmatpush.bf16.msrb.mxu1 %v9857_v46  ;;  %v2984_v14 = vpack.c.bf16 %v2956_v54, %v2956_v54  ;;  %v9869_v55 = vld [vmem:[%s15932_s1 + $0x48] sm:$0xff] }
 0x492   :  { %v2695_v45 = vadd.f32 %v2694_v13, %v2616_v60  ;;  %3125 = vmatmul.bf16.gmra.mxu0 %v12140_v34  ;;  %3204 = vmatmul.bf16.gmra.mxu1 %v12146_v27  ;;  %v9860_v34 = vld [vmem:[%s15932_s1 + $0x218] sm:$0xff]  ;;  %v9868_v13 = vld [vmem:[%s15932_s1 + $0x208] sm:$0xff] }
 0x493   :  { %v2900_v11 = vmax.f32 %v12129_v7, %v2850_v20  ;;  %3283 = vmatmul.bf16.gmra.mxu2 %v12152_v38  ;;  %3748 = vmatpush.bf16.msrb.mxu0 %v9860_v34  ;;  %v9861_v7 = vld [vmem:[%s15932_s1 + $0x58] sm:$0xff]  ;;  %v5004_v32 = vunpack.c.l.b16 %v2984_v14  ;;  %v9870_v35 = vld [vmem:[%s15932_s1 + $0x248] sm:$0xff]  ;;  %v9871_v34 = vld [vmem:[%s15932_s1] sm:$0xff] }
 0x494   :  { %3362 = vmatmul.bf16.gmra.mxu3 %v9858_v26  ;;  %4046 = vmatpush.bf16.msrb.mxu2 %v9859_v59  ;;  %v9862_v38 = vld [vmem:[%s15932_s1 + $0x258] sm:$0xff] }
 0x495   :  { %v2929_v27 = vadd.f32 %v12454_v3, %v2900_v11  ;;  %4125 = vmatpush.bf16.msrb.mxu3 %v9861_v7  ;;  %3827 = vmatpush.bf16.msrb.mxu1 %v9862_v38  ;;  %v16590_v26 = vld [vmem:[#allocation57_spill] sm:$0xff]  ;;  %v9873_v38 = vld [vmem:[%s15932_s1 + $0x40] sm:$0xff] }
 0x496   :  { %v2773_v50 = vpop.f32.mrf.mxu2  ;;  %v16591_v14 = vld [vmem:[#allocation49_spill] sm:$0xff] }
 0x497   :  { %v2852_v4 = vpop.f32.mrf.mxu3  ;;  %v2957_v37 = vmax.f32 %v2929_v27, 0.0  ;;  %v2774_v5 = vadd.f32 %v2773_v50, %v2695_v45  ;;  %v2617_v61 = vpop.f32.mrf.mxu0  ;;  %3749 = vmatpush.bf16.msrb.mxu0 %v9864_v31  ;;  %v9872_v27 = vld [vmem:[%s15932_s1 + $0x200] sm:$0xff] }
 0x498   :  { %v2696_v58 = vpop.f32.mrf.mxu1  ;;  %v2618_v17 = vadd.f32 %v2617_v61, %v12200_v36  ;;  %4047 = vmatpush.bf16.msrb.mxu2 %v9863_v49  ;;  %v9866_v36 = vld [vmem:[%s15932_s1 + $0x250] sm:$0xff]  ;;  %v9874_v50 = vld [vmem:[%s15932_s1 + $0x240] sm:$0xff] }
 0x499   :  { %v2985_v41 = vpack.c.bf16 %v2957_v37, %v2957_v37  ;;  %v2853_v63 = vadd.f32 %v2852_v4, %v2774_v5  ;;  %4126 = vmatpush.bf16.msrb.mxu3 %v9865_v52  ;;  %3828 = vmatpush.bf16.msrb.mxu1 %v9866_v36  ;;  %v16592_v37 = vld [vmem:[#allocation55_spill] sm:$0xff]  ;;  %v16593_v61 = vld [vmem:[#allocation52_spill] sm:$0xff]  ;;  %v9875_v49 = vld [vmem:[%s15933_s0 + $0xa0] sm:$0xff] }
 0x49a   :  { %v2697_v48 = vadd.f32 %v2696_v58, %v2618_v17  ;;  %v16594_v17 = vld [vmem:[#allocation56_spill] sm:$0xff] }
 0x49b   :  { %v5005_v33 = vunpack.c.l.b16 %v2985_v41  ;;  %v2901_v23 = vmax.f32 %v16588_v15, %v2853_v63  ;;  %3750 = vmatpush.bf16.msrb.mxu0 %v9868_v13 }
 0x49c   :  { %4048 = vmatpush.bf16.msrb.mxu2 %v9867_v43 }
 0x49d   :  { %v12685_v60 = vpack.c.b16 %v5005_v33, %v5004_v32  ;;  %4127 = vmatpush.bf16.msrb.mxu3 %v9869_v55  ;;  %3829 = vmatpush.bf16.msrb.mxu1 %v9870_v35  ;;  %v2930_v46 = vadd.f32 %v12454_v3, %v2901_v23 }
 0x49e   :  { %v2775_v20 = vpop.f32.mrf.mxu2 }
 0x49f   :  { %16589 = vst [vmem:[#allocation10_spill] sm:$0xff] %v12685_v60  ;;  %v2854_v30 = vpop.f32.mrf.mxu3  ;;  %v2776_v45 = vadd.f32 %v2775_v20, %v2697_v48  ;;  %v2620_v54 = vpop.f32.mrf.mxu0  ;;  %3751 = vmatpush.bf16.msrb.mxu0 %v9872_v27  ;;  %v2958_v5 = vmax.f32 %v2930_v46, 0.0 }
 0x4a0   :  { %v2699_v11 = vpop.f32.mrf.mxu1  ;;  %v2621_v59 = vadd.f32 %v2620_v54, %v16590_v26  ;;  %4049 = vmatpush.bf16.msrb.mxu2 %v9871_v34  ;;  %v16596_v34 = vld [vmem:[#allocation61_spill] sm:$0xff] }
 0x4a1   :  { %v2855_v7 = vadd.f32 %v2854_v30, %v2776_v45  ;;  %4128 = vmatpush.bf16.msrb.mxu3 %v9873_v38  ;;  %3830 = vmatpush.bf16.msrb.mxu1 %v9874_v50  ;;  %v2986_v52 = vpack.c.bf16 %v2958_v5, %v2958_v5  ;;  %v16597_v38 = vld [vmem:[#allocation6_spill] sm:$0xff]  ;;  %v9876_v5 = vld [vmem:[%s15933_s0 + $0xa8] sm:$0xff] }
 0x4a2   :  { %v2700_v4 = vadd.f32 %v2699_v11, %v2621_v59  ;;  %3130 = vmatmul.bf16.gmra.mxu0 %v16591_v14  ;;  %3209 = vmatmul.bf16.gmra.mxu1 %v16592_v37  ;;  %v16598_v50 = vld [vmem:[#allocation58_spill] sm:$0xff]  ;;  %v16600_v37 = vld [vmem:[#allocation60_spill] sm:$0xff] }
 0x4a3   :  { %v2902_v58 = vmax.f32 %v16593_v61, %v2855_v7  ;;  %3288 = vmatmul.bf16.gmra.mxu2 %v16594_v17  ;;  %v5006_v55 = vunpack.c.l.b16 %v2986_v52  ;;  %v16599_v14 = vld [vmem:[#allocation54_spill] sm:$0xff] }
 0x4a4   :  { %3367 = vmatmul.bf16.gmra.mxu3 %v9875_v49 }
 0x4a5   :  { %v2931_v31 = vadd.f32 %v12454_v3, %v2902_v58 }
 0x4a6   :  { %v2778_v41 = vpop.f32.mrf.mxu2 }
 0x4a7   :  { %v2857_v63 = vpop.f32.mrf.mxu3  ;;  %v2959_v36 = vmax.f32 %v2931_v31, 0.0  ;;  %v2779_v48 = vadd.f32 %v2778_v41, %v2700_v4  ;;  %v2622_v32 = vpop.f32.mrf.mxu0 }
 0x4a8   :  { %v2701_v33 = vpop.f32.mrf.mxu1  ;;  %v2623_v15 = vadd.f32 %v2622_v32, %v12247_v56 }
 0x4a9   :  { %v2987_v23 = vpack.c.bf16 %v2959_v36, %v2959_v36  ;;  %v2858_v43 = vadd.f32 %v2857_v63, %v2779_v48 }
 0x4aa   :  { %v2702_v13 = vadd.f32 %v2701_v33, %v2623_v15 }
 0x4ab   :  { %v5007_v35 = vunpack.c.l.b16 %v2987_v23  ;;  %v2903_v20 = vmax.f32 %v12245_v0, %v2858_v43 }
 0x4ad   :  { %v12717_v30 = vpack.c.b16 %v5007_v35, %v5006_v55  ;;  %v2932_v54 = vadd.f32 %v12454_v3, %v2903_v20 }
 0x4ae   :  { %v2780_v46 = vpop.f32.mrf.mxu2 }
 0x4af   :  { %16595 = vst [vmem:[#allocation34_spill] sm:$0xff] %v12717_v30  ;;  %v2859_v45 = vpop.f32.mrf.mxu3  ;;  %v2781_v11 = vadd.f32 %v2780_v46, %v2702_v13  ;;  %v2625_v26 = vpop.f32.mrf.mxu0  ;;  %v2960_v4 = vmax.f32 %v2932_v54, 0.0 }
 0x4b0   :  { %v2704_v59 = vpop.f32.mrf.mxu1  ;;  %v2626_v27 = vadd.f32 %v2625_v26, %v16596_v34  ;;  %v16603_v34 = vld [vmem:[#allocation59_spill] sm:$0xff] }
 0x4b1   :  { %v2860_v7 = vadd.f32 %v2859_v45, %v2781_v11  ;;  %v2988_v49 = vpack.c.bf16 %v2960_v4, %v2960_v4  ;;  %v16602_v11 = vld [vmem:[#allocation65_spill] sm:$0xff] }
 0x4b2   :  { %v2705_v56 = vadd.f32 %v2704_v59, %v2626_v27  ;;  %3135 = vmatmul.bf16.gmra.mxu0 %v16597_v38  ;;  %3214 = vmatmul.bf16.gmra.mxu1 %v16598_v50  ;;  %v16604_v27 = vld [vmem:[#allocation2_spill] sm:$0xff]  ;;  %v16606_v38 = vld [vmem:[#allocation64_spill] sm:$0xff] }
 0x4b3   :  { %v2904_v0 = vmax.f32 %v16599_v14, %v2860_v7  ;;  %3293 = vmatmul.bf16.gmra.mxu2 %v16600_v37  ;;  %v5008_v15 = vunpack.c.l.b16 %v2988_v49  ;;  %v9877_v50 = vld [vmem:[%s15933_s0 + $0xb0] sm:$0xff] }
 0x4b4   :  { %3372 = vmatmul.bf16.gmra.mxu3 %v9876_v5 }
 0x4b5   :  { %v2933_v61 = vadd.f32 %v12454_v3, %v2904_v0 }
 0x4b6   :  { %v2783_v58 = vpop.f32.mrf.mxu2 }
 0x4b7   :  { %v2862_v17 = vpop.f32.mrf.mxu3  ;;  %v2961_v31 = vmax.f32 %v2933_v61, 0.0  ;;  %v2784_v41 = vadd.f32 %v2783_v58, %v2705_v56  ;;  %v2627_v63 = vpop.f32.mrf.mxu0  ;;  %v16605_v56 = vld [vmem:[#allocation62_spill] sm:$0xff] }
 0x4b8   :  { %v2706_v52 = vpop.f32.mrf.mxu1  ;;  %v2628_v36 = vadd.f32 %v2627_v63, %v12282_v25 }
 0x4b9   :  { %v2989_v48 = vpack.c.bf16 %v2961_v31, %v2961_v31  ;;  %v2863_v32 = vadd.f32 %v2862_v17, %v2784_v41 }
 0x4ba   :  { %v2707_v33 = vadd.f32 %v2706_v52, %v2628_v36 }
 0x4bb   :  { %v5009_v23 = vunpack.c.l.b16 %v2989_v48  ;;  %v2905_v43 = vmax.f32 %v12280_v21, %v2863_v32 }
 0x4bd   :  { %v12731_v13 = vpack.c.b16 %v5009_v23, %v5008_v15  ;;  %v2934_v20 = vadd.f32 %v12454_v3, %v2905_v43 }
 0x4be   :  { %v2785_v55 = vpop.f32.mrf.mxu2 }
 0x4bf   :  { %16601 = vst [vmem:[#allocation11_spill] sm:$0xff] %v12731_v13  ;;  %v2864_v35 = vpop.f32.mrf.mxu3  ;;  %v2786_v46 = vadd.f32 %v2785_v55, %v2707_v33  ;;  %v2630_v45 = vpop.f32.mrf.mxu0  ;;  %v2962_v7 = vmax.f32 %v2934_v20, 0.0  ;;  %v16608_v20 = vld [vmem:[#allocation70_spill] sm:$0xff] }
 0x4c0   :  { %v2709_v54 = vpop.f32.mrf.mxu1  ;;  %v2631_v26 = vadd.f32 %v2630_v45, %v16602_v11  ;;  %v16610_v11 = vld [vmem:[#allocation67_spill] sm:$0xff] }
 0x4c1   :  { %v2865_v59 = vadd.f32 %v2864_v35, %v2786_v46  ;;  %v2990_v37 = vpack.c.bf16 %v2962_v7, %v2962_v7 }
 0x4c2   :  { %v2710_v25 = vadd.f32 %v2709_v54, %v2631_v26  ;;  %3140 = vmatmul.bf16.gmra.mxu0 %v16603_v34  ;;  %3219 = vmatmul.bf16.gmra.mxu1 %v16604_v27  ;;  %v16609_v54 = vld [vmem:[#allocation63_spill] sm:$0xff]  ;;  %v9878_v34 = vld [vmem:[%s15933_s0 + $0xb8] sm:$0xff] }
 0x4c3   :  { %v2906_v21 = vmax.f32 %v16605_v56, %v2865_v59  ;;  %3298 = vmatmul.bf16.gmra.mxu2 %v16606_v38  ;;  %v5010_v52 = vunpack.c.l.b16 %v2990_v37  ;;  %v16611_v59 = vld [vmem:[#allocation66_spill] sm:$0xff] }
 0x4c4   :  { %3377 = vmatmul.bf16.gmra.mxu3 %v9877_v50 }
 0x4c5   :  { %v2935_v4 = vadd.f32 %v12454_v3, %v2906_v21 }
 0x4c6   :  { %v2788_v14 = vpop.f32.mrf.mxu2 }
 0x4c7   :  { %v2867_v0 = vpop.f32.mrf.mxu3  ;;  %v2963_v5 = vmax.f32 %v2935_v4, 0.0  ;;  %v2789_v61 = vadd.f32 %v2788_v14, %v2710_v25  ;;  %v2632_v58 = vpop.f32.mrf.mxu0  ;;  %v16612_v25 = vld [vmem:[#allocation69_spill] sm:$0xff] }
 0x4c8   :  { %v2711_v17 = vpop.f32.mrf.mxu1  ;;  %v2633_v49 = vadd.f32 %v2632_v58, %v12317_v9 }
 0x4c9   :  { %v2991_v31 = vpack.c.bf16 %v2963_v5, %v2963_v5  ;;  %v2868_v41 = vadd.f32 %v2867_v0, %v2789_v61 }
 0x4ca   :  { %v2712_v63 = vadd.f32 %v2711_v17, %v2633_v49 }
 0x4cb   :  { %v5011_v36 = vunpack.c.l.b16 %v2991_v31  ;;  %v2907_v48 = vmax.f32 %v12315_v24, %v2868_v41 }
 0x4cd   :  { %v12745_v32 = vpack.c.b16 %v5011_v36, %v5010_v52  ;;  %v2936_v23 = vadd.f32 %v12454_v3, %v2907_v48 }
 0x4ce   :  { %v2790_v33 = vpop.f32.mrf.mxu2 }
 0x4cf   :  { %16607 = vst [vmem:[#allocation38_spill] sm:$0xff] %v12745_v32  ;;  %v2869_v15 = vpop.f32.mrf.mxu3  ;;  %v2791_v43 = vadd.f32 %v2790_v33, %v2712_v63  ;;  %v2635_v55 = vpop.f32.mrf.mxu0  ;;  %v2964_v26 = vmax.f32 %v2936_v23, 0.0 }
 0x4d0   :  { %v2714_v35 = vpop.f32.mrf.mxu1  ;;  %v2636_v46 = vadd.f32 %v2635_v55, %v16608_v20  ;;  %v16615_v55 = vld [vmem:[#allocation68_spill] sm:$0xff]  ;;  %v16616_v20 = vld [vmem:[#allocation71_spill] sm:$0xff] }
 0x4d1   :  { %v2870_v45 = vadd.f32 %v2869_v15, %v2791_v43  ;;  %v2992_v21 = vpack.c.bf16 %v2964_v26, %v2964_v26  ;;  %v16614_v43 = vld [vmem:[#allocation4_spill] sm:$0xff] }
 0x4d2   :  { %v2715_v9 = vadd.f32 %v2714_v35, %v2636_v46  ;;  %3145 = vmatmul.bf16.gmra.mxu0 %v16609_v54  ;;  %3224 = vmatmul.bf16.gmra.mxu1 %v16610_v11  ;;  %v16617_v46 = vld [vmem:[#allocation12_spill] sm:$0xff] }
 0x4d3   :  { %v2908_v24 = vmax.f32 %v16611_v59, %v2870_v45  ;;  %3303 = vmatmul.bf16.gmra.mxu2 %v16612_v25  ;;  %v5096_v58 = vunpack.c.l.b16 %v2992_v21  ;;  %v9879_v45 = vld [vmem:[%s15933_s0 + $0xc0] sm:$0xff] }
 0x4d4   :  { %3382 = vmatmul.bf16.gmra.mxu3 %v9878_v34 }
 0x4d5   :  { %v2937_v27 = vadd.f32 %v12454_v3, %v2908_v24 }
 0x4d6   :  { %v2793_v7 = vpop.f32.mrf.mxu2 }
 0x4d7   :  { %v2872_v56 = vpop.f32.mrf.mxu3  ;;  %v2965_v38 = vmax.f32 %v2937_v27, 0.0  ;;  %v2794_v50 = vadd.f32 %v2793_v7, %v2715_v9  ;;  %v2637_v4 = vpop.f32.mrf.mxu0 }
 0x4d8   :  { %v2716_v14 = vpop.f32.mrf.mxu1  ;;  %v2638_v0 = vadd.f32 %v2637_v4, %v12352_v12 }
 0x4d9   :  { %v2993_v37 = vpack.c.bf16 %v2965_v38, %v2965_v38  ;;  %v2873_v5 = vadd.f32 %v2872_v56, %v2794_v50 }
 0x4da   :  { %v2717_v61 = vadd.f32 %v2716_v14, %v2638_v0 }
 0x4db   :  { %v5097_v17 = vunpack.c.l.b16 %v2993_v37  ;;  %v2909_v49 = vmax.f32 %v12350_v29, %v2873_v5 }
 0x4dd   :  { %v12759_v31 = vpack.c.b16 %v5097_v17, %v5096_v58  ;;  %v2938_v52 = vadd.f32 %v12454_v3, %v2909_v49  ;;  %v16619_v17 = vld [vmem:[#allocation25_spill] sm:$0xff] }
 0x4de   :  { %v2795_v41 = vpop.f32.mrf.mxu2 }
 0x4df   :  { %16613 = vst [vmem:[#allocation16_spill] sm:$0xff] %v12759_v31  ;;  %v2874_v63 = vpop.f32.mrf.mxu3  ;;  %v2796_v36 = vadd.f32 %v2795_v41, %v2717_v61  ;;  %v2640_v48 = vpop.f32.mrf.mxu0  ;;  %v2966_v35 = vmax.f32 %v2938_v52, 0.0  ;;  %v16621_v52 = vld [vmem:[#allocation14_spill] sm:$0xff] }
 0x4e0   :  { %v2719_v33 = vpop.f32.mrf.mxu1  ;;  %v2641_v15 = vadd.f32 %v2640_v48, %v12379_v51  ;;  %v16622_v48 = vld [vmem:[#allocation72_spill] sm:$0xff] }
 0x4e1   :  { %v2875_v23 = vadd.f32 %v2874_v63, %v2796_v36  ;;  %v2994_v11 = vpack.c.bf16 %v2966_v35, %v2966_v35  ;;  %v16620_v63 = vld [vmem:[#allocation74_spill] sm:$0xff] }
 0x4e2   :  { %v2720_v12 = vadd.f32 %v2719_v33, %v2641_v15  ;;  %3150 = vmatmul.bf16.gmra.mxu0 %v16614_v43  ;;  %3229 = vmatmul.bf16.gmra.mxu1 %v16615_v55  ;;  %v16623_v33 = vld [vmem:[#allocation73_spill] sm:$0xff]  ;;  %v9880_v15 = vld [vmem:[%s15933_s0 + $0xc8] sm:$0xff] }
 0x4e3   :  { %v2910_v29 = vmax.f32 %v16616_v20, %v2875_v23  ;;  %3308 = vmatmul.bf16.gmra.mxu2 %v16617_v46  ;;  %v5098_v21 = vunpack.c.l.b16 %v2994_v11 }
 0x4e4   :  { %3387 = vmatmul.bf16.gmra.mxu3 %v9879_v45 }
 0x4e5   :  { %v2939_v9 = vadd.f32 %v12454_v3, %v2910_v29 }
 0x4e6   :  { %v2798_v54 = vpop.f32.mrf.mxu2 }
 0x4e7   :  { %v2877_v51 = vpop.f32.mrf.mxu3  ;;  %v2967_v26 = vmax.f32 %v2939_v9, 0.0  ;;  %v2799_v59 = vadd.f32 %v2798_v54, %v2720_v12  ;;  %v2642_v24 = vpop.f32.mrf.mxu0 }
 0x4e8   :  { %v2721_v25 = vpop.f32.mrf.mxu1  ;;  %v2643_v34 = vadd.f32 %v2642_v24, %v12387_v1 }
 0x4e9   :  { %v2995_v27 = vpack.c.bf16 %v2967_v26, %v2967_v26  ;;  %v2878_v7 = vadd.f32 %v2877_v51, %v2799_v59  ;;  %v16624_v59 = vld [vmem:[#allocation15_spill] sm:$0xff] }
 0x4ea   :  { %v2722_v56 = vadd.f32 %v2721_v25, %v2643_v34 }
 0x4eb   :  { %v5099_v38 = vunpack.c.l.b16 %v2995_v27  ;;  %v2911_v50 = vmax.f32 %v12385_v2, %v2878_v7 }
 0x4ed   :  { %v12773_v4 = vpack.c.b16 %v5099_v38, %v5098_v21  ;;  %v2940_v37 = vadd.f32 %v12454_v3, %v2911_v50 }
 0x4ee   :  { %v2800_v14 = vpop.f32.mrf.mxu2 }
 0x4ef   :  { %16618 = vst [vmem:[#allocation17_spill] sm:$0xff] %v12773_v4  ;;  %v2879_v0 = vpop.f32.mrf.mxu3  ;;  %v2801_v5 = vadd.f32 %v2800_v14, %v2722_v56  ;;  %v2645_v61 = vpop.f32.mrf.mxu0  ;;  %v2968_v36 = vmax.f32 %v2940_v37, 0.0 }
 0x4f0   :  { %v2724_v58 = vpop.f32.mrf.mxu1  ;;  %v2646_v49 = vadd.f32 %v2645_v61, %v16619_v17  ;;  %v9881_v17 = vld [vmem:[%s15933_s0 + $0xd0] sm:$0xff] }
 0x4f1   :  { %v2880_v41 = vadd.f32 %v2879_v0, %v2801_v5  ;;  %v2996_v55 = vpack.c.bf16 %v2968_v36, %v2968_v36  ;;  %v16626_v0 = vld [vmem:[#allocation29_spill] sm:$0xff]  ;;  %v16628_v5 = vld [vmem:[#allocation75_spill] sm:$0xff] }
 0x4f2   :  { %v2725_v1 = vadd.f32 %v2724_v58, %v2646_v49  ;;  %3155 = vmatmul.bf16.gmra.mxu0 %v16620_v63  ;;  %3234 = vmatmul.bf16.gmra.mxu1 %v16621_v52  ;;  %v16629_v58 = vld [vmem:[#allocation3_spill] sm:$0xff] }
 0x4f3   :  { %v2912_v2 = vmax.f32 %v16622_v48, %v2880_v41  ;;  %3313 = vmatmul.bf16.gmra.mxu2 %v16623_v33  ;;  %v5120_v11 = vunpack.c.l.b16 %v2996_v55 }
 0x4f4   :  { %3392 = vmatmul.bf16.gmra.mxu3 %v9880_v15 }
 0x4f5   :  { %v2941_v23 = vadd.f32 %v12454_v3, %v2912_v2 }
 0x4f6   :  { %v2803_v12 = vpop.f32.mrf.mxu2 }
 0x4f7   :  { %v2882_v43 = vpop.f32.mrf.mxu3  ;;  %v2969_v35 = vmax.f32 %v2941_v23, 0.0  ;;  %v2804_v20 = vadd.f32 %v2803_v12, %v2725_v1  ;;  %v2647_v29 = vpop.f32.mrf.mxu0 }
 0x4f8   :  { %v2726_v46 = vpop.f32.mrf.mxu1  ;;  %v2648_v45 = vadd.f32 %v2647_v29, %v12422_v39  ;;  %v16627_v39 = vld [vmem:[#allocation30_spill] sm:$0xff] }
 0x4f9   :  { %v2997_v9 = vpack.c.bf16 %v2969_v35, %v2969_v35  ;;  %v2883_v54 = vadd.f32 %v2882_v43, %v2804_v20 }
 0x4fa   :  { %v2727_v51 = vadd.f32 %v2726_v46, %v2648_v45 }
 0x4fb   :  { %v5121_v26 = vunpack.c.l.b16 %v2997_v9  ;;  %v2913_v24 = vmax.f32 %v16624_v59, %v2883_v54  ;;  %v16631_v54 = vld [vmem:[#allocation22_spill] sm:$0xff] }
 0x4fd   :  { %v12787_v25 = vpack.c.b16 %v5121_v26, %v5120_v11  ;;  %v2942_v7 = vadd.f32 %v12454_v3, %v2913_v24  ;;  %v16633_v11 = vld [vmem:[#allocation24_spill] sm:$0xff]  ;;  %v9882_v26 = vld [vmem:[%s15933_s0 + $0xd8] sm:$0xff] }
 0x4fe   :  { %v2805_v34 = vpop.f32.mrf.mxu2 }
 0x4ff   :  { %16625 = vst [vmem:[#allocation39_spill] sm:$0xff] %v12787_v25  ;;  %v2884_v27 = vpop.f32.mrf.mxu3  ;;  %v2806_v56 = vadd.f32 %v2805_v34, %v2727_v51  ;;  %v3121_v21 = vpop.f32.mrf.mxu0  ;;  %v2970_v37 = vmax.f32 %v2942_v7, 0.0  ;;  %v16632_v51 = vld [vmem:[#allocation9_spill] sm:$0xff] }
 0x500   :  { %v3200_v38 = vpop.f32.mrf.mxu1 }
 0x501   :  { %v3201_v50 = vadd.f32 %v3200_v38, %v3121_v21  ;;  %v2885_v14 = vadd.f32 %v2884_v27, %v2806_v56  ;;  %v2998_v63 = vpack.c.bf16 %v2970_v37, %v2970_v37 }
 0x502   :  { %3160 = vmatmul.bf16.gmra.mxu0 %v16626_v0  ;;  %3239 = vmatmul.bf16.gmra.mxu1 %v16627_v39 }
 0x503   :  { %v2914_v61 = vmax.f32 %v16628_v5, %v2885_v14  ;;  %3318 = vmatmul.bf16.gmra.mxu2 %v16629_v58  ;;  %v5122_v12 = vunpack.c.l.b16 %v2998_v63 }
 0x504   :  { %3397 = vmatmul.bf16.gmra.mxu3 %v9881_v17 }
 0x505   :  { %v2943_v49 = vadd.f32 %v12454_v3, %v2914_v61  ;;  %v9883_v61 = vld [vmem:[%s15933_s0 + $0xe0] sm:$0xff] }
 0x506   :  { %v3279_v41 = vpop.f32.mrf.mxu2 }
 0x507   :  { %v3358_v1 = vpop.f32.mrf.mxu3  ;;  %v2971_v52 = vmax.f32 %v2943_v49, 0.0  ;;  %v3280_v36 = vadd.f32 %v3279_v41, %v3201_v50  ;;  %v3123_v48 = vpop.f32.mrf.mxu0 }
 0x508   :  { %v3202_v2 = vpop.f32.mrf.mxu1 }
 0x509   :  { %v3203_v33 = vadd.f32 %v3202_v2, %v3123_v48  ;;  %v2999_v15 = vpack.c.bf16 %v2971_v52, %v2971_v52  ;;  %v12798_v23 = vadd.f32 %v3358_v1, %v3280_v36 }
 0x50b   :  { %v5123_v43 = vunpack.c.l.b16 %v2999_v15  ;;  %v9884_v15 = vld [vmem:[%s15933_s0 + $0xe8] sm:$0xff] }
 0x50d   :  { %v12800_v55 = vpack.c.b16 %v5123_v43, %v5122_v12 }
 0x50e   :  { %v3281_v35 = vpop.f32.mrf.mxu2 }
 0x50f   :  { %16630 = vst [vmem:[#allocation23_spill] sm:$0xff] %v12800_v55  ;;  %v3360_v20 = vpop.f32.mrf.mxu3  ;;  %v3282_v29 = vadd.f32 %v3281_v35, %v3203_v33  ;;  %v3126_v46 = vpop.f32.mrf.mxu0 }
 0x510   :  { %v3205_v3 = vpop.f32.mrf.mxu1 }
 0x511   :  { %v3206_v45 = vadd.f32 %v3205_v3, %v3126_v46  ;;  %v12802_v9 = vadd.f32 %v3360_v20, %v3282_v29 }
 0x512   :  { %3165 = vmatmul.bf16.gmra.mxu0 %v16631_v54  ;;  %3244 = vmatmul.bf16.gmra.mxu1 %v16632_v51 }
 0x513   :  { %3323 = vmatmul.bf16.gmra.mxu2 %v16633_v11 }
 0x514   :  { %3402 = vmatmul.bf16.gmra.mxu3 %v9882_v26  ;;  %v12839_v26 = vld [vmem:[%s15933_s0 + $0x70] sm:$0xff] }
 0x516   :  { %v3284_v59 = vpop.f32.mrf.mxu2 }
 0x517   :  { %v3363_v24 = vpop.f32.mrf.mxu3  ;;  %v3285_v34 = vadd.f32 %v3284_v59, %v3206_v45  ;;  %v3128_v27 = vpop.f32.mrf.mxu0  ;;  %v9886_v59 = vld [vmem:[%s15933_s0 + $0xf0] sm:$0xff] }
 0x518   :  { %v3207_v7 = vpop.f32.mrf.mxu1 }
 0x519   :  { %v3208_v56 = vadd.f32 %v3207_v7, %v3128_v27  ;;  %v12810_v21 = vadd.f32 %v3363_v24, %v3285_v34 }
 0x51e   :  { %v3286_v38 = vpop.f32.mrf.mxu2 }
 0x51f   :  { %v3365_v50 = vpop.f32.mrf.mxu3  ;;  %v3287_v14 = vadd.f32 %v3286_v38, %v3208_v56  ;;  %v3131_v0 = vpop.f32.mrf.mxu0 }
 0x520   :  { %v3210_v39 = vpop.f32.mrf.mxu1 }
 0x521   :  { %v3211_v37 = vadd.f32 %v3210_v39, %v3131_v0  ;;  %v12812_v5 = vadd.f32 %v3365_v50, %v3287_v14 }
 0x522   :  { %3170 = vmatmul.bf16.gmra.mxu0 %v12488_v18  ;;  %3249 = vmatmul.bf16.gmra.mxu1 %v12494_v42 }
 0x523   :  { %3328 = vmatmul.bf16.gmra.mxu2 %v12501_v40 }
 0x524   :  { %3407 = vmatmul.bf16.gmra.mxu3 %v9883_v61 }
 0x526   :  { %v3289_v58 = vpop.f32.mrf.mxu2 }
 0x527   :  { %v3368_v17 = vpop.f32.mrf.mxu3  ;;  %v3290_v49 = vadd.f32 %v3289_v58, %v3211_v37  ;;  %v3133_v41 = vpop.f32.mrf.mxu0  ;;  %v12854_v58 = vld [vmem:[%s15933_s0 + $0x78] sm:$0xff] }
 0x528   :  { %v3212_v1 = vpop.f32.mrf.mxu1 }
 0x529   :  { %v3213_v63 = vadd.f32 %v3212_v1, %v3133_v41  ;;  %v12820_v52 = vadd.f32 %v3368_v17, %v3290_v49  ;;  %v9888_v17 = vld [vmem:[%s15933_s0 + $0xf8] sm:$0xff] }
 0x52e   :  { %v3291_v36 = vpop.f32.mrf.mxu2 }
 0x52f   :  { %v3370_v48 = vpop.f32.mrf.mxu3  ;;  %v3292_v18 = vadd.f32 %v3291_v36, %v3213_v63  ;;  %v3136_v2 = vpop.f32.mrf.mxu0 }
 0x530   :  { %v3215_v42 = vpop.f32.mrf.mxu1 }
 0x531   :  { %v3216_v33 = vadd.f32 %v3215_v42, %v3136_v2  ;;  %v12822_v40 = vadd.f32 %v3370_v48, %v3292_v18  ;;  %v12865_v2 = vld [vmem:[%s15933_s0 + $0x110] sm:$0xff] }
 0x532   :  { %3175 = vmatmul.bf16.gmra.mxu0 %v12515_v16  ;;  %3254 = vmatmul.bf16.gmra.mxu1 %v12521_v53 }
 0x533   :  { %3333 = vmatmul.bf16.gmra.mxu2 %v12528_v19 }
 0x534   :  { %3412 = vmatmul.bf16.gmra.mxu3 %v9884_v15 }
 0x536   :  { %v3294_v12 = vpop.f32.mrf.mxu2 }
 0x537   :  { %v3373_v43 = vpop.f32.mrf.mxu3  ;;  %v3295_v35 = vadd.f32 %v3294_v12, %v3216_v33  ;;  %v3138_v20 = vpop.f32.mrf.mxu0 }
 0x538   :  { %v3217_v29 = vpop.f32.mrf.mxu1 }
 0x539   :  { %v3218_v46 = vadd.f32 %v3217_v29, %v3138_v20  ;;  %v12830_v3 = vadd.f32 %v3373_v43, %v3295_v35  ;;  %v9889_v35 = vld [vmem:[%s15933_s0 + $0x100] sm:$0xff]  ;;  %v12882_v29 = vld [vmem:[%s15933_s0 + $0x10] sm:$0xff] }
 0x53a   :  { %v12876_v20 = vld [vmem:[%s15933_s0 + $0x180] sm:$0xff] }
 0x53e   :  { %v3296_v45 = vpop.f32.mrf.mxu2 }
 0x53f   :  { %v3375_v54 = vpop.f32.mrf.mxu3  ;;  %v3297_v16 = vadd.f32 %v3296_v45, %v3218_v46  ;;  %v3141_v51 = vpop.f32.mrf.mxu0  ;;  %v9892_v46 = vld [vmem:[%s15932_s1 + $0x138] sm:$0xff] }
 0x540   :  { %v3220_v53 = vpop.f32.mrf.mxu1  ;;  %v9893_v45 = vld [vmem:[%s15932_s1 + $0xb8] sm:$0xff] }
 0x541   :  { %v3221_v11 = vadd.f32 %v3220_v53, %v3141_v51  ;;  %v12832_v19 = vadd.f32 %v3375_v54, %v3297_v16  ;;  %v9894_v54 = vld [vmem:[%s15932_s1 + $0x178] sm:$0xff] }
 0x542   :  { %3180 = vmatmul.bf16.gmra.mxu0 %v12542_v57  ;;  %3259 = vmatmul.bf16.gmra.mxu1 %v12548_v10  ;;  %v9895_v16 = vld [vmem:[%s15932_s1 + $0xf8] sm:$0xff] }
 0x543   :  { %3338 = vmatmul.bf16.gmra.mxu2 %v12839_v26 }
 0x544   :  { %3417 = vmatmul.bf16.gmra.mxu3 %v9886_v59 }
 0x546   :  { %v3299_v24 = vpop.f32.mrf.mxu2 }
 0x547   :  { %v3378_v34 = vpop.f32.mrf.mxu3  ;;  %v3300_v27 = vadd.f32 %v3299_v24, %v3221_v11  ;;  %v3143_v7 = vpop.f32.mrf.mxu0 }
 0x548   :  { %v3222_v56 = vpop.f32.mrf.mxu1 }
 0x549   :  { %v3223_v57 = vadd.f32 %v3222_v56, %v3143_v7  ;;  %v12845_v38 = vadd.f32 %v3378_v34, %v3300_v27  ;;  %v9896_v27 = vld [vmem:[%s15932_s1 + $0x130] sm:$0xff] }
 0x54a   :  { %v9897_v7 = vld [vmem:[%s15932_s1 + $0xb0] sm:$0xff] }
 0x54e   :  { %v3301_v10 = vpop.f32.mrf.mxu2 }
 0x54f   :  { %v3380_v50 = vpop.f32.mrf.mxu3  ;;  %v3302_v14 = vadd.f32 %v3301_v10, %v3223_v57  ;;  %v3146_v0 = vpop.f32.mrf.mxu0  ;;  %v9898_v57 = vld [vmem:[%s15932_s1 + $0x170] sm:$0xff] }
 0x550   :  { %v3225_v39 = vpop.f32.mrf.mxu1  ;;  %v9899_v10 = vld [vmem:[%s15932_s1 + $0xf0] sm:$0xff] }
 0x551   :  { %v3226_v37 = vadd.f32 %v3225_v39, %v3146_v0  ;;  %v12847_v61 = vadd.f32 %v3380_v50, %v3302_v14  ;;  %v9900_v50 = vld [vmem:[%s15932_s1 + $0x128] sm:$0xff] }
 0x552   :  { %3185 = vmatmul.bf16.gmra.mxu0 %v12564_v22  ;;  %3264 = vmatmul.bf16.gmra.mxu1 %v12570_v6  ;;  %v9901_v14 = vld [vmem:[%s15932_s1 + $0xa8] sm:$0xff] }
 0x553   :  { %3343 = vmatmul.bf16.gmra.mxu2 %v12854_v58  ;;  %v9902_v0 = vld [vmem:[%s15932_s1 + $0x168] sm:$0xff] }
 0x554   :  { %3422 = vmatmul.bf16.gmra.mxu3 %v9888_v17  ;;  %v9903_v39 = vld [vmem:[%s15932_s1 + $0xe8] sm:$0xff] }
 0x556   :  { %v3304_v49 = vpop.f32.mrf.mxu2 }
 0x557   :  { %v3383_v41 = vpop.f32.mrf.mxu3  ;;  %v3305_v1 = vadd.f32 %v3304_v49, %v3226_v37  ;;  %v3148_v63 = vpop.f32.mrf.mxu0  ;;  %v12926_v49 = vld [vmem:[%s15933_s0 + $0x118] sm:$0xff] }
 0x558   :  { %v3227_v36 = vpop.f32.mrf.mxu1 }
 0x559   :  { %v3228_v22 = vadd.f32 %v3227_v36, %v3148_v63  ;;  %v12860_v48 = vadd.f32 %v3383_v41, %v3305_v1 }
 0x55e   :  { %v3306_v6 = vpop.f32.mrf.mxu2 }
 0x55f   :  { %v3385_v18 = vpop.f32.mrf.mxu3  ;;  %v3307_v42 = vadd.f32 %v3306_v6, %v3228_v22  ;;  %v3151_v33 = vpop.f32.mrf.mxu0  ;;  %v9904_v22 = vld [vmem:[%s15932_s1 + $0x120] sm:$0xff] }
 0x560   :  { %v3230_v15 = vpop.f32.mrf.mxu1  ;;  %v9905_v6 = vld [vmem:[%s15932_s1 + $0xa0] sm:$0xff] }
 0x561   :  { %v3231_v12 = vadd.f32 %v3230_v15, %v3151_v33  ;;  %v12867_v43 = vadd.f32 %v3385_v18, %v3307_v42  ;;  %v9906_v42 = vld [vmem:[%s15932_s1 + $0x160] sm:$0xff]  ;;  %v9908_v15 = vld [vmem:[%s15933_s0 + $0x108] sm:$0xff] }
 0x562   :  { %3436 = vmatmul.bf16.vlgmr.msra.gmra.mxu0 %v12865_v2  ;;  %3515 = vmatmul.bf16.vlgmr.msra.gmra.mxu1 %v9889_v35  ;;  %v9907_v33 = vld [vmem:[%s15932_s1 + $0xe0] sm:$0xff]  ;;  %v12955_v35 = vld [vmem:[%s15933_s0 + $0x18] sm:$0xff] }
 0x563   :  { %3594 = vmatmul.bf16.vlgmr.msra.gmra.mxu2 %v12876_v20  ;;  %4200 = vmatpush.bf16.msra.mxu0 %v9893_v45  ;;  %v9912_v45 = vld [vmem:[%s15932_s1 + $0x98] sm:$0xff] }
 0x564   :  { %3673 = vmatmul.bf16.vlgmr.msra.gmra.mxu3 %v12882_v29  ;;  %4358 = vmatpush.bf16.msra.mxu2 %v9892_v46  ;;  %v9911_v46 = vld [vmem:[%s15932_s1 + $0x118] sm:$0xff] }
 0x565   :  { %4465 = vmatpush.bf16.msra.mxu3 %v9894_v54  ;;  %4279 = vmatpush.bf16.msra.mxu1 %v9895_v16  ;;  %v9913_v54 = vld [vmem:[%s15932_s1 + $0x158] sm:$0xff] }
 0x566   :  { %v3309_v51 = vpop.f32.mrf.mxu2  ;;  %v9914_v16 = vld [vmem:[%s15932_s1 + $0xd8] sm:$0xff] }
 0x567   :  { %v3388_v53 = vpop.f32.mrf.mxu3  ;;  %v3310_v11 = vadd.f32 %v3309_v51, %v3231_v12  ;;  %v3153_v59 = vpop.f32.mrf.mxu0  ;;  %4201 = vmatpush.bf16.msra.mxu0 %v9897_v7  ;;  %v12949_v12 = vld [vmem:[%s15933_s0 + $0x188] sm:$0xff]  ;;  %v9916_v7 = vld [vmem:[%s15932_s1 + $0x90] sm:$0xff] }
 0x568   :  { %v3232_v24 = vpop.f32.mrf.mxu1  ;;  %4359 = vmatpush.bf16.msra.mxu2 %v9896_v27  ;;  %v9915_v27 = vld [vmem:[%s15932_s1 + $0x110] sm:$0xff] }
 0x569   :  { %v3233_v34 = vadd.f32 %v3232_v24, %v3153_v59  ;;  %v12903_v56 = vadd.f32 %v3388_v53, %v3310_v11  ;;  %4466 = vmatpush.bf16.msra.mxu3 %v9898_v57  ;;  %4280 = vmatpush.bf16.msra.mxu1 %v9899_v10  ;;  %v9917_v10 = vld [vmem:[%s15932_s1 + $0x150] sm:$0xff] }
 0x56b   :  { %4202 = vmatpush.bf16.msra.mxu0 %v9901_v14  ;;  %v9919_v14 = vld [vmem:[%s15932_s1 + $0x108] sm:$0xff] }
 0x56c   :  { %4360 = vmatpush.bf16.msra.mxu2 %v9900_v50  ;;  %v9918_v50 = vld [vmem:[%s15932_s1 + $0xd0] sm:$0xff] }
 0x56d   :  { %4467 = vmatpush.bf16.msra.mxu3 %v9902_v0  ;;  %4281 = vmatpush.bf16.msra.mxu1 %v9903_v39  ;;  %v9920_v0 = vld [vmem:[%s15932_s1 + $0x88] sm:$0xff] }
 0x56e   :  { %v3311_v37 = vpop.f32.mrf.mxu2  ;;  %v9921_v39 = vld [vmem:[%s15932_s1 + $0x148] sm:$0xff] }
 0x56f   :  { %v3390_v17 = vpop.f32.mrf.mxu3  ;;  %v3312_v41 = vadd.f32 %v3311_v37, %v3233_v34  ;;  %v3156_v1 = vpop.f32.mrf.mxu0  ;;  %4203 = vmatpush.bf16.msra.mxu0 %v9905_v6  ;;  %v9922_v37 = vld [vmem:[%s15932_s1 + $0xc8] sm:$0xff] }
 0x570   :  { %v3235_v63 = vpop.f32.mrf.mxu1  ;;  %4361 = vmatpush.bf16.msra.mxu2 %v9904_v22 }
 0x571   :  { %v3236_v36 = vadd.f32 %v3235_v63, %v3156_v1  ;;  %v12934_v18 = vadd.f32 %v3390_v17, %v3312_v41  ;;  %4468 = vmatpush.bf16.msra.mxu3 %v9906_v42  ;;  %4282 = vmatpush.bf16.msra.mxu1 %v9907_v33  ;;  %v12999_v1 = vld [vmem:[%s15933_s0 + $0x120] sm:$0xff] }
 0x572   :  { %3441 = vmatmul.bf16.gmra.mxu0 %v12926_v49  ;;  %3520 = vmatmul.bf16.gmra.mxu1 %v9908_v15  ;;  %v9923_v42 = vld [vmem:[%s15932_s1 + $0x100] sm:$0xff] }
 0x573   :  { %3599 = vmatmul.bf16.gmra.mxu2 %v12949_v12  ;;  %4204 = vmatpush.bf16.msra.mxu0 %v9912_v45  ;;  %v9924_v33 = vld [vmem:[%s15932_s1 + $0x80] sm:$0xff] }
 0x574   :  { %3678 = vmatmul.bf16.gmra.mxu3 %v12955_v35  ;;  %4362 = vmatpush.bf16.msra.mxu2 %v9911_v46  ;;  %v9925_v46 = vld [vmem:[%s15932_s1 + $0x140] sm:$0xff] }
 0x575   :  { %4469 = vmatpush.bf16.msra.mxu3 %v9913_v54  ;;  %4283 = vmatpush.bf16.msra.mxu1 %v9914_v16  ;;  %v9926_v45 = vld [vmem:[%s15932_s1 + $0xc0] sm:$0xff]  ;;  %v9927_v54 = vld [vmem:[%s15933_s0 + $0x110] sm:$0xff] }
 0x576   :  { %v3314_v51 = vpop.f32.mrf.mxu2  ;;  %v13022_v16 = vld [vmem:[%s15933_s0 + $0x190] sm:$0xff] }
 0x577   :  { %v3393_v53 = vpop.f32.mrf.mxu3  ;;  %v3315_v11 = vadd.f32 %v3314_v51, %v3236_v36  ;;  %v3158_v59 = vpop.f32.mrf.mxu0  ;;  %4205 = vmatpush.bf16.msra.mxu0 %v9916_v7  ;;  %v13028_v51 = vld [vmem:[%s15933_s0 + $0x20] sm:$0xff] }
 0x578   :  { %v3237_v24 = vpop.f32.mrf.mxu1  ;;  %4363 = vmatpush.bf16.msra.mxu2 %v9915_v27 }
 0x579   :  { %v3238_v34 = vadd.f32 %v3237_v24, %v3158_v59  ;;  %v12976_v57 = vadd.f32 %v3393_v53, %v3315_v11  ;;  %4470 = vmatpush.bf16.msra.mxu3 %v9917_v10  ;;  %4284 = vmatpush.bf16.msra.mxu1 %v9918_v50 }
 0x57b   :  { %4206 = vmatpush.bf16.msra.mxu0 %v9920_v0 }
 0x57c   :  { %4364 = vmatpush.bf16.msra.mxu2 %v9919_v14  ;;  %v13036_v14 = vld [vmem:[%s15933_s0 + $0x128] sm:$0xff] }
 0x57d   :  { %4471 = vmatpush.bf16.msra.mxu3 %v9921_v39  ;;  %4285 = vmatpush.bf16.msra.mxu1 %v9922_v37 }
 0x57e   :  { %v3316_v17 = vpop.f32.mrf.mxu2 }
 0x57f   :  { %v3395_v41 = vpop.f32.mrf.mxu3  ;;  %v3317_v63 = vadd.f32 %v3316_v17, %v3238_v34  ;;  %v3161_v36 = vpop.f32.mrf.mxu0  ;;  %4207 = vmatpush.bf16.msra.mxu0 %v9924_v33 }
 0x580   :  { %v3240_v22 = vpop.f32.mrf.mxu1  ;;  %4365 = vmatpush.bf16.msra.mxu2 %v9923_v42 }
 0x581   :  { %v3241_v6 = vadd.f32 %v3240_v22, %v3161_v36  ;;  %v13007_v15 = vadd.f32 %v3395_v41, %v3317_v63  ;;  %4472 = vmatpush.bf16.msra.mxu3 %v9925_v46  ;;  %4286 = vmatpush.bf16.msra.mxu1 %v9926_v45  ;;  %v9930_v63 = vld [vmem:[%s15933_s0 + $0x118] sm:$0xff]  ;;  %v13053_v22 = vld [vmem:[%s15933_s0 + $0x28] sm:$0xff] }
 0x582   :  { %3446 = vmatmul.bf16.gmra.mxu0 %v12999_v1  ;;  %3525 = vmatmul.bf16.gmra.mxu1 %v9927_v54  ;;  %v13047_v36 = vld [vmem:[%s15933_s0 + $0x198] sm:$0xff] }
 0x583   :  { %3604 = vmatmul.bf16.gmra.mxu2 %v13022_v16 }
 0x584   :  { %3683 = vmatmul.bf16.gmra.mxu3 %v13028_v51 }
 0x586   :  { %v3319_v53 = vpop.f32.mrf.mxu2 }
 0x587   :  { %v3398_v11 = vpop.f32.mrf.mxu3  ;;  %v3320_v59 = vadd.f32 %v3319_v53, %v3241_v6  ;;  %v3163_v24 = vpop.f32.mrf.mxu0 }
 0x588   :  { %v3242_v34 = vpop.f32.mrf.mxu1 }
 0x589   :  { %v3243_v27 = vadd.f32 %v3242_v34, %v3163_v24  ;;  %v13031_v7 = vadd.f32 %v3398_v11, %v3320_v59  ;;  %v13061_v24 = vld [vmem:[%s15933_s0 + $0x130] sm:$0xff] }
 0x58e   :  { %v3321_v10 = vpop.f32.mrf.mxu2 }
 0x58f   :  { %v3400_v50 = vpop.f32.mrf.mxu3  ;;  %v3322_v0 = vadd.f32 %v3321_v10, %v3243_v27  ;;  %v3166_v39 = vpop.f32.mrf.mxu0 }
 0x590   :  { %v3245_v37 = vpop.f32.mrf.mxu1 }
 0x591   :  { %v3246_v17 = vadd.f32 %v3245_v37, %v3166_v39  ;;  %v13038_v41 = vadd.f32 %v3400_v50, %v3322_v0  ;;  %v9933_v39 = vld [vmem:[%s15933_s0 + $0x120] sm:$0xff] }
 0x592   :  { %3451 = vmatmul.bf16.gmra.mxu0 %v13036_v14  ;;  %3530 = vmatmul.bf16.gmra.mxu1 %v9930_v63  ;;  %v13072_v37 = vld [vmem:[%s15933_s0 + $0x1a0] sm:$0xff] }
 0x593   :  { %3609 = vmatmul.bf16.gmra.mxu2 %v13047_v36 }
 0x594   :  { %3688 = vmatmul.bf16.gmra.mxu3 %v13053_v22 }
 0x596   :  { %v3324_v6 = vpop.f32.mrf.mxu2 }
 0x597   :  { %v3403_v42 = vpop.f32.mrf.mxu3  ;;  %v3325_v33 = vadd.f32 %v3324_v6, %v3246_v17  ;;  %v3168_v46 = vpop.f32.mrf.mxu0  ;;  %v13078_v17 = vld [vmem:[%s15933_s0 + $0x30] sm:$0xff] }
 0x598   :  { %v3247_v45 = vpop.f32.mrf.mxu1 }
 0x599   :  { %v3248_v54 = vadd.f32 %v3247_v45, %v3168_v46  ;;  %v13056_v53 = vadd.f32 %v3403_v42, %v3325_v33 }
 0x59e   :  { %v3326_v11 = vpop.f32.mrf.mxu2 }
 0x59f   :  { %v3405_v59 = vpop.f32.mrf.mxu3  ;;  %v3327_v34 = vadd.f32 %v3326_v11, %v3248_v54  ;;  %v3171_v27 = vpop.f32.mrf.mxu0 }
 0x5a0   :  { %v3250_v10 = vpop.f32.mrf.mxu1 }
 0x5a1   :  { %v3251_v50 = vadd.f32 %v3250_v10, %v3171_v27  ;;  %v13063_v0 = vadd.f32 %v3405_v59, %v3327_v34  ;;  %v13086_v34 = vld [vmem:[%s15933_s0 + $0x138] sm:$0xff] }
 0x5a2   :  { %3456 = vmatmul.bf16.gmra.mxu0 %v13061_v24  ;;  %3535 = vmatmul.bf16.gmra.mxu1 %v9933_v39 }
 0x5a3   :  { %3614 = vmatmul.bf16.gmra.mxu2 %v13072_v37 }
 0x5a4   :  { %3693 = vmatmul.bf16.gmra.mxu3 %v13078_v17 }
 0x5a6   :  { %v3329_v63 = vpop.f32.mrf.mxu2 }
 0x5a7   :  { %v3408_v6 = vpop.f32.mrf.mxu3  ;;  %v3330_v42 = vadd.f32 %v3329_v63, %v3251_v50  ;;  %v3173_v33 = vpop.f32.mrf.mxu0  ;;  %v9936_v50 = vld [vmem:[%s15933_s0 + $0x128] sm:$0xff] }
 0x5a8   :  { %v3252_v46 = vpop.f32.mrf.mxu1  ;;  %v13097_v63 = vld [vmem:[%s15933_s0 + $0x1a8] sm:$0xff] }
 0x5a9   :  { %v3253_v45 = vadd.f32 %v3252_v46, %v3173_v33  ;;  %v13081_v54 = vadd.f32 %v3408_v6, %v3330_v42  ;;  %v13103_v6 = vld [vmem:[%s15933_s0 + $0x38] sm:$0xff] }
 0x5ae   :  { %v3331_v11 = vpop.f32.mrf.mxu2 }
 0x5af   :  { %v3410_v59 = vpop.f32.mrf.mxu3  ;;  %v3332_v27 = vadd.f32 %v3331_v11, %v3253_v45  ;;  %v3176_v10 = vpop.f32.mrf.mxu0 }
 0x5b0   :  { %v3255_v39 = vpop.f32.mrf.mxu1 }
 0x5b1   :  { %v3256_v55 = vadd.f32 %v3255_v39, %v3176_v10  ;;  %v13088_v25 = vadd.f32 %v3410_v59, %v3332_v27 }
 0x5b2   :  { %3461 = vmatmul.bf16.gmra.mxu0 %v13086_v34  ;;  %3540 = vmatmul.bf16.gmra.mxu1 %v9936_v50  ;;  %v13111_v50 = vld [vmem:[%s15933_s0 + $0x140] sm:$0xff] }
 0x5b3   :  { %3619 = vmatmul.bf16.gmra.mxu2 %v13097_v63 }
 0x5b4   :  { %3698 = vmatmul.bf16.gmra.mxu3 %v13103_v6 }
 0x5b6   :  { %v3334_v42 = vpop.f32.mrf.mxu2 }
 0x5b7   :  { %v3413_v33 = vpop.f32.mrf.mxu3  ;;  %v3335_v46 = vadd.f32 %v3334_v42, %v3256_v55  ;;  %v3178_v45 = vpop.f32.mrf.mxu0  ;;  %v9939_v55 = vld [vmem:[%s15933_s0 + $0x130] sm:$0xff] }
 0x5b8   :  { %v3257_v11 = vpop.f32.mrf.mxu1  ;;  %v13122_v42 = vld [vmem:[%s15933_s0 + $0x1b0] sm:$0xff] }
 0x5b9   :  { %v3258_v59 = vadd.f32 %v3257_v11, %v3178_v45  ;;  %v13106_v27 = vadd.f32 %v3413_v33, %v3335_v46 }
 0x5be   :  { %v3336_v10 = vpop.f32.mrf.mxu2 }
 0x5bf   :  { %v3415_v39 = vpop.f32.mrf.mxu3  ;;  %v3337_v4 = vadd.f32 %v3336_v10, %v3258_v59  ;;  %v3181_v31 = vpop.f32.mrf.mxu0 }
 0x5c0   :  { %v3260_v32 = vpop.f32.mrf.mxu1 }
 0x5c1   :  { %v3261_v13 = vadd.f32 %v3260_v32, %v3181_v31  ;;  %v13113_v30 = vadd.f32 %v3415_v39, %v3337_v4  ;;  %v13128_v32 = vld [vmem:[%s15933_s0 + $0x40] sm:$0xff] }
 0x5c2   :  { %3466 = vmatmul.bf16.gmra.mxu0 %v13111_v50  ;;  %3545 = vmatmul.bf16.gmra.mxu1 %v9939_v55  ;;  %v13136_v55 = vld [vmem:[%s15933_s0 + $0x148] sm:$0xff] }
 0x5c3   :  { %3624 = vmatmul.bf16.gmra.mxu2 %v13122_v42  ;;  %16634 = vst [vmem:[#allocation43_spill] sm:$0xff] %v13136_v55 }
 0x5c4   :  { %3703 = vmatmul.bf16.gmra.mxu3 %v13128_v32 }
 0x5c6   :  { %v3339_v31 = vpop.f32.mrf.mxu2 }
 0x5c7   :  { %v3418_v4 = vpop.f32.mrf.mxu3  ;;  %v3340_v33 = vadd.f32 %v3339_v31, %v3261_v13  ;;  %v3183_v46 = vpop.f32.mrf.mxu0  ;;  %v9942_v13 = vld [vmem:[%s15933_s0 + $0x138] sm:$0xff] }
 0x5c8   :  { %v3262_v45 = vpop.f32.mrf.mxu1  ;;  %v13147_v31 = vld [vmem:[%s15933_s0 + $0x1b8] sm:$0xff] }
 0x5c9   :  { %v3263_v11 = vadd.f32 %v3262_v45, %v3183_v46  ;;  %v13131_v59 = vadd.f32 %v3418_v4, %v3340_v33  ;;  %16636 = vst [vmem:[#allocation20_spill] sm:$0xff] %v13147_v31 }
 0x5ce   :  { %v3341_v10 = vpop.f32.mrf.mxu2 }
 0x5cf   :  { %v3420_v39 = vpop.f32.mrf.mxu3  ;;  %v3342_v60 = vadd.f32 %v3341_v10, %v3263_v11  ;;  %v3186_v28 = vpop.f32.mrf.mxu0 }
 0x5d0   :  { %v3265_v47 = vpop.f32.mrf.mxu1 }
 0x5d1   :  { %v3266_v62 = vadd.f32 %v3265_v47, %v3186_v28  ;;  %v13138_v8 = vadd.f32 %v3420_v39, %v3342_v60  ;;  %v13153_v47 = vld [vmem:[%s15933_s0 + $0x48] sm:$0xff] }
 0x5d2   :  { %3471 = vmatmul.bf16.gmra.mxu0 %v13136_v55  ;;  %3550 = vmatmul.bf16.gmra.mxu1 %v9942_v13  ;;  %16637 = vst [vmem:[#allocation21_spill] sm:$0xff] %v13153_v47  ;;  %v13161_v13 = vld [vmem:[%s15933_s0 + $0x150] sm:$0xff] }
 0x5d3   :  { %16635 = vst [vmem:[#allocation26_spill] sm:$0xff] %v13138_v8  ;;  %3629 = vmatmul.bf16.gmra.mxu2 %v13147_v31 }
 0x5d4   :  { %3708 = vmatmul.bf16.gmra.mxu3 %v13153_v47  ;;  %16638 = vst [vmem:[#allocation48_spill] sm:$0xff] %v13161_v13 }
 0x5d6   :  { %v3344_v28 = vpop.f32.mrf.mxu2 }
 0x5d7   :  { %v3423_v60 = vpop.f32.mrf.mxu3  ;;  %v3345_v4 = vadd.f32 %v3344_v28, %v3266_v62  ;;  %v3188_v33 = vpop.f32.mrf.mxu0  ;;  %v9945_v62 = vld [vmem:[%s15933_s0 + $0x140] sm:$0xff] }
 0x5d8   :  { %v3267_v46 = vpop.f32.mrf.mxu1  ;;  %v13175_v28 = vld [vmem:[%s15933_s0 + $0x1c0] sm:$0xff] }
 0x5d9   :  { %v3268_v45 = vadd.f32 %v3267_v46, %v3188_v33  ;;  %v13156_v11 = vadd.f32 %v3423_v60, %v3345_v4  ;;  %16640 = vst [vmem:[#allocation28_spill] sm:$0xff] %v13175_v28 }
 0x5de   :  { %v3346_v10 = vpop.f32.mrf.mxu2 }
 0x5df   :  { %v3425_v39 = vpop.f32.mrf.mxu3  ;;  %v3347_v44 = vadd.f32 %v3346_v10, %v3268_v45  ;;  %v3437_v31 = vpop.f32.mrf.mxu0 }
 0x5e0   :  { %v3516_v55 = vpop.f32.mrf.mxu1  ;;  %v13164_v47 = vadd.f32 %v3437_v31, %v12798_v23  ;;  %v13181_v23 = vld [vmem:[%s15933_s0 + $0x50] sm:$0xff] }
 0x5e1   :  { %v13166_v8 = vadd.f32 %v3425_v39, %v3347_v44  ;;  %16641 = vst [vmem:[#allocation19_spill] sm:$0xff] %v13181_v23 }
 0x5e2   :  { %16639 = vst [vmem:[#allocation27_spill] sm:$0xff] %v13164_v47  ;;  %3476 = vmatmul.bf16.gmra.mxu0 %v13161_v13  ;;  %3555 = vmatmul.bf16.gmra.mxu1 %v9945_v62  ;;  %v13192_v62 = vld [vmem:[%s15933_s0 + $0x158] sm:$0xff] }
 0x5e3   :  { %3634 = vmatmul.bf16.gmra.mxu2 %v13175_v28  ;;  %16643 = vst [vmem:[#allocation53_spill] sm:$0xff] %v13192_v62 }
 0x5e4   :  { %3713 = vmatmul.bf16.gmra.mxu3 %v13181_v23 }
 0x5e6   :  { %v3595_v44 = vpop.f32.mrf.mxu2 }
 0x5e7   :  { %v3674_v31 = vpop.f32.mrf.mxu3  ;;  %v3596_v60 = vadd.f32 %v3595_v44, %v3516_v55  ;;  %v3439_v4 = vpop.f32.mrf.mxu0  ;;  %v13206_v44 = vld [vmem:[%s15933_s0 + $0x1c8] sm:$0xff] }
 0x5e8   :  { %v3518_v33 = vpop.f32.mrf.mxu1  ;;  %v13185_v46 = vadd.f32 %v3439_v4, %v12802_v9  ;;  %v9948_v9 = vld [vmem:[%s15933_s0 + $0x148] sm:$0xff]  ;;  %16645 = vst [vmem:[#allocation32_spill] sm:$0xff] %v13206_v44 }
 0x5e9   :  { %v13187_v45 = vadd.f32 %v3674_v31, %v3596_v60 }
 0x5ea   :  { %16642 = vst [vmem:[#allocation35_spill] sm:$0xff] %v13185_v46 }
 0x5ee   :  { %v3597_v10 = vpop.f32.mrf.mxu2 }
 0x5ef   :  { %v3676_v39 = vpop.f32.mrf.mxu3  ;;  %v3598_v47 = vadd.f32 %v3597_v10, %v3518_v33  ;;  %v3442_v28 = vpop.f32.mrf.mxu0 }
 0x5f0   :  { %v3521_v23 = vpop.f32.mrf.mxu1  ;;  %v13195_v13 = vadd.f32 %v3442_v28, %v12810_v21  ;;  %v13212_v21 = vld [vmem:[%s15933_s0 + $0x58] sm:$0xff] }
 0x5f1   :  { %v13197_v55 = vadd.f32 %v3676_v39, %v3598_v47  ;;  %16646 = vst [vmem:[#allocation36_spill] sm:$0xff] %v13212_v21 }
 0x5f2   :  { %16644 = vst [vmem:[#allocation31_spill] sm:$0xff] %v13195_v13  ;;  %3481 = vmatmul.bf16.gmra.mxu0 %v13192_v62  ;;  %3560 = vmatmul.bf16.gmra.mxu1 %v9948_v9  ;;  %v13223_v13 = vld [vmem:[%s15933_s0 + $0x160] sm:$0xff] }
 0x5f3   :  { %3639 = vmatmul.bf16.gmra.mxu2 %v13206_v44  ;;  %16648 = vst [vmem:[#allocation40_spill] sm:$0xff] %v13223_v13 }
 0x5f4   :  { %3718 = vmatmul.bf16.gmra.mxu3 %v13212_v21 }
 0x5f6   :  { %v3600_v47 = vpop.f32.mrf.mxu2 }
 0x5f7   :  { %v3679_v28 = vpop.f32.mrf.mxu3  ;;  %v3601_v31 = vadd.f32 %v3600_v47, %v3521_v23  ;;  %v3444_v60 = vpop.f32.mrf.mxu0  ;;  %v13237_v47 = vld [vmem:[%s15933_s0 + $0x1d0] sm:$0xff] }
 0x5f8   :  { %v3523_v4 = vpop.f32.mrf.mxu1  ;;  %v13216_v33 = vadd.f32 %v3444_v60, %v12812_v5  ;;  %v9951_v5 = vld [vmem:[%s15933_s0 + $0x150] sm:$0xff]  ;;  %16650 = vst [vmem:[#allocation41_spill] sm:$0xff] %v13237_v47 }
 0x5f9   :  { %v13218_v10 = vadd.f32 %v3679_v28, %v3601_v31 }
 0x5fa   :  { %16647 = vst [vmem:[#allocation37_spill] sm:$0xff] %v13216_v33 }
 0x5fe   :  { %v3602_v39 = vpop.f32.mrf.mxu2 }
 0x5ff   :  { %v3681_v9 = vpop.f32.mrf.mxu3  ;;  %v3603_v44 = vadd.f32 %v3602_v39, %v3523_v4  ;;  %v3447_v62 = vpop.f32.mrf.mxu0 }
 0x600   :  { %v3526_v21 = vpop.f32.mrf.mxu1  ;;  %v13226_v46 = vadd.f32 %v3447_v62, %v12820_v52  ;;  %v13243_v52 = vld [vmem:[%s15933_s0 + $0x60] sm:$0xff] }
 0x601   :  { %v13228_v23 = vadd.f32 %v3681_v9, %v3603_v44  ;;  %16651 = vst [vmem:[#allocation46_spill] sm:$0xff] %v13243_v52 }
 0x602   :  { %16649 = vst [vmem:[#allocation42_spill] sm:$0xff] %v13226_v46  ;;  %3486 = vmatmul.bf16.gmra.mxu0 %v13223_v13  ;;  %3565 = vmatmul.bf16.gmra.mxu1 %v9951_v5  ;;  %v13254_v46 = vld [vmem:[%s15933_s0 + $0x168] sm:$0xff] }
 0x603   :  { %3644 = vmatmul.bf16.gmra.mxu2 %v13237_v47  ;;  %16653 = vst [vmem:[#allocation45_spill] sm:$0xff] %v13254_v46 }
 0x604   :  { %3723 = vmatmul.bf16.gmra.mxu3 %v13243_v52 }
 0x606   :  { %v3605_v62 = vpop.f32.mrf.mxu2 }
 0x607   :  { %v3684_v44 = vpop.f32.mrf.mxu3  ;;  %v3606_v28 = vadd.f32 %v3605_v62, %v3526_v21  ;;  %v3449_v31 = vpop.f32.mrf.mxu0  ;;  %v13268_v62 = vld [vmem:[%s15933_s0 + $0x1d8] sm:$0xff] }
 0x608   :  { %v3528_v60 = vpop.f32.mrf.mxu1  ;;  %v13247_v4 = vadd.f32 %v3449_v31, %v12822_v40  ;;  %v9954_v40 = vld [vmem:[%s15933_s0 + $0x158] sm:$0xff]  ;;  %16655 = vst [vmem:[#allocation44_spill] sm:$0xff] %v13268_v62 }
 0x609   :  { %v13249_v39 = vadd.f32 %v3684_v44, %v3606_v28 }
 0x60a   :  { %16652 = vst [vmem:[#allocation47_spill] sm:$0xff] %v13247_v4 }
 0x60e   :  { %v3607_v9 = vpop.f32.mrf.mxu2 }
 0x60f   :  { %v3686_v5 = vpop.f32.mrf.mxu3  ;;  %v3608_v47 = vadd.f32 %v3607_v9, %v3528_v60  ;;  %v3452_v13 = vpop.f32.mrf.mxu0 }
 0x610   :  { %v3531_v52 = vpop.f32.mrf.mxu1  ;;  %v13257_v33 = vadd.f32 %v3452_v13, %v12830_v3  ;;  %v13274_v3 = vld [vmem:[%s15933_s0 + $0x68] sm:$0xff] }
 0x611   :  { %v13259_v21 = vadd.f32 %v3686_v5, %v3608_v47  ;;  %16656 = vst [vmem:[#allocation51_spill] sm:$0xff] %v13274_v3 }
 0x612   :  { %16654 = vst [vmem:[#allocation50_spill] sm:$0xff] %v13257_v33  ;;  %3491 = vmatmul.bf16.gmra.mxu0 %v13254_v46  ;;  %3570 = vmatmul.bf16.gmra.mxu1 %v9954_v40  ;;  %v13285_v33 = vld [vmem:[%s15933_s0 + $0x170] sm:$0xff] }
 0x613   :  { %3649 = vmatmul.bf16.gmra.mxu2 %v13268_v62  ;;  %16658 = vst [vmem:[#allocation49_spill] sm:$0xff] %v13285_v33 }
 0x614   :  { %3728 = vmatmul.bf16.gmra.mxu3 %v13274_v3 }
 0x616   :  { %v3610_v13 = vpop.f32.mrf.mxu2 }
 0x617   :  { %v3689_v47 = vpop.f32.mrf.mxu3  ;;  %v3611_v44 = vadd.f32 %v3610_v13, %v3531_v52  ;;  %v3454_v28 = vpop.f32.mrf.mxu0  ;;  %v13299_v13 = vld [vmem:[%s15933_s0 + $0x1e0] sm:$0xff] }
 0x618   :  { %v3533_v31 = vpop.f32.mrf.mxu1  ;;  %v13278_v60 = vadd.f32 %v3454_v28, %v12832_v19  ;;  %v9957_v19 = vld [vmem:[%s15933_s0 + $0x160] sm:$0xff]  ;;  %16660 = vst [vmem:[#allocation52_spill] sm:$0xff] %v13299_v13 }
 0x619   :  { %v13280_v9 = vadd.f32 %v3689_v47, %v3611_v44 }
 0x61a   :  { %16657 = vst [vmem:[#allocation57_spill] sm:$0xff] %v13278_v60 }
 0x61e   :  { %v3612_v5 = vpop.f32.mrf.mxu2 }
 0x61f   :  { %v3691_v40 = vpop.f32.mrf.mxu3  ;;  %v3613_v62 = vadd.f32 %v3612_v5, %v3533_v31  ;;  %v3457_v46 = vpop.f32.mrf.mxu0 }
 0x620   :  { %v3536_v3 = vpop.f32.mrf.mxu1  ;;  %v13288_v4 = vadd.f32 %v3457_v46, %v12845_v38 }
 0x621   :  { %v13290_v52 = vadd.f32 %v3691_v40, %v3613_v62 }
 0x622   :  { %16659 = vst [vmem:[#allocation55_spill] sm:$0xff] %v13288_v4  ;;  %3496 = vmatmul.bf16.gmra.mxu0 %v13285_v33  ;;  %3575 = vmatmul.bf16.gmra.mxu1 %v9957_v19  ;;  %v13311_v19 = vld [vmem:[%s15933_s0 + $0x178] sm:$0xff] }
 0x623   :  { %3654 = vmatmul.bf16.gmra.mxu2 %v13299_v13  ;;  %16662 = vst [vmem:[#allocation61_spill] sm:$0xff] %v13311_v19 }
 0x624   :  { %3733 = vmatmul.bf16.gmra.mxu3 %v12839_v26 }
 0x626   :  { %v3615_v38 = vpop.f32.mrf.mxu2 }
 0x627   :  { %v3694_v46 = vpop.f32.mrf.mxu3  ;;  %v3616_v62 = vadd.f32 %v3615_v38, %v3536_v3  ;;  %v3459_v47 = vpop.f32.mrf.mxu0  ;;  %v13325_v38 = vld [vmem:[%s15933_s0 + $0x1e8] sm:$0xff] }
 0x628   :  { %v3538_v44 = vpop.f32.mrf.mxu1  ;;  %v13304_v28 = vadd.f32 %v3459_v47, %v12847_v61  ;;  %v9959_v61 = vld [vmem:[%s15933_s0 + $0x168] sm:$0xff]  ;;  %16664 = vst [vmem:[#allocation58_spill] sm:$0xff] %v13325_v38 }
 0x629   :  { %v13306_v31 = vadd.f32 %v3694_v46, %v3616_v62 }
 0x62a   :  { %16661 = vst [vmem:[#allocation56_spill] sm:$0xff] %v13304_v28 }
 0x62e   :  { %v3617_v5 = vpop.f32.mrf.mxu2 }
 0x62f   :  { %v3696_v40 = vpop.f32.mrf.mxu3  ;;  %v3618_v4 = vadd.f32 %v3617_v5, %v3538_v44  ;;  %v3462_v13 = vpop.f32.mrf.mxu0 }
 0x630   :  { %v3541_v26 = vpop.f32.mrf.mxu1  ;;  %v13314_v33 = vadd.f32 %v3462_v13, %v12860_v48 }
 0x631   :  { %v13316_v3 = vadd.f32 %v3696_v40, %v3618_v4 }
 0x632   :  { %16663 = vst [vmem:[#allocation6_spill] sm:$0xff] %v13314_v33  ;;  %3501 = vmatmul.bf16.gmra.mxu0 %v13311_v19  ;;  %3580 = vmatmul.bf16.gmra.mxu1 %v9959_v61 }
 0x633   :  { %3659 = vmatmul.bf16.gmra.mxu2 %v13325_v38 }
 0x634   :  { %3738 = vmatmul.bf16.gmra.mxu3 %v12854_v58  ;;  %v13342_v58 = vld [vmem:[%s15933_s0 + $0x90] sm:$0xff] }
 0x636   :  { %v3620_v48 = vpop.f32.mrf.mxu2 }
 0x637   :  { %v3699_v13 = vpop.f32.mrf.mxu3  ;;  %v3621_v4 = vadd.f32 %v3620_v48, %v3541_v26  ;;  %v3464_v46 = vpop.f32.mrf.mxu0 }
 0x638   :  { %v3543_v62 = vpop.f32.mrf.mxu1  ;;  %v13330_v47 = vadd.f32 %v3464_v46, %v12867_v43  ;;  %v9962_v43 = vld [vmem:[%s15932_s1 + $0x238] sm:$0xff]  ;;  %v9966_v46 = vld [vmem:[%s15932_s1 + $0x230] sm:$0xff] }
 0x639   :  { %v13332_v44 = vadd.f32 %v3699_v13, %v3621_v4 }
 0x63e   :  { %v3622_v5 = vpop.f32.mrf.mxu2 }
 0x63f   :  { %v3701_v40 = vpop.f32.mrf.mxu3  ;;  %v3623_v61 = vadd.f32 %v3622_v5, %v3543_v62  ;;  %v3467_v33 = vpop.f32.mrf.mxu0  ;;  %v9967_v62 = vld [vmem:[%s15932_s1 + $0x1b0] sm:$0xff] }
 0x640   :  { %v3546_v19 = vpop.f32.mrf.mxu1  ;;  %v13335_v28 = vadd.f32 %v3467_v33, %v12903_v56  ;;  %v9963_v56 = vld [vmem:[%s15932_s1 + $0x1b8] sm:$0xff] }
 0x641   :  { %v13337_v38 = vadd.f32 %v3701_v40, %v3623_v61  ;;  %v9964_v33 = vld [vmem:[%s15932_s1 + $0x278] sm:$0xff]  ;;  %v9970_v40 = vld [vmem:[%s15932_s1 + $0x228] sm:$0xff] }
 0x642   :  { %3752 = vmatmul.bf16.vlgmr.msrb.gmra.mxu0 %v13342_v58  ;;  %3831 = vmatmul.bf16.vlgmr.msrb.gmra.mxu1 %v12865_v2  ;;  %v9965_v2 = vld [vmem:[%s15932_s1 + $0x1f8] sm:$0xff]  ;;  %v9971_v61 = vld [vmem:[%s15932_s1 + $0x1a8] sm:$0xff] }
 0x643   :  { %4050 = vmatmul.bf16.vlgmr.msrb.gmra.mxu2 %v12876_v20  ;;  %4544 = vmatpush.bf16.msrb.mxu0 %v9963_v56  ;;  %v9973_v56 = vld [vmem:[%s15932_s1 + $0x1e8] sm:$0xff] }
 0x644   :  { %4129 = vmatmul.bf16.vlgmr.msrb.gmra.mxu3 %v12882_v29  ;;  %4702 = vmatpush.bf16.msrb.mxu2 %v9962_v43  ;;  %v9972_v43 = vld [vmem:[%s15932_s1 + $0x268] sm:$0xff] }
 0x645   :  { %4781 = vmatpush.bf16.msrb.mxu3 %v9964_v33  ;;  %4623 = vmatpush.bf16.msrb.mxu1 %v9965_v2 }
 0x646   :  { %v3625_v20 = vpop.f32.mrf.mxu2 }
 0x647   :  { %v3704_v29 = vpop.f32.mrf.mxu3  ;;  %v3626_v26 = vadd.f32 %v3625_v20, %v3546_v19  ;;  %v3469_v48 = vpop.f32.mrf.mxu0  ;;  %4545 = vmatpush.bf16.msrb.mxu0 %v9967_v62  ;;  %v9968_v19 = vld [vmem:[%s15932_s1 + $0x270] sm:$0xff]  ;;  %v9975_v62 = vld [vmem:[%s15932_s1 + $0x1a0] sm:$0xff] }
 0x648   :  { %v3548_v13 = vpop.f32.mrf.mxu1  ;;  %v13361_v4 = vadd.f32 %v3469_v48, %v12934_v18  ;;  %4703 = vmatpush.bf16.msrb.mxu2 %v9966_v46  ;;  %v9969_v18 = vld [vmem:[%s15932_s1 + $0x1f0] sm:$0xff]  ;;  %v9974_v46 = vld [vmem:[%s15932_s1 + $0x220] sm:$0xff] }
 0x649   :  { %v13369_v5 = vadd.f32 %v3704_v29, %v3626_v26  ;;  %4782 = vmatpush.bf16.msrb.mxu3 %v9968_v19  ;;  %4624 = vmatpush.bf16.msrb.mxu1 %v9969_v18  ;;  %v13409_v18 = vld [vmem:[%s15933_s0 + $0x98] sm:$0xff] }
 0x64b   :  { %4546 = vmatpush.bf16.msrb.mxu0 %v9971_v61  ;;  %v9980_v61 = vld [vmem:[%s15932_s1 + $0x198] sm:$0xff] }
 0x64c   :  { %4704 = vmatpush.bf16.msrb.mxu2 %v9970_v40  ;;  %v9979_v40 = vld [vmem:[%s15932_s1 + $0x218] sm:$0xff] }
 0x64d   :  { %4783 = vmatpush.bf16.msrb.mxu3 %v9972_v43  ;;  %4625 = vmatpush.bf16.msrb.mxu1 %v9973_v56  ;;  %v9981_v43 = vld [vmem:[%s15932_s1 + $0x258] sm:$0xff] }
 0x64e   :  { %v3627_v33 = vpop.f32.mrf.mxu2 }
 0x64f   :  { %v3706_v2 = vpop.f32.mrf.mxu3  ;;  %v3628_v20 = vadd.f32 %v3627_v33, %v3548_v13  ;;  %v3472_v29 = vpop.f32.mrf.mxu0  ;;  %4547 = vmatpush.bf16.msrb.mxu0 %v9975_v62  ;;  %v9976_v13 = vld [vmem:[%s15932_s1 + $0x260] sm:$0xff] }
 0x650   :  { %v3551_v26 = vpop.f32.mrf.mxu1  ;;  %v13390_v48 = vadd.f32 %v3472_v29, %v12976_v57  ;;  %4705 = vmatpush.bf16.msrb.mxu2 %v9974_v46  ;;  %v9977_v57 = vld [vmem:[%s15932_s1 + $0x1e0] sm:$0xff]  ;;  %v9983_v29 = vld [vmem:[%s15932_s1 + $0x210] sm:$0xff] }
 0x651   :  { %v13398_v19 = vadd.f32 %v3706_v2, %v3628_v20  ;;  %4784 = vmatpush.bf16.msrb.mxu3 %v9976_v13  ;;  %4626 = vmatpush.bf16.msrb.mxu1 %v9977_v57  ;;  %v9984_v46 = vld [vmem:[%s15932_s1 + $0x190] sm:$0xff]  ;;  %v9987_v13 = vld [vmem:[%s15932_s1 + $0x208] sm:$0xff] }
 0x652   :  { %3757 = vmatmul.bf16.gmra.mxu0 %v13409_v18  ;;  %3836 = vmatmul.bf16.gmra.mxu1 %v12926_v49  ;;  %v9982_v49 = vld [vmem:[%s15932_s1 + $0x1d8] sm:$0xff]  ;;  %v9988_v57 = vld [vmem:[%s15932_s1 + $0x188] sm:$0xff] }
 0x653   :  { %4055 = vmatmul.bf16.gmra.mxu2 %v12949_v12  ;;  %4548 = vmatpush.bf16.msrb.mxu0 %v9980_v61  ;;  %v9990_v61 = vld [vmem:[%s15932_s1 + $0x1c8] sm:$0xff] }
 0x654   :  { %4134 = vmatmul.bf16.gmra.mxu3 %v12955_v35  ;;  %4706 = vmatpush.bf16.msrb.mxu2 %v9979_v40  ;;  %v9989_v40 = vld [vmem:[%s15932_s1 + $0x248] sm:$0xff] }
 0x655   :  { %4785 = vmatpush.bf16.msrb.mxu3 %v9981_v43  ;;  %4627 = vmatpush.bf16.msrb.mxu1 %v9982_v49 }
 0x656   :  { %v3630_v12 = vpop.f32.mrf.mxu2 }
 0x657   :  { %v3709_v35 = vpop.f32.mrf.mxu3  ;;  %v3631_v56 = vadd.f32 %v3630_v12, %v3551_v26  ;;  %v3474_v33 = vpop.f32.mrf.mxu0  ;;  %4549 = vmatpush.bf16.msrb.mxu0 %v9984_v46  ;;  %v9985_v26 = vld [vmem:[%s15932_s1 + $0x250] sm:$0xff]  ;;  %v9992_v46 = vld [vmem:[%s15932_s1 + $0x180] sm:$0xff] }
 0x658   :  { %v3553_v2 = vpop.f32.mrf.mxu1  ;;  %v13428_v20 = vadd.f32 %v3474_v33, %v13007_v15  ;;  %4707 = vmatpush.bf16.msrb.mxu2 %v9983_v29  ;;  %v9986_v15 = vld [vmem:[%s15932_s1 + $0x1d0] sm:$0xff]  ;;  %v9991_v29 = vld [vmem:[%s15932_s1 + $0x200] sm:$0xff] }
 0x659   :  { %v13436_v62 = vadd.f32 %v3709_v35, %v3631_v56  ;;  %4786 = vmatpush.bf16.msrb.mxu3 %v9985_v26  ;;  %4628 = vmatpush.bf16.msrb.mxu1 %v9986_v15  ;;  %v13476_v15 = vld [vmem:[%s15933_s0 + $0xa0] sm:$0xff] }
 0x65b   :  { %4550 = vmatpush.bf16.msrb.mxu0 %v9988_v57 }
 0x65c   :  { %4708 = vmatpush.bf16.msrb.mxu2 %v9987_v13 }
 0x65d   :  { %4787 = vmatpush.bf16.msrb.mxu3 %v9989_v40  ;;  %4629 = vmatpush.bf16.msrb.mxu1 %v9990_v61 }
 0x65e   :  { %v3632_v43 = vpop.f32.mrf.mxu2 }
 0x65f   :  { %v3711_v49 = vpop.f32.mrf.mxu3  ;;  %v3633_v12 = vadd.f32 %v3632_v43, %v3553_v2  ;;  %v3477_v35 = vpop.f32.mrf.mxu0  ;;  %4551 = vmatpush.bf16.msrb.mxu0 %v9992_v46  ;;  %v9993_v2 = vld [vmem:[%s15932_s1 + $0x240] sm:$0xff] }
 0x660   :  { %v3556_v56 = vpop.f32.mrf.mxu1  ;;  %v13457_v33 = vadd.f32 %v3477_v35, %v13031_v7  ;;  %4709 = vmatpush.bf16.msrb.mxu2 %v9991_v29  ;;  %v9994_v7 = vld [vmem:[%s15932_s1 + $0x1c0] sm:$0xff] }
 0x661   :  { %v13465_v26 = vadd.f32 %v3711_v49, %v3633_v12  ;;  %4788 = vmatpush.bf16.msrb.mxu3 %v9993_v2  ;;  %4630 = vmatpush.bf16.msrb.mxu1 %v9994_v7 }
 0x662   :  { %3762 = vmatmul.bf16.gmra.mxu0 %v13476_v15  ;;  %3841 = vmatmul.bf16.gmra.mxu1 %v12999_v1 }
 0x663   :  { %4060 = vmatmul.bf16.gmra.mxu2 %v13022_v16 }
 0x664   :  { %4139 = vmatmul.bf16.gmra.mxu3 %v13028_v51  ;;  %v13495_v51 = vld [vmem:[%s15933_s0 + $0xa8] sm:$0xff] }
 0x666   :  { %v3635_v13 = vpop.f32.mrf.mxu2 }
 0x667   :  { %v3714_v57 = vpop.f32.mrf.mxu3  ;;  %v3636_v40 = vadd.f32 %v3635_v13, %v3556_v56  ;;  %v3479_v61 = vpop.f32.mrf.mxu0 }
 0x668   :  { %v3558_v43 = vpop.f32.mrf.mxu1  ;;  %v13483_v49 = vadd.f32 %v3479_v61, %v13038_v41 }
 0x669   :  { %v13485_v12 = vadd.f32 %v3714_v57, %v3636_v40 }
 0x66e   :  { %v3637_v35 = vpop.f32.mrf.mxu2 }
 0x66f   :  { %v3716_v29 = vpop.f32.mrf.mxu3  ;;  %v3638_v46 = vadd.f32 %v3637_v35, %v3558_v43  ;;  %v3482_v2 = vpop.f32.mrf.mxu0 }
 0x670   :  { %v3561_v7 = vpop.f32.mrf.mxu1  ;;  %v13488_v1 = vadd.f32 %v3482_v2, %v13056_v53 }
 0x671   :  { %v13490_v16 = vadd.f32 %v3716_v29, %v3638_v46 }
 0x672   :  { %3767 = vmatmul.bf16.gmra.mxu0 %v13495_v51  ;;  %3846 = vmatmul.bf16.gmra.mxu1 %v13036_v14 }
 0x673   :  { %4065 = vmatmul.bf16.gmra.mxu2 %v13047_v36 }
 0x674   :  { %4144 = vmatmul.bf16.gmra.mxu3 %v13053_v22  ;;  %v13514_v22 = vld [vmem:[%s15933_s0 + $0xb0] sm:$0xff] }
 0x676   :  { %v3640_v41 = vpop.f32.mrf.mxu2 }
 0x677   :  { %v3719_v56 = vpop.f32.mrf.mxu3  ;;  %v3641_v13 = vadd.f32 %v3640_v41, %v3561_v7  ;;  %v3484_v53 = vpop.f32.mrf.mxu0 }
 0x678   :  { %v3563_v57 = vpop.f32.mrf.mxu1  ;;  %v13502_v40 = vadd.f32 %v3484_v53, %v13063_v0 }
 0x679   :  { %v13504_v61 = vadd.f32 %v3719_v56, %v3641_v13 }
 0x67e   :  { %v3642_v43 = vpop.f32.mrf.mxu2 }
 0x67f   :  { %v3721_v35 = vpop.f32.mrf.mxu3  ;;  %v3643_v29 = vadd.f32 %v3642_v43, %v3563_v57  ;;  %v3487_v46 = vpop.f32.mrf.mxu0 }
 0x680   :  { %v3566_v2 = vpop.f32.mrf.mxu1  ;;  %v13507_v14 = vadd.f32 %v3487_v46, %v13081_v54 }
 0x681   :  { %v13509_v36 = vadd.f32 %v3721_v35, %v3643_v29 }
 0x682   :  { %3772 = vmatmul.bf16.gmra.mxu0 %v13514_v22  ;;  %3851 = vmatmul.bf16.gmra.mxu1 %v13061_v24 }
 0x683   :  { %4070 = vmatmul.bf16.gmra.mxu2 %v13072_v37 }
 0x684   :  { %4149 = vmatmul.bf16.gmra.mxu3 %v13078_v17  ;;  %v13533_v17 = vld [vmem:[%s15933_s0 + $0xb8] sm:$0xff] }
 0x686   :  { %v3645_v0 = vpop.f32.mrf.mxu2 }
 0x687   :  { %v3724_v7 = vpop.f32.mrf.mxu3  ;;  %v3646_v41 = vadd.f32 %v3645_v0, %v3566_v2  ;;  %v3489_v54 = vpop.f32.mrf.mxu0 }
 0x688   :  { %v3568_v56 = vpop.f32.mrf.mxu1  ;;  %v13521_v13 = vadd.f32 %v3489_v54, %v13088_v25 }
 0x689   :  { %v13523_v53 = vadd.f32 %v3724_v7, %v3646_v41 }
 0x68e   :  { %v3647_v57 = vpop.f32.mrf.mxu2 }
 0x68f   :  { %v3726_v43 = vpop.f32.mrf.mxu3  ;;  %v3648_v35 = vadd.f32 %v3647_v57, %v3568_v56  ;;  %v3492_v29 = vpop.f32.mrf.mxu0 }
 0x690   :  { %v3571_v46 = vpop.f32.mrf.mxu1  ;;  %v13526_v24 = vadd.f32 %v3492_v29, %v13106_v27 }
 0x691   :  { %v13528_v37 = vadd.f32 %v3726_v43, %v3648_v35 }
 0x692   :  { %3777 = vmatmul.bf16.gmra.mxu0 %v13533_v17  ;;  %3856 = vmatmul.bf16.gmra.mxu1 %v13086_v34 }
 0x693   :  { %4075 = vmatmul.bf16.gmra.mxu2 %v13097_v63 }
 0x694   :  { %4154 = vmatmul.bf16.gmra.mxu3 %v13103_v6  ;;  %v13552_v6 = vld [vmem:[%s15933_s0 + $0xc0] sm:$0xff] }
 0x696   :  { %v3650_v25 = vpop.f32.mrf.mxu2 }
 0x697   :  { %v3729_v2 = vpop.f32.mrf.mxu3  ;;  %v3651_v0 = vadd.f32 %v3650_v25, %v3571_v46  ;;  %v3494_v27 = vpop.f32.mrf.mxu0 }
 0x698   :  { %v3573_v7 = vpop.f32.mrf.mxu1  ;;  %v13540_v41 = vadd.f32 %v3494_v27, %v13113_v30 }
 0x699   :  { %v13542_v54 = vadd.f32 %v3729_v2, %v3651_v0  ;;  %v16667_v0 = vld [vmem:[#allocation26_spill] sm:$0xff] }
 0x69a   :  { %16665 = vst [vmem:[#allocation54_spill] sm:$0xff] %v13540_v41 }
 0x69e   :  { %v3652_v56 = vpop.f32.mrf.mxu2 }
 0x69f   :  { %v3731_v57 = vpop.f32.mrf.mxu3  ;;  %v3653_v43 = vadd.f32 %v3652_v56, %v3573_v7  ;;  %v3497_v35 = vpop.f32.mrf.mxu0 }
 0x6a0   :  { %v3576_v29 = vpop.f32.mrf.mxu1  ;;  %v13545_v34 = vadd.f32 %v3497_v35, %v13131_v59 }
 0x6a1   :  { %v13547_v63 = vadd.f32 %v3731_v57, %v3653_v43 }
 0x6a2   :  { %16666 = vst [vmem:[#allocation60_spill] sm:$0xff] %v13545_v34  ;;  %3782 = vmatmul.bf16.gmra.mxu0 %v13552_v6  ;;  %3861 = vmatmul.bf16.gmra.mxu1 %v13111_v50 }
 0x6a3   :  { %4080 = vmatmul.bf16.gmra.mxu2 %v13122_v42 }
 0x6a4   :  { %4159 = vmatmul.bf16.gmra.mxu3 %v13128_v32  ;;  %v13571_v32 = vld [vmem:[%s15933_s0 + $0xc8] sm:$0xff] }
 0x6a5   :  { %16670 = vst [vmem:[#allocation2_spill] sm:$0xff] %v13571_v32 }
 0x6a6   :  { %v3655_v30 = vpop.f32.mrf.mxu2 }
 0x6a7   :  { %v3734_v46 = vpop.f32.mrf.mxu3  ;;  %v3656_v25 = vadd.f32 %v3655_v30, %v3576_v29  ;;  %v3499_v59 = vpop.f32.mrf.mxu0  ;;  %v16671_v29 = vld [vmem:[#allocation43_spill] sm:$0xff]  ;;  %v16672_v30 = vld [vmem:[#allocation20_spill] sm:$0xff] }
 0x6a8   :  { %v3578_v2 = vpop.f32.mrf.mxu1  ;;  %v13559_v27 = vadd.f32 %v3499_v59, %v16667_v0 }
 0x6a9   :  { %v13561_v7 = vadd.f32 %v3734_v46, %v3656_v25  ;;  %v16673_v46 = vld [vmem:[#allocation21_spill] sm:$0xff] }
 0x6aa   :  { %16668 = vst [vmem:[#allocation65_spill] sm:$0xff] %v13559_v27 }
 0x6ae   :  { %v3657_v56 = vpop.f32.mrf.mxu2 }
 0x6af   :  { %v3736_v57 = vpop.f32.mrf.mxu3  ;;  %v3658_v43 = vadd.f32 %v3657_v56, %v3578_v2  ;;  %v3502_v35 = vpop.f32.mrf.mxu0 }
 0x6b0   :  { %v3581_v34 = vpop.f32.mrf.mxu1  ;;  %v13564_v50 = vadd.f32 %v3502_v35, %v13156_v11 }
 0x6b1   :  { %v13566_v42 = vadd.f32 %v3736_v57, %v3658_v43 }
 0x6b2   :  { %16669 = vst [vmem:[#allocation59_spill] sm:$0xff] %v13564_v50  ;;  %3787 = vmatmul.bf16.gmra.mxu0 %v13571_v32  ;;  %3866 = vmatmul.bf16.gmra.mxu1 %v16671_v29 }
 0x6b3   :  { %4085 = vmatmul.bf16.gmra.mxu2 %v16672_v30 }
 0x6b4   :  { %4164 = vmatmul.bf16.gmra.mxu3 %v16673_v46 }
 0x6b6   :  { %v3660_v25 = vpop.f32.mrf.mxu2 }
 0x6b7   :  { %v3739_v59 = vpop.f32.mrf.mxu3  ;;  %v3661_v2 = vadd.f32 %v3660_v25, %v3581_v34  ;;  %v3504_v11 = vpop.f32.mrf.mxu0  ;;  %v13590_v34 = vld [vmem:[%s15933_s0 + $0xd0] sm:$0xff] }
 0x6b8   :  { %v3583_v0 = vpop.f32.mrf.mxu1  ;;  %v13578_v56 = vadd.f32 %v3504_v11, %v13166_v8  ;;  %16677 = vst [vmem:[#allocation63_spill] sm:$0xff] %v13590_v34  ;;  %v16678_v8 = vld [vmem:[#allocation48_spill] sm:$0xff] }
 0x6b9   :  { %v13580_v57 = vadd.f32 %v3739_v59, %v3661_v2  ;;  %v16679_v25 = vld [vmem:[#allocation28_spill] sm:$0xff]  ;;  %v16680_v59 = vld [vmem:[#allocation19_spill] sm:$0xff] }
 0x6ba   :  { %16674 = vst [vmem:[#allocation62_spill] sm:$0xff] %v13578_v56 }
 0x6be   :  { %v3662_v43 = vpop.f32.mrf.mxu2 }
 0x6bf   :  { %v3741_v35 = vpop.f32.mrf.mxu3  ;;  %v3663_v50 = vadd.f32 %v3662_v43, %v3583_v0  ;;  %v3753_v32 = vpop.f32.mrf.mxu0 }
 0x6c0   :  { %v3832_v27 = vpop.f32.mrf.mxu1  ;;  %v3754_v29 = vadd.f32 %v3753_v32, %v13187_v45 }
 0x6c1   :  { %v13583_v30 = vadd.f32 %v3741_v35, %v3663_v50 }
 0x6c2   :  { %v13585_v46 = vadd.f32 %v3832_v27, %v3754_v29  ;;  %3792 = vmatmul.bf16.gmra.mxu0 %v13590_v34  ;;  %3871 = vmatmul.bf16.gmra.mxu1 %v16678_v8 }
 0x6c3   :  { %16675 = vst [vmem:[#allocation64_spill] sm:$0xff] %v13583_v30  ;;  %4090 = vmatmul.bf16.gmra.mxu2 %v16679_v25 }
 0x6c4   :  { %16676 = vst [vmem:[#allocation70_spill] sm:$0xff] %v13585_v46  ;;  %4169 = vmatmul.bf16.gmra.mxu3 %v16680_v59 }
 0x6c6   :  { %v4051_v50 = vpop.f32.mrf.mxu2 }
 0x6c7   :  { %v4130_v32 = vpop.f32.mrf.mxu3  ;;  %v3755_v11 = vpop.f32.mrf.mxu0 }
 0x6c8   :  { %v13598_v27 = vadd.f32 %v4130_v32, %v4051_v50  ;;  %v3834_v0 = vpop.f32.mrf.mxu1  ;;  %v3756_v43 = vadd.f32 %v3755_v11, %v13197_v55  ;;  %v13613_v50 = vld [vmem:[%s15933_s0 + $0xd8] sm:$0xff]  ;;  %v16687_v32 = vld [vmem:[#allocation32_spill] sm:$0xff] }
 0x6c9   :  { %16685 = vst [vmem:[#allocation69_spill] sm:$0xff] %v13613_v50  ;;  %v16686_v55 = vld [vmem:[#allocation53_spill] sm:$0xff]  ;;  %v16688_v11 = vld [vmem:[#allocation36_spill] sm:$0xff] }
 0x6ca   :  { %v13601_v35 = vadd.f32 %v3834_v0, %v3756_v43 }
 0x6cc   :  { %16682 = vst [vmem:[#allocation67_spill] sm:$0xff] %v13601_v35 }
 0x6ce   :  { %v4053_v34 = vpop.f32.mrf.mxu2 }
 0x6cf   :  { %v4132_v25 = vpop.f32.mrf.mxu3  ;;  %v3758_v59 = vpop.f32.mrf.mxu0 }
 0x6d0   :  { %v13605_v56 = vadd.f32 %v4132_v25, %v4053_v34  ;;  %v3837_v30 = vpop.f32.mrf.mxu1  ;;  %v3759_v45 = vadd.f32 %v3758_v59, %v13218_v10 }
 0x6d2   :  { %v13608_v46 = vadd.f32 %v3837_v30, %v3759_v45  ;;  %3797 = vmatmul.bf16.gmra.mxu0 %v13613_v50  ;;  %3876 = vmatmul.bf16.gmra.mxu1 %v16686_v55 }
 0x6d3   :  { %4095 = vmatmul.bf16.gmra.mxu2 %v16687_v32 }
 0x6d4   :  { %16684 = vst [vmem:[#allocation66_spill] sm:$0xff] %v13608_v46  ;;  %4174 = vmatmul.bf16.gmra.mxu3 %v16688_v11 }
 0x6d6   :  { %v4056_v43 = vpop.f32.mrf.mxu2 }
 0x6d7   :  { %v4135_v10 = vpop.f32.mrf.mxu3  ;;  %v3760_v45 = vpop.f32.mrf.mxu0 }
 0x6d8   :  { %v13621_v30 = vadd.f32 %v4135_v10, %v4056_v43  ;;  %v3839_v25 = vpop.f32.mrf.mxu1  ;;  %v3761_v59 = vadd.f32 %v3760_v45, %v13228_v23  ;;  %v13636_v43 = vld [vmem:[%s15933_s0 + $0xe0] sm:$0xff]  ;;  %v16694_v23 = vld [vmem:[#allocation40_spill] sm:$0xff]  ;;  %v16695_v10 = vld [vmem:[#allocation41_spill] sm:$0xff] }
 0x6d9   :  { %16693 = vst [vmem:[#allocation71_spill] sm:$0xff] %v13636_v43  ;;  %v16696_v45 = vld [vmem:[#allocation46_spill] sm:$0xff] }
 0x6da   :  { %v13624_v8 = vadd.f32 %v3839_v25, %v3761_v59 }
 0x6dc   :  { %16690 = vst [vmem:[#allocation4_spill] sm:$0xff] %v13624_v8 }
 0x6de   :  { %v4058_v35 = vpop.f32.mrf.mxu2 }
 0x6df   :  { %v4137_v32 = vpop.f32.mrf.mxu3  ;;  %v3763_v11 = vpop.f32.mrf.mxu0 }
 0x6e0   :  { %v13628_v29 = vadd.f32 %v4137_v32, %v4058_v35  ;;  %v3842_v2 = vpop.f32.mrf.mxu1  ;;  %v3764_v0 = vadd.f32 %v3763_v11, %v13249_v39  ;;  %v16697_v35 = vld [vmem:[#allocation42_spill] sm:$0xff] }
 0x6e2   :  { %v13631_v46 = vadd.f32 %v3842_v2, %v3764_v0  ;;  %3802 = vmatmul.bf16.gmra.mxu0 %v13636_v43  ;;  %3881 = vmatmul.bf16.gmra.mxu1 %v16694_v23 }
 0x6e3   :  { %4100 = vmatmul.bf16.gmra.mxu2 %v16695_v10 }
 0x6e4   :  { %16692 = vst [vmem:[#allocation68_spill] sm:$0xff] %v13631_v46  ;;  %4179 = vmatmul.bf16.gmra.mxu3 %v16696_v45 }
 0x6e6   :  { %v4061_v59 = vpop.f32.mrf.mxu2 }
 0x6e7   :  { %v4140_v39 = vpop.f32.mrf.mxu3  ;;  %v3765_v0 = vpop.f32.mrf.mxu0 }
 0x6e8   :  { %v13644_v2 = vadd.f32 %v4140_v39, %v4061_v59  ;;  %v3844_v32 = vpop.f32.mrf.mxu1  ;;  %v3766_v11 = vadd.f32 %v3765_v0, %v13259_v21  ;;  %v13659_v59 = vld [vmem:[%s15933_s0 + $0xe8] sm:$0xff]  ;;  %v16702_v21 = vld [vmem:[#allocation45_spill] sm:$0xff]  ;;  %v16703_v39 = vld [vmem:[#allocation44_spill] sm:$0xff] }
 0x6e9   :  { %16701 = vst [vmem:[#allocation74_spill] sm:$0xff] %v13659_v59  ;;  %v16704_v0 = vld [vmem:[#allocation51_spill] sm:$0xff] }
 0x6ea   :  { %v13647_v55 = vadd.f32 %v3844_v32, %v3766_v11 }
 0x6ec   :  { %16698 = vst [vmem:[#allocation12_spill] sm:$0xff] %v13647_v55 }
 0x6ee   :  { %v4063_v8 = vpop.f32.mrf.mxu2 }
 0x6ef   :  { %v4142_v10 = vpop.f32.mrf.mxu3  ;;  %v3768_v45 = vpop.f32.mrf.mxu0 }
 0x6f0   :  { %v13651_v50 = vadd.f32 %v4142_v10, %v4063_v8  ;;  %v3847_v34 = vpop.f32.mrf.mxu1  ;;  %v3769_v25 = vadd.f32 %v3768_v45, %v13280_v9 }
 0x6f2   :  { %v13654_v46 = vadd.f32 %v3847_v34, %v3769_v25  ;;  %3807 = vmatmul.bf16.gmra.mxu0 %v13659_v59  ;;  %3886 = vmatmul.bf16.gmra.mxu1 %v16702_v21 }
 0x6f3   :  { %4105 = vmatmul.bf16.gmra.mxu2 %v16703_v39 }
 0x6f4   :  { %16700 = vst [vmem:[#allocation25_spill] sm:$0xff] %v13654_v46  ;;  %4184 = vmatmul.bf16.gmra.mxu3 %v16704_v0 }
 0x6f6   :  { %v4066_v11 = vpop.f32.mrf.mxu2 }
 0x6f7   :  { %v4145_v9 = vpop.f32.mrf.mxu3  ;;  %v3770_v25 = vpop.f32.mrf.mxu0 }
 0x6f8   :  { %v13667_v34 = vadd.f32 %v4145_v9, %v4066_v11  ;;  %v3849_v10 = vpop.f32.mrf.mxu1  ;;  %v3771_v45 = vadd.f32 %v3770_v25, %v13290_v52  ;;  %v13682_v11 = vld [vmem:[%s15933_s0 + $0xf0] sm:$0xff]  ;;  %v16709_v52 = vld [vmem:[#allocation49_spill] sm:$0xff] }
 0x6f9   :  { %16708 = vst [vmem:[#allocation73_spill] sm:$0xff] %v13682_v11  ;;  %v16710_v9 = vld [vmem:[#allocation52_spill] sm:$0xff] }
 0x6fa   :  { %v13670_v23 = vadd.f32 %v3849_v10, %v3771_v45 }
 0x6fc   :  { %16706 = vst [vmem:[#allocation14_spill] sm:$0xff] %v13670_v23 }
 0x6fe   :  { %v4068_v59 = vpop.f32.mrf.mxu2 }
 0x6ff   :  { %v4147_v39 = vpop.f32.mrf.mxu3  ;;  %v3773_v0 = vpop.f32.mrf.mxu0 }
 0x700   :  { %v13674_v55 = vadd.f32 %v4147_v39, %v4068_v59  ;;  %v3852_v43 = vpop.f32.mrf.mxu1  ;;  %v3774_v32 = vadd.f32 %v3773_v0, %v13306_v31  ;;  %v10006_v59 = vld [vmem:[%s15933_s0 + $0x70] sm:$0xff]  ;;  %v16711_v31 = vld [vmem:[#allocation55_spill] sm:$0xff] }
 0x702   :  { %v13677_v46 = vadd.f32 %v3852_v43, %v3774_v32  ;;  %3812 = vmatmul.bf16.gmra.mxu0 %v13682_v11  ;;  %3891 = vmatmul.bf16.gmra.mxu1 %v16709_v52 }
 0x703   :  { %4110 = vmatmul.bf16.gmra.mxu2 %v16710_v9 }
 0x704   :  { %16707 = vst [vmem:[#allocation72_spill] sm:$0xff] %v13677_v46  ;;  %4189 = vmatmul.bf16.gmra.mxu3 %v10006_v59 }
 0x706   :  { %v4071_v32 = vpop.f32.mrf.mxu2 }
 0x707   :  { %v4150_v25 = vpop.f32.mrf.mxu3  ;;  %v3775_v45 = vpop.f32.mrf.mxu0 }
 0x708   :  { %v13692_v10 = vadd.f32 %v4150_v25, %v4071_v32  ;;  %v3854_v39 = vpop.f32.mrf.mxu1  ;;  %v3776_v0 = vadd.f32 %v3775_v45, %v13316_v3  ;;  %v13707_v32 = vld [vmem:[%s15933_s0 + $0xf8] sm:$0xff]  ;;  %v16716_v25 = vld [vmem:[#allocation58_spill] sm:$0xff] }
 0x709   :  { %16714 = vst [vmem:[#allocation29_spill] sm:$0xff] %v13707_v32  ;;  %v16715_v3 = vld [vmem:[#allocation61_spill] sm:$0xff] }
 0x70a   :  { %v13695_v21 = vadd.f32 %v3854_v39, %v3776_v0 }
 0x70c   :  { %16712 = vst [vmem:[#allocation15_spill] sm:$0xff] %v13695_v21 }
 0x70e   :  { %v4073_v11 = vpop.f32.mrf.mxu2 }
 0x70f   :  { %v4152_v23 = vpop.f32.mrf.mxu3  ;;  %v3778_v59 = vpop.f32.mrf.mxu0 }
 0x710   :  { %v13699_v60 = vadd.f32 %v4152_v23, %v4073_v11  ;;  %v3857_v8 = vpop.f32.mrf.mxu1  ;;  %v3779_v43 = vadd.f32 %v3778_v59, %v13332_v44  ;;  %v10008_v23 = vld [vmem:[%s15933_s0 + $0x78] sm:$0xff]  ;;  %v16717_v44 = vld [vmem:[#allocation6_spill] sm:$0xff] }
 0x712   :  { %v13702_v46 = vadd.f32 %v3857_v8, %v3779_v43  ;;  %3817 = vmatmul.bf16.gmra.mxu0 %v13707_v32  ;;  %3896 = vmatmul.bf16.gmra.mxu1 %v16715_v3 }
 0x713   :  { %4115 = vmatmul.bf16.gmra.mxu2 %v16716_v25 }
 0x714   :  { %4194 = vmatmul.bf16.gmra.mxu3 %v10008_v23 }
 0x716   :  { %v4076_v11 = vpop.f32.mrf.mxu2 }
 0x717   :  { %v4155_v43 = vpop.f32.mrf.mxu3  ;;  %v3780_v39 = vpop.f32.mrf.mxu0 }
 0x718   :  { %v13717_v45 = vadd.f32 %v4155_v43, %v4076_v11  ;;  %v3859_v0 = vpop.f32.mrf.mxu1  ;;  %v3781_v59 = vadd.f32 %v3780_v39, %v13337_v38  ;;  %v13729_v11 = vld [vmem:[%s15933_s0 + $0x190] sm:$0xff] }
 0x719   :  { %16719 = vst [vmem:[#allocation75_spill] sm:$0xff] %v13729_v11  ;;  %v13738_v38 = vld [vmem:[%s15933_s0 + $0x110] sm:$0xff] }
 0x71a   :  { %v13720_v9 = vadd.f32 %v3859_v0, %v3781_v59  ;;  %16720 = vst [vmem:[#allocation3_spill] sm:$0xff] %v13738_v38 }
 0x71c   :  { %16718 = vst [vmem:[#allocation30_spill] sm:$0xff] %v13720_v9 }
 0x71e   :  { %v4078_v25 = vpop.f32.mrf.mxu2 }
 0x71f   :  { %v4157_v32 = vpop.f32.mrf.mxu3  ;;  %v3783_v23 = vpop.f32.mrf.mxu0 }
 0x720   :  { %v13724_v21 = vadd.f32 %v4157_v32, %v4078_v25  ;;  %v3862_v52 = vpop.f32.mrf.mxu1  ;;  %v3784_v43 = vadd.f32 %v3783_v23, %v13369_v5  ;;  %v10010_v32 = vld [vmem:[%s15933_s0 + $0x180] sm:$0xff] }
 0x722   :  { %v13732_v8 = vadd.f32 %v3862_v52, %v3784_v43  ;;  %4208 = vmatmul.bf16.vlgmr.msra.gmra.mxu0 %v13342_v58  ;;  %4287 = vmatmul.bf16.vlgmr.msra.gmra.mxu1 %v13738_v38 }
 0x723   :  { %4366 = vmatmul.bf16.vlgmr.msra.gmra.mxu2 %v13729_v11 }
 0x724   :  { %4473 = vmatmul.bf16.vlgmr.msra.gmra.mxu3 %v10010_v32 }
 0x726   :  { %v4081_v52 = vpop.f32.mrf.mxu2 }
 0x727   :  { %v4160_v39 = vpop.f32.mrf.mxu3  ;;  %v3785_v0 = vpop.f32.mrf.mxu0 }
 0x728   :  { %v13747_v58 = vadd.f32 %v4160_v39, %v4081_v52  ;;  %v3864_v59 = vpop.f32.mrf.mxu1  ;;  %v3786_v25 = vadd.f32 %v3785_v0, %v13398_v19  ;;  %v13759_v52 = vld [vmem:[%s15933_s0 + $0x198] sm:$0xff] }
 0x729   :  { %16722 = vst [vmem:[#allocation9_spill] sm:$0xff] %v13759_v52  ;;  %v13768_v19 = vld [vmem:[%s15933_s0 + $0x118] sm:$0xff] }
 0x72a   :  { %v13750_v23 = vadd.f32 %v3864_v59, %v3786_v25  ;;  %16723 = vst [vmem:[#allocation24_spill] sm:$0xff] %v13768_v19 }
 0x72c   :  { %16721 = vst [vmem:[#allocation22_spill] sm:$0xff] %v13750_v23 }
 0x72e   :  { %v4083_v3 = vpop.f32.mrf.mxu2 }
 0x72f   :  { %v4162_v11 = vpop.f32.mrf.mxu3  ;;  %v3788_v32 = vpop.f32.mrf.mxu0 }
 0x730   :  { %v13754_v38 = vadd.f32 %v4162_v11, %v4083_v3  ;;  %v3867_v9 = vpop.f32.mrf.mxu1  ;;  %v3789_v39 = vadd.f32 %v3788_v32, %v13436_v62  ;;  %v10012_v3 = vld [vmem:[%s15933_s0 + $0x188] sm:$0xff] }
 0x732   :  { %v13762_v5 = vadd.f32 %v3867_v9, %v3789_v39  ;;  %4213 = vmatmul.bf16.gmra.mxu0 %v13409_v18  ;;  %4292 = vmatmul.bf16.gmra.mxu1 %v13768_v19 }
 0x733   :  { %4371 = vmatmul.bf16.gmra.mxu2 %v13759_v52 }
 0x734   :  { %4478 = vmatmul.bf16.gmra.mxu3 %v10012_v3 }
 0x736   :  { %v4086_v9 = vpop.f32.mrf.mxu2 }
 0x737   :  { %v4165_v11 = vpop.f32.mrf.mxu3  ;;  %v3790_v0 = vpop.f32.mrf.mxu0 }
 0x738   :  { %v13777_v18 = vadd.f32 %v4165_v11, %v4086_v9  ;;  %v3869_v59 = vpop.f32.mrf.mxu1  ;;  %v3791_v25 = vadd.f32 %v3790_v0, %v13465_v26  ;;  %v13789_v9 = vld [vmem:[%s15933_s0 + $0x1a0] sm:$0xff] }
 0x739   :  { %16725 = vst [vmem:[#allocation43_spill] sm:$0xff] %v13789_v9  ;;  %v13798_v26 = vld [vmem:[%s15933_s0 + $0x120] sm:$0xff] }
 0x73a   :  { %v13780_v32 = vadd.f32 %v3869_v59, %v3791_v25  ;;  %16726 = vst [vmem:[#allocation20_spill] sm:$0xff] %v13798_v26 }
 0x73c   :  { %16724 = vst [vmem:[#allocation26_spill] sm:$0xff] %v13780_v32 }
 0x73e   :  { %v4088_v43 = vpop.f32.mrf.mxu2 }
 0x73f   :  { %v4167_v52 = vpop.f32.mrf.mxu3  ;;  %v3793_v3 = vpop.f32.mrf.mxu0 }
 0x740   :  { %v13784_v19 = vadd.f32 %v4167_v52, %v4088_v43  ;;  %v3872_v23 = vpop.f32.mrf.mxu1  ;;  %v3794_v11 = vadd.f32 %v3793_v3, %v13485_v12  ;;  %v10014_v43 = vld [vmem:[%s15933_s0 + $0x190] sm:$0xff] }
 0x742   :  { %v13792_v62 = vadd.f32 %v3872_v23, %v3794_v11  ;;  %4218 = vmatmul.bf16.gmra.mxu0 %v13476_v15  ;;  %4297 = vmatmul.bf16.gmra.mxu1 %v13798_v26 }
 0x743   :  { %4376 = vmatmul.bf16.gmra.mxu2 %v13789_v9 }
 0x744   :  { %4483 = vmatmul.bf16.gmra.mxu3 %v10014_v43 }
 0x746   :  { %v4091_v23 = vpop.f32.mrf.mxu2 }
 0x747   :  { %v4170_v52 = vpop.f32.mrf.mxu3  ;;  %v3795_v0 = vpop.f32.mrf.mxu0 }
 0x748   :  { %v13807_v15 = vadd.f32 %v4170_v52, %v4091_v23  ;;  %v3874_v59 = vpop.f32.mrf.mxu1  ;;  %v3796_v25 = vadd.f32 %v3795_v0, %v13490_v16  ;;  %v13819_v23 = vld [vmem:[%s15933_s0 + $0x1a8] sm:$0xff] }
 0x749   :  { %16728 = vst [vmem:[#allocation48_spill] sm:$0xff] %v13819_v23  ;;  %v13828_v16 = vld [vmem:[%s15933_s0 + $0x128] sm:$0xff] }
 0x74a   :  { %v13810_v3 = vadd.f32 %v3874_v59, %v3796_v25  ;;  %16729 = vst [vmem:[#allocation28_spill] sm:$0xff] %v13828_v16 }
 0x74c   :  { %16727 = vst [vmem:[#allocation21_spill] sm:$0xff] %v13810_v3 }
 0x74e   :  { %v4093_v39 = vpop.f32.mrf.mxu2 }
 0x74f   :  { %v4172_v9 = vpop.f32.mrf.mxu3  ;;  %v3798_v43 = vpop.f32.mrf.mxu0 }
 0x750   :  { %v13814_v26 = vadd.f32 %v4172_v9, %v4093_v39  ;;  %v3877_v32 = vpop.f32.mrf.mxu1  ;;  %v3799_v52 = vadd.f32 %v3798_v43, %v13504_v61  ;;  %v10016_v39 = vld [vmem:[%s15933_s0 + $0x198] sm:$0xff] }
 0x752   :  { %v13822_v12 = vadd.f32 %v3877_v32, %v3799_v52  ;;  %4223 = vmatmul.bf16.gmra.mxu0 %v13495_v51  ;;  %4302 = vmatmul.bf16.gmra.mxu1 %v13828_v16 }
 0x753   :  { %4381 = vmatmul.bf16.gmra.mxu2 %v13819_v23 }
 0x754   :  { %4488 = vmatmul.bf16.gmra.mxu3 %v10016_v39 }
 0x756   :  { %v4096_v32 = vpop.f32.mrf.mxu2 }
 0x757   :  { %v4175_v9 = vpop.f32.mrf.mxu3  ;;  %v3800_v0 = vpop.f32.mrf.mxu0 }
 0x758   :  { %v13837_v51 = vadd.f32 %v4175_v9, %v4096_v32  ;;  %v3879_v59 = vpop.f32.mrf.mxu1  ;;  %v3801_v25 = vadd.f32 %v3800_v0, %v13509_v36  ;;  %v13849_v32 = vld [vmem:[%s15933_s0 + $0x1b0] sm:$0xff] }
 0x759   :  { %16731 = vst [vmem:[#allocation53_spill] sm:$0xff] %v13849_v32  ;;  %v13858_v36 = vld [vmem:[%s15933_s0 + $0x130] sm:$0xff] }
 0x75a   :  { %v13840_v43 = vadd.f32 %v3879_v59, %v3801_v25  ;;  %16732 = vst [vmem:[#allocation32_spill] sm:$0xff] %v13858_v36 }
 0x75c   :  { %16730 = vst [vmem:[#allocation19_spill] sm:$0xff] %v13840_v43 }
 0x75e   :  { %v4098_v11 = vpop.f32.mrf.mxu2 }
 0x75f   :  { %v4177_v23 = vpop.f32.mrf.mxu3  ;;  %v3803_v39 = vpop.f32.mrf.mxu0 }
 0x760   :  { %v13844_v16 = vadd.f32 %v4177_v23, %v4098_v11  ;;  %v3882_v3 = vpop.f32.mrf.mxu1  ;;  %v3804_v9 = vadd.f32 %v3803_v39, %v13523_v53  ;;  %v10018_v11 = vld [vmem:[%s15933_s0 + $0x1a0] sm:$0xff] }
 0x762   :  { %v13852_v61 = vadd.f32 %v3882_v3, %v3804_v9  ;;  %4228 = vmatmul.bf16.gmra.mxu0 %v13514_v22  ;;  %4307 = vmatmul.bf16.gmra.mxu1 %v13858_v36 }
 0x763   :  { %4386 = vmatmul.bf16.gmra.mxu2 %v13849_v32 }
 0x764   :  { %4493 = vmatmul.bf16.gmra.mxu3 %v10018_v11 }
 0x766   :  { %v4101_v3 = vpop.f32.mrf.mxu2 }
 0x767   :  { %v4180_v23 = vpop.f32.mrf.mxu3  ;;  %v3805_v0 = vpop.f32.mrf.mxu0 }
 0x768   :  { %v13867_v22 = vadd.f32 %v4180_v23, %v4101_v3  ;;  %v3884_v59 = vpop.f32.mrf.mxu1  ;;  %v3806_v25 = vadd.f32 %v3805_v0, %v13528_v37  ;;  %v13879_v3 = vld [vmem:[%s15933_s0 + $0x1b8] sm:$0xff] }
 0x769   :  { %16734 = vst [vmem:[#allocation40_spill] sm:$0xff] %v13879_v3  ;;  %v13888_v37 = vld [vmem:[%s15933_s0 + $0x138] sm:$0xff] }
 0x76a   :  { %v13870_v39 = vadd.f32 %v3884_v59, %v3806_v25  ;;  %16736 = vst [vmem:[#allocation46_spill] sm:$0xff] %v13888_v37 }
 0x76c   :  { %16733 = vst [vmem:[#allocation36_spill] sm:$0xff] %v13870_v39 }
 0x76e   :  { %v4103_v52 = vpop.f32.mrf.mxu2 }
 0x76f   :  { %v4182_v32 = vpop.f32.mrf.mxu3  ;;  %v3808_v11 = vpop.f32.mrf.mxu0 }
 0x770   :  { %v13874_v36 = vadd.f32 %v4182_v32, %v4103_v52  ;;  %v3887_v43 = vpop.f32.mrf.mxu1  ;;  %v3809_v23 = vadd.f32 %v3808_v11, %v13542_v54  ;;  %v10020_v52 = vld [vmem:[%s15933_s0 + $0x1a8] sm:$0xff] }
 0x772   :  { %v13882_v53 = vadd.f32 %v3887_v43, %v3809_v23  ;;  %4233 = vmatmul.bf16.gmra.mxu0 %v13533_v17  ;;  %4312 = vmatmul.bf16.gmra.mxu1 %v13888_v37 }
 0x773   :  { %4391 = vmatmul.bf16.gmra.mxu2 %v13879_v3 }
 0x774   :  { %16735 = vst [vmem:[#allocation41_spill] sm:$0xff] %v13882_v53  ;;  %4498 = vmatmul.bf16.gmra.mxu3 %v10020_v52 }
 0x776   :  { %v4106_v43 = vpop.f32.mrf.mxu2 }
 0x777   :  { %v4185_v32 = vpop.f32.mrf.mxu3  ;;  %v3810_v0 = vpop.f32.mrf.mxu0 }
 0x778   :  { %v13897_v17 = vadd.f32 %v4185_v32, %v4106_v43  ;;  %v3889_v59 = vpop.f32.mrf.mxu1  ;;  %v3811_v25 = vadd.f32 %v3810_v0, %v13547_v63  ;;  %v13909_v43 = vld [vmem:[%s15933_s0 + $0x1c0] sm:$0xff] }
 0x779   :  { %16738 = vst [vmem:[#allocation45_spill] sm:$0xff] %v13909_v43  ;;  %v13918_v63 = vld [vmem:[%s15933_s0 + $0x140] sm:$0xff] }
 0x77a   :  { %v13900_v11 = vadd.f32 %v3889_v59, %v3811_v25  ;;  %16740 = vst [vmem:[#allocation51_spill] sm:$0xff] %v13918_v63 }
 0x77c   :  { %16737 = vst [vmem:[#allocation42_spill] sm:$0xff] %v13900_v11 }
 0x77e   :  { %v4108_v9 = vpop.f32.mrf.mxu2 }
 0x77f   :  { %v4187_v3 = vpop.f32.mrf.mxu3  ;;  %v3813_v52 = vpop.f32.mrf.mxu0 }
 0x780   :  { %v13904_v37 = vadd.f32 %v4187_v3, %v4108_v9  ;;  %v3892_v39 = vpop.f32.mrf.mxu1  ;;  %v3814_v32 = vadd.f32 %v3813_v52, %v13561_v7  ;;  %v10022_v9 = vld [vmem:[%s15933_s0 + $0x1b0] sm:$0xff] }
 0x782   :  { %v13912_v54 = vadd.f32 %v3892_v39, %v3814_v32  ;;  %4238 = vmatmul.bf16.gmra.mxu0 %v13552_v6  ;;  %4317 = vmatmul.bf16.gmra.mxu1 %v13918_v63 }
 0x783   :  { %4396 = vmatmul.bf16.gmra.mxu2 %v13909_v43 }
 0x784   :  { %16739 = vst [vmem:[#allocation44_spill] sm:$0xff] %v13912_v54  ;;  %4503 = vmatmul.bf16.gmra.mxu3 %v10022_v9 }
 0x786   :  { %v4111_v3 = vpop.f32.mrf.mxu2 }
 0x787   :  { %v4190_v0 = vpop.f32.mrf.mxu3  ;;  %v3815_v59 = vpop.f32.mrf.mxu0 }
 0x788   :  { %v13927_v6 = vadd.f32 %v4190_v0, %v4111_v3  ;;  %v3894_v25 = vpop.f32.mrf.mxu1  ;;  %v3816_v52 = vadd.f32 %v3815_v59, %v13566_v42  ;;  %v13939_v3 = vld [vmem:[%s15933_s0 + $0x1c8] sm:$0xff]  ;;  %v16747_v42 = vld [vmem:[#allocation2_spill] sm:$0xff] }
 0x789   :  { %16745 = vst [vmem:[#allocation55_spill] sm:$0xff] %v13939_v3  ;;  %v13948_v59 = vld [vmem:[%s15933_s0 + $0x148] sm:$0xff] }
 0x78a   :  { %v13930_v32 = vadd.f32 %v3894_v25, %v3816_v52  ;;  %16748 = vst [vmem:[#allocation58_spill] sm:$0xff] %v13948_v59 }
 0x78c   :  { %16742 = vst [vmem:[#allocation49_spill] sm:$0xff] %v13930_v32 }
 0x78e   :  { %v4113_v63 = vpop.f32.mrf.mxu2 }
 0x78f   :  { %v4192_v11 = vpop.f32.mrf.mxu3  ;;  %v3818_v9 = vpop.f32.mrf.mxu0 }
 0x790   :  { %v13934_v41 = vadd.f32 %v4192_v11, %v4113_v63  ;;  %v3897_v53 = vpop.f32.mrf.mxu1  ;;  %v3819_v0 = vadd.f32 %v3818_v9, %v13580_v57  ;;  %v10024_v11 = vld [vmem:[%s15933_s0 + $0x1b8] sm:$0xff] }
 0x792   :  { %16744 = vst [vmem:[#allocation52_spill] sm:$0xff] %v13934_v41  ;;  %v13942_v39 = vadd.f32 %v3897_v53, %v3819_v0  ;;  %4243 = vmatmul.bf16.gmra.mxu0 %v16747_v42  ;;  %4322 = vmatmul.bf16.gmra.mxu1 %v13948_v59  ;;  %v16750_v42 = vld [vmem:[#allocation64_spill] sm:$0xff] }
 0x793   :  { %4401 = vmatmul.bf16.gmra.mxu2 %v13939_v3 }
 0x794   :  { %16746 = vst [vmem:[#allocation61_spill] sm:$0xff] %v13942_v39  ;;  %4508 = vmatmul.bf16.gmra.mxu3 %v10024_v11 }
 0x796   :  { %v4116_v63 = vpop.f32.mrf.mxu2 }
 0x797   :  { %v4195_v25 = vpop.f32.mrf.mxu3  ;;  %v3820_v9 = vpop.f32.mrf.mxu0 }
 0x798   :  { %v13957_v52 = vadd.f32 %v4195_v25, %v4116_v63  ;;  %v3899_v0 = vpop.f32.mrf.mxu1  ;;  %v3821_v43 = vadd.f32 %v3820_v9, %v16750_v42  ;;  %v13969_v63 = vld [vmem:[%s15933_s0 + $0x1d0] sm:$0xff]  ;;  %v16754_v9 = vld [vmem:[#allocation63_spill] sm:$0xff] }
 0x799   :  { %16753 = vst [vmem:[#allocation2_spill] sm:$0xff] %v13969_v63 }
 0x79a   :  { %v13960_v32 = vadd.f32 %v3899_v0, %v3821_v43  ;;  %v13976_v43 = vld [vmem:[%s15933_s0 + $0x150] sm:$0xff] }
 0x79b   :  { %16755 = vst [vmem:[#allocation64_spill] sm:$0xff] %v13976_v43 }
 0x79c   :  { %16751 = vst [vmem:[#allocation6_spill] sm:$0xff] %v13960_v32 }
 0x79e   :  { %v4118_v23 = vpop.f32.mrf.mxu2 }
 0x79f   :  { %v4197_v54 = vpop.f32.mrf.mxu3  ;;  %v4209_v11 = vpop.f32.mrf.mxu0 }
 0x7a0   :  { %v13964_v7 = vadd.f32 %v4197_v54, %v4118_v23  ;;  %v4288_v41 = vpop.f32.mrf.mxu1  ;;  %v4210_v25 = vadd.f32 %v4209_v11, %v13598_v27  ;;  %v10026_v54 = vld [vmem:[%s15933_s0 + $0x1c0] sm:$0xff] }
 0x7a2   :  { %v4289_v53 = vadd.f32 %v4288_v41, %v4210_v25  ;;  %4248 = vmatmul.bf16.gmra.mxu0 %v16754_v9  ;;  %4327 = vmatmul.bf16.gmra.mxu1 %v13976_v43  ;;  %v16757_v25 = vld [vmem:[#allocation27_spill] sm:$0xff]  ;;  %v16758_v9 = vld [vmem:[#allocation70_spill] sm:$0xff] }
 0x7a3   :  { %4406 = vmatmul.bf16.gmra.mxu2 %v13969_v63  ;;  %v16759_v59 = vmax.f32 %v16757_v25, %v16758_v9  ;;  %v16768_v9 = vld [vmem:[#allocation31_spill] sm:$0xff] }
 0x7a4   :  { %4513 = vmatmul.bf16.gmra.mxu3 %v10026_v54 }
 0x7a6   :  { %v4367_v23 = vpop.f32.mrf.mxu2 }
 0x7a7   :  { %v13983_v0 = vpop.f32.mrf.mxu3  ;;  %v4368_v41 = vadd.f32 %v4367_v23, %v4289_v53  ;;  %v4211_v27 = vpop.f32.mrf.mxu0  ;;  %v13996_v53 = vld [vmem:[%s15933_s0 + $0x1d8] sm:$0xff] }
 0x7a8   :  { %16756 = vst [vmem:[#allocation63_spill] sm:$0xff] %v13983_v0  ;;  %v4290_v42 = vpop.f32.mrf.mxu1  ;;  %v4212_v11 = vadd.f32 %v4211_v27, %v13605_v56  ;;  %v16761_v56 = vld [vmem:[#allocation35_spill] sm:$0xff] }
 0x7a9   :  { %v13989_v32 = vmax.f32 %v16759_v59, %v4368_v41  ;;  %16760 = vst [vmem:[#allocation27_spill] sm:$0xff] %v13996_v53  ;;  %v16762_v27 = vld [vmem:[#allocation67_spill] sm:$0xff]  ;;  %v16765_v41 = vld [vmem:[#allocation69_spill] sm:$0xff] }
 0x7aa   :  { %v4291_v43 = vadd.f32 %v4290_v42, %v4212_v11  ;;  %v16763_v0 = vmax.f32 %v16761_v56, %v16762_v27 }
 0x7ae   :  { %v4369_v63 = vpop.f32.mrf.mxu2 }
 0x7af   :  { %v13991_v3 = vpop.f32.mrf.mxu3  ;;  %v4370_v39 = vadd.f32 %v4369_v63, %v4291_v43  ;;  %v4214_v57 = vpop.f32.mrf.mxu0  ;;  %v14008_v63 = vld [vmem:[%s15933_s0 + $0x158] sm:$0xff] }
 0x7b0   :  { %v4293_v54 = vpop.f32.mrf.mxu1  ;;  %v4215_v23 = vadd.f32 %v4214_v57, %v13621_v30  ;;  %16766 = vst [vmem:[#allocation35_spill] sm:$0xff] %v14008_v63  ;;  %v10028_v30 = vld [vmem:[%s15933_s0 + $0x1c8] sm:$0xff] }
 0x7b1   :  { %v14002_v25 = vmax.f32 %v16763_v0, %v4370_v39 }
 0x7b2   :  { %v4294_v59 = vadd.f32 %v4293_v54, %v4215_v23  ;;  %4253 = vmatmul.bf16.gmra.mxu0 %v16765_v41  ;;  %4332 = vmatmul.bf16.gmra.mxu1 %v14008_v63  ;;  %v16769_v54 = vld [vmem:[#allocation66_spill] sm:$0xff] }
 0x7b3   :  { %16764 = vst [vmem:[#allocation70_spill] sm:$0xff] %v14002_v25  ;;  %4411 = vmatmul.bf16.gmra.mxu2 %v13996_v53  ;;  %v16770_v23 = vmax.f32 %v16768_v9, %v16769_v54 }
 0x7b4   :  { %4518 = vmatmul.bf16.gmra.mxu3 %v10028_v30 }
 0x7b6   :  { %v4372_v57 = vpop.f32.mrf.mxu2 }
 0x7b7   :  { %v14015_v39 = vpop.f32.mrf.mxu3  ;;  %v4373_v43 = vadd.f32 %v4372_v57, %v4294_v59  ;;  %v4216_v0 = vpop.f32.mrf.mxu0  ;;  %v14028_v59 = vld [vmem:[%s15933_s0 + $0x1e0] sm:$0xff] }
 0x7b8   :  { %16767 = vst [vmem:[#allocation67_spill] sm:$0xff] %v14015_v39  ;;  %v4295_v42 = vpop.f32.mrf.mxu1  ;;  %v4217_v11 = vadd.f32 %v4216_v0, %v13628_v29  ;;  %v16772_v29 = vld [vmem:[#allocation37_spill] sm:$0xff]  ;;  %v16773_v0 = vld [vmem:[#allocation4_spill] sm:$0xff] }
 0x7b9   :  { %v14021_v56 = vmax.f32 %v16770_v23, %v4373_v43  ;;  %16771 = vst [vmem:[#allocation69_spill] sm:$0xff] %v14028_v59  ;;  %v16774_v39 = vmax.f32 %v16772_v29, %v16773_v0 }
 0x7ba   :  { %v4296_v27 = vadd.f32 %v4295_v42, %v4217_v11  ;;  %v16776_v42 = vld [vmem:[#allocation71_spill] sm:$0xff]  ;;  %v14040_v11 = vld [vmem:[%s15933_s0 + $0x160] sm:$0xff] }
 0x7bb   :  { %16777 = vst [vmem:[#allocation66_spill] sm:$0xff] %v14040_v11 }
 0x7be   :  { %v4374_v41 = vpop.f32.mrf.mxu2 }
 0x7bf   :  { %v14023_v53 = vpop.f32.mrf.mxu3  ;;  %v4375_v63 = vadd.f32 %v4374_v41, %v4296_v27  ;;  %v4219_v25 = vpop.f32.mrf.mxu0  ;;  %v16778_v41 = vld [vmem:[#allocation68_spill] sm:$0xff] }
 0x7c0   :  { %v4298_v30 = vpop.f32.mrf.mxu1  ;;  %v4220_v57 = vadd.f32 %v4219_v25, %v13644_v2  ;;  %v10030_v2 = vld [vmem:[%s15933_s0 + $0x1d0] sm:$0xff] }
 0x7c1   :  { %v14034_v9 = vmax.f32 %v16774_v39, %v4375_v63 }
 0x7c2   :  { %v4299_v43 = vadd.f32 %v4298_v30, %v4220_v57  ;;  %4258 = vmatmul.bf16.gmra.mxu0 %v16776_v42  ;;  %4337 = vmatmul.bf16.gmra.mxu1 %v14040_v11  ;;  %v16779_v30 = vmax.f32 %v16697_v35, %v16778_v41 }
 0x7c3   :  { %16775 = vst [vmem:[#allocation31_spill] sm:$0xff] %v14034_v9  ;;  %4416 = vmatmul.bf16.gmra.mxu2 %v14028_v59 }
 0x7c4   :  { %4523 = vmatmul.bf16.gmra.mxu3 %v10030_v2 }
 0x7c6   :  { %v4377_v25 = vpop.f32.mrf.mxu2 }
 0x7c7   :  { %v14047_v63 = vpop.f32.mrf.mxu3  ;;  %v4378_v39 = vadd.f32 %v4377_v25, %v4299_v43  ;;  %v4221_v54 = vpop.f32.mrf.mxu0  ;;  %v14060_v43 = vld [vmem:[%s15933_s0 + $0x1e8] sm:$0xff] }
 0x7c8   :  { %v4300_v23 = vpop.f32.mrf.mxu1  ;;  %v4222_v27 = vadd.f32 %v4221_v54, %v13651_v50  ;;  %16780 = vst [vmem:[#allocation37_spill] sm:$0xff] %v14060_v43  ;;  %v16781_v50 = vld [vmem:[#allocation47_spill] sm:$0xff]  ;;  %v16782_v54 = vld [vmem:[#allocation12_spill] sm:$0xff] }
 0x7c9   :  { %v14053_v57 = vmax.f32 %v16779_v30, %v4378_v39  ;;  %v16783_v9 = vmax.f32 %v16781_v50, %v16782_v54 }
 0x7ca   :  { %v4301_v29 = vadd.f32 %v4300_v23, %v4222_v27  ;;  %v16785_v23 = vld [vmem:[#allocation74_spill] sm:$0xff]  ;;  %v14072_v27 = vld [vmem:[%s15933_s0 + $0x168] sm:$0xff] }
 0x7cb   :  { %16786 = vst [vmem:[#allocation71_spill] sm:$0xff] %v14072_v27 }
 0x7ce   :  { %v4379_v0 = vpop.f32.mrf.mxu2 }
 0x7cf   :  { %v14055_v42 = vpop.f32.mrf.mxu3  ;;  %v4380_v59 = vadd.f32 %v4379_v0, %v4301_v29  ;;  %v4224_v11 = vpop.f32.mrf.mxu0  ;;  %v16788_v0 = vld [vmem:[#allocation50_spill] sm:$0xff] }
 0x7d0   :  { %v4303_v2 = vpop.f32.mrf.mxu1  ;;  %v4225_v25 = vadd.f32 %v4224_v11, %v13667_v34  ;;  %v10032_v34 = vld [vmem:[%s15933_s0 + $0x1d8] sm:$0xff] }
 0x7d1   :  { %v14066_v35 = vmax.f32 %v16783_v9, %v4380_v59 }
 0x7d2   :  { %v4304_v39 = vadd.f32 %v4303_v2, %v4225_v25  ;;  %4263 = vmatmul.bf16.gmra.mxu0 %v16785_v23  ;;  %4342 = vmatmul.bf16.gmra.mxu1 %v14072_v27  ;;  %v16789_v2 = vld [vmem:[#allocation25_spill] sm:$0xff] }
 0x7d3   :  { %16784 = vst [vmem:[#allocation4_spill] sm:$0xff] %v14066_v35  ;;  %4421 = vmatmul.bf16.gmra.mxu2 %v14060_v43  ;;  %v16790_v25 = vmax.f32 %v16788_v0, %v16789_v2 }
 0x7d4   :  { %4528 = vmatmul.bf16.gmra.mxu3 %v10032_v34 }
 0x7d6   :  { %v4382_v11 = vpop.f32.mrf.mxu2 }
 0x7d7   :  { %v14079_v59 = vpop.f32.mrf.mxu3  ;;  %v4383_v9 = vadd.f32 %v4382_v11, %v4304_v39  ;;  %v4226_v41 = vpop.f32.mrf.mxu0  ;;  %v14092_v39 = vld [vmem:[%s15933_s0 + $0x1f0] sm:$0xff] }
 0x7d8   :  { %16787 = vst [vmem:[#allocation68_spill] sm:$0xff] %v14079_v59  ;;  %v4305_v30 = vpop.f32.mrf.mxu1  ;;  %v4227_v29 = vadd.f32 %v4226_v41, %v13674_v55  ;;  %v16792_v55 = vld [vmem:[#allocation57_spill] sm:$0xff]  ;;  %v16793_v41 = vld [vmem:[#allocation14_spill] sm:$0xff] }
 0x7d9   :  { %v14085_v50 = vmax.f32 %v16790_v25, %v4383_v9  ;;  %16791 = vst [vmem:[#allocation47_spill] sm:$0xff] %v14092_v39  ;;  %v16794_v59 = vmax.f32 %v16792_v55, %v16793_v41  ;;  %v16796_v55 = vld [vmem:[#allocation72_spill] sm:$0xff] }
 0x7da   :  { %v4306_v54 = vadd.f32 %v4305_v30, %v4227_v29  ;;  %v16795_v30 = vld [vmem:[#allocation73_spill] sm:$0xff]  ;;  %v14104_v29 = vld [vmem:[%s15933_s0 + $0x170] sm:$0xff]  ;;  %v16797_v41 = vmax.f32 %v16711_v31, %v16796_v55 }
 0x7de   :  { %v4384_v23 = vpop.f32.mrf.mxu2 }
 0x7df   :  { %v14087_v43 = vpop.f32.mrf.mxu3  ;;  %v4385_v27 = vadd.f32 %v4384_v23, %v4306_v54  ;;  %v4229_v35 = vpop.f32.mrf.mxu0 }
 0x7e0   :  { %v4308_v34 = vpop.f32.mrf.mxu1  ;;  %v4230_v11 = vadd.f32 %v4229_v35, %v13692_v10  ;;  %v10034_v10 = vld [vmem:[%s15933_s0 + $0x1e0] sm:$0xff]  ;;  %v9541_v35 = vld [vmem:[%s15935_s2 + $0xb8] sm:$0xff] }
 0x7e1   :  { %v14098_v0 = vmax.f32 %v16794_v59, %v4385_v27  ;;  %v9525_v27 = vld [vmem:[%s15935_s2 + $0x38] sm:$0xff]  ;;  %5566 = vmatpush.bf16.msra.mxu2 %v9541_v35 }
 0x7e2   :  { %v4309_v9 = vadd.f32 %v4308_v34, %v4230_v11  ;;  %4268 = vmatmul.bf16.gmra.mxu0 %v16795_v30  ;;  %4347 = vmatmul.bf16.gmra.mxu1 %v14104_v29  ;;  %v9549_v59 = vld [vmem:[%s15935_s2 + $0xf8] sm:$0xff] }
 0x7e3   :  { %4426 = vmatmul.bf16.gmra.mxu2 %v14092_v39  ;;  %5448 = vmatpush.bf16.msra.mxu0 %v9525_v27 }
 0x7e4   :  { %4533 = vmatmul.bf16.gmra.mxu3 %v10034_v10  ;;  %v9533_v10 = vld [vmem:[%s15935_s2 + $0x78] sm:$0xff] }
 0x7e5   :  { %5625 = vmatpush.bf16.msra.mxu3 %v9549_v59  ;;  %5507 = vmatpush.bf16.msra.mxu1 %v9533_v10  ;;  %v14148_v10 = vld [vmem:[%s15933_s0 + $0x178] sm:$0xff] }
 0x7e6   :  { %v4387_v2 = vpop.f32.mrf.mxu2  ;;  %16805 = vst [vmem:[#allocation25_spill] sm:$0xff] %v14148_v10 }
 0x7e7   :  { %v14120_v25 = vpop.f32.mrf.mxu3  ;;  %v4388_v54 = vadd.f32 %v4387_v2, %v4309_v9  ;;  %v4231_v23 = vpop.f32.mrf.mxu0 }
 0x7e8   :  { %v4310_v34 = vpop.f32.mrf.mxu1  ;;  %v4232_v11 = vadd.f32 %v4231_v23, %v13699_v60  ;;  %v14136_v60 = vld [vmem:[%s15933_s0 + $0x1f8] sm:$0xff]  ;;  %v16801_v23 = vld [vmem:[#allocation15_spill] sm:$0xff] }
 0x7e9   :  { %v14126_v30 = vmax.f32 %v16797_v41, %v4388_v54  ;;  %16799 = vst [vmem:[#allocation74_spill] sm:$0xff] %v14136_v60  ;;  %v16800_v54 = vld [vmem:[#allocation56_spill] sm:$0xff] }
 0x7ea   :  { %v4311_v35 = vadd.f32 %v4310_v34, %v4232_v11  ;;  %v16802_v55 = vmax.f32 %v16800_v54, %v16801_v23  ;;  %v16804_v11 = vld [vmem:[#allocation29_spill] sm:$0xff]  ;;  %v16807_v54 = vmax.f32 %v16717_v44, %v13702_v46  ;;  %v9540_v46 = vld [vmem:[%s15935_s2 + $0xb0] sm:$0xff] }
 0x7eb   :  { %16798 = vst [vmem:[#allocation12_spill] sm:$0xff] %v14126_v30  ;;  %v10037_v44 = vld [vmem:[%s15933_s0 + $0x10] sm:$0xff]  ;;  %5567 = vmatpush.bf16.msra.mxu2 %v9540_v46 }
 0x7ee   :  { %v4389_v27 = vpop.f32.mrf.mxu2 }
 0x7ef   :  { %v14131_v39 = vpop.f32.mrf.mxu3  ;;  %v4390_v59 = vadd.f32 %v4389_v27, %v4311_v35  ;;  %v4234_v9 = vpop.f32.mrf.mxu0 }
 0x7f0   :  { %v4313_v2 = vpop.f32.mrf.mxu1  ;;  %v4235_v31 = vadd.f32 %v4234_v9, %v13717_v45  ;;  %v10036_v45 = vld [vmem:[%s15933_s0 + $0x1e8] sm:$0xff] }
 0x7f1   :  { %v14142_v41 = vmax.f32 %v16802_v55, %v4390_v59 }
 0x7f2   :  { %v4314_v34 = vadd.f32 %v4313_v2, %v4235_v31  ;;  %4273 = vmatmul.bf16.gmra.mxu0 %v16804_v11  ;;  %4352 = vmatmul.bf16.gmra.mxu1 %v14148_v10 }
 0x7f3   :  { %16803 = vst [vmem:[#allocation50_spill] sm:$0xff] %v14142_v41  ;;  %4431 = vmatmul.bf16.gmra.mxu2 %v14136_v60 }
 0x7f4   :  { %4538 = vmatmul.bf16.gmra.mxu3 %v10036_v45 }
 0x7f6   :  { %v4392_v35 = vpop.f32.mrf.mxu2 }
 0x7f7   :  { %v14155_v27 = vpop.f32.mrf.mxu3  ;;  %v4393_v59 = vadd.f32 %v4392_v35, %v4314_v34  ;;  %v4236_v9 = vpop.f32.mrf.mxu0  ;;  %v16808_v34 = vld [vmem:[#allocation30_spill] sm:$0xff] }
 0x7f8   :  { %16806 = vst [vmem:[#allocation57_spill] sm:$0xff] %v14155_v27  ;;  %v4315_v2 = vpop.f32.mrf.mxu1  ;;  %v4237_v31 = vadd.f32 %v4236_v9, %v13724_v21  ;;  %v16809_v35 = vmax.f32 %v13330_v47, %v16808_v34  ;;  %v9524_v47 = vld [vmem:[%s15935_s2 + $0x30] sm:$0xff] }
 0x7f9   :  { %v14161_v23 = vmax.f32 %v16807_v54, %v4393_v59  ;;  %v10038_v59 = vld [vmem:[%s15933_s0 + $0x90] sm:$0xff]  ;;  %5449 = vmatpush.bf16.msra.mxu0 %v9524_v47 }
 0x7fa   :  { %v4316_v55 = vadd.f32 %v4315_v2, %v4237_v31 }
 0x7fe   :  { %v4394_v11 = vpop.f32.mrf.mxu2 }
 0x7ff   :  { %v14163_v60 = vpop.f32.mrf.mxu3  ;;  %v4395_v10 = vadd.f32 %v4394_v11, %v4316_v55  ;;  %v4239_v41 = vpop.f32.mrf.mxu0 }
 0x800   :  { %v4318_v45 = vpop.f32.mrf.mxu1  ;;  %v4240_v30 = vadd.f32 %v4239_v41, %v13747_v58  ;;  %v9548_v58 = vld [vmem:[%s15935_s2 + $0xf0] sm:$0xff]  ;;  %v16810_v41 = vld [vmem:[#allocation3_spill] sm:$0xff] }
 0x801   :  { %v14169_v27 = vmax.f32 %v16809_v35, %v4395_v10  ;;  %v9532_v10 = vld [vmem:[%s15935_s2 + $0x70] sm:$0xff]  ;;  %5626 = vmatpush.bf16.msra.mxu3 %v9548_v58 }
 0x802   :  { %v4319_v21 = vadd.f32 %v4318_v45, %v4240_v30  ;;  %4552 = vmatmul.bf16.vlgmr.msrb.gmra.mxu0 %v10037_v44  ;;  %4631 = vmatmul.bf16.vlgmr.msrb.gmra.mxu1 %v10038_v59  ;;  %v16811_v30 = vld [vmem:[#allocation75_spill] sm:$0xff]  ;;  %v16812_v45 = vmax.f32 %v13335_v28, %v13732_v8  ;;  %v10039_v28 = vld [vmem:[%s15933_s0 + $0x18] sm:$0xff] }
 0x803   :  { %4710 = vmatmul.bf16.vlgmr.msrb.gmra.mxu2 %v16810_v41  ;;  %5508 = vmatpush.bf16.msra.mxu1 %v9532_v10  ;;  %v10040_v8 = vld [vmem:[%s15933_s0 + $0x98] sm:$0xff] }
 0x804   :  { %4789 = vmatmul.bf16.vlgmr.msrb.gmra.mxu3 %v16811_v30 }
 0x806   :  { %v4397_v9 = vpop.f32.mrf.mxu2 }
 0x807   :  { %v14191_v2 = vpop.f32.mrf.mxu3  ;;  %v4398_v31 = vadd.f32 %v4397_v9, %v4319_v21  ;;  %v4241_v54 = vpop.f32.mrf.mxu0  ;;  %v16813_v21 = vld [vmem:[#allocation22_spill] sm:$0xff]  ;;  %v16815_v9 = vld [vmem:[#allocation24_spill] sm:$0xff] }
 0x808   :  { %v4320_v55 = vpop.f32.mrf.mxu1  ;;  %v4242_v11 = vadd.f32 %v4241_v54, %v13754_v38  ;;  %v16814_v30 = vmax.f32 %v13361_v4, %v16813_v21 }
 0x809   :  { %v14197_v34 = vmax.f32 %v16812_v45, %v4398_v31  ;;  %v16816_v31 = vld [vmem:[#allocation9_spill] sm:$0xff] }
 0x80a   :  { %v4321_v35 = vadd.f32 %v4320_v55, %v4242_v11 }
 0x80e   :  { %v4399_v44 = vpop.f32.mrf.mxu2 }
 0x80f   :  { %v14199_v59 = vpop.f32.mrf.mxu3  ;;  %v4400_v46 = vadd.f32 %v4399_v44, %v4321_v35  ;;  %v4244_v47 = vpop.f32.mrf.mxu0  ;;  %v16817_v35 = vmax.f32 %v13390_v48, %v13762_v5 }
 0x810   :  { %v4323_v58 = vpop.f32.mrf.mxu1  ;;  %v4245_v41 = vadd.f32 %v4244_v47, %v13777_v18  ;;  %v9539_v47 = vld [vmem:[%s15935_s2 + $0xa8] sm:$0xff] }
 0x811   :  { %v14205_v10 = vmax.f32 %v16814_v30, %v4400_v46  ;;  %5568 = vmatpush.bf16.msra.mxu2 %v9539_v47 }
 0x812   :  { %v4324_v38 = vadd.f32 %v4323_v58, %v4245_v41  ;;  %4557 = vmatmul.bf16.gmra.mxu0 %v10039_v28  ;;  %4636 = vmatmul.bf16.gmra.mxu1 %v10040_v8  ;;  %v9523_v58 = vld [vmem:[%s15935_s2 + $0x28] sm:$0xff]  ;;  %v16818_v28 = vld [vmem:[#allocation26_spill] sm:$0xff] }
 0x813   :  { %4715 = vmatmul.bf16.gmra.mxu2 %v16815_v9  ;;  %v9547_v41 = vld [vmem:[%s15935_s2 + $0xe8] sm:$0xff]  ;;  %5450 = vmatpush.bf16.msra.mxu0 %v9523_v58  ;;  %v16819_v8 = vmax.f32 %v13428_v20, %v16818_v28 }
 0x814   :  { %4794 = vmatmul.bf16.gmra.mxu3 %v16816_v31  ;;  %v9531_v31 = vld [vmem:[%s15935_s2 + $0x68] sm:$0xff] }
 0x815   :  { %5627 = vmatpush.bf16.msra.mxu3 %v9547_v41  ;;  %v16821_v20 = vld [vmem:[#allocation43_spill] sm:$0xff]  ;;  %5509 = vmatpush.bf16.msra.mxu1 %v9531_v31  ;;  %v16822_v41 = vmax.f32 %v13457_v33, %v13792_v62 }
 0x816   :  { %v4402_v18 = vpop.f32.mrf.mxu2  ;;  %v10043_v33 = vld [vmem:[%s15933_s0 + $0x28] sm:$0xff] }
 0x817   :  { %v14215_v54 = vpop.f32.mrf.mxu3  ;;  %v4403_v4 = vadd.f32 %v4402_v18, %v4324_v38  ;;  %v4246_v55 = vpop.f32.mrf.mxu0  ;;  %v10044_v62 = vld [vmem:[%s15933_s0 + $0xa8] sm:$0xff] }
 0x818   :  { %v4325_v11 = vpop.f32.mrf.mxu1  ;;  %v4247_v45 = vadd.f32 %v4246_v55, %v13784_v19  ;;  %v10042_v55 = vld [vmem:[%s15933_s0 + $0xa0] sm:$0xff] }
 0x819   :  { %v14221_v44 = vmax.f32 %v16817_v35, %v4403_v4  ;;  %v10041_v4 = vld [vmem:[%s15933_s0 + $0x20] sm:$0xff] }
 0x81a   :  { %v4326_v46 = vadd.f32 %v4325_v11, %v4247_v45 }
 0x81e   :  { %v4404_v19 = vpop.f32.mrf.mxu2 }
 0x81f   :  { %v14232_v48 = vpop.f32.mrf.mxu3  ;;  %v4405_v5 = vadd.f32 %v4404_v19, %v4326_v46  ;;  %v4249_v21 = vpop.f32.mrf.mxu0 }
 0x820   :  { %v4328_v30 = vpop.f32.mrf.mxu1  ;;  %v4250_v38 = vadd.f32 %v4249_v21, %v13807_v15  ;;  %v16820_v15 = vld [vmem:[#allocation20_spill] sm:$0xff] }
 0x821   :  { %v14238_v9 = vmax.f32 %v16819_v8, %v4405_v5 }
 0x822   :  { %v4329_v18 = vadd.f32 %v4328_v30, %v4250_v38  ;;  %4562 = vmatmul.bf16.gmra.mxu0 %v10041_v4  ;;  %4641 = vmatmul.bf16.gmra.mxu1 %v10042_v55 }
 0x823   :  { %4720 = vmatmul.bf16.gmra.mxu2 %v16820_v15  ;;  %v16825_v15 = vld [vmem:[#allocation28_spill] sm:$0xff] }
 0x824   :  { %4799 = vmatmul.bf16.gmra.mxu3 %v16821_v20  ;;  %v16826_v20 = vld [vmem:[#allocation48_spill] sm:$0xff] }
 0x826   :  { %v4407_v11 = vpop.f32.mrf.mxu2 }
 0x827   :  { %v14251_v45 = vpop.f32.mrf.mxu3  ;;  %v4408_v35 = vadd.f32 %v4407_v11, %v4329_v18  ;;  %v4251_v46 = vpop.f32.mrf.mxu0  ;;  %v16823_v18 = vld [vmem:[#allocation21_spill] sm:$0xff] }
 0x828   :  { %v4330_v47 = vpop.f32.mrf.mxu1  ;;  %v4252_v58 = vadd.f32 %v4251_v46, %v13814_v26  ;;  %v16824_v4 = vmax.f32 %v13483_v49, %v16823_v18 }
 0x829   :  { %v14257_v19 = vmax.f32 %v16822_v41, %v4408_v35 }
 0x82a   :  { %v4331_v5 = vadd.f32 %v4330_v47, %v4252_v58  ;;  %v16827_v58 = vmax.f32 %v13488_v1, %v13822_v12 }
 0x82e   :  { %v4409_v21 = vpop.f32.mrf.mxu2 }
 0x82f   :  { %v14259_v30 = vpop.f32.mrf.mxu3  ;;  %v4410_v38 = vadd.f32 %v4409_v21, %v4331_v5  ;;  %v4254_v28 = vpop.f32.mrf.mxu0  ;;  %v9538_v5 = vld [vmem:[%s15935_s2 + $0xa0] sm:$0xff] }
 0x830   :  { %v4333_v8 = vpop.f32.mrf.mxu1  ;;  %v4255_v31 = vadd.f32 %v4254_v28, %v13837_v51  ;;  %v9546_v28 = vld [vmem:[%s15935_s2 + $0xe0] sm:$0xff]  ;;  %5569 = vmatpush.bf16.msra.mxu2 %v9538_v5 }
 0x831   :  { %v14265_v55 = vmax.f32 %v16824_v4, %v4410_v38  ;;  %v9522_v38 = vld [vmem:[%s15935_s2 + $0x20] sm:$0xff]  ;;  %5628 = vmatpush.bf16.msra.mxu3 %v9546_v28 }
 0x832   :  { %v4334_v26 = vadd.f32 %v4333_v8, %v4255_v31  ;;  %4567 = vmatmul.bf16.gmra.mxu0 %v10043_v33  ;;  %4646 = vmatmul.bf16.gmra.mxu1 %v10044_v62 }
 0x833   :  { %4725 = vmatmul.bf16.gmra.mxu2 %v16825_v15  ;;  %5451 = vmatpush.bf16.msra.mxu0 %v9522_v38 }
 0x834   :  { %4804 = vmatmul.bf16.gmra.mxu3 %v16826_v20  ;;  %v10045_v20 = vld [vmem:[%s15933_s0 + $0x30] sm:$0xff] }
 0x836   :  { %v4412_v51 = vpop.f32.mrf.mxu2 }
 0x837   :  { %v14275_v11 = vpop.f32.mrf.mxu3  ;;  %v4413_v49 = vadd.f32 %v4412_v51, %v4334_v26  ;;  %v4256_v35 = vpop.f32.mrf.mxu0  ;;  %v16828_v26 = vld [vmem:[#allocation19_spill] sm:$0xff]  ;;  %v10046_v51 = vld [vmem:[%s15933_s0 + $0xb0] sm:$0xff] }
 0x838   :  { %v4335_v46 = vpop.f32.mrf.mxu1  ;;  %v4257_v47 = vadd.f32 %v4256_v35, %v13844_v16  ;;  %v9530_v16 = vld [vmem:[%s15935_s2 + $0x60] sm:$0xff]  ;;  %v16829_v33 = vmax.f32 %v13502_v40, %v16828_v26  ;;  %v16831_v35 = vld [vmem:[#allocation53_spill] sm:$0xff]  ;;  %v16833_v26 = vld [vmem:[#allocation36_spill] sm:$0xff] }
 0x839   :  { %v14281_v41 = vmax.f32 %v16827_v58, %v4413_v49  ;;  %5510 = vmatpush.bf16.msra.mxu1 %v9530_v16  ;;  %v16830_v49 = vld [vmem:[#allocation32_spill] sm:$0xff] }
 0x83a   :  { %v4336_v21 = vadd.f32 %v4335_v46, %v4257_v47 }
 0x83e   :  { %v4414_v1 = vpop.f32.mrf.mxu2 }
 0x83f   :  { %v14295_v12 = vpop.f32.mrf.mxu3  ;;  %v4415_v8 = vadd.f32 %v4414_v1, %v4336_v21  ;;  %v4259_v31 = vpop.f32.mrf.mxu0  ;;  %v16832_v21 = vmax.f32 %v13507_v14, %v13852_v61  ;;  %v10047_v14 = vld [vmem:[%s15933_s0 + $0x38] sm:$0xff] }
 0x840   :  { %v4338_v18 = vpop.f32.mrf.mxu1  ;;  %v4260_v4 = vadd.f32 %v4259_v31, %v13867_v22  ;;  %v10048_v61 = vld [vmem:[%s15933_s0 + $0xb8] sm:$0xff] }
 0x841   :  { %v14301_v62 = vmax.f32 %v16829_v33, %v4415_v8  ;;  %v16834_v33 = vmax.f32 %v13521_v13, %v16833_v26  ;;  %v9537_v13 = vld [vmem:[%s15935_s2 + $0x98] sm:$0xff] }
 0x842   :  { %v4339_v15 = vadd.f32 %v4338_v18, %v4260_v4  ;;  %4572 = vmatmul.bf16.gmra.mxu0 %v10045_v20  ;;  %4651 = vmatmul.bf16.gmra.mxu1 %v10046_v51  ;;  %v16835_v20 = vld [vmem:[#allocation46_spill] sm:$0xff]  ;;  %v16836_v51 = vld [vmem:[#allocation40_spill] sm:$0xff] }
 0x843   :  { %4730 = vmatmul.bf16.gmra.mxu2 %v16830_v49  ;;  %v9545_v49 = vld [vmem:[%s15935_s2 + $0xd8] sm:$0xff] }
 0x844   :  { %4809 = vmatmul.bf16.gmra.mxu3 %v16831_v35  ;;  %5570 = vmatpush.bf16.msra.mxu2 %v9537_v13  ;;  %v10049_v13 = vld [vmem:[%s15933_s0 + $0x40] sm:$0xff] }
 0x845   :  { %5629 = vmatpush.bf16.msra.mxu3 %v9545_v49  ;;  %v16842_v49 = vld [vmem:[#allocation51_spill] sm:$0xff] }
 0x846   :  { %v4417_v22 = vpop.f32.mrf.mxu2 }
 0x847   :  { %v14311_v46 = vpop.f32.mrf.mxu3  ;;  %v4418_v40 = vadd.f32 %v4417_v22, %v4339_v15  ;;  %v4261_v47 = vpop.f32.mrf.mxu0 }
 0x848   :  { %v4340_v58 = vpop.f32.mrf.mxu1  ;;  %v4262_v5 = vadd.f32 %v4261_v47, %v13874_v36 }
 0x849   :  { %v14317_v38 = vmax.f32 %v16832_v21, %v4418_v40  ;;  %v16837_v21 = vld [vmem:[#allocation41_spill] sm:$0xff] }
 0x84a   :  { %v4341_v28 = vadd.f32 %v4340_v58, %v4262_v5 }
 0x84e   :  { %v4419_v16 = vpop.f32.mrf.mxu2 }
 0x84f   :  { %v14319_v1 = vpop.f32.mrf.mxu3  ;;  %v4420_v8 = vadd.f32 %v4419_v16, %v4341_v28  ;;  %v4264_v31 = vpop.f32.mrf.mxu0  ;;  %v16838_v28 = vmax.f32 %v13526_v24, %v16837_v21  ;;  %v16844_v21 = vld [vmem:[#allocation52_spill] sm:$0xff] }
 0x850   :  { %v4343_v18 = vpop.f32.mrf.mxu1  ;;  %v4265_v4 = vadd.f32 %v4264_v31, %v13897_v17  ;;  %v9521_v17 = vld [vmem:[%s15935_s2 + $0x18] sm:$0xff] }
 0x851   :  { %v14325_v15 = vmax.f32 %v16834_v33, %v4420_v8  ;;  %5452 = vmatpush.bf16.msra.mxu0 %v9521_v17  ;;  %v9529_v8 = vld [vmem:[%s15935_s2 + $0x58] sm:$0xff]  ;;  %v10050_v17 = vld [vmem:[%s15933_s0 + $0xc0] sm:$0xff] }
 0x852   :  { %v4344_v36 = vadd.f32 %v4343_v18, %v4265_v4  ;;  %4577 = vmatmul.bf16.gmra.mxu0 %v10047_v14  ;;  %4656 = vmatmul.bf16.gmra.mxu1 %v10048_v61  ;;  %v16840_v61 = vld [vmem:[#allocation42_spill] sm:$0xff] }
 0x853   :  { %4735 = vmatmul.bf16.gmra.mxu2 %v16835_v20  ;;  %5511 = vmatpush.bf16.msra.mxu1 %v9529_v8  ;;  %v16845_v8 = vld [vmem:[#allocation60_spill] sm:$0xff] }
 0x854   :  { %4814 = vmatmul.bf16.gmra.mxu3 %v16836_v51 }
 0x856   :  { %v4422_v35 = vpop.f32.mrf.mxu2 }
 0x857   :  { %v14344_v22 = vpop.f32.mrf.mxu3  ;;  %v4423_v40 = vadd.f32 %v4422_v35, %v4344_v36  ;;  %v4266_v47 = vpop.f32.mrf.mxu0  ;;  %v16843_v35 = vld [vmem:[#allocation45_spill] sm:$0xff] }
 0x858   :  { %v4345_v58 = vpop.f32.mrf.mxu1  ;;  %v4267_v5 = vadd.f32 %v4266_v47, %v13904_v37  ;;  %v16839_v37 = vld [vmem:[#allocation54_spill] sm:$0xff] }
 0x859   :  { %v14350_v16 = vmax.f32 %v16838_v28, %v4423_v40  ;;  %v16841_v20 = vmax.f32 %v16839_v37, %v16840_v61 }
 0x85a   :  { %v4346_v31 = vadd.f32 %v4345_v58, %v4267_v5 }
 0x85e   :  { %v4424_v18 = vpop.f32.mrf.mxu2 }
 0x85f   :  { %v14355_v4 = vpop.f32.mrf.mxu3  ;;  %v4425_v26 = vadd.f32 %v4424_v18, %v4346_v31  ;;  %v4269_v33 = vpop.f32.mrf.mxu0  ;;  %v16846_v31 = vld [vmem:[#allocation44_spill] sm:$0xff] }
 0x860   :  { %v4348_v36 = vpop.f32.mrf.mxu1  ;;  %v4270_v14 = vadd.f32 %v4269_v33, %v13927_v6  ;;  %v16847_v18 = vmax.f32 %v16845_v8, %v16846_v31 }
 0x861   :  { %v14361_v24 = vmax.f32 %v16841_v20, %v4425_v26 }
 0x862   :  { %v4349_v51 = vadd.f32 %v4348_v36, %v4270_v14  ;;  %4582 = vmatmul.bf16.gmra.mxu0 %v10049_v13  ;;  %4661 = vmatmul.bf16.gmra.mxu1 %v10050_v17  ;;  %v16848_v17 = vld [vmem:[#allocation65_spill] sm:$0xff] }
 0x863   :  { %4740 = vmatmul.bf16.gmra.mxu2 %v16842_v49 }
 0x864   :  { %4819 = vmatmul.bf16.gmra.mxu3 %v16843_v35 }
 0x866   :  { %v4427_v6 = vpop.f32.mrf.mxu2 }
 0x867   :  { %v14371_v40 = vpop.f32.mrf.mxu3  ;;  %v4428_v47 = vadd.f32 %v4427_v6, %v4349_v51  ;;  %v4271_v58 = vpop.f32.mrf.mxu0  ;;  %v16849_v51 = vld [vmem:[#allocation49_spill] sm:$0xff] }
 0x868   :  { %v4350_v5 = vpop.f32.mrf.mxu1  ;;  %v4272_v28 = vadd.f32 %v4271_v58, %v16844_v21  ;;  %v16850_v49 = vmax.f32 %v16848_v17, %v16849_v51  ;;  %v10052_v58 = vld [vmem:[%s15933_s0 + $0xc8] sm:$0xff]  ;;  %v9536_v17 = vld [vmem:[%s15935_s2 + $0x90] sm:$0xff] }
 0x869   :  { %v14377_v26 = vmax.f32 %v16847_v18, %v4428_v47  ;;  %v10051_v47 = vld [vmem:[%s15933_s0 + $0x48] sm:$0xff]  ;;  %v9520_v51 = vld [vmem:[%s15935_s2 + $0x10] sm:$0xff]  ;;  %5571 = vmatpush.bf16.msra.mxu2 %v9536_v17 }
 0x86a   :  { %v4351_v33 = vadd.f32 %v4350_v5, %v4272_v28  ;;  %v16852_v5 = vld [vmem:[#allocation58_spill] sm:$0xff]  ;;  %v16853_v21 = vld [vmem:[#allocation55_spill] sm:$0xff]  ;;  %5453 = vmatpush.bf16.msra.mxu0 %v9520_v51  ;;  %v16864_v17 = vld [vmem:[#allocation64_spill] sm:$0xff] }
 0x86b   :  { %v16865_v51 = vld [vmem:[#allocation2_spill] sm:$0xff] }
 0x86e   :  { %v4429_v36 = vpop.f32.mrf.mxu2 }
 0x86f   :  { %v14379_v14 = vpop.f32.mrf.mxu3  ;;  %v4430_v37 = vadd.f32 %v4429_v36, %v4351_v33  ;;  %v4274_v61 = vpop.f32.mrf.mxu0  ;;  %v16854_v36 = vld [vmem:[#allocation59_spill] sm:$0xff] }
 0x870   :  { %v4353_v20 = vpop.f32.mrf.mxu1  ;;  %v4275_v13 = vadd.f32 %v4274_v61, %v13957_v52 }
 0x871   :  { %v14385_v35 = vmax.f32 %v16850_v49, %v4430_v37  ;;  %v16855_v37 = vld [vmem:[#allocation61_spill] sm:$0xff]  ;;  %v9544_v49 = vld [vmem:[%s15935_s2 + $0xd0] sm:$0xff] }
 0x872   :  { %v4354_v6 = vadd.f32 %v4353_v20, %v4275_v13  ;;  %4587 = vmatmul.bf16.gmra.mxu0 %v10051_v47  ;;  %4666 = vmatmul.bf16.gmra.mxu1 %v10052_v58  ;;  %v16856_v61 = vmax.f32 %v16854_v36, %v16855_v37  ;;  %v9528_v47 = vld [vmem:[%s15935_s2 + $0x50] sm:$0xff] }
 0x873   :  { %16851 = vst [vmem:[#allocation14_spill] sm:$0xff] %v14385_v35  ;;  %4745 = vmatmul.bf16.gmra.mxu2 %v16852_v5  ;;  %5630 = vmatpush.bf16.msra.mxu3 %v9544_v49 }
 0x874   :  { %4824 = vmatmul.bf16.gmra.mxu3 %v16853_v21  ;;  %5512 = vmatpush.bf16.msra.mxu1 %v9528_v47 }
 0x876   :  { %v4432_v52 = vpop.f32.mrf.mxu2 }
 0x877   :  { %v14395_v28 = vpop.f32.mrf.mxu3  ;;  %v4433_v8 = vadd.f32 %v4432_v52, %v4354_v6  ;;  %v4276_v31 = vpop.f32.mrf.mxu0  ;;  %v16859_v52 = vld [vmem:[#allocation63_spill] sm:$0xff] }
 0x878   :  { %v4355_v18 = vpop.f32.mrf.mxu1  ;;  %v4277_v33 = vadd.f32 %v4276_v31, %v13964_v7  ;;  %v16860_v31 = vld [vmem:[#allocation62_spill] sm:$0xff] }
 0x879   :  { %v14401_v20 = vmax.f32 %v16856_v61, %v4433_v8  ;;  %v10053_v61 = vld [vmem:[%s15933_s0 + $0x50] sm:$0xff] }
 0x87a   :  { %v4356_v13 = vadd.f32 %v4355_v18, %v4277_v33  ;;  %v16861_v18 = vld [vmem:[#allocation6_spill] sm:$0xff] }
 0x87b   :  { %16857 = vst [vmem:[#allocation73_spill] sm:$0xff] %v14401_v20  ;;  %v16862_v33 = vmax.f32 %v16860_v31, %v16861_v18 }
 0x87e   :  { %v4434_v6 = vpop.f32.mrf.mxu2 }
 0x87f   :  { %v14412_v7 = vpop.f32.mrf.mxu3  ;;  %v4435_v58 = vadd.f32 %v4434_v6, %v4356_v13  ;;  %v4553_v5 = vpop.f32.mrf.mxu0  ;;  %v10054_v13 = vld [vmem:[%s15933_s0 + $0xd0] sm:$0xff] }
 0x880   :  { %16858 = vst [vmem:[#allocation72_spill] sm:$0xff] %v14412_v7  ;;  %v4632_v21 = vpop.f32.mrf.mxu1  ;;  %v4554_v8 = vadd.f32 %v4553_v5, %v16859_v52 }
 0x881   :  { %v14421_v36 = vmax.f32 %v16862_v33, %v4435_v58 }
 0x882   :  { %v4633_v37 = vadd.f32 %v4632_v21, %v4554_v8  ;;  %4592 = vmatmul.bf16.gmra.mxu0 %v10053_v61  ;;  %4671 = vmatmul.bf16.gmra.mxu1 %v10054_v13  ;;  %v14436_v61 = vld [vmem:[%s15934_s6] ss:$0 sm:$0xff] }
 0x883   :  { %16863 = vst [vmem:[#allocation56_spill] sm:$0xff] %v14421_v36  ;;  %4750 = vmatmul.bf16.gmra.mxu2 %v16864_v17 }
 0x884   :  { %4829 = vmatmul.bf16.gmra.mxu3 %v16865_v51 }
 0x886   :  { %v4711_v49 = vpop.f32.mrf.mxu2 }
 0x887   :  { %v4790_v6 = vpop.f32.mrf.mxu3  ;;  %v4712_v47 = vadd.f32 %v4711_v49, %v4633_v37  ;;  %v4555_v58 = vpop.f32.mrf.mxu0  ;;  %v16866_v49 = vld [vmem:[#allocation67_spill] sm:$0xff] }
 0x888   :  { %v4634_v5 = vpop.f32.mrf.mxu1  ;;  %v4556_v21 = vadd.f32 %v4555_v58, %v13991_v3  ;;  %v16867_v58 = vld [vmem:[#allocation70_spill] sm:$0xff] }
 0x889   :  { %v4791_v52 = vadd.f32 %v4790_v6, %v4712_v47  ;;  %v10057_v6 = vld [vmem:[%s15933_s0 + $0xd8] sm:$0xff] }
 0x88a   :  { %v4635_v8 = vadd.f32 %v4634_v5, %v4556_v21  ;;  %v16868_v21 = vld [vmem:[#allocation35_spill] sm:$0xff] }
 0x88b   :  { %v4860_v31 = vmax.f32 %v13989_v32, %v4791_v52  ;;  %v10056_v32 = vld [vmem:[%s15933_s0 + $0x58] sm:$0xff]  ;;  %v16869_v52 = vld [vmem:[#allocation27_spill] sm:$0xff] }
 0x88d   :  { %v4888_v13 = vadd.f32 %v14436_v61, %v4860_v31  ;;  %v9543_v31 = vld [vmem:[%s15935_s2 + $0xc8] sm:$0xff] }
 0x88e   :  { %v4713_v18 = vpop.f32.mrf.mxu2  ;;  %5631 = vmatpush.bf16.msra.mxu3 %v9543_v31 }
 0x88f   :  { %v4792_v33 = vpop.f32.mrf.mxu3  ;;  %v4714_v17 = vadd.f32 %v4713_v18, %v4635_v8  ;;  %v4558_v51 = vpop.f32.mrf.mxu0  ;;  %v4916_v47 = vmax.f32 %v4888_v13, 0.0  ;;  %v9519_v8 = vld [vmem:[%s15935_s2 + $0x8] sm:$0xff] }
 0x890   :  { %v4637_v37 = vpop.f32.mrf.mxu1  ;;  %v4559_v36 = vadd.f32 %v4558_v51, %v16866_v49  ;;  %5454 = vmatpush.bf16.msra.mxu0 %v9519_v8 }
 0x891   :  { %v4793_v20 = vadd.f32 %v4792_v33, %v4714_v17  ;;  %v4944_v13 = vpack.c.bf16 %v4916_v47, %v4916_v47 }
 0x892   :  { %v4638_v3 = vadd.f32 %v4637_v37, %v4559_v36  ;;  %4597 = vmatmul.bf16.gmra.mxu0 %v10056_v32  ;;  %4676 = vmatmul.bf16.gmra.mxu1 %v10057_v6  ;;  %v9535_v36 = vld [vmem:[%s15935_s2 + $0x88] sm:$0xff] }
 0x893   :  { %v4861_v5 = vmax.f32 %v16867_v58, %v4793_v20  ;;  %4755 = vmatmul.bf16.gmra.mxu2 %v16868_v21 }
 0x894   :  { %4834 = vmatmul.bf16.gmra.mxu3 %v16869_v52  ;;  %5572 = vmatpush.bf16.msra.mxu2 %v9535_v36  ;;  %v5052_v52 = vunpack.c.l.b16 %v4944_v13  ;;  %v14466_v36 = vld [vmem:[%s15935_s2 + $0x48] sm:$0xff] }
 0x895   :  { %v4889_v18 = vadd.f32 %v14436_v61, %v4861_v5  ;;  %5513 = vmatpush.bf16.msra.mxu1 %v14466_v36 }
 0x896   :  { %v4716_v20 = vpop.f32.mrf.mxu2 }
 0x897   :  { %v4795_v33 = vpop.f32.mrf.mxu3  ;;  %v4917_v17 = vmax.f32 %v4889_v18, 0.0  ;;  %v4717_v51 = vadd.f32 %v4716_v20, %v4638_v3  ;;  %v4560_v37 = vpop.f32.mrf.mxu0 }
 0x898   :  { %v4639_v49 = vpop.f32.mrf.mxu1  ;;  %v4561_v32 = vadd.f32 %v4560_v37, %v14023_v53  ;;  %v16872_v37 = vld [vmem:[#allocation69_spill] sm:$0xff] }
 0x899   :  { %v4945_v6 = vpack.c.bf16 %v4917_v17, %v4917_v17  ;;  %v4796_v58 = vadd.f32 %v4795_v33, %v4717_v51  ;;  %v16871_v51 = vld [vmem:[#allocation66_spill] sm:$0xff] }
 0x89a   :  { %v4640_v21 = vadd.f32 %v4639_v49, %v4561_v32 }
 0x89b   :  { %v5053_v7 = vunpack.c.l.b16 %v4945_v6  ;;  %v4862_v35 = vmax.f32 %v14021_v56, %v4796_v58  ;;  %v10058_v56 = vld [vmem:[%s15933_s0 + $0x60] sm:$0xff] }
 0x89d   :  { %v14461_v5 = vpack.c.b16 %v5053_v7, %v5052_v52  ;;  %v4890_v8 = vadd.f32 %v14436_v61, %v4862_v35  ;;  %v10059_v7 = vld [vmem:[%s15933_s0 + $0xe0] sm:$0xff]  ;;  %v16870_v35 = vld [vmem:[#allocation31_spill] sm:$0xff] }
 0x89e   :  { %v4718_v47 = vpop.f32.mrf.mxu2 }
 0x89f   :  { %v4797_v3 = vpop.f32.mrf.mxu3  ;;  %v4719_v31 = vadd.f32 %v4718_v47, %v4640_v21  ;;  %v4563_v53 = vpop.f32.mrf.mxu0  ;;  %v4918_v13 = vmax.f32 %v4890_v8, 0.0 }
 0x8a0   :  { %v4642_v18 = vpop.f32.mrf.mxu1  ;;  %v4564_v33 = vadd.f32 %v4563_v53, %v14047_v63 }
 0x8a1   :  { %v4798_v20 = vadd.f32 %v4797_v3, %v4719_v31  ;;  %v4946_v58 = vpack.c.bf16 %v4918_v13, %v4918_v13 }
 0x8a2   :  { %4602 = vmatmul.bf16.gmra.mxu0 %v10058_v56  ;;  %4681 = vmatmul.bf16.gmra.mxu1 %v10059_v7  ;;  %v4643_v63 = vadd.f32 %v4642_v18, %v4564_v33 }
 0x8a3   :  { %v4863_v17 = vmax.f32 %v16870_v35, %v4798_v20  ;;  %4760 = vmatmul.bf16.gmra.mxu2 %v16871_v51  ;;  %v5054_v56 = vunpack.c.l.b16 %v4946_v58  ;;  %v16874_v58 = vld [vmem:[#allocation4_spill] sm:$0xff] }
 0x8a4   :  { %4839 = vmatmul.bf16.gmra.mxu3 %v16872_v37 }
 0x8a5   :  { %v4891_v49 = vadd.f32 %v14436_v61, %v4863_v17 }
 0x8a6   :  { %v4721_v32 = vpop.f32.mrf.mxu2 }
 0x8a7   :  { %v4800_v6 = vpop.f32.mrf.mxu3  ;;  %v4919_v21 = vmax.f32 %v4891_v49, 0.0  ;;  %v4722_v52 = vadd.f32 %v4721_v32, %v4643_v63  ;;  %v4565_v47 = vpop.f32.mrf.mxu0  ;;  %v16873_v32 = vld [vmem:[#allocation68_spill] sm:$0xff] }
 0x8a8   :  { %v4644_v3 = vpop.f32.mrf.mxu1  ;;  %v4566_v8 = vadd.f32 %v4565_v47, %v14055_v42  ;;  %v10060_v42 = vld [vmem:[%s15933_s0 + $0x68] sm:$0xff] }
 0x8a9   :  { %v4947_v31 = vpack.c.bf16 %v4919_v21, %v4919_v21  ;;  %v4801_v53 = vadd.f32 %v4800_v6, %v4722_v52  ;;  %v16875_v47 = vld [vmem:[#allocation71_spill] sm:$0xff] }
 0x8aa   :  { %v4645_v35 = vadd.f32 %v4644_v3, %v4566_v8  ;;  %v16876_v3 = vld [vmem:[#allocation37_spill] sm:$0xff]  ;;  %v9542_v8 = vld [vmem:[%s15935_s2 + $0xc0] sm:$0xff] }
 0x8ab   :  { %v5055_v20 = vunpack.c.l.b16 %v4947_v31  ;;  %v4864_v7 = vmax.f32 %v14053_v57, %v4801_v53  ;;  %v10061_v57 = vld [vmem:[%s15933_s0 + $0xe8] sm:$0xff]  ;;  %v9534_v31 = vld [vmem:[%s15935_s2 + $0x80] sm:$0xff]  ;;  %5632 = vmatpush.bf16.msra.mxu3 %v9542_v8 }
 0x8ac   :  { %v14502_v53 = vld [vmem:[%s15935_s2] sm:$0xff]  ;;  %5573 = vmatpush.bf16.msra.mxu2 %v9534_v31 }
 0x8ad   :  { %v14483_v51 = vpack.c.b16 %v5055_v20, %v5054_v56  ;;  %v4892_v33 = vadd.f32 %v14436_v61, %v4864_v7  ;;  %v14510_v56 = vld [vmem:[%s15935_s2 + $0x40] sm:$0xff]  ;;  %5455 = vmatpush.bf16.msra.mxu0 %v14502_v53 }
 0x8ae   :  { %v4723_v17 = vpop.f32.mrf.mxu2  ;;  %5514 = vmatpush.bf16.msra.mxu1 %v14510_v56 }
 0x8af   :  { %v4802_v18 = vpop.f32.mrf.mxu3  ;;  %v4724_v13 = vadd.f32 %v4723_v17, %v4645_v35  ;;  %v4568_v37 = vpop.f32.mrf.mxu0  ;;  %v4920_v6 = vmax.f32 %v4892_v33, 0.0 }
 0x8b0   :  { %v4647_v49 = vpop.f32.mrf.mxu1  ;;  %v4569_v21 = vadd.f32 %v4568_v37, %v16873_v32 }
 0x8b1   :  { %v4803_v63 = vadd.f32 %v4802_v18, %v4724_v13  ;;  %v4948_v18 = vpack.c.bf16 %v4920_v6, %v4920_v6 }
 0x8b2   :  { %4607 = vmatmul.bf16.gmra.mxu0 %v10060_v42  ;;  %4686 = vmatmul.bf16.gmra.mxu1 %v10061_v57  ;;  %v4648_v7 = vadd.f32 %v4647_v49, %v4569_v21 }
 0x8b3   :  { %v4865_v52 = vmax.f32 %v16874_v58, %v4803_v63  ;;  %4765 = vmatmul.bf16.gmra.mxu2 %v16875_v47  ;;  %v5056_v58 = vunpack.c.l.b16 %v4948_v18 }
 0x8b4   :  { %4844 = vmatmul.bf16.gmra.mxu3 %v16876_v3 }
 0x8b5   :  { %v4893_v20 = vadd.f32 %v14436_v61, %v4865_v52 }
 0x8b6   :  { %v4726_v35 = vpop.f32.mrf.mxu2 }
 0x8b7   :  { %v4805_v17 = vpop.f32.mrf.mxu3  ;;  %v4921_v33 = vmax.f32 %v4893_v20, 0.0  ;;  %v4727_v13 = vadd.f32 %v4726_v35, %v4648_v7  ;;  %v4570_v37 = vpop.f32.mrf.mxu0 }
 0x8b8   :  { %v4649_v63 = vpop.f32.mrf.mxu1  ;;  %v4571_v57 = vadd.f32 %v4570_v37, %v14087_v43  ;;  %v10062_v43 = vld [vmem:[%s15933_s0 + $0x70] sm:$0xff] }
 0x8b9   :  { %v4949_v32 = vpack.c.bf16 %v4921_v33, %v4921_v33  ;;  %v4806_v42 = vadd.f32 %v4805_v17, %v4727_v13  ;;  %v16877_v13 = vld [vmem:[#allocation47_spill] sm:$0xff] }
 0x8ba   :  { %v4650_v47 = vadd.f32 %v4649_v63, %v4571_v57 }
 0x8bb   :  { %v5057_v52 = vunpack.c.l.b16 %v4949_v32  ;;  %v4866_v49 = vmax.f32 %v14085_v50, %v4806_v42  ;;  %v10063_v50 = vld [vmem:[%s15933_s0 + $0xf0] sm:$0xff] }
 0x8bd   :  { %v14517_v21 = vpack.c.b16 %v5057_v52, %v5056_v58  ;;  %v4894_v8 = vadd.f32 %v14436_v61, %v4866_v49 }
 0x8be   :  { %v4728_v3 = vpop.f32.mrf.mxu2 }
 0x8bf   :  { %v4807_v31 = vpop.f32.mrf.mxu3  ;;  %v4729_v6 = vadd.f32 %v4728_v3, %v4650_v47  ;;  %v4573_v20 = vpop.f32.mrf.mxu0  ;;  %v4922_v17 = vmax.f32 %v4894_v8, 0.0 }
 0x8c0   :  { %v4652_v7 = vpop.f32.mrf.mxu1  ;;  %v4574_v33 = vadd.f32 %v4573_v20, %v14120_v25 }
 0x8c1   :  { %v4808_v35 = vadd.f32 %v4807_v31, %v4729_v6  ;;  %v4950_v42 = vpack.c.bf16 %v4922_v17, %v4922_v17  ;;  %v16878_v6 = vld [vmem:[#allocation12_spill] sm:$0xff] }
 0x8c2   :  { %4612 = vmatmul.bf16.gmra.mxu0 %v10062_v43  ;;  %4691 = vmatmul.bf16.gmra.mxu1 %v10063_v50  ;;  %v4653_v25 = vadd.f32 %v4652_v7, %v4574_v33  ;;  %v9573_v7 = vld [vmem:[%s15935_s2 + $0x1b8] sm:$0xff] }
 0x8c3   :  { %v4867_v18 = vmax.f32 %v14098_v0, %v4808_v35  ;;  %4770 = vmatmul.bf16.gmra.mxu2 %v14104_v29  ;;  %v5058_v8 = vunpack.c.l.b16 %v4950_v42  ;;  %v14541_v33 = vld [vmem:[%s15935_s2 + $0x138] sm:$0xff] }
 0x8c4   :  { %4849 = vmatmul.bf16.gmra.mxu3 %v16877_v13  ;;  %6123 = vmatpush.bf16.msrb.mxu2 %v9573_v7  ;;  %v10064_v42 = vld [vmem:[%s15933_s0 + $0x78] sm:$0xff] }
 0x8c5   :  { %v4895_v37 = vadd.f32 %v14436_v61, %v4867_v18  ;;  %5684 = vmatpush.bf16.msrb.mxu0 %v14541_v33 }
 0x8c6   :  { %v4731_v63 = vpop.f32.mrf.mxu2 }
 0x8c7   :  { %v4810_v32 = vpop.f32.mrf.mxu3  ;;  %v4923_v57 = vmax.f32 %v4895_v37, 0.0  ;;  %v4732_v58 = vadd.f32 %v4731_v63, %v4653_v25  ;;  %v4575_v52 = vpop.f32.mrf.mxu0  ;;  %v16879_v63 = vld [vmem:[#allocation57_spill] sm:$0xff] }
 0x8c8   :  { %v4654_v49 = vpop.f32.mrf.mxu1  ;;  %v4576_v31 = vadd.f32 %v4575_v52, %v14131_v39  ;;  %v9581_v39 = vld [vmem:[%s15935_s2 + $0x1f8] sm:$0xff]  ;;  %v16880_v52 = vld [vmem:[#allocation50_spill] sm:$0xff] }
 0x8c9   :  { %v4951_v47 = vpack.c.bf16 %v4923_v57, %v4923_v57  ;;  %v4811_v3 = vadd.f32 %v4810_v32, %v4732_v58  ;;  %6182 = vmatpush.bf16.msrb.mxu3 %v9581_v39  ;;  %v10065_v57 = vld [vmem:[%s15933_s0 + $0xf8] sm:$0xff] }
 0x8ca   :  { %v4655_v35 = vadd.f32 %v4654_v49, %v4576_v31  ;;  %v14561_v31 = vld [vmem:[%s15935_s2 + $0x178] sm:$0xff] }
 0x8cb   :  { %v5059_v0 = vunpack.c.l.b16 %v4951_v47  ;;  %v4868_v29 = vmax.f32 %v16878_v6, %v4811_v3  ;;  %v16881_v47 = vld [vmem:[#allocation25_spill] sm:$0xff]  ;;  %v16882_v3 = vld [vmem:[#allocation74_spill] sm:$0xff]  ;;  %6064 = vmatpush.bf16.msrb.mxu1 %v14561_v31 }
 0x8cd   :  { %v14533_v20 = vpack.c.b16 %v5059_v0, %v5058_v8  ;;  %v4896_v17 = vadd.f32 %v14436_v61, %v4868_v29 }
 0x8ce   :  { %v4733_v43 = vpop.f32.mrf.mxu2 }
 0x8cf   :  { %v4812_v50 = vpop.f32.mrf.mxu3  ;;  %v4734_v18 = vadd.f32 %v4733_v43, %v4655_v35  ;;  %v4578_v13 = vpop.f32.mrf.mxu0  ;;  %v4924_v58 = vmax.f32 %v4896_v17, 0.0 }
 0x8d0   :  { %v4657_v37 = vpop.f32.mrf.mxu1  ;;  %v4579_v32 = vadd.f32 %v4578_v13, %v16879_v63 }
 0x8d1   :  { %v4813_v25 = vadd.f32 %v4812_v50, %v4734_v18  ;;  %v4952_v35 = vpack.c.bf16 %v4924_v58, %v4924_v58 }
 0x8d2   :  { %4617 = vmatmul.bf16.gmra.mxu0 %v10064_v42  ;;  %4696 = vmatmul.bf16.gmra.mxu1 %v10065_v57  ;;  %v4658_v0 = vadd.f32 %v4657_v37, %v4579_v32 }
 0x8d3   :  { %v4869_v49 = vmax.f32 %v16880_v52, %v4813_v25  ;;  %4775 = vmatmul.bf16.gmra.mxu2 %v16881_v47  ;;  %v5060_v25 = vunpack.c.l.b16 %v4952_v35  ;;  %v9572_v35 = vld [vmem:[%s15935_s2 + $0x1b0] sm:$0xff] }
 0x8d4   :  { %4854 = vmatmul.bf16.gmra.mxu3 %v16882_v3  ;;  %6124 = vmatpush.bf16.msrb.mxu2 %v9572_v35 }
 0x8d5   :  { %v4897_v8 = vadd.f32 %v14436_v61, %v4869_v49 }
 0x8d6   :  { %v4736_v6 = vpop.f32.mrf.mxu2 }
 0x8d7   :  { %v4815_v29 = vpop.f32.mrf.mxu3  ;;  %v4925_v7 = vmax.f32 %v4897_v8, 0.0  ;;  %v4737_v39 = vadd.f32 %v4736_v6, %v4658_v0  ;;  %v4580_v43 = vpop.f32.mrf.mxu0  ;;  %v16883_v6 = vld [vmem:[#allocation5_spill] sm:$0xff] }
 0x8d8   :  { %v4659_v50 = vpop.f32.mrf.mxu1  ;;  %v4581_v13 = vadd.f32 %v4580_v43, %v14163_v60 }
 0x8d9   :  { %v4953_v17 = vpack.c.bf16 %v4925_v7, %v4925_v7  ;;  %v4816_v18 = vadd.f32 %v4815_v29, %v4737_v39  ;;  %v16884_v29 = vld [vmem:[#allocation18_spill] sm:$0xff]  ;;  %v14582_v7 = vld [vmem:[%s15935_s2 + $0x130] sm:$0xff] }
 0x8da   :  { %v4660_v37 = vadd.f32 %v4659_v50, %v4581_v13  ;;  %5685 = vmatpush.bf16.msrb.mxu0 %v14582_v7 }
 0x8db   :  { %v5061_v63 = vunpack.c.l.b16 %v4953_v17  ;;  %v4870_v42 = vmax.f32 %v14161_v23, %v4816_v18 }
 0x8dd   :  { %v14567_v57 = vpack.c.b16 %v5061_v63, %v5060_v25  ;;  %v4898_v49 = vadd.f32 %v14436_v61, %v4870_v42 }
 0x8de   :  { %v4738_v32 = vpop.f32.mrf.mxu2 }
 0x8df   :  { %v4817_v52 = vpop.f32.mrf.mxu3  ;;  %v4739_v58 = vadd.f32 %v4738_v32, %v4660_v37  ;;  %v4583_v47 = vpop.f32.mrf.mxu0  ;;  %v4926_v60 = vmax.f32 %v4898_v49, 0.0 }
 0x8e0   :  { %v4662_v3 = vpop.f32.mrf.mxu1  ;;  %v4584_v0 = vadd.f32 %v4583_v47, %v14191_v2  ;;  %v9580_v2 = vld [vmem:[%s15935_s2 + $0x1f0] sm:$0xff] }
 0x8e1   :  { %v4818_v8 = vadd.f32 %v4817_v52, %v4739_v58  ;;  %6183 = vmatpush.bf16.msrb.mxu3 %v9580_v2  ;;  %v4954_v18 = vpack.c.bf16 %v4926_v60, %v4926_v60 }
 0x8e2   :  { %5456 = vmatmul.bf16.vlgmr.msra.gmra.mxu0 %v16883_v6  ;;  %5515 = vmatmul.bf16.vlgmr.msra.gmra.mxu1 %v14461_v5  ;;  %v4663_v43 = vadd.f32 %v4662_v3, %v4584_v0 }
 0x8e3   :  { %v4871_v23 = vmax.f32 %v14169_v27, %v4818_v8  ;;  %5574 = vmatmul.bf16.vlgmr.msra.gmra.mxu2 %v16884_v29  ;;  %v14590_v27 = vld [vmem:[%s15935_s2 + $0x170] sm:$0xff]  ;;  %v5062_v49 = vunpack.c.l.b16 %v4954_v18  ;;  %v16886_v18 = vld [vmem:[#allocation7_spill] sm:$0xff] }
 0x8e4   :  { %5633 = vmatmul.bf16.vlgmr.msra.gmra.mxu3 %v14517_v21  ;;  %6065 = vmatpush.bf16.msrb.mxu1 %v14590_v27 }
 0x8e5   :  { %v4899_v39 = vadd.f32 %v14436_v61, %v4871_v23 }
 0x8e6   :  { %v4741_v50 = vpop.f32.mrf.mxu2 }
 0x8e7   :  { %v4820_v17 = vpop.f32.mrf.mxu3  ;;  %v4927_v13 = vmax.f32 %v4899_v39, 0.0  ;;  %v4742_v25 = vadd.f32 %v4741_v50, %v4663_v43  ;;  %v4585_v63 = vpop.f32.mrf.mxu0 }
 0x8e8   :  { %v4664_v42 = vpop.f32.mrf.mxu1  ;;  %v4586_v52 = vadd.f32 %v4585_v63, %v14199_v59 }
 0x8e9   :  { %v4955_v37 = vpack.c.bf16 %v4927_v13, %v4927_v13  ;;  %v4821_v32 = vadd.f32 %v4820_v17, %v4742_v25  ;;  %v16885_v17 = vld [vmem:[#allocation13_spill] sm:$0xff]  ;;  %v9571_v13 = vld [vmem:[%s15935_s2 + $0x1a8] sm:$0xff] }
 0x8ea   :  { %v4665_v8 = vadd.f32 %v4664_v42, %v4586_v52  ;;  %v14612_v25 = vld [vmem:[%s15935_s2 + $0x128] sm:$0xff]  ;;  %6125 = vmatpush.bf16.msrb.mxu2 %v9571_v13 }
 0x8eb   :  { %v5063_v58 = vunpack.c.l.b16 %v4955_v37  ;;  %v4872_v47 = vmax.f32 %v14197_v34, %v4821_v32  ;;  %5686 = vmatpush.bf16.msrb.mxu0 %v14612_v25 }
 0x8ed   :  { %v14597_v3 = vpack.c.b16 %v5063_v58, %v5062_v49  ;;  %v4900_v35 = vadd.f32 %v14436_v61, %v4872_v47 }
 0x8ee   :  { %v4743_v0 = vpop.f32.mrf.mxu2 }
 0x8ef   :  { %v4822_v23 = vpop.f32.mrf.mxu3  ;;  %v4744_v60 = vadd.f32 %v4743_v0, %v4665_v8  ;;  %v4588_v2 = vpop.f32.mrf.mxu0  ;;  %v4928_v59 = vmax.f32 %v4900_v35, 0.0 }
 0x8f0   :  { %v4667_v39 = vpop.f32.mrf.mxu1  ;;  %v4589_v50 = vadd.f32 %v4588_v2, %v14215_v54  ;;  %v9579_v54 = vld [vmem:[%s15935_s2 + $0x1e8] sm:$0xff] }
 0x8f1   :  { %v4823_v43 = vadd.f32 %v4822_v23, %v4744_v60  ;;  %6184 = vmatpush.bf16.msrb.mxu3 %v9579_v54  ;;  %v4956_v32 = vpack.c.bf16 %v4928_v59, %v4928_v59 }
 0x8f2   :  { %5461 = vmatmul.bf16.gmra.mxu0 %v16885_v17  ;;  %5520 = vmatmul.bf16.gmra.mxu1 %v14483_v51 }
 0x8f3   :  { %v4873_v34 = vmax.f32 %v14205_v10, %v4823_v43  ;;  %5579 = vmatmul.bf16.gmra.mxu2 %v16886_v18  ;;  %v4668_v10 = vadd.f32 %v4667_v39, %v4589_v50  ;;  %v5064_v35 = vunpack.c.l.b16 %v4956_v32  ;;  %v14626_v50 = vld [vmem:[%s15935_s2 + $0x168] sm:$0xff]  ;;  %v16888_v32 = vld [vmem:[#allocation33_spill] sm:$0xff] }
 0x8f4   :  { %5638 = vmatmul.bf16.gmra.mxu3 %v14533_v20  ;;  %6066 = vmatpush.bf16.msrb.mxu1 %v14626_v50 }
 0x8f5   :  { %v4901_v63 = vadd.f32 %v14436_v61, %v4873_v34 }
 0x8f6   :  { %v4746_v42 = vpop.f32.mrf.mxu2 }
 0x8f7   :  { %v4825_v37 = vpop.f32.mrf.mxu3  ;;  %v4929_v52 = vmax.f32 %v4901_v63, 0.0  ;;  %v4747_v49 = vadd.f32 %v4746_v42, %v4668_v10  ;;  %v4590_v58 = vpop.f32.mrf.mxu0 }
 0x8f8   :  { %v4669_v47 = vpop.f32.mrf.mxu1  ;;  %v4591_v23 = vadd.f32 %v4590_v58, %v14232_v48 }
 0x8f9   :  { %v4957_v8 = vpack.c.bf16 %v4929_v52, %v4929_v52  ;;  %v4826_v0 = vadd.f32 %v4825_v37, %v4747_v49 }
 0x8fa   :  { %v4670_v43 = vadd.f32 %v4669_v47, %v4591_v23 }
 0x8fb   :  { %v5065_v60 = vunpack.c.l.b16 %v4957_v8  ;;  %v4874_v2 = vmax.f32 %v14221_v44, %v4826_v0 }
 0x8fd   :  { %v14621_v39 = vpack.c.b16 %v5065_v60, %v5064_v35  ;;  %v4902_v13 = vadd.f32 %v14436_v61, %v4874_v2 }
 0x8fe   :  { %v4748_v59 = vpop.f32.mrf.mxu2 }
 0x8ff   :  { %16887 = vst [vmem:[#allocation15_spill] sm:$0xff] %v14621_v39  ;;  %v4827_v34 = vpop.f32.mrf.mxu3  ;;  %v4749_v54 = vadd.f32 %v4748_v59, %v4670_v43  ;;  %v4593_v63 = vpop.f32.mrf.mxu0  ;;  %v4930_v42 = vmax.f32 %v4902_v13, 0.0 }
 0x900   :  { %v4672_v10 = vpop.f32.mrf.mxu1  ;;  %v4594_v44 = vadd.f32 %v4593_v63, %v14251_v45  ;;  %v9570_v63 = vld [vmem:[%s15935_s2 + $0x1a0] sm:$0xff] }
 0x901   :  { %v4828_v48 = vadd.f32 %v4827_v34, %v4749_v54  ;;  %v4958_v8 = vpack.c.bf16 %v4930_v42, %v4930_v42  ;;  %6126 = vmatpush.bf16.msrb.mxu2 %v9570_v63 }
 0x902   :  { %5466 = vmatmul.bf16.gmra.mxu0 %v16884_v29  ;;  %5525 = vmatmul.bf16.gmra.mxu1 %v14517_v21  ;;  %v4673_v49 = vadd.f32 %v4672_v10, %v4594_v44  ;;  %v14647_v10 = vld [vmem:[%s15935_s2 + $0x120] sm:$0xff] }
 0x903   :  { %v4875_v37 = vmax.f32 %v14238_v9, %v4828_v48  ;;  %5584 = vmatmul.bf16.gmra.mxu2 %v16888_v32  ;;  %v5066_v59 = vunpack.c.l.b16 %v4958_v8  ;;  %5687 = vmatpush.bf16.msrb.mxu0 %v14647_v10 }
 0x904   :  { %5643 = vmatmul.bf16.gmra.mxu3 %v14567_v57 }
 0x905   :  { %v4903_v52 = vadd.f32 %v14436_v61, %v4875_v37 }
 0x906   :  { %v4751_v58 = vpop.f32.mrf.mxu2 }
 0x907   :  { %v4830_v47 = vpop.f32.mrf.mxu3  ;;  %v4931_v0 = vmax.f32 %v4903_v52, 0.0  ;;  %v4752_v23 = vadd.f32 %v4751_v58, %v4673_v49  ;;  %v4595_v45 = vpop.f32.mrf.mxu0 }
 0x908   :  { %v4674_v35 = vpop.f32.mrf.mxu1  ;;  %v4596_v43 = vadd.f32 %v4595_v45, %v14259_v30  ;;  %v9578_v30 = vld [vmem:[%s15935_s2 + $0x1e0] sm:$0xff] }
 0x909   :  { %v4959_v60 = vpack.c.bf16 %v4931_v0, %v4931_v0  ;;  %v4831_v2 = vadd.f32 %v4830_v47, %v4752_v23  ;;  %6185 = vmatpush.bf16.msrb.mxu3 %v9578_v30  ;;  %v16889_v23 = vld [vmem:[#allocation8_spill] sm:$0xff] }
 0x90a   :  { %v4675_v54 = vadd.f32 %v4674_v35, %v4596_v43 }
 0x90b   :  { %v5067_v9 = vunpack.c.l.b16 %v4959_v60  ;;  %v4876_v34 = vmax.f32 %v14257_v19, %v4831_v2  ;;  %v14655_v19 = vld [vmem:[%s15935_s2 + $0x160] sm:$0xff] }
 0x90c   :  { %6067 = vmatpush.bf16.msrb.mxu1 %v14655_v19 }
 0x90d   :  { %v14639_v13 = vpack.c.b16 %v5067_v9, %v5066_v59  ;;  %v4904_v42 = vadd.f32 %v14436_v61, %v4876_v34 }
 0x90e   :  { %v4753_v48 = vpop.f32.mrf.mxu2 }
 0x90f   :  { %v4832_v44 = vpop.f32.mrf.mxu3  ;;  %v4754_v37 = vadd.f32 %v4753_v48, %v4675_v54  ;;  %v4598_v52 = vpop.f32.mrf.mxu0  ;;  %v4932_v8 = vmax.f32 %v4904_v42, 0.0 }
 0x910   :  { %v4677_v49 = vpop.f32.mrf.mxu1  ;;  %v4599_v47 = vadd.f32 %v4598_v52, %v14275_v11  ;;  %v14674_v52 = vld [vmem:[%s15935_s2 + $0x198] sm:$0xff] }
 0x911   :  { %v4833_v58 = vadd.f32 %v4832_v44, %v4754_v37  ;;  %v4960_v43 = vpack.c.bf16 %v4932_v8, %v4932_v8  ;;  %6127 = vmatpush.bf16.msrb.mxu2 %v14674_v52 }
 0x912   :  { %5471 = vmatmul.bf16.gmra.mxu0 %v16886_v18  ;;  %5530 = vmatmul.bf16.gmra.mxu1 %v14533_v20  ;;  %v4678_v35 = vadd.f32 %v4677_v49, %v4599_v47  ;;  %v14679_v49 = vld [vmem:[%s15935_s2 + $0x118] sm:$0xff] }
 0x913   :  { %v4877_v0 = vmax.f32 %v14265_v55, %v4833_v58  ;;  %5589 = vmatmul.bf16.gmra.mxu2 %v16889_v23  ;;  %v5068_v48 = vunpack.c.l.b16 %v4960_v43  ;;  %5688 = vmatpush.bf16.msrb.mxu0 %v14679_v49 }
 0x914   :  { %5648 = vmatmul.bf16.gmra.mxu3 %v14597_v3 }
 0x915   :  { %v4905_v45 = vadd.f32 %v14436_v61, %v4877_v0 }
 0x916   :  { %v4756_v60 = vpop.f32.mrf.mxu2 }
 0x917   :  { %v4835_v2 = vpop.f32.mrf.mxu3  ;;  %v4933_v59 = vmax.f32 %v4905_v45, 0.0  ;;  %v4757_v9 = vadd.f32 %v4756_v60, %v4678_v35  ;;  %v4600_v11 = vpop.f32.mrf.mxu0 }
 0x918   :  { %v4679_v34 = vpop.f32.mrf.mxu1  ;;  %v4601_v30 = vadd.f32 %v4600_v11, %v14295_v12  ;;  %v14684_v12 = vld [vmem:[%s15935_s2 + $0x1d8] sm:$0xff] }
 0x919   :  { %v4961_v54 = vpack.c.bf16 %v4933_v59, %v4933_v59  ;;  %v4836_v63 = vadd.f32 %v4835_v2, %v4757_v9  ;;  %6186 = vmatpush.bf16.msrb.mxu3 %v14684_v12  ;;  %v16890_v59 = vld [vmem:[#allocation10_spill] sm:$0xff]  ;;  %v14699_v9 = vld [vmem:[%s15935_s2 + $0x158] sm:$0xff] }
 0x91a   :  { %v4680_v37 = vadd.f32 %v4679_v34, %v4601_v30  ;;  %6068 = vmatpush.bf16.msrb.mxu1 %v14699_v9 }
 0x91b   :  { %v5069_v55 = vunpack.c.l.b16 %v4961_v54  ;;  %v4878_v44 = vmax.f32 %v14281_v41, %v4836_v63 }
 0x91d   :  { %v14669_v42 = vpack.c.b16 %v5069_v55, %v5068_v48  ;;  %v4906_v47 = vadd.f32 %v14436_v61, %v4878_v44 }
 0x91e   :  { %v4758_v58 = vpop.f32.mrf.mxu2 }
 0x91f   :  { %v4837_v41 = vpop.f32.mrf.mxu3  ;;  %v4759_v8 = vadd.f32 %v4758_v58, %v4680_v37  ;;  %v4603_v0 = vpop.f32.mrf.mxu0  ;;  %v4934_v2 = vmax.f32 %v4906_v47, 0.0 }
 0x920   :  { %v4682_v45 = vpop.f32.mrf.mxu1  ;;  %v4604_v60 = vadd.f32 %v4603_v0, %v14311_v46 }
 0x921   :  { %v4838_v35 = vadd.f32 %v4837_v41, %v4759_v8  ;;  %v4962_v63 = vpack.c.bf16 %v4934_v2, %v4934_v2 }
 0x922   :  { %5476 = vmatmul.bf16.gmra.mxu0 %v16888_v32  ;;  %5535 = vmatmul.bf16.gmra.mxu1 %v14567_v57  ;;  %v4683_v34 = vadd.f32 %v4682_v45, %v4604_v60 }
 0x923   :  { %v4879_v43 = vmax.f32 %v14301_v62, %v4838_v35  ;;  %5594 = vmatmul.bf16.gmra.mxu2 %v16890_v59  ;;  %v5070_v41 = vunpack.c.l.b16 %v4962_v63 }
 0x924   :  { %5653 = vmatmul.bf16.gmra.mxu3 %v14621_v39 }
 0x925   :  { %v4907_v11 = vadd.f32 %v14436_v61, %v4879_v43 }
 0x926   :  { %v4761_v46 = vpop.f32.mrf.mxu2 }
 0x927   :  { %v4840_v54 = vpop.f32.mrf.mxu3  ;;  %v4935_v30 = vmax.f32 %v4907_v11, 0.0  ;;  %v4762_v48 = vadd.f32 %v4761_v46, %v4683_v34  ;;  %v4605_v62 = vpop.f32.mrf.mxu0 }
 0x928   :  { %v4684_v55 = vpop.f32.mrf.mxu1  ;;  %v4606_v58 = vadd.f32 %v4605_v62, %v14319_v1  ;;  %v14712_v1 = vld [vmem:[%s15935_s2 + $0x190] sm:$0xff]  ;;  %v16894_v62 = vld [vmem:[#allocation34_spill] sm:$0xff] }
 0x929   :  { %v4963_v44 = vpack.c.bf16 %v4935_v30, %v4935_v30  ;;  %v4841_v37 = vadd.f32 %v4840_v54, %v4762_v48  ;;  %16892 = vst [vmem:[#allocation30_spill] sm:$0xff] %v14712_v1  ;;  %v14722_v54 = vld [vmem:[%s15935_s2 + $0x1d0] sm:$0xff]  ;;  %6128 = vmatpush.bf16.msrb.mxu2 %v14712_v1 }
 0x92a   :  { %v4685_v45 = vadd.f32 %v4684_v55, %v4606_v58  ;;  %16893 = vst [vmem:[#allocation3_spill] sm:$0xff] %v14722_v54  ;;  %6187 = vmatpush.bf16.msrb.mxu3 %v14722_v54 }
 0x92b   :  { %v5071_v47 = vunpack.c.l.b16 %v4963_v44  ;;  %v4880_v8 = vmax.f32 %v14317_v38, %v4841_v37  ;;  %v14717_v38 = vld [vmem:[%s15935_s2 + $0x110] sm:$0xff] }
 0x92c   :  { %5689 = vmatpush.bf16.msrb.mxu0 %v14717_v38 }
 0x92d   :  { %v14705_v0 = vpack.c.b16 %v5071_v47, %v5070_v41  ;;  %v4908_v43 = vadd.f32 %v14436_v61, %v4880_v8 }
 0x92e   :  { %v4763_v35 = vpop.f32.mrf.mxu2 }
 0x92f   :  { %16891 = vst [vmem:[#allocation29_spill] sm:$0xff] %v14705_v0  ;;  %v4842_v60 = vpop.f32.mrf.mxu3  ;;  %v4764_v2 = vadd.f32 %v4763_v35, %v4685_v45  ;;  %v4608_v11 = vpop.f32.mrf.mxu0  ;;  %v4936_v63 = vmax.f32 %v4908_v43, 0.0 }
 0x930   :  { %v4687_v34 = vpop.f32.mrf.mxu1  ;;  %v4609_v30 = vadd.f32 %v4608_v11, %v14344_v22  ;;  %v14729_v22 = vld [vmem:[%s15935_s2 + $0x150] sm:$0xff] }
 0x931   :  { %v4843_v46 = vadd.f32 %v4842_v60, %v4764_v2  ;;  %6069 = vmatpush.bf16.msrb.mxu1 %v14729_v22  ;;  %v4964_v41 = vpack.c.bf16 %v4936_v63, %v4936_v63 }
 0x932   :  { %5481 = vmatmul.bf16.gmra.mxu0 %v16889_v23  ;;  %5540 = vmatmul.bf16.gmra.mxu1 %v14597_v3  ;;  %v4688_v44 = vadd.f32 %v4687_v34, %v4609_v30 }
 0x933   :  { %v4881_v48 = vmax.f32 %v14325_v15, %v4843_v46  ;;  %5599 = vmatmul.bf16.gmra.mxu2 %v16894_v62  ;;  %v5108_v2 = vunpack.c.l.b16 %v4964_v41 }
 0x934   :  { %5658 = vmatmul.bf16.gmra.mxu3 %v14639_v13 }
 0x935   :  { %v4909_v55 = vadd.f32 %v14436_v61, %v4881_v48 }
 0x936   :  { %v4766_v37 = vpop.f32.mrf.mxu2 }
 0x937   :  { %v4845_v58 = vpop.f32.mrf.mxu3  ;;  %v4937_v47 = vmax.f32 %v4909_v55, 0.0  ;;  %v4767_v15 = vadd.f32 %v4766_v37, %v4688_v44  ;;  %v4610_v8 = vpop.f32.mrf.mxu0 }
 0x938   :  { %v4689_v45 = vpop.f32.mrf.mxu1  ;;  %v4611_v43 = vadd.f32 %v4610_v8, %v14355_v4  ;;  %v14748_v4 = vld [vmem:[%s15935_s2 + $0x188] sm:$0xff] }
 0x939   :  { %v4965_v35 = vpack.c.bf16 %v4937_v47, %v4937_v47  ;;  %v4846_v60 = vadd.f32 %v4845_v58, %v4767_v15  ;;  %v14758_v58 = vld [vmem:[%s15935_s2 + $0x1c8] sm:$0xff]  ;;  %6129 = vmatpush.bf16.msrb.mxu2 %v14748_v4 }
 0x93a   :  { %v4690_v30 = vadd.f32 %v4689_v45, %v4611_v43  ;;  %16896 = vst [vmem:[#allocation22_spill] sm:$0xff] %v14758_v58  ;;  %v16897_v15 = vld [vmem:[#allocation11_spill] sm:$0xff]  ;;  %6188 = vmatpush.bf16.msrb.mxu3 %v14758_v58 }
 0x93b   :  { %v5109_v11 = vunpack.c.l.b16 %v4965_v35  ;;  %v4882_v46 = vmax.f32 %v14350_v16, %v4846_v60  ;;  %v14753_v16 = vld [vmem:[%s15935_s2 + $0x108] sm:$0xff] }
 0x93c   :  { %5690 = vmatpush.bf16.msrb.mxu0 %v14753_v16 }
 0x93d   :  { %v14741_v34 = vpack.c.b16 %v5109_v11, %v5108_v2  ;;  %v4910_v1 = vadd.f32 %v14436_v61, %v4882_v46 }
 0x93e   :  { %v4768_v48 = vpop.f32.mrf.mxu2 }
 0x93f   :  { %16895 = vst [vmem:[#allocation75_spill] sm:$0xff] %v14741_v34  ;;  %v4847_v54 = vpop.f32.mrf.mxu3  ;;  %v4769_v63 = vadd.f32 %v4768_v48, %v4690_v30  ;;  %v4613_v55 = vpop.f32.mrf.mxu0 }
 0x940   :  { %v4692_v44 = vpop.f32.mrf.mxu1  ;;  %v4614_v37 = vadd.f32 %v4613_v55, %v14371_v40  ;;  %v4938_v40 = vmax.f32 %v4910_v1, 0.0 }
 0x941   :  { %v4848_v47 = vadd.f32 %v4847_v54, %v4769_v63 }
 0x942   :  { %v4693_v41 = vadd.f32 %v4692_v44, %v4614_v37  ;;  %5486 = vmatmul.bf16.gmra.mxu0 %v16890_v59  ;;  %5545 = vmatmul.bf16.gmra.mxu1 %v14621_v39  ;;  %v4966_v60 = vpack.c.bf16 %v4938_v40, %v4938_v40 }
 0x943   :  { %v4883_v54 = vmax.f32 %v14361_v24, %v4848_v47  ;;  %5604 = vmatmul.bf16.gmra.mxu2 %v16897_v15  ;;  %v14772_v24 = vld [vmem:[%s15935_s2 + $0x148] sm:$0xff] }
 0x944   :  { %5663 = vmatmul.bf16.gmra.mxu3 %v14669_v42  ;;  %6070 = vmatpush.bf16.msrb.mxu1 %v14772_v24  ;;  %v5110_v55 = vunpack.c.l.b16 %v4966_v60  ;;  %v14794_v60 = vld [vmem:[%s15935_s2 + $0x1c0] sm:$0xff] }
 0x945   :  { %v4911_v8 = vadd.f32 %v14436_v61, %v4883_v54  ;;  %16899 = vst [vmem:[#allocation9_spill] sm:$0xff] %v14794_v60  ;;  %6189 = vmatpush.bf16.msrb.mxu3 %v14794_v60  ;;  %v10068_v60 = vld [vmem:[%s15935_s2 + $0x30] sm:$0xff] }
 0x946   :  { %v4771_v45 = vpop.f32.mrf.mxu2 }
 0x947   :  { %v4850_v35 = vpop.f32.mrf.mxu3  ;;  %v4939_v43 = vmax.f32 %v4911_v8, 0.0  ;;  %v4772_v2 = vadd.f32 %v4771_v45, %v4693_v41  ;;  %v4615_v1 = vpop.f32.mrf.mxu0 }
 0x948   :  { %v4694_v11 = vpop.f32.mrf.mxu1  ;;  %v4616_v46 = vadd.f32 %v4615_v1, %v14379_v14  ;;  %v16900_v1 = vld [vmem:[#allocation14_spill] sm:$0xff] }
 0x949   :  { %v4967_v30 = vpack.c.bf16 %v4939_v43, %v4939_v43  ;;  %v4851_v48 = vadd.f32 %v4850_v35, %v4772_v2  ;;  %v14784_v35 = vld [vmem:[%s15935_s2 + $0x180] sm:$0xff] }
 0x94a   :  { %v4695_v63 = vadd.f32 %v4694_v11, %v4616_v46  ;;  %v16901_v46 = vld [vmem:[#allocation38_spill] sm:$0xff]  ;;  %6130 = vmatpush.bf16.msrb.mxu2 %v14784_v35 }
 0x94b   :  { %v5111_v44 = vunpack.c.l.b16 %v4967_v30  ;;  %v4884_v37 = vmax.f32 %v14377_v26, %v4851_v48  ;;  %v14789_v26 = vld [vmem:[%s15935_s2 + $0x100] sm:$0xff] }
 0x94c   :  { %v14804_v30 = vld [vmem:[%s15935_s2 + $0x140] sm:$0xff]  ;;  %5691 = vmatpush.bf16.msrb.mxu0 %v14789_v26 }
 0x94d   :  { %v14777_v47 = vpack.c.b16 %v5111_v44, %v5110_v55  ;;  %v4912_v54 = vadd.f32 %v14436_v61, %v4884_v37  ;;  %6071 = vmatpush.bf16.msrb.mxu1 %v14804_v30  ;;  %v10066_v55 = vld [vmem:[%s15935_s2 + $0x38] sm:$0xff] }
 0x94e   :  { %v4773_v41 = vpop.f32.mrf.mxu2  ;;  %6391 = vmatpush.bf16.msra.mxu2 %v10066_v55  ;;  %v10067_v44 = vld [vmem:[%s15935_s2 + $0x78] sm:$0xff]  ;;  %v10069_v55 = vld [vmem:[%s15935_s2 + $0x70] sm:$0xff] }
 0x94f   :  { %16898 = vst [vmem:[#allocation24_spill] sm:$0xff] %v14777_v47  ;;  %v4852_v40 = vpop.f32.mrf.mxu3  ;;  %v4774_v8 = vadd.f32 %v4773_v41, %v4695_v63  ;;  %v4618_v45 = vpop.f32.mrf.mxu0  ;;  %6450 = vmatpush.bf16.msra.mxu3 %v10067_v44 }
 0x950   :  { %v4697_v58 = vpop.f32.mrf.mxu1  ;;  %v4619_v14 = vadd.f32 %v4618_v45, %v14395_v28  ;;  %v4940_v28 = vmax.f32 %v4912_v54, 0.0  ;;  %v16902_v45 = vld [vmem:[#allocation72_spill] sm:$0xff] }
 0x951   :  { %v4853_v43 = vadd.f32 %v4852_v40, %v4774_v8 }
 0x952   :  { %v4698_v2 = vadd.f32 %v4697_v58, %v4619_v14  ;;  %5491 = vmatmul.bf16.gmra.mxu0 %v16894_v62  ;;  %5550 = vmatmul.bf16.gmra.mxu1 %v14639_v13  ;;  %v4968_v37 = vpack.c.bf16 %v4940_v28, %v4940_v28  ;;  %v16903_v28 = vld [vmem:[#allocation73_spill] sm:$0xff] }
 0x953   :  { %v4885_v11 = vmax.f32 %v16900_v1, %v4853_v43  ;;  %5609 = vmatmul.bf16.gmra.mxu2 %v16901_v46  ;;  %6451 = vmatpush.bf16.msra.mxu3 %v10069_v55  ;;  %v16905_v55 = vld [vmem:[#allocation56_spill] sm:$0xff] }
 0x954   :  { %5668 = vmatmul.bf16.gmra.mxu3 %v14705_v0  ;;  %6392 = vmatpush.bf16.msra.mxu2 %v10068_v60  ;;  %v10071_v60 = vld [vmem:[%s15935_s2 + $0x68] sm:$0xff] }
 0x955   :  { %v4913_v58 = vadd.f32 %v14436_v61, %v4885_v11 }
 0x956   :  { %v4776_v48 = vpop.f32.mrf.mxu2 }
 0x957   :  { %v4855_v63 = vpop.f32.mrf.mxu3  ;;  %v4941_v41 = vmax.f32 %v4913_v58, 0.0  ;;  %v4777_v40 = vadd.f32 %v4776_v48, %v4698_v2  ;;  %v4620_v54 = vpop.f32.mrf.mxu0  ;;  %v6383_v2 = vunpack.c.l.b16 %v4968_v37  ;;  %6452 = vmatpush.bf16.msra.mxu3 %v10071_v60 }
 0x958   :  { %v4699_v8 = vpop.f32.mrf.mxu1  ;;  %v4621_v14 = vadd.f32 %v4620_v54, %v16902_v45 }
 0x959   :  { %v4856_v43 = vadd.f32 %v4855_v63, %v4777_v40  ;;  %v4969_v1 = vpack.c.bf16 %v4941_v41, %v4941_v41  ;;  %v10070_v41 = vld [vmem:[%s15935_s2 + $0x28] sm:$0xff] }
 0x95a   :  { %v4700_v11 = vadd.f32 %v4699_v8, %v4621_v14  ;;  %6393 = vmatpush.bf16.msra.mxu2 %v10070_v41 }
 0x95b   :  { %v4886_v58 = vmax.f32 %v16903_v28, %v4856_v43  ;;  %v6384_v48 = vunpack.c.l.b16 %v4969_v1 }
 0x95d   :  { %v14825_v44 = vpack.c.b16 %v6384_v48, %v6383_v2  ;;  %v4914_v40 = vadd.f32 %v14436_v61, %v4886_v58  ;;  %v16906_v2 = vld [vmem:[#allocation16_spill] sm:$0xff]  ;;  %v14842_v58 = vld [vmem:[%s15935_s2 + $0x238] sm:$0xff]  ;;  %v10073_v48 = vld [vmem:[%s15935_s2 + $0x60] sm:$0xff] }
 0x95e   :  { %v4778_v54 = vpop.f32.mrf.mxu2  ;;  %6453 = vmatpush.bf16.msra.mxu3 %v10073_v48  ;;  %6241 = vmatpush.bf16.msra.mxu0 %v14842_v58 }
 0x95f   :  { %16904 = vst [vmem:[#allocation26_spill] sm:$0xff] %v14825_v44  ;;  %v4857_v63 = vpop.f32.mrf.mxu3  ;;  %v4779_v8 = vadd.f32 %v4778_v54, %v4700_v11  ;;  %v5457_v45 = vpop.f32.mrf.mxu0  ;;  %v4942_v1 = vmax.f32 %v4914_v40, 0.0  ;;  %v10072_v11 = vld [vmem:[%s15935_s2 + $0x20] sm:$0xff] }
 0x960   :  { %v5516_v37 = vpop.f32.mrf.mxu1  ;;  %6394 = vmatpush.bf16.msra.mxu2 %v10072_v11  ;;  %v10075_v11 = vld [vmem:[%s15935_s2 + $0x58] sm:$0xff] }
 0x961   :  { %v5517_v14 = vadd.f32 %v5516_v37, %v5457_v45  ;;  %v4858_v43 = vadd.f32 %v4857_v63, %v4779_v8  ;;  %v4970_v60 = vpack.c.bf16 %v4942_v1, %v4942_v1  ;;  %v14863_v1 = vld [vmem:[%s15935_s2 + $0x278] sm:$0xff] }
 0x962   :  { %5496 = vmatmul.bf16.gmra.mxu0 %v16897_v15  ;;  %5555 = vmatmul.bf16.gmra.mxu1 %v14669_v42 }
 0x963   :  { %v4887_v28 = vmax.f32 %v16905_v55, %v4858_v43  ;;  %5614 = vmatmul.bf16.gmra.mxu2 %v16906_v2  ;;  %v10074_v55 = vld [vmem:[%s15935_s2 + $0x18] sm:$0xff]  ;;  %6454 = vmatpush.bf16.msra.mxu3 %v10075_v11 }
 0x964   :  { %5673 = vmatmul.bf16.gmra.mxu3 %v14741_v34  ;;  %6395 = vmatpush.bf16.msra.mxu2 %v10074_v55 }
 0x965   :  { %v4915_v54 = vadd.f32 %v14436_v61, %v4887_v28  ;;  %6300 = vmatpush.bf16.msra.mxu1 %v14863_v1  ;;  %v6385_v28 = vunpack.c.l.b16 %v4970_v60  ;;  %v10078_v60 = vld [vmem:[%s15935_s2 + $0x8] sm:$0xff] }
 0x966   :  { %v5575_v63 = vpop.f32.mrf.mxu2 }
 0x967   :  { %v5634_v41 = vpop.f32.mrf.mxu3  ;;  %v4943_v40 = vmax.f32 %v4915_v54, 0.0  ;;  %v5576_v8 = vadd.f32 %v5575_v63, %v5517_v14  ;;  %v5459_v45 = vpop.f32.mrf.mxu0  ;;  %v10076_v54 = vld [vmem:[%s15935_s2 + $0x10] sm:$0xff] }
 0x968   :  { %v5518_v37 = vpop.f32.mrf.mxu1  ;;  %6396 = vmatpush.bf16.msra.mxu2 %v10076_v54  ;;  %v10077_v63 = vld [vmem:[%s15935_s2 + $0x50] sm:$0xff] }
 0x969   :  { %v5519_v43 = vadd.f32 %v5518_v37, %v5459_v45  ;;  %v14858_v61 = vadd.f32 %v5634_v41, %v5576_v8  ;;  %v4971_v14 = vpack.c.bf16 %v4943_v40, %v4943_v40  ;;  %6455 = vmatpush.bf16.msra.mxu3 %v10077_v63 }
 0x96b   :  { %v6386_v48 = vunpack.c.l.b16 %v4971_v14 }
 0x96c   :  { %6397 = vmatpush.bf16.msra.mxu2 %v10078_v60 }
 0x96d   :  { %v14872_v41 = vpack.c.b16 %v6386_v48, %v6385_v28  ;;  %6456 = vmatpush.bf16.msra.mxu3 %v14466_v36  ;;  %v16908_v28 = vld [vmem:[#allocation17_spill] sm:$0xff] }
 0x96e   :  { %v5577_v8 = vpop.f32.mrf.mxu2 }
 0x96f   :  { %16907 = vst [vmem:[#allocation20_spill] sm:$0xff] %v14872_v41  ;;  %v5636_v45 = vpop.f32.mrf.mxu3  ;;  %v5578_v37 = vadd.f32 %v5577_v8, %v5519_v43  ;;  %v5462_v40 = vpop.f32.mrf.mxu0 }
 0x970   :  { %v5521_v55 = vpop.f32.mrf.mxu1  ;;  %6398 = vmatpush.bf16.msra.mxu2 %v14502_v53 }
 0x971   :  { %v5522_v11 = vadd.f32 %v5521_v55, %v5462_v40  ;;  %v14878_v14 = vadd.f32 %v5636_v45, %v5578_v37  ;;  %6457 = vmatpush.bf16.msra.mxu3 %v14510_v56  ;;  %v14891_v37 = vld [vmem:[%s15935_s2 + $0x230] sm:$0xff] }
 0x972   :  { %5501 = vmatmul.bf16.gmra.mxu0 %v16901_v46  ;;  %5560 = vmatmul.bf16.gmra.mxu1 %v14705_v0  ;;  %v14896_v40 = vld [vmem:[%s15935_s2 + $0x270] sm:$0xff] }
 0x973   :  { %5619 = vmatmul.bf16.gmra.mxu2 %v16908_v28  ;;  %6242 = vmatpush.bf16.msra.mxu0 %v14891_v37 }
 0x974   :  { %5678 = vmatmul.bf16.gmra.mxu3 %v14777_v47  ;;  %6301 = vmatpush.bf16.msra.mxu1 %v14896_v40 }
 0x976   :  { %v5580_v43 = vpop.f32.mrf.mxu2 }
 0x977   :  { %v5639_v48 = vpop.f32.mrf.mxu3  ;;  %v5581_v54 = vadd.f32 %v5580_v43, %v5522_v11  ;;  %v5464_v63 = vpop.f32.mrf.mxu0 }
 0x978   :  { %v5523_v8 = vpop.f32.mrf.mxu1 }
 0x979   :  { %v5524_v36 = vadd.f32 %v5523_v8, %v5464_v63  ;;  %v14886_v45 = vadd.f32 %v5639_v48, %v5581_v54 }
 0x97e   :  { %v5582_v53 = vpop.f32.mrf.mxu2 }
 0x97f   :  { %v5641_v56 = vpop.f32.mrf.mxu3  ;;  %v5583_v55 = vadd.f32 %v5582_v53, %v5524_v36  ;;  %v5467_v11 = vpop.f32.mrf.mxu0 }
 0x980   :  { %v5526_v60 = vpop.f32.mrf.mxu1 }
 0x981   :  { %v5527_v43 = vadd.f32 %v5526_v60, %v5467_v11  ;;  %v14900_v48 = vadd.f32 %v5641_v56, %v5583_v55 }
 0x982   :  { %5692 = vmatmul.bf16.vlgmr.msrb.gmra.mxu0 %v16888_v32  ;;  %6072 = vmatmul.bf16.vlgmr.msrb.gmra.mxu1 %v16883_v6  ;;  %v14915_v6 = vld [vmem:[%s15935_s2 + $0x228] sm:$0xff] }
 0x983   :  { %6131 = vmatmul.bf16.vlgmr.msrb.gmra.mxu2 %v14461_v5  ;;  %6243 = vmatpush.bf16.msra.mxu0 %v14915_v6 }
 0x984   :  { %6190 = vmatmul.bf16.vlgmr.msrb.gmra.mxu3 %v16884_v29  ;;  %6627 = vmatpush.bf16.msrb.mxu2 %v14541_v33 }
 0x985   :  { %6706 = vmatpush.bf16.msrb.mxu3 %v14561_v31 }
 0x986   :  { %v5585_v54 = vpop.f32.mrf.mxu2 }
 0x987   :  { %v5644_v63 = vpop.f32.mrf.mxu3  ;;  %v5586_v8 = vadd.f32 %v5585_v54, %v5527_v43  ;;  %v5469_v36 = vpop.f32.mrf.mxu0  ;;  %v14927_v54 = vld [vmem:[%s15935_s2 + $0x268] sm:$0xff] }
 0x988   :  { %v5528_v53 = vpop.f32.mrf.mxu1  ;;  %6628 = vmatpush.bf16.msrb.mxu2 %v14582_v7  ;;  %6302 = vmatpush.bf16.msra.mxu1 %v14927_v54 }
 0x989   :  { %v5529_v11 = vadd.f32 %v5528_v53, %v5469_v36  ;;  %6707 = vmatpush.bf16.msrb.mxu3 %v14590_v27  ;;  %v14910_v56 = vadd.f32 %v5644_v63, %v5586_v8 }
 0x98c   :  { %6629 = vmatpush.bf16.msrb.mxu2 %v14612_v25 }
 0x98d   :  { %6708 = vmatpush.bf16.msrb.mxu3 %v14626_v50 }
 0x98e   :  { %v5587_v33 = vpop.f32.mrf.mxu2 }
 0x98f   :  { %v5646_v31 = vpop.f32.mrf.mxu3  ;;  %v5588_v55 = vadd.f32 %v5587_v33, %v5529_v11  ;;  %v5472_v60 = vpop.f32.mrf.mxu0 }
 0x990   :  { %v5531_v7 = vpop.f32.mrf.mxu1  ;;  %6630 = vmatpush.bf16.msrb.mxu2 %v14647_v10 }
 0x991   :  { %v5532_v43 = vadd.f32 %v5531_v7, %v5472_v60  ;;  %6709 = vmatpush.bf16.msrb.mxu3 %v14655_v19  ;;  %v14922_v27 = vadd.f32 %v5646_v31, %v5588_v55 }
 0x992   :  { %5697 = vmatmul.bf16.gmra.mxu0 %v16889_v23  ;;  %6077 = vmatmul.bf16.gmra.mxu1 %v16885_v17 }
 0x993   :  { %6136 = vmatmul.bf16.gmra.mxu2 %v14483_v51 }
 0x994   :  { %6195 = vmatmul.bf16.gmra.mxu3 %v16886_v18  ;;  %6631 = vmatpush.bf16.msrb.mxu2 %v14679_v49 }
 0x995   :  { %6710 = vmatpush.bf16.msrb.mxu3 %v14699_v9 }
 0x996   :  { %v5590_v25 = vpop.f32.mrf.mxu2 }
 0x997   :  { %v5649_v50 = vpop.f32.mrf.mxu3  ;;  %v5591_v10 = vadd.f32 %v5590_v25, %v5532_v43  ;;  %v5474_v19 = vpop.f32.mrf.mxu0 }
 0x998   :  { %v5533_v63 = vpop.f32.mrf.mxu1  ;;  %6632 = vmatpush.bf16.msrb.mxu2 %v14717_v38  ;;  %v14948_v38 = vld [vmem:[%s15935_s2 + $0x220] sm:$0xff] }
 0x999   :  { %v5534_v8 = vadd.f32 %v5533_v63, %v5474_v19  ;;  %v14937_v36 = vadd.f32 %v5649_v50, %v5591_v10  ;;  %6711 = vmatpush.bf16.msrb.mxu3 %v14729_v22  ;;  %v14958_v22 = vld [vmem:[%s15935_s2 + $0x260] sm:$0xff]  ;;  %6244 = vmatpush.bf16.msra.mxu0 %v14948_v38 }
 0x99a   :  { %6303 = vmatpush.bf16.msra.mxu1 %v14958_v22 }
 0x99c   :  { %6633 = vmatpush.bf16.msrb.mxu2 %v14753_v16 }
 0x99d   :  { %6712 = vmatpush.bf16.msrb.mxu3 %v14772_v24 }
 0x99e   :  { %v5592_v17 = vpop.f32.mrf.mxu2 }
 0x99f   :  { %v5651_v49 = vpop.f32.mrf.mxu3  ;;  %v5593_v53 = vadd.f32 %v5592_v17, %v5534_v8  ;;  %v5477_v9 = vpop.f32.mrf.mxu0  ;;  %v14973_v17 = vld [vmem:[%s15935_s2 + $0x218] sm:$0xff] }
 0x9a0   :  { %v5536_v11 = vpop.f32.mrf.mxu1  ;;  %6634 = vmatpush.bf16.msrb.mxu2 %v14789_v26  ;;  %6245 = vmatpush.bf16.msra.mxu0 %v14973_v17 }
 0x9a1   :  { %v5537_v33 = vadd.f32 %v5536_v11, %v5477_v9  ;;  %v14943_v31 = vadd.f32 %v5651_v49, %v5593_v53  ;;  %6713 = vmatpush.bf16.msrb.mxu3 %v14804_v30 }
 0x9a2   :  { %5702 = vmatmul.bf16.gmra.mxu0 %v16890_v59  ;;  %6082 = vmatmul.bf16.gmra.mxu1 %v16884_v29 }
 0x9a3   :  { %6141 = vmatmul.bf16.gmra.mxu2 %v14517_v21 }
 0x9a4   :  { %6200 = vmatmul.bf16.gmra.mxu3 %v16888_v32 }
 0x9a6   :  { %v5595_v16 = vpop.f32.mrf.mxu2 }
 0x9a7   :  { %v5654_v24 = vpop.f32.mrf.mxu3  ;;  %v5596_v26 = vadd.f32 %v5595_v16, %v5537_v33  ;;  %v5479_v30 = vpop.f32.mrf.mxu0 }
 0x9a8   :  { %v5538_v55 = vpop.f32.mrf.mxu1 }
 0x9a9   :  { %v5539_v60 = vadd.f32 %v5538_v55, %v5479_v30  ;;  %v14962_v7 = vadd.f32 %v5654_v24, %v5596_v26  ;;  %v14981_v26 = vld [vmem:[%s15935_s2 + $0x258] sm:$0xff] }
 0x9aa   :  { %6304 = vmatpush.bf16.msra.mxu1 %v14981_v26 }
 0x9ae   :  { %v5597_v43 = vpop.f32.mrf.mxu2 }
 0x9af   :  { %v5656_v25 = vpop.f32.mrf.mxu3  ;;  %v5598_v50 = vadd.f32 %v5597_v43, %v5539_v60  ;;  %v5482_v10 = vpop.f32.mrf.mxu0 }
 0x9b0   :  { %v5541_v19 = vpop.f32.mrf.mxu1 }
 0x9b1   :  { %v5542_v63 = vadd.f32 %v5541_v19, %v5482_v10  ;;  %v14964_v8 = vadd.f32 %v5656_v25, %v5598_v50 }
 0x9b2   :  { %5707 = vmatmul.bf16.gmra.mxu0 %v16894_v62  ;;  %6087 = vmatmul.bf16.gmra.mxu1 %v16886_v18 }
 0x9b3   :  { %6146 = vmatmul.bf16.gmra.mxu2 %v14533_v20 }
 0x9b4   :  { %6205 = vmatmul.bf16.gmra.mxu3 %v16889_v23 }
 0x9b6   :  { %v5600_v49 = vpop.f32.mrf.mxu2 }
 0x9b7   :  { %v5659_v53 = vpop.f32.mrf.mxu3  ;;  %v5601_v9 = vadd.f32 %v5600_v49, %v5542_v63  ;;  %v5484_v11 = vpop.f32.mrf.mxu0 }
 0x9b8   :  { %v5543_v33 = vpop.f32.mrf.mxu1 }
 0x9b9   :  { %v5544_v16 = vadd.f32 %v5543_v33, %v5484_v11  ;;  %v14976_v24 = vadd.f32 %v5659_v53, %v5601_v9 }
 0x9be   :  { %v5602_v30 = vpop.f32.mrf.mxu2 }
 0x9bf   :  { %v5661_v55 = vpop.f32.mrf.mxu3  ;;  %v5603_v60 = vadd.f32 %v5602_v30, %v5544_v16  ;;  %v5487_v43 = vpop.f32.mrf.mxu0  ;;  %v14995_v16 = vld [vmem:[%s15935_s2 + $0x210] sm:$0xff] }
 0x9c0   :  { %v5546_v25 = vpop.f32.mrf.mxu1  ;;  %v15000_v30 = vld [vmem:[%s15935_s2 + $0x250] sm:$0xff]  ;;  %6246 = vmatpush.bf16.msra.mxu0 %v14995_v16 }
 0x9c1   :  { %v5547_v50 = vadd.f32 %v5546_v25, %v5487_v43  ;;  %v14984_v10 = vadd.f32 %v5661_v55, %v5603_v60  ;;  %6305 = vmatpush.bf16.msra.mxu1 %v15000_v30 }
 0x9c2   :  { %5712 = vmatmul.bf16.gmra.mxu0 %v16897_v15  ;;  %6092 = vmatmul.bf16.gmra.mxu1 %v16888_v32 }
 0x9c3   :  { %16909 = vst [vmem:[#allocation43_spill] sm:$0xff] %v14984_v10  ;;  %6151 = vmatmul.bf16.gmra.mxu2 %v14567_v57 }
 0x9c4   :  { %6210 = vmatmul.bf16.gmra.mxu3 %v16890_v59 }
 0x9c6   :  { %v5605_v19 = vpop.f32.mrf.mxu2 }
 0x9c7   :  { %v5664_v63 = vpop.f32.mrf.mxu3  ;;  %v5606_v49 = vadd.f32 %v5605_v19, %v5547_v50  ;;  %v5489_v53 = vpop.f32.mrf.mxu0 }
 0x9c8   :  { %v5548_v9 = vpop.f32.mrf.mxu1 }
 0x9c9   :  { %v5549_v11 = vadd.f32 %v5548_v9, %v5489_v53  ;;  %v14990_v33 = vadd.f32 %v5664_v63, %v5606_v49 }
 0x9cb   :  { %16910 = vst [vmem:[#allocation21_spill] sm:$0xff] %v14990_v33 }
 0x9ce   :  { %v5607_v55 = vpop.f32.mrf.mxu2 }
 0x9cf   :  { %v5666_v60 = vpop.f32.mrf.mxu3  ;;  %v5608_v43 = vadd.f32 %v5607_v55, %v5549_v11  ;;  %v5492_v25 = vpop.f32.mrf.mxu0  ;;  %v15015_v55 = vld [vmem:[%s15935_s2 + $0x208] sm:$0xff] }
 0x9d0   :  { %v5551_v50 = vpop.f32.mrf.mxu1  ;;  %6247 = vmatpush.bf16.msra.mxu0 %v15015_v55 }
 0x9d1   :  { %v5552_v19 = vadd.f32 %v5551_v50, %v5492_v25  ;;  %v15004_v63 = vadd.f32 %v5666_v60, %v5608_v43 }
 0x9d2   :  { %5717 = vmatmul.bf16.gmra.mxu0 %v16901_v46  ;;  %6097 = vmatmul.bf16.gmra.mxu1 %v16889_v23 }
 0x9d3   :  { %16911 = vst [vmem:[#allocation28_spill] sm:$0xff] %v15004_v63  ;;  %6156 = vmatmul.bf16.gmra.mxu2 %v14597_v3 }
 0x9d4   :  { %6215 = vmatmul.bf16.gmra.mxu3 %v16894_v62 }
 0x9d6   :  { %v5610_v49 = vpop.f32.mrf.mxu2 }
 0x9d7   :  { %v5669_v53 = vpop.f32.mrf.mxu3  ;;  %v5611_v9 = vadd.f32 %v5610_v49, %v5552_v19  ;;  %v5494_v41 = vpop.f32.mrf.mxu0 }
 0x9d8   :  { %v5553_v44 = vpop.f32.mrf.mxu1 }
 0x9d9   :  { %v5554_v47 = vadd.f32 %v5553_v44, %v5494_v41  ;;  %v15010_v11 = vadd.f32 %v5669_v53, %v5611_v9  ;;  %v15023_v44 = vld [vmem:[%s15935_s2 + $0x248] sm:$0xff] }
 0x9da   :  { %6306 = vmatpush.bf16.msra.mxu1 %v15023_v44 }
 0x9db   :  { %16912 = vst [vmem:[#allocation48_spill] sm:$0xff] %v15010_v11 }
 0x9de   :  { %v5612_v60 = vpop.f32.mrf.mxu2 }
 0x9df   :  { %v5671_v43 = vpop.f32.mrf.mxu3  ;;  %v5613_v25 = vadd.f32 %v5612_v60, %v5554_v47  ;;  %v5497_v50 = vpop.f32.mrf.mxu0 }
 0x9e0   :  { %v5556_v34 = vpop.f32.mrf.mxu1 }
 0x9e1   :  { %v5557_v63 = vadd.f32 %v5556_v34, %v5497_v50  ;;  %v15018_v33 = vadd.f32 %v5671_v43, %v5613_v25 }
 0x9e2   :  { %5722 = vmatmul.bf16.gmra.mxu0 %v16906_v2  ;;  %6102 = vmatmul.bf16.gmra.mxu1 %v16890_v59 }
 0x9e3   :  { %16913 = vst [vmem:[#allocation19_spill] sm:$0xff] %v15018_v33  ;;  %6161 = vmatmul.bf16.gmra.mxu2 %v14621_v39  ;;  %v15037_v39 = vld [vmem:[%s15935_s2 + $0x200] sm:$0xff] }
 0x9e4   :  { %6220 = vmatmul.bf16.gmra.mxu3 %v16897_v15  ;;  %6248 = vmatpush.bf16.msra.mxu0 %v15037_v39 }
 0x9e6   :  { %v5615_v47 = vpop.f32.mrf.mxu2 }
 0x9e7   :  { %v5674_v41 = vpop.f32.mrf.mxu3  ;;  %v5616_v34 = vadd.f32 %v5615_v47, %v5557_v63  ;;  %v5499_v19 = vpop.f32.mrf.mxu0  ;;  %v15046_v63 = vld [vmem:[%s15935_s2 + $0x240] sm:$0xff] }
 0x9e8   :  { %v5558_v49 = vpop.f32.mrf.mxu1  ;;  %6307 = vmatpush.bf16.msra.mxu1 %v15046_v63 }
 0x9e9   :  { %v5559_v53 = vadd.f32 %v5558_v49, %v5499_v19  ;;  %v15030_v9 = vadd.f32 %v5674_v41, %v5616_v34  ;;  %v10080_v34 = vld [vmem:[%s15935_s2 + $0xf8] sm:$0xff] }
 0x9ec   :  { %6568 = vmatpush.bf16.msrb.mxu1 %v10080_v34 }
 0x9ee   :  { %v5617_v60 = vpop.f32.mrf.mxu2 }
 0x9ef   :  { %v5676_v43 = vpop.f32.mrf.mxu3  ;;  %v5618_v25 = vadd.f32 %v5617_v60, %v5559_v53  ;;  %v5502_v50 = vpop.f32.mrf.mxu0 }
 0x9f0   :  { %v5561_v33 = vpop.f32.mrf.mxu1 }
 0x9f1   :  { %v5562_v11 = vadd.f32 %v5561_v33, %v5502_v50  ;;  %v15032_v10 = vadd.f32 %v5676_v43, %v5618_v25  ;;  %v10079_v33 = vld [vmem:[%s15935_s2 + $0xb8] sm:$0xff]  ;;  %v10081_v25 = vld [vmem:[%s15935_s2 + $0xb0] sm:$0xff] }
 0x9f2   :  { %5727 = vmatmul.bf16.gmra.mxu0 %v16908_v28  ;;  %6107 = vmatmul.bf16.gmra.mxu1 %v16894_v62  ;;  %v10082_v50 = vld [vmem:[%s15935_s2 + $0xf0] sm:$0xff] }
 0x9f3   :  { %6166 = vmatmul.bf16.gmra.mxu2 %v14639_v13  ;;  %6509 = vmatpush.bf16.msrb.mxu0 %v10079_v33  ;;  %v10083_v33 = vld [vmem:[%s15935_s2 + $0xa8] sm:$0xff] }
 0x9f4   :  { %6225 = vmatmul.bf16.gmra.mxu3 %v16901_v46  ;;  %6569 = vmatpush.bf16.msrb.mxu1 %v10082_v50  ;;  %v10085_v50 = vld [vmem:[%s15935_s2 + $0xa0] sm:$0xff] }
 0x9f6   :  { %v5620_v47 = vpop.f32.mrf.mxu2 }
 0x9f7   :  { %v5679_v41 = vpop.f32.mrf.mxu3  ;;  %v5621_v19 = vadd.f32 %v5620_v47, %v5562_v11  ;;  %v5504_v49 = vpop.f32.mrf.mxu0  ;;  %6510 = vmatpush.bf16.msrb.mxu0 %v10081_v25 }
 0x9f8   :  { %v5563_v53 = vpop.f32.mrf.mxu1 }
 0x9f9   :  { %v5564_v60 = vadd.f32 %v5563_v53, %v5504_v49  ;;  %v15056_v43 = vadd.f32 %v5679_v41, %v5621_v19  ;;  %v10084_v41 = vld [vmem:[%s15935_s2 + $0xe8] sm:$0xff] }
 0x9fa   :  { %6570 = vmatpush.bf16.msrb.mxu1 %v10084_v41 }
 0x9fb   :  { %6511 = vmatpush.bf16.msrb.mxu0 %v10083_v33  ;;  %v16916_v33 = vld [vmem:[#allocation39_spill] sm:$0xff] }
 0x9fe   :  { %v5622_v11 = vpop.f32.mrf.mxu2 }
 0x9ff   :  { %v5681_v47 = vpop.f32.mrf.mxu3  ;;  %v5623_v34 = vadd.f32 %v5622_v11, %v5564_v60  ;;  %v5693_v19 = vpop.f32.mrf.mxu0  ;;  %6512 = vmatpush.bf16.msrb.mxu0 %v10085_v50  ;;  %v10087_v60 = vld [vmem:[%s15935_s2 + $0x98] sm:$0xff] }
 0xa00   :  { %v6073_v49 = vpop.f32.mrf.mxu1  ;;  %v15071_v53 = vadd.f32 %v5693_v19, %v14858_v61  ;;  %v10086_v61 = vld [vmem:[%s15935_s2 + $0xe0] sm:$0xff] }
 0xa01   :  { %v15073_v25 = vadd.f32 %v5681_v47, %v5623_v34  ;;  %6571 = vmatpush.bf16.msrb.mxu1 %v10086_v61  ;;  %v10089_v61 = vld [vmem:[%s15935_s2 + $0x90] sm:$0xff] }
 0xa02   :  { %16914 = vst [vmem:[#allocation32_spill] sm:$0xff] %v15071_v53  ;;  %5732 = vmatmul.bf16.gmra.mxu0 %v16916_v33  ;;  %6112 = vmatmul.bf16.gmra.mxu1 %v16897_v15  ;;  %v10088_v53 = vld [vmem:[%s15935_s2 + $0xd8] sm:$0xff] }
 0xa03   :  { %16915 = vst [vmem:[#allocation53_spill] sm:$0xff] %v15073_v25  ;;  %6171 = vmatmul.bf16.gmra.mxu2 %v14669_v42  ;;  %6513 = vmatpush.bf16.msrb.mxu0 %v10087_v60 }
 0xa04   :  { %6230 = vmatmul.bf16.gmra.mxu3 %v16906_v2 }
 0xa05   :  { %6572 = vmatpush.bf16.msrb.mxu1 %v10088_v53 }
 0xa06   :  { %v6132_v11 = vpop.f32.mrf.mxu2 }
 0xa07   :  { %v6191_v47 = vpop.f32.mrf.mxu3  ;;  %v6133_v41 = vadd.f32 %v6132_v11, %v6073_v49  ;;  %v5695_v34 = vpop.f32.mrf.mxu0  ;;  %6514 = vmatpush.bf16.msrb.mxu0 %v10089_v61  ;;  %v10090_v49 = vld [vmem:[%s15935_s2 + $0xd0] sm:$0xff]  ;;  %v10092_v61 = vld [vmem:[%s15935_s2 + $0xc8] sm:$0xff] }
 0xa08   :  { %v6075_v19 = vpop.f32.mrf.mxu1  ;;  %v15089_v50 = vadd.f32 %v5695_v34, %v14878_v14  ;;  %v10091_v14 = vld [vmem:[%s15935_s2 + $0x88] sm:$0xff] }
 0xa09   :  { %v15094_v33 = vadd.f32 %v6191_v47, %v6133_v41  ;;  %6573 = vmatpush.bf16.msrb.mxu1 %v10090_v49  ;;  %v10093_v49 = vld [vmem:[%s15935_s2 + $0x80] sm:$0xff] }
 0xa0a   :  { %16917 = vst [vmem:[#allocation36_spill] sm:$0xff] %v15089_v50 }
 0xa0b   :  { %16918 = vst [vmem:[#allocation46_spill] sm:$0xff] %v15094_v33  ;;  %6515 = vmatpush.bf16.msrb.mxu0 %v10091_v14  ;;  %v16921_v14 = vld [vmem:[#allocation23_spill] sm:$0xff] }
 0xa0d   :  { %6574 = vmatpush.bf16.msrb.mxu1 %v10092_v61 }
 0xa0e   :  { %v6134_v60 = vpop.f32.mrf.mxu2 }
 0xa0f   :  { %v6193_v11 = vpop.f32.mrf.mxu3  ;;  %v6135_v53 = vadd.f32 %v6134_v60, %v6075_v19  ;;  %v5698_v47 = vpop.f32.mrf.mxu0  ;;  %6516 = vmatpush.bf16.msrb.mxu0 %v10093_v49 }
 0xa10   :  { %v6078_v41 = vpop.f32.mrf.mxu1  ;;  %v15106_v34 = vadd.f32 %v5698_v47, %v14886_v45  ;;  %v10094_v45 = vld [vmem:[%s15935_s2 + $0xc0] sm:$0xff] }
 0xa11   :  { %v15111_v50 = vadd.f32 %v6193_v11, %v6135_v53  ;;  %6575 = vmatpush.bf16.msrb.mxu1 %v10094_v45 }
 0xa12   :  { %16919 = vst [vmem:[#allocation40_spill] sm:$0xff] %v15106_v34  ;;  %5737 = vmatmul.bf16.gmra.mxu0 %v16921_v14  ;;  %6117 = vmatmul.bf16.gmra.mxu1 %v16901_v46 }
 0xa13   :  { %16920 = vst [vmem:[#allocation41_spill] sm:$0xff] %v15111_v50  ;;  %6176 = vmatmul.bf16.gmra.mxu2 %v14705_v0 }
 0xa14   :  { %6235 = vmatmul.bf16.gmra.mxu3 %v16908_v28 }
 0xa16   :  { %v6137_v19 = vpop.f32.mrf.mxu2 }
 0xa17   :  { %v6196_v60 = vpop.f32.mrf.mxu3  ;;  %v6138_v11 = vadd.f32 %v6137_v19, %v6078_v41  ;;  %v5700_v53 = vpop.f32.mrf.mxu0 }
 0xa18   :  { %v6080_v47 = vpop.f32.mrf.mxu1  ;;  %v15124_v61 = vadd.f32 %v5700_v53, %v14900_v48  ;;  %v10095_v48 = vld [vmem:[%s15935_s2 + $0x1b8] sm:$0xff] }
 0xa19   :  { %v15126_v49 = vadd.f32 %v6196_v60, %v6138_v11 }
 0xa1e   :  { %v6139_v34 = vpop.f32.mrf.mxu2 }
 0xa1f   :  { %v6198_v14 = vpop.f32.mrf.mxu3  ;;  %v6140_v50 = vadd.f32 %v6139_v34, %v6080_v47  ;;  %v5703_v33 = vpop.f32.mrf.mxu0 }
 0xa20   :  { %v6083_v25 = vpop.f32.mrf.mxu1  ;;  %v15129_v28 = vadd.f32 %v5703_v33, %v14910_v56  ;;  %v10096_v56 = vld [vmem:[%s15935_s2 + $0x1f8] sm:$0xff] }
 0xa21   :  { %v15131_v0 = vadd.f32 %v6198_v14, %v6140_v50 }
 0xa22   :  { %6249 = vmatmul.bf16.vlgmr.msra.gmra.mxu0 %v14517_v21  ;;  %6308 = vmatmul.bf16.vlgmr.msra.gmra.mxu1 %v16888_v32 }
 0xa23   :  { %6399 = vmatmul.bf16.vlgmr.msra.gmra.mxu2 %v14461_v5  ;;  %6765 = vmatpush.bf16.msra.mxu0 %v10095_v48  ;;  %v10102_v48 = vld [vmem:[%s15935_s2 + $0x1e0] sm:$0xff] }
 0xa24   :  { %6458 = vmatmul.bf16.vlgmr.msra.gmra.mxu3 %v16884_v29  ;;  %6883 = vmatpush.bf16.msra.mxu2 %v14842_v58  ;;  %v10097_v58 = vld [vmem:[%s15935_s2 + $0x1b0] sm:$0xff] }
 0xa25   :  { %6942 = vmatpush.bf16.msra.mxu3 %v14863_v1  ;;  %6824 = vmatpush.bf16.msra.mxu1 %v10096_v56 }
 0xa26   :  { %v6142_v33 = vpop.f32.mrf.mxu2 }
 0xa27   :  { %v6201_v50 = vpop.f32.mrf.mxu3  ;;  %v6143_v41 = vadd.f32 %v6142_v33, %v6083_v25  ;;  %v5705_v34 = vpop.f32.mrf.mxu0  ;;  %6766 = vmatpush.bf16.msra.mxu0 %v10097_v58  ;;  %v10098_v25 = vld [vmem:[%s15935_s2 + $0x1f0] sm:$0xff] }
 0xa28   :  { %v6085_v14 = vpop.f32.mrf.mxu1  ;;  %v15146_v45 = vadd.f32 %v5705_v34, %v14922_v27  ;;  %6884 = vmatpush.bf16.msra.mxu2 %v14891_v37  ;;  %v10099_v37 = vld [vmem:[%s15935_s2 + $0x1a8] sm:$0xff] }
 0xa29   :  { %v15152_v1 = vadd.f32 %v6201_v50, %v6143_v41  ;;  %6943 = vmatpush.bf16.msra.mxu3 %v14896_v40  ;;  %6825 = vmatpush.bf16.msra.mxu1 %v10098_v25  ;;  %v10100_v27 = vld [vmem:[%s15935_s2 + $0x1e8] sm:$0xff]  ;;  %v16922_v41 = vld [vmem:[#allocation30_spill] sm:$0xff] }
 0xa2b   :  { %6767 = vmatpush.bf16.msra.mxu0 %v10099_v37 }
 0xa2c   :  { %6885 = vmatpush.bf16.msra.mxu2 %v14915_v6  ;;  %v10101_v6 = vld [vmem:[%s15935_s2 + $0x1a0] sm:$0xff] }
 0xa2d   :  { %6944 = vmatpush.bf16.msra.mxu3 %v14927_v54  ;;  %6826 = vmatpush.bf16.msra.mxu1 %v10100_v27 }
 0xa2e   :  { %v6144_v40 = vpop.f32.mrf.mxu2 }
 0xa2f   :  { %v6203_v19 = vpop.f32.mrf.mxu3  ;;  %v6145_v60 = vadd.f32 %v6144_v40, %v6085_v14  ;;  %v5708_v11 = vpop.f32.mrf.mxu0  ;;  %6768 = vmatpush.bf16.msra.mxu0 %v10101_v6 }
 0xa30   :  { %v6088_v53 = vpop.f32.mrf.mxu1  ;;  %v15167_v47 = vadd.f32 %v5708_v11, %v14937_v36  ;;  %6886 = vmatpush.bf16.msra.mxu2 %v14948_v38 }
 0xa31   :  { %v15173_v54 = vadd.f32 %v6203_v19, %v6145_v60  ;;  %6945 = vmatpush.bf16.msra.mxu3 %v14958_v22  ;;  %6827 = vmatpush.bf16.msra.mxu1 %v10102_v48 }
 0xa32   :  { %6254 = vmatmul.bf16.gmra.mxu0 %v14533_v20  ;;  %6313 = vmatmul.bf16.gmra.mxu1 %v16889_v23 }
 0xa33   :  { %6404 = vmatmul.bf16.gmra.mxu2 %v14483_v51  ;;  %6769 = vmatpush.bf16.msra.mxu0 %v14674_v52  ;;  %v16923_v52 = vld [vmem:[#allocation3_spill] sm:$0xff] }
 0xa34   :  { %6463 = vmatmul.bf16.gmra.mxu3 %v16886_v18  ;;  %6887 = vmatpush.bf16.msra.mxu2 %v14973_v17 }
 0xa35   :  { %6946 = vmatpush.bf16.msra.mxu3 %v14981_v26  ;;  %6828 = vmatpush.bf16.msra.mxu1 %v14684_v12  ;;  %v16924_v12 = vld [vmem:[#allocation22_spill] sm:$0xff] }
 0xa36   :  { %v6147_v36 = vpop.f32.mrf.mxu2 }
 0xa37   :  { %v6206_v38 = vpop.f32.mrf.mxu3  ;;  %v6148_v22 = vadd.f32 %v6147_v36, %v6088_v53  ;;  %v5710_v56 = vpop.f32.mrf.mxu0  ;;  %6770 = vmatpush.bf16.msra.mxu0 %v16922_v41 }
 0xa38   :  { %v6090_v33 = vpop.f32.mrf.mxu1  ;;  %v15188_v50 = vadd.f32 %v5710_v56, %v14943_v31  ;;  %6888 = vmatpush.bf16.msra.mxu2 %v14995_v16 }
 0xa39   :  { %v15192_v34 = vadd.f32 %v6206_v38, %v6148_v22  ;;  %6947 = vmatpush.bf16.msra.mxu3 %v15000_v30  ;;  %6829 = vmatpush.bf16.msra.mxu1 %v16923_v52  ;;  %v16926_v22 = vld [vmem:[#allocation43_spill] sm:$0xff] }
 0xa3b   :  { %6771 = vmatpush.bf16.msra.mxu0 %v14748_v4  ;;  %v16925_v4 = vld [vmem:[#allocation9_spill] sm:$0xff] }
 0xa3c   :  { %6889 = vmatpush.bf16.msra.mxu2 %v15015_v55 }
 0xa3d   :  { %6948 = vmatpush.bf16.msra.mxu3 %v15023_v44  ;;  %6830 = vmatpush.bf16.msra.mxu1 %v16924_v12 }
 0xa3e   :  { %v6149_v31 = vpop.f32.mrf.mxu2 }
 0xa3f   :  { %v6208_v17 = vpop.f32.mrf.mxu3  ;;  %v6150_v26 = vadd.f32 %v6149_v31, %v6090_v33  ;;  %v5713_v16 = vpop.f32.mrf.mxu0  ;;  %6772 = vmatpush.bf16.msra.mxu0 %v14784_v35 }
 0xa40   :  { %v6093_v14 = vpop.f32.mrf.mxu1  ;;  %v15201_v58 = vadd.f32 %v5713_v16, %v14962_v7  ;;  %6890 = vmatpush.bf16.msra.mxu2 %v15037_v39 }
 0xa41   :  { %v15205_v30 = vadd.f32 %v6208_v17, %v6150_v26  ;;  %6949 = vmatpush.bf16.msra.mxu3 %v15046_v63  ;;  %6831 = vmatpush.bf16.msra.mxu1 %v16925_v4  ;;  %v16927_v17 = vld [vmem:[#allocation21_spill] sm:$0xff] }
 0xa42   :  { %6259 = vmatmul.bf16.gmra.mxu0 %v14567_v57  ;;  %6318 = vmatmul.bf16.gmra.mxu1 %v16890_v59 }
 0xa43   :  { %6409 = vmatmul.bf16.gmra.mxu2 %v14517_v21 }
 0xa44   :  { %6468 = vmatmul.bf16.gmra.mxu3 %v16888_v32 }
 0xa46   :  { %v6152_v7 = vpop.f32.mrf.mxu2 }
 0xa47   :  { %v6211_v55 = vpop.f32.mrf.mxu3  ;;  %v6153_v44 = vadd.f32 %v6152_v7, %v6093_v14  ;;  %v5715_v39 = vpop.f32.mrf.mxu0  ;;  %v16928_v14 = vld [vmem:[#allocation15_spill] sm:$0xff] }
 0xa48   :  { %v6095_v25 = vpop.f32.mrf.mxu1  ;;  %v15214_v35 = vadd.f32 %v5715_v39, %v14964_v8 }
 0xa49   :  { %v15216_v37 = vadd.f32 %v6211_v55, %v6153_v44 }
 0xa4e   :  { %v6154_v63 = vpop.f32.mrf.mxu2 }
 0xa4f   :  { %v6213_v27 = vpop.f32.mrf.mxu3  ;;  %v6155_v40 = vadd.f32 %v6154_v63, %v6095_v25  ;;  %v5718_v19 = vpop.f32.mrf.mxu0  ;;  %v16929_v25 = vld [vmem:[#allocation28_spill] sm:$0xff] }
 0xa50   :  { %v6098_v60 = vpop.f32.mrf.mxu1  ;;  %v15219_v11 = vadd.f32 %v5718_v19, %v14976_v24 }
 0xa51   :  { %v15221_v53 = vadd.f32 %v6213_v27, %v6155_v40 }
 0xa52   :  { %6264 = vmatmul.bf16.gmra.mxu0 %v14597_v3  ;;  %6323 = vmatmul.bf16.gmra.mxu1 %v16894_v62 }
 0xa53   :  { %6414 = vmatmul.bf16.gmra.mxu2 %v14533_v20 }
 0xa54   :  { %6473 = vmatmul.bf16.gmra.mxu3 %v16889_v23 }
 0xa56   :  { %v6157_v8 = vpop.f32.mrf.mxu2 }
 0xa57   :  { %v6216_v6 = vpop.f32.mrf.mxu3  ;;  %v6158_v48 = vadd.f32 %v6157_v8, %v6098_v60  ;;  %v5720_v36 = vpop.f32.mrf.mxu0 }
 0xa58   :  { %v6100_v38 = vpop.f32.mrf.mxu1  ;;  %v15228_v56 = vadd.f32 %v5720_v36, %v16926_v22 }
 0xa59   :  { %v15230_v24 = vadd.f32 %v6216_v6, %v6158_v48  ;;  %v16930_v48 = vld [vmem:[#allocation48_spill] sm:$0xff] }
 0xa5e   :  { %v6159_v33 = vpop.f32.mrf.mxu2 }
 0xa5f   :  { %v6218_v41 = vpop.f32.mrf.mxu3  ;;  %v6160_v52 = vadd.f32 %v6159_v33, %v6100_v38  ;;  %v5723_v12 = vpop.f32.mrf.mxu0 }
 0xa60   :  { %v6103_v31 = vpop.f32.mrf.mxu1  ;;  %v15233_v26 = vadd.f32 %v5723_v12, %v16927_v17 }
 0xa61   :  { %v15235_v16 = vadd.f32 %v6218_v41, %v6160_v52 }
 0xa62   :  { %6269 = vmatmul.bf16.gmra.mxu0 %v16928_v14  ;;  %6328 = vmatmul.bf16.gmra.mxu1 %v16897_v15 }
 0xa63   :  { %6419 = vmatmul.bf16.gmra.mxu2 %v14567_v57 }
 0xa64   :  { %6478 = vmatmul.bf16.gmra.mxu3 %v16890_v59 }
 0xa66   :  { %v6162_v4 = vpop.f32.mrf.mxu2 }
 0xa67   :  { %v6221_v7 = vpop.f32.mrf.mxu3  ;;  %v6163_v55 = vadd.f32 %v6162_v4, %v6103_v31  ;;  %v5725_v44 = vpop.f32.mrf.mxu0  ;;  %v16932_v31 = vld [vmem:[#allocation19_spill] sm:$0xff] }
 0xa68   :  { %v6105_v39 = vpop.f32.mrf.mxu1  ;;  %v15242_v63 = vadd.f32 %v5725_v44, %v16929_v25 }
 0xa69   :  { %v15244_v27 = vadd.f32 %v6221_v7, %v6163_v55 }
 0xa6e   :  { %v6164_v40 = vpop.f32.mrf.mxu2 }
 0xa6f   :  { %v6223_v19 = vpop.f32.mrf.mxu3  ;;  %v6165_v60 = vadd.f32 %v6164_v40, %v6105_v39  ;;  %v5728_v8 = vpop.f32.mrf.mxu0 }
 0xa70   :  { %v6108_v6 = vpop.f32.mrf.mxu1  ;;  %v15247_v36 = vadd.f32 %v5728_v8, %v16930_v48 }
 0xa71   :  { %v15249_v38 = vadd.f32 %v6223_v19, %v6165_v60 }
 0xa72   :  { %16931 = vst [vmem:[#allocation54_spill] sm:$0xff] %v15247_v36  ;;  %6274 = vmatmul.bf16.gmra.mxu0 %v14639_v13  ;;  %6333 = vmatmul.bf16.gmra.mxu1 %v16901_v46 }
 0xa73   :  { %6424 = vmatmul.bf16.gmra.mxu2 %v14597_v3 }
 0xa74   :  { %6483 = vmatmul.bf16.gmra.mxu3 %v16894_v62 }
 0xa76   :  { %v6167_v22 = vpop.f32.mrf.mxu2 }
 0xa77   :  { %v6226_v33 = vpop.f32.mrf.mxu3  ;;  %v6168_v41 = vadd.f32 %v6167_v22, %v6108_v6  ;;  %v5730_v52 = vpop.f32.mrf.mxu0 }
 0xa78   :  { %v6110_v12 = vpop.f32.mrf.mxu1  ;;  %v15256_v17 = vadd.f32 %v5730_v52, %v16932_v31 }
 0xa79   :  { %v15258_v4 = vadd.f32 %v6226_v33, %v6168_v41 }
 0xa7a   :  { %16933 = vst [vmem:[#allocation42_spill] sm:$0xff] %v15256_v17 }
 0xa7e   :  { %v6169_v7 = vpop.f32.mrf.mxu2 }
 0xa7f   :  { %v6228_v55 = vpop.f32.mrf.mxu3  ;;  %v6170_v44 = vadd.f32 %v6169_v7, %v6110_v12  ;;  %v5733_v39 = vpop.f32.mrf.mxu0 }
 0xa80   :  { %v6113_v25 = vpop.f32.mrf.mxu1  ;;  %v15261_v40 = vadd.f32 %v5733_v39, %v15030_v9  ;;  %v16939_v39 = vld [vmem:[#allocation29_spill] sm:$0xff] }
 0xa81   :  { %v15263_v19 = vadd.f32 %v6228_v55, %v6170_v44 }
 0xa82   :  { %16934 = vst [vmem:[#allocation51_spill] sm:$0xff] %v15261_v40  ;;  %6279 = vmatmul.bf16.gmra.mxu0 %v14669_v42  ;;  %6338 = vmatmul.bf16.gmra.mxu1 %v16906_v2 }
 0xa83   :  { %6429 = vmatmul.bf16.gmra.mxu2 %v16928_v14 }
 0xa84   :  { %6488 = vmatmul.bf16.gmra.mxu3 %v16897_v15 }
 0xa86   :  { %v6172_v60 = vpop.f32.mrf.mxu2 }
 0xa87   :  { %v6231_v8 = vpop.f32.mrf.mxu3  ;;  %v6173_v6 = vadd.f32 %v6172_v60, %v6113_v25  ;;  %v5735_v48 = vpop.f32.mrf.mxu0  ;;  %v16940_v25 = vld [vmem:[#allocation17_spill] sm:$0xff] }
 0xa88   :  { %v6115_v22 = vpop.f32.mrf.mxu1  ;;  %v15270_v33 = vadd.f32 %v5735_v48, %v15032_v10 }
 0xa89   :  { %v15272_v9 = vadd.f32 %v6231_v8, %v6173_v6 }
 0xa8a   :  { %16935 = vst [vmem:[#allocation45_spill] sm:$0xff] %v15270_v33 }
 0xa8b   :  { %16936 = vst [vmem:[#allocation52_spill] sm:$0xff] %v15272_v9  ;;  %v16947_v9 = vld [vmem:[#allocation75_spill] sm:$0xff] }
 0xa8e   :  { %v6174_v41 = vpop.f32.mrf.mxu2 }
 0xa8f   :  { %v6233_v52 = vpop.f32.mrf.mxu3  ;;  %v6175_v12 = vadd.f32 %v6174_v41, %v6115_v22  ;;  %v5738_v31 = vpop.f32.mrf.mxu0  ;;  %v16941_v22 = vld [vmem:[#allocation53_spill] sm:$0xff] }
 0xa90   :  { %v6118_v7 = vpop.f32.mrf.mxu1  ;;  %v15275_v55 = vadd.f32 %v5738_v31, %v15056_v43 }
 0xa91   :  { %v15277_v44 = vadd.f32 %v6233_v52, %v6175_v12 }
 0xa92   :  { %16937 = vst [vmem:[#allocation60_spill] sm:$0xff] %v15275_v55  ;;  %6284 = vmatmul.bf16.gmra.mxu0 %v16939_v39  ;;  %6343 = vmatmul.bf16.gmra.mxu1 %v16940_v25  ;;  %v16944_v55 = vld [vmem:[#allocation46_spill] sm:$0xff] }
 0xa93   :  { %16938 = vst [vmem:[#allocation44_spill] sm:$0xff] %v15277_v44  ;;  %6434 = vmatmul.bf16.gmra.mxu2 %v14639_v13 }
 0xa94   :  { %6493 = vmatmul.bf16.gmra.mxu3 %v16901_v46 }
 0xa96   :  { %v6177_v10 = vpop.f32.mrf.mxu2 }
 0xa97   :  { %v6236_v60 = vpop.f32.mrf.mxu3  ;;  %v6178_v8 = vadd.f32 %v6177_v10, %v6118_v7  ;;  %v5740_v6 = vpop.f32.mrf.mxu0  ;;  %v16948_v7 = vld [vmem:[#allocation39_spill] sm:$0xff] }
 0xa98   :  { %v6120_v48 = vpop.f32.mrf.mxu1  ;;  %v15284_v41 = vadd.f32 %v5740_v6, %v16941_v22  ;;  %v16950_v22 = vld [vmem:[#allocation41_spill] sm:$0xff] }
 0xa99   :  { %v15286_v43 = vadd.f32 %v6236_v60, %v6178_v8 }
 0xa9a   :  { %16942 = vst [vmem:[#allocation65_spill] sm:$0xff] %v15284_v41 }
 0xa9b   :  { %16943 = vst [vmem:[#allocation49_spill] sm:$0xff] %v15286_v43 }
 0xa9e   :  { %v6179_v52 = vpop.f32.mrf.mxu2 }
 0xa9f   :  { %v6238_v12 = vpop.f32.mrf.mxu3  ;;  %v6180_v31 = vadd.f32 %v6179_v52, %v6120_v48  ;;  %v6250_v18 = vpop.f32.mrf.mxu0 }
 0xaa0   :  { %v6309_v29 = vpop.f32.mrf.mxu1  ;;  %v6251_v33 = vadd.f32 %v6250_v18, %v16944_v55 }
 0xaa1   :  { %v15289_v44 = vadd.f32 %v6238_v12, %v6180_v31 }
 0xaa2   :  { %v15291_v40 = vadd.f32 %v6309_v29, %v6251_v33  ;;  %6289 = vmatmul.bf16.gmra.mxu0 %v16947_v9  ;;  %6348 = vmatmul.bf16.gmra.mxu1 %v16948_v7 }
 0xaa3   :  { %16945 = vst [vmem:[#allocation58_spill] sm:$0xff] %v15289_v44  ;;  %6439 = vmatmul.bf16.gmra.mxu2 %v14669_v42 }
 0xaa4   :  { %16946 = vst [vmem:[#allocation55_spill] sm:$0xff] %v15291_v40  ;;  %6498 = vmatmul.bf16.gmra.mxu3 %v16906_v2 }
 0xaa6   :  { %v6400_v8 = vpop.f32.mrf.mxu2 }
 0xaa7   :  { %v6459_v6 = vpop.f32.mrf.mxu3  ;;  %v6252_v18 = vpop.f32.mrf.mxu0 }
 0xaa8   :  { %v15299_v48 = vadd.f32 %v6459_v6, %v6400_v8  ;;  %v6311_v55 = vpop.f32.mrf.mxu1  ;;  %v6253_v29 = vadd.f32 %v6252_v18, %v16950_v22  ;;  %v16954_v8 = vld [vmem:[#allocation24_spill] sm:$0xff]  ;;  %v16955_v6 = vld [vmem:[#allocation23_spill] sm:$0xff] }
 0xaa9   :  { %v16956_v18 = vld [vmem:[#allocation40_spill] sm:$0xff] }
 0xaaa   :  { %v15302_v33 = vadd.f32 %v6311_v55, %v6253_v29 }
 0xaac   :  { %16951 = vst [vmem:[#allocation59_spill] sm:$0xff] %v15302_v33 }
 0xaae   :  { %v6402_v31 = vpop.f32.mrf.mxu2 }
 0xaaf   :  { %v6461_v7 = vpop.f32.mrf.mxu3  ;;  %v6255_v44 = vpop.f32.mrf.mxu0 }
 0xab0   :  { %v15306_v41 = vadd.f32 %v6461_v7, %v6402_v31  ;;  %v6314_v43 = vpop.f32.mrf.mxu1  ;;  %v6256_v60 = vadd.f32 %v6255_v44, %v15126_v49 }
 0xab2   :  { %v15309_v40 = vadd.f32 %v6314_v43, %v6256_v60  ;;  %6294 = vmatmul.bf16.gmra.mxu0 %v16954_v8  ;;  %6353 = vmatmul.bf16.gmra.mxu1 %v16955_v6 }
 0xab3   :  { %6444 = vmatmul.bf16.gmra.mxu2 %v16939_v39 }
 0xab4   :  { %16953 = vst [vmem:[#allocation61_spill] sm:$0xff] %v15309_v40  ;;  %6503 = vmatmul.bf16.gmra.mxu3 %v16940_v25 }
 0xab6   :  { %v6405_v22 = vpop.f32.mrf.mxu2 }
 0xab7   :  { %v6464_v7 = vpop.f32.mrf.mxu3  ;;  %v6257_v31 = vpop.f32.mrf.mxu0 }
 0xab8   :  { %v15317_v29 = vadd.f32 %v6464_v7, %v6405_v22  ;;  %v6316_v12 = vpop.f32.mrf.mxu1  ;;  %v6258_v49 = vadd.f32 %v6257_v31, %v15131_v0 }
 0xaba   :  { %v15320_v44 = vadd.f32 %v6316_v12, %v6258_v49 }
 0xabe   :  { %v6407_v60 = vpop.f32.mrf.mxu2 }
 0xabf   :  { %v6466_v6 = vpop.f32.mrf.mxu3  ;;  %v6260_v52 = vpop.f32.mrf.mxu0 }
 0xac0   :  { %v15324_v33 = vadd.f32 %v6466_v6, %v6407_v60  ;;  %v6319_v10 = vpop.f32.mrf.mxu1  ;;  %v6261_v55 = vadd.f32 %v6260_v52, %v15152_v1 }
 0xac2   :  { %v15327_v40 = vadd.f32 %v6319_v10, %v6261_v55  ;;  %6517 = vmatmul.bf16.vlgmr.msrb.gmra.mxu0 %v14517_v21  ;;  %6576 = vmatmul.bf16.vlgmr.msrb.gmra.mxu1 %v16888_v32 }
 0xac3   :  { %6635 = vmatmul.bf16.vlgmr.msrb.gmra.mxu2 %v14567_v57 }
 0xac4   :  { %16957 = vst [vmem:[#allocation63_spill] sm:$0xff] %v15327_v40  ;;  %6714 = vmatmul.bf16.vlgmr.msrb.gmra.mxu3 %v14461_v5 }
 0xac6   :  { %v6410_v12 = vpop.f32.mrf.mxu2 }
 0xac7   :  { %v6469_v6 = vpop.f32.mrf.mxu3  ;;  %v6262_v7 = vpop.f32.mrf.mxu0 }
 0xac8   :  { %v15335_v22 = vadd.f32 %v6469_v6, %v6410_v12  ;;  %v6321_v31 = vpop.f32.mrf.mxu1  ;;  %v6263_v1 = vadd.f32 %v6262_v7, %v15173_v54 }
 0xaca   :  { %v15338_v10 = vadd.f32 %v6321_v31, %v6263_v1 }
 0xace   :  { %v6412_v55 = vpop.f32.mrf.mxu2 }
 0xacf   :  { %v6471_v49 = vpop.f32.mrf.mxu3  ;;  %v6265_v5 = vpop.f32.mrf.mxu0 }
 0xad0   :  { %v15342_v60 = vadd.f32 %v6471_v49, %v6412_v55  ;;  %v6324_v43 = vpop.f32.mrf.mxu1  ;;  %v6266_v0 = vadd.f32 %v6265_v5, %v15192_v34 }
 0xad2   :  { %v15345_v40 = vadd.f32 %v6324_v43, %v6266_v0  ;;  %6522 = vmatmul.bf16.gmra.mxu0 %v14533_v20  ;;  %6581 = vmatmul.bf16.gmra.mxu1 %v16889_v23 }
 0xad3   :  { %6640 = vmatmul.bf16.gmra.mxu2 %v14597_v3 }
 0xad4   :  { %16958 = vst [vmem:[#allocation62_spill] sm:$0xff] %v15345_v40  ;;  %6719 = vmatmul.bf16.gmra.mxu3 %v14483_v51 }
 0xad6   :  { %v6415_v12 = vpop.f32.mrf.mxu2 }
 0xad7   :  { %v6474_v6 = vpop.f32.mrf.mxu3  ;;  %v6267_v31 = vpop.f32.mrf.mxu0 }
 0xad8   :  { %v15353_v7 = vadd.f32 %v6474_v6, %v6415_v12  ;;  %v6326_v1 = vpop.f32.mrf.mxu1  ;;  %v6268_v34 = vadd.f32 %v6267_v31, %v15205_v30 }
 0xada   :  { %v15356_v43 = vadd.f32 %v6326_v1, %v6268_v34 }
 0xade   :  { %v6417_v55 = vpop.f32.mrf.mxu2 }
 0xadf   :  { %v6476_v49 = vpop.f32.mrf.mxu3  ;;  %v6270_v51 = vpop.f32.mrf.mxu0 }
 0xae0   :  { %v15360_v5 = vadd.f32 %v6476_v49, %v6417_v55  ;;  %v6329_v52 = vpop.f32.mrf.mxu1  ;;  %v6271_v54 = vadd.f32 %v6270_v51, %v15216_v37 }
 0xae2   :  { %v15363_v40 = vadd.f32 %v6329_v52, %v6271_v54  ;;  %6527 = vmatmul.bf16.gmra.mxu0 %v14567_v57  ;;  %6586 = vmatmul.bf16.gmra.mxu1 %v16890_v59 }
 0xae3   :  { %6645 = vmatmul.bf16.gmra.mxu2 %v16928_v14 }
 0xae4   :  { %16959 = vst [vmem:[#allocation6_spill] sm:$0xff] %v15363_v40  ;;  %6724 = vmatmul.bf16.gmra.mxu3 %v14517_v21 }
 0xae6   :  { %v6420_v12 = vpop.f32.mrf.mxu2 }
 0xae7   :  { %v6479_v6 = vpop.f32.mrf.mxu3  ;;  %v6272_v1 = vpop.f32.mrf.mxu0 }
 0xae8   :  { %v15371_v31 = vadd.f32 %v6479_v6, %v6420_v12  ;;  %v6331_v34 = vpop.f32.mrf.mxu1  ;;  %v6273_v37 = vadd.f32 %v6272_v1, %v15221_v53 }
 0xaea   :  { %v15374_v52 = vadd.f32 %v6331_v34, %v6273_v37 }
 0xaee   :  { %v6422_v55 = vpop.f32.mrf.mxu2 }
 0xaef   :  { %v6481_v49 = vpop.f32.mrf.mxu3  ;;  %v6275_v0 = vpop.f32.mrf.mxu0 }
 0xaf0   :  { %v15378_v51 = vadd.f32 %v6481_v49, %v6422_v55  ;;  %v6334_v59 = vpop.f32.mrf.mxu1  ;;  %v6276_v30 = vadd.f32 %v6275_v0, %v15230_v24 }
 0xaf2   :  { %v15381_v40 = vadd.f32 %v6334_v59, %v6276_v30  ;;  %6532 = vmatmul.bf16.gmra.mxu0 %v14597_v3  ;;  %6591 = vmatmul.bf16.gmra.mxu1 %v16894_v62 }
 0xaf3   :  { %6650 = vmatmul.bf16.gmra.mxu2 %v14639_v13 }
 0xaf4   :  { %16960 = vst [vmem:[#allocation64_spill] sm:$0xff] %v15381_v40  ;;  %6729 = vmatmul.bf16.gmra.mxu3 %v14533_v20 }
 0xaf6   :  { %v6425_v12 = vpop.f32.mrf.mxu2 }
 0xaf7   :  { %v6484_v6 = vpop.f32.mrf.mxu3  ;;  %v6277_v34 = vpop.f32.mrf.mxu0 }
 0xaf8   :  { %v15389_v1 = vadd.f32 %v6484_v6, %v6425_v12  ;;  %v6336_v37 = vpop.f32.mrf.mxu1  ;;  %v6278_v59 = vadd.f32 %v6277_v34, %v15235_v16 }
 0xafa   :  { %v15392_v24 = vadd.f32 %v6336_v37, %v6278_v59 }
 0xafe   :  { %v6427_v30 = vpop.f32.mrf.mxu2 }
 0xaff   :  { %v6486_v55 = vpop.f32.mrf.mxu3  ;;  %v6280_v54 = vpop.f32.mrf.mxu0 }
 0xb00   :  { %v15396_v49 = vadd.f32 %v6486_v55, %v6427_v30  ;;  %v6339_v62 = vpop.f32.mrf.mxu1  ;;  %v6281_v53 = vadd.f32 %v6280_v54, %v15244_v27 }
 0xb02   :  { %v15399_v40 = vadd.f32 %v6339_v62, %v6281_v53  ;;  %6537 = vmatmul.bf16.gmra.mxu0 %v16928_v14  ;;  %6596 = vmatmul.bf16.gmra.mxu1 %v16897_v15 }
 0xb03   :  { %6655 = vmatmul.bf16.gmra.mxu2 %v14669_v42 }
 0xb04   :  { %16961 = vst [vmem:[#allocation2_spill] sm:$0xff] %v15399_v40  ;;  %6734 = vmatmul.bf16.gmra.mxu3 %v14567_v57 }
 0xb06   :  { %v6430_v12 = vpop.f32.mrf.mxu2 }
 0xb07   :  { %v6489_v6 = vpop.f32.mrf.mxu3  ;;  %v6282_v37 = vpop.f32.mrf.mxu0 }
 0xb08   :  { %v15407_v34 = vadd.f32 %v6489_v6, %v6430_v12  ;;  %v6341_v59 = vpop.f32.mrf.mxu1  ;;  %v6283_v62 = vadd.f32 %v6282_v37, %v15249_v38  ;;  %v16965_v38 = vld [vmem:[#allocation52_spill] sm:$0xff] }
 0xb0a   :  { %v15410_v27 = vadd.f32 %v6341_v59, %v6283_v62 }
 0xb0e   :  { %v6432_v53 = vpop.f32.mrf.mxu2 }
 0xb0f   :  { %v6491_v30 = vpop.f32.mrf.mxu3  ;;  %v6285_v0 = vpop.f32.mrf.mxu0 }
 0xb10   :  { %v15414_v55 = vadd.f32 %v6491_v30, %v6432_v53  ;;  %v6344_v15 = vpop.f32.mrf.mxu1  ;;  %v6286_v16 = vadd.f32 %v6285_v0, %v15258_v4 }
 0xb12   :  { %v15417_v40 = vadd.f32 %v6344_v15, %v6286_v16  ;;  %6542 = vmatmul.bf16.gmra.mxu0 %v14639_v13  ;;  %6601 = vmatmul.bf16.gmra.mxu1 %v16901_v46 }
 0xb13   :  { %6660 = vmatmul.bf16.gmra.mxu2 %v16939_v39 }
 0xb14   :  { %16962 = vst [vmem:[#allocation67_spill] sm:$0xff] %v15417_v40  ;;  %6739 = vmatmul.bf16.gmra.mxu3 %v14597_v3 }
 0xb16   :  { %v6435_v12 = vpop.f32.mrf.mxu2 }
 0xb17   :  { %v6494_v6 = vpop.f32.mrf.mxu3  ;;  %v6287_v59 = vpop.f32.mrf.mxu0 }
 0xb18   :  { %v15425_v37 = vadd.f32 %v6494_v6, %v6435_v12  ;;  %v6346_v62 = vpop.f32.mrf.mxu1  ;;  %v6288_v15 = vadd.f32 %v6287_v59, %v15263_v19  ;;  %v16972_v12 = vld [vmem:[#allocation49_spill] sm:$0xff] }
 0xb1a   :  { %v15428_v4 = vadd.f32 %v6346_v62, %v6288_v15 }
 0xb1c   :  { %16963 = vst [vmem:[#allocation70_spill] sm:$0xff] %v15428_v4 }
 0xb1e   :  { %v6437_v16 = vpop.f32.mrf.mxu2 }
 0xb1f   :  { %v6496_v53 = vpop.f32.mrf.mxu3  ;;  %v6290_v54 = vpop.f32.mrf.mxu0 }
 0xb20   :  { %v15432_v30 = vadd.f32 %v6496_v53, %v6437_v16  ;;  %v6349_v46 = vpop.f32.mrf.mxu1  ;;  %v6291_v40 = vadd.f32 %v6290_v54, %v16965_v38  ;;  %v16968_v54 = vld [vmem:[#allocation44_spill] sm:$0xff] }
 0xb22   :  { %16964 = vst [vmem:[#allocation35_spill] sm:$0xff] %v15432_v30  ;;  %v15435_v36 = vadd.f32 %v6349_v46, %v6291_v40  ;;  %6547 = vmatmul.bf16.gmra.mxu0 %v14669_v42  ;;  %6606 = vmatmul.bf16.gmra.mxu1 %v16906_v2 }
 0xb23   :  { %6665 = vmatmul.bf16.gmra.mxu2 %v16947_v9 }
 0xb24   :  { %16966 = vst [vmem:[#allocation27_spill] sm:$0xff] %v15435_v36  ;;  %6744 = vmatmul.bf16.gmra.mxu3 %v16928_v14 }
 0xb26   :  { %v6440_v6 = vpop.f32.mrf.mxu2 }
 0xb27   :  { %v6499_v59 = vpop.f32.mrf.mxu3  ;;  %v6292_v15 = vpop.f32.mrf.mxu0 }
 0xb28   :  { %v15443_v62 = vadd.f32 %v6499_v59, %v6440_v6  ;;  %v6351_v16 = vpop.f32.mrf.mxu1  ;;  %v6293_v46 = vadd.f32 %v6292_v15, %v16968_v54 }
 0xb2a   :  { %v15446_v40 = vadd.f32 %v6351_v16, %v6293_v46  ;;  %v16983_v46 = vld [vmem:[#allocation32_spill] sm:$0xff] }
 0xb2c   :  { %16969 = vst [vmem:[#allocation31_spill] sm:$0xff] %v15446_v40 }
 0xb2e   :  { %v6442_v0 = vpop.f32.mrf.mxu2 }
 0xb2f   :  { %v6501_v2 = vpop.f32.mrf.mxu3  ;;  %v6295_v17 = vpop.f32.mrf.mxu0 }
 0xb30   :  { %v15450_v4 = vadd.f32 %v6501_v2, %v6442_v0  ;;  %v6354_v30 = vpop.f32.mrf.mxu1  ;;  %v6296_v36 = vadd.f32 %v6295_v17, %v16972_v12  ;;  %v16976_v17 = vld [vmem:[#allocation58_spill] sm:$0xff] }
 0xb32   :  { %16971 = vst [vmem:[#allocation66_spill] sm:$0xff] %v15450_v4  ;;  %v15453_v19 = vadd.f32 %v6354_v30, %v6296_v36  ;;  %6552 = vmatmul.bf16.gmra.mxu0 %v16939_v39  ;;  %6611 = vmatmul.bf16.gmra.mxu1 %v16940_v25 }
 0xb33   :  { %6670 = vmatmul.bf16.gmra.mxu2 %v16954_v8 }
 0xb34   :  { %16973 = vst [vmem:[#allocation69_spill] sm:$0xff] %v15453_v19  ;;  %6749 = vmatmul.bf16.gmra.mxu3 %v14639_v13 }
 0xb36   :  { %v6445_v15 = vpop.f32.mrf.mxu2 }
 0xb37   :  { %v6504_v2 = vpop.f32.mrf.mxu3  ;;  %v6297_v16 = vpop.f32.mrf.mxu0 }
 0xb38   :  { %v15461_v0 = vadd.f32 %v6504_v2, %v6445_v15  ;;  %v6356_v54 = vpop.f32.mrf.mxu1  ;;  %v6298_v36 = vadd.f32 %v6297_v16, %v16976_v17  ;;  %v16980_v15 = vld [vmem:[#allocation39_spill] sm:$0xff]  ;;  %v16981_v2 = vld [vmem:[#allocation26_spill] sm:$0xff] }
 0xb3a   :  { %16975 = vst [vmem:[#allocation68_spill] sm:$0xff] %v15461_v0  ;;  %v15464_v30 = vadd.f32 %v6356_v54, %v6298_v36 }
 0xb3c   :  { %16977 = vst [vmem:[#allocation4_spill] sm:$0xff] %v15464_v30  ;;  %v16984_v30 = vld [vmem:[#allocation55_spill] sm:$0xff] }
 0xb3e   :  { %v6447_v53 = vpop.f32.mrf.mxu2 }
 0xb3f   :  { %v6506_v25 = vpop.f32.mrf.mxu3  ;;  %v6518_v38 = vpop.f32.mrf.mxu0 }
 0xb40   :  { %v15468_v40 = vadd.f32 %v6506_v25, %v6447_v53  ;;  %v6577_v4 = vpop.f32.mrf.mxu1  ;;  %v6519_v59 = vadd.f32 %v6518_v38, %v15299_v48  ;;  %v16985_v48 = vmax.f32 %v16983_v46, %v16984_v30  ;;  %v16989_v30 = vld [vmem:[#allocation23_spill] sm:$0xff]  ;;  %v16990_v46 = vld [vmem:[#allocation20_spill] sm:$0xff] }
 0xb42   :  { %16979 = vst [vmem:[#allocation71_spill] sm:$0xff] %v15468_v40  ;;  %v6578_v19 = vadd.f32 %v6577_v4, %v6519_v59  ;;  %6557 = vmatmul.bf16.gmra.mxu0 %v16947_v9  ;;  %6616 = vmatmul.bf16.gmra.mxu1 %v16980_v15 }
 0xb43   :  { %6675 = vmatmul.bf16.gmra.mxu2 %v16981_v2 }
 0xb44   :  { %6754 = vmatmul.bf16.gmra.mxu3 %v14669_v42 }
 0xb46   :  { %v6636_v16 = vpop.f32.mrf.mxu2 }
 0xb47   :  { %v15475_v54 = vpop.f32.mrf.mxu3  ;;  %v6637_v17 = vadd.f32 %v6636_v16, %v6578_v19  ;;  %v6520_v36 = vpop.f32.mrf.mxu0  ;;  %v16987_v19 = vld [vmem:[#allocation59_spill] sm:$0xff] }
 0xb48   :  { %16982 = vst [vmem:[#allocation37_spill] sm:$0xff] %v15475_v54  ;;  %v6579_v25 = vpop.f32.mrf.mxu1  ;;  %v6521_v53 = vadd.f32 %v6520_v36, %v15306_v41  ;;  %v16986_v54 = vld [vmem:[#allocation36_spill] sm:$0xff] }
 0xb49   :  { %v15481_v4 = vmax.f32 %v16985_v48, %v6637_v17  ;;  %v16988_v16 = vmax.f32 %v16986_v54, %v16987_v19 }
 0xb4a   :  { %v6580_v38 = vadd.f32 %v6579_v25, %v6521_v53 }
 0xb4e   :  { %v6638_v59 = vpop.f32.mrf.mxu2 }
 0xb4f   :  { %v15483_v15 = vpop.f32.mrf.mxu3  ;;  %v6639_v2 = vadd.f32 %v6638_v59, %v6580_v38  ;;  %v6523_v12 = vpop.f32.mrf.mxu0 }
 0xb50   :  { %v6582_v6 = vpop.f32.mrf.mxu1  ;;  %v6524_v40 = vadd.f32 %v6523_v12, %v15317_v29 }
 0xb51   :  { %v15489_v0 = vmax.f32 %v16988_v16, %v6639_v2  ;;  %v16991_v2 = vld [vmem:[#allocation61_spill] sm:$0xff] }
 0xb52   :  { %v6583_v41 = vadd.f32 %v6582_v6, %v6524_v40  ;;  %6562 = vmatmul.bf16.gmra.mxu0 %v16954_v8  ;;  %6621 = vmatmul.bf16.gmra.mxu1 %v16989_v30  ;;  %v16992_v54 = vmax.f32 %v16956_v18, %v16991_v2 }
 0xb53   :  { %6680 = vmatmul.bf16.gmra.mxu2 %v16990_v46 }
 0xb54   :  { %6759 = vmatmul.bf16.gmra.mxu3 %v16939_v39 }
 0xb56   :  { %v6641_v17 = vpop.f32.mrf.mxu2 }
 0xb57   :  { %v15495_v36 = vpop.f32.mrf.mxu3  ;;  %v6642_v25 = vadd.f32 %v6641_v17, %v6583_v41  ;;  %v6525_v53 = vpop.f32.mrf.mxu0  ;;  %v16993_v41 = vmax.f32 %v15124_v61, %v15320_v44  ;;  %v16995_v61 = vld [vmem:[#allocation63_spill] sm:$0xff] }
 0xb58   :  { %v6584_v29 = vpop.f32.mrf.mxu1  ;;  %v6526_v12 = vadd.f32 %v6525_v53, %v15324_v33  ;;  %v16994_v53 = vld [vmem:[#allocation18_spill] sm:$0xff]  ;;  %v16996_v44 = vmax.f32 %v15129_v28, %v16995_v61 }
 0xb59   :  { %v15501_v40 = vmax.f32 %v16992_v54, %v6642_v25 }
 0xb5a   :  { %v6585_v6 = vadd.f32 %v6584_v29, %v6526_v12 }
 0xb5e   :  { %v6643_v48 = vpop.f32.mrf.mxu2 }
 0xb5f   :  { %v15503_v38 = vpop.f32.mrf.mxu3  ;;  %v6644_v59 = vadd.f32 %v6643_v48, %v6585_v6  ;;  %v6528_v19 = vpop.f32.mrf.mxu0 }
 0xb60   :  { %v6587_v16 = vpop.f32.mrf.mxu1  ;;  %v6529_v46 = vadd.f32 %v6528_v19, %v15335_v22 }
 0xb61   :  { %v15509_v17 = vmax.f32 %v16993_v41, %v6644_v59  ;;  %v16997_v41 = vmax.f32 %v15146_v45, %v15338_v10  ;;  %v16999_v45 = vld [vmem:[#allocation62_spill] sm:$0xff] }
 0xb62   :  { %v6588_v33 = vadd.f32 %v6587_v16, %v6529_v46  ;;  %6773 = vmatmul.bf16.vlgmr.msra.gmra.mxu0 %v16994_v53  ;;  %6832 = vmatmul.bf16.vlgmr.msra.gmra.mxu1 %v14517_v21  ;;  %v16998_v53 = vld [vmem:[#allocation7_spill] sm:$0xff]  ;;  %v17000_v10 = vmax.f32 %v15167_v47, %v16999_v45  ;;  %v17002_v47 = vld [vmem:[#allocation10_spill] sm:$0xff] }
 0xb63   :  { %6891 = vmatmul.bf16.vlgmr.msra.gmra.mxu2 %v16888_v32 }
 0xb64   :  { %6950 = vmatmul.bf16.vlgmr.msra.gmra.mxu3 %v14567_v57 }
 0xb66   :  { %v6646_v18 = vpop.f32.mrf.mxu2 }
 0xb67   :  { %v15515_v25 = vpop.f32.mrf.mxu3  ;;  %v6647_v29 = vadd.f32 %v6646_v18, %v6588_v33  ;;  %v6530_v12 = vpop.f32.mrf.mxu0 }
 0xb68   :  { %v6589_v22 = vpop.f32.mrf.mxu1  ;;  %v6531_v2 = vadd.f32 %v6530_v12, %v15342_v60 }
 0xb69   :  { %v15521_v46 = vmax.f32 %v16996_v44, %v6647_v29 }
 0xb6a   :  { %v6590_v54 = vadd.f32 %v6589_v22, %v6531_v2 }
 0xb6e   :  { %v6648_v6 = vpop.f32.mrf.mxu2 }
 0xb6f   :  { %v15523_v21 = vpop.f32.mrf.mxu3  ;;  %v6649_v48 = vadd.f32 %v6648_v6, %v6590_v54  ;;  %v6533_v59 = vpop.f32.mrf.mxu0 }
 0xb70   :  { %v6592_v19 = vpop.f32.mrf.mxu1  ;;  %v6534_v16 = vadd.f32 %v6533_v59, %v15353_v7 }
 0xb71   :  { %v15529_v33 = vmax.f32 %v16997_v41, %v6649_v48 }
 0xb72   :  { %v6593_v60 = vadd.f32 %v6592_v19, %v6534_v16  ;;  %6778 = vmatmul.bf16.gmra.mxu0 %v16998_v53  ;;  %6837 = vmatmul.bf16.gmra.mxu1 %v14533_v20  ;;  %v17001_v19 = vmax.f32 %v15188_v50, %v15356_v43  ;;  %v17003_v50 = vld [vmem:[#allocation6_spill] sm:$0xff] }
 0xb73   :  { %6896 = vmatmul.bf16.gmra.mxu2 %v16889_v23  ;;  %v17004_v43 = vmax.f32 %v15201_v58, %v17003_v50  ;;  %v17006_v58 = vld [vmem:[#allocation34_spill] sm:$0xff] }
 0xb74   :  { %6955 = vmatmul.bf16.gmra.mxu3 %v14597_v3 }
 0xb76   :  { %v6651_v28 = vpop.f32.mrf.mxu2 }
 0xb77   :  { %v15535_v18 = vpop.f32.mrf.mxu3  ;;  %v6652_v29 = vadd.f32 %v6651_v28, %v6593_v60  ;;  %v6535_v12 = vpop.f32.mrf.mxu0 }
 0xb78   :  { %v6594_v7 = vpop.f32.mrf.mxu1  ;;  %v6536_v22 = vadd.f32 %v6535_v12, %v15360_v5 }
 0xb79   :  { %v15541_v2 = vmax.f32 %v17000_v10, %v6652_v29 }
 0xb7a   :  { %v6595_v61 = vadd.f32 %v6594_v7, %v6536_v22 }
 0xb7e   :  { %v6653_v44 = vpop.f32.mrf.mxu2 }
 0xb7f   :  { %v15543_v20 = vpop.f32.mrf.mxu3  ;;  %v6654_v54 = vadd.f32 %v6653_v44, %v6595_v61  ;;  %v6538_v6 = vpop.f32.mrf.mxu0  ;;  %v17005_v44 = vmax.f32 %v15214_v35, %v15374_v52  ;;  %v17007_v35 = vld [vmem:[#allocation64_spill] sm:$0xff] }
 0xb80   :  { %v6597_v48 = vpop.f32.mrf.mxu1  ;;  %v6539_v59 = vadd.f32 %v6538_v6, %v15371_v31  ;;  %v17008_v52 = vmax.f32 %v15219_v11, %v17007_v35  ;;  %v17010_v11 = vld [vmem:[#allocation11_spill] sm:$0xff]  ;;  %v17013_v35 = vmax.f32 %v15242_v63, %v15410_v27 }
 0xb81   :  { %v15549_v16 = vmax.f32 %v17001_v19, %v6654_v54 }
 0xb82   :  { %v6598_v5 = vadd.f32 %v6597_v48, %v6539_v59  ;;  %6783 = vmatmul.bf16.gmra.mxu0 %v16888_v32  ;;  %6842 = vmatmul.bf16.gmra.mxu1 %v14567_v57 }
 0xb83   :  { %6901 = vmatmul.bf16.gmra.mxu2 %v17002_v47 }
 0xb84   :  { %6960 = vmatmul.bf16.gmra.mxu3 %v16928_v14 }
 0xb86   :  { %v6656_v41 = vpop.f32.mrf.mxu2 }
 0xb87   :  { %v15555_v60 = vpop.f32.mrf.mxu3  ;;  %v6657_v53 = vadd.f32 %v6656_v41, %v6598_v5  ;;  %v6540_v28 = vpop.f32.mrf.mxu0 }
 0xb88   :  { %v6599_v31 = vpop.f32.mrf.mxu1  ;;  %v6541_v29 = vadd.f32 %v6540_v28, %v15378_v51 }
 0xb89   :  { %v15561_v12 = vmax.f32 %v17004_v43, %v6657_v53  ;;  %v17009_v43 = vmax.f32 %v15228_v56, %v15392_v24 }
 0xb8a   :  { %v6600_v32 = vadd.f32 %v6599_v31, %v6541_v29 }
 0xb8e   :  { %v6658_v7 = vpop.f32.mrf.mxu2 }
 0xb8f   :  { %v15563_v57 = vpop.f32.mrf.mxu3  ;;  %v6659_v22 = vadd.f32 %v6658_v7, %v6600_v32  ;;  %v6543_v45 = vpop.f32.mrf.mxu0  ;;  %v9605_v7 = vld [vmem:[%s15936_s3 + $0x38] sm:$0xff] }
 0xb90   :  { %v6602_v10 = vpop.f32.mrf.mxu1  ;;  %v6544_v61 = vadd.f32 %v6543_v45, %v15389_v1  ;;  %7463 = vmatpush.bf16.msrb.mxu0 %v9605_v7 }
 0xb91   :  { %v15569_v54 = vmax.f32 %v17005_v44, %v6659_v22 }
 0xb92   :  { %v6603_v51 = vadd.f32 %v6602_v10, %v6544_v61  ;;  %6788 = vmatmul.bf16.gmra.mxu0 %v16889_v23  ;;  %6847 = vmatmul.bf16.gmra.mxu1 %v14597_v3 }
 0xb93   :  { %6906 = vmatmul.bf16.gmra.mxu2 %v17006_v58 }
 0xb94   :  { %6965 = vmatmul.bf16.gmra.mxu3 %v14639_v13 }
 0xb96   :  { %v6661_v6 = vpop.f32.mrf.mxu2 }
 0xb97   :  { %v15575_v48 = vpop.f32.mrf.mxu3  ;;  %v6662_v59 = vadd.f32 %v6661_v6, %v6603_v51  ;;  %v6545_v19 = vpop.f32.mrf.mxu0 }
 0xb98   :  { %v6604_v1 = vpop.f32.mrf.mxu1  ;;  %v6546_v5 = vadd.f32 %v6545_v19, %v15396_v49 }
 0xb99   :  { %v15581_v41 = vmax.f32 %v17008_v52, %v6662_v59 }
 0xb9a   :  { %v6605_v23 = vadd.f32 %v6604_v1, %v6546_v5 }
 0xb9e   :  { %v6663_v53 = vpop.f32.mrf.mxu2 }
 0xb9f   :  { %v15583_v3 = vpop.f32.mrf.mxu3  ;;  %v6664_v28 = vadd.f32 %v6663_v53, %v6605_v23  ;;  %v6548_v31 = vpop.f32.mrf.mxu0  ;;  %v17014_v23 = vld [vmem:[#allocation38_spill] sm:$0xff] }
 0xba0   :  { %v6607_v29 = vpop.f32.mrf.mxu1  ;;  %v6549_v50 = vadd.f32 %v6548_v31, %v15407_v34  ;;  %v17015_v31 = vld [vmem:[#allocation35_spill] sm:$0xff] }
 0xba1   :  { %v15589_v32 = vmax.f32 %v17009_v43, %v6664_v28  ;;  %v17017_v43 = vld [vmem:[#allocation67_spill] sm:$0xff] }
 0xba2   :  { %v6608_v49 = vadd.f32 %v6607_v29, %v6549_v50  ;;  %6793 = vmatmul.bf16.gmra.mxu0 %v17002_v47  ;;  %6852 = vmatmul.bf16.gmra.mxu1 %v16928_v14  ;;  %v17011_v47 = vld [vmem:[#allocation2_spill] sm:$0xff] }
 0xba3   :  { %6911 = vmatmul.bf16.gmra.mxu2 %v17010_v11  ;;  %v17012_v14 = vmax.f32 %v15233_v26, %v17011_v47  ;;  %v9629_v26 = vld [vmem:[%s15936_s3 + $0xf8] sm:$0xff]  ;;  %v17016_v50 = vld [vmem:[#allocation54_spill] sm:$0xff] }
 0xba4   :  { %6970 = vmatmul.bf16.gmra.mxu3 %v14669_v42 }
 0xba5   :  { %7520 = vmatpush.bf16.msrb.mxu3 %v9629_v26 }
 0xba6   :  { %v6666_v34 = vpop.f32.mrf.mxu2 }
 0xba7   :  { %v15598_v22 = vpop.f32.mrf.mxu3  ;;  %v6667_v56 = vadd.f32 %v6666_v34, %v6608_v49  ;;  %v6550_v24 = vpop.f32.mrf.mxu0  ;;  %v17018_v49 = vmax.f32 %v17016_v50, %v17017_v43  ;;  %v9621_v34 = vld [vmem:[%s15936_s3 + $0xb8] sm:$0xff]  ;;  %v9603_v43 = vld [vmem:[%s15936_s3 + $0x28] sm:$0xff] }
 0xba8   :  { %v6609_v45 = vpop.f32.mrf.mxu1  ;;  %v6551_v10 = vadd.f32 %v6550_v24, %v15414_v55  ;;  %7501 = vmatpush.bf16.msrb.mxu2 %v9621_v34  ;;  %v9602_v34 = vld [vmem:[%s15936_s3 + $0x20] sm:$0xff] }
 0xba9   :  { %v15604_v61 = vmax.f32 %v17012_v14, %v6667_v56 }
 0xbaa   :  { %v6610_v44 = vadd.f32 %v6609_v45, %v6551_v10 }
 0xbae   :  { %v6668_v51 = vpop.f32.mrf.mxu2 }
 0xbaf   :  { %v15606_v6 = vpop.f32.mrf.mxu3  ;;  %v6669_v59 = vadd.f32 %v6668_v51, %v6610_v44  ;;  %v6553_v19 = vpop.f32.mrf.mxu0  ;;  %v17019_v44 = vld [vmem:[#allocation42_spill] sm:$0xff] }
 0xbb0   :  { %v6612_v1 = vpop.f32.mrf.mxu1  ;;  %v6554_v5 = vadd.f32 %v6553_v19, %v15425_v37  ;;  %v17020_v51 = vld [vmem:[#allocation70_spill] sm:$0xff] }
 0xbb1   :  { %v15612_v52 = vmax.f32 %v17013_v35, %v6669_v59  ;;  %v17021_v59 = vmax.f32 %v17019_v44, %v17020_v51  ;;  %v17022_v35 = vld [vmem:[#allocation16_spill] sm:$0xff]  ;;  %v17028_v44 = vld [vmem:[#allocation45_spill] sm:$0xff]  ;;  %v17029_v51 = vld [vmem:[#allocation31_spill] sm:$0xff] }
 0xbb2   :  { %v6613_v55 = vadd.f32 %v6612_v1, %v6554_v5  ;;  %6798 = vmatmul.bf16.gmra.mxu0 %v17006_v58  ;;  %6857 = vmatmul.bf16.gmra.mxu1 %v14639_v13  ;;  %v9604_v13 = vld [vmem:[%s15936_s3 + $0x30] sm:$0xff]  ;;  %v9613_v1 = vld [vmem:[%s15936_s3 + $0x78] sm:$0xff] }
 0xbb3   :  { %6916 = vmatmul.bf16.gmra.mxu2 %v17014_v23  ;;  %7464 = vmatpush.bf16.msrb.mxu0 %v9604_v13 }
 0xbb4   :  { %6975 = vmatmul.bf16.gmra.mxu3 %v16939_v39  ;;  %7482 = vmatpush.bf16.msrb.mxu1 %v9613_v1 }
 0xbb6   :  { %v6671_v37 = vpop.f32.mrf.mxu2 }
 0xbb7   :  { %v15621_v53 = vpop.f32.mrf.mxu3  ;;  %v6672_v63 = vadd.f32 %v6671_v37, %v6613_v55  ;;  %v6555_v27 = vpop.f32.mrf.mxu0  ;;  %7465 = vmatpush.bf16.msrb.mxu0 %v9603_v43 }
 0xbb8   :  { %v6614_v28 = vpop.f32.mrf.mxu1  ;;  %v6556_v29 = vadd.f32 %v6555_v27, %v17015_v31  ;;  %v17024_v31 = vld [vmem:[#allocation51_spill] sm:$0xff] }
 0xbb9   :  { %v15627_v7 = vmax.f32 %v17018_v49, %v6672_v63 }
 0xbba   :  { %v6615_v58 = vadd.f32 %v6614_v28, %v6556_v29  ;;  %v17023_v28 = vld [vmem:[#allocation66_spill] sm:$0xff] }
 0xbbb   :  { %7466 = vmatpush.bf16.msrb.mxu0 %v9602_v34 }
 0xbbe   :  { %v6673_v56 = vpop.f32.mrf.mxu2 }
 0xbbf   :  { %v15635_v24 = vpop.f32.mrf.mxu3  ;;  %v6674_v45 = vadd.f32 %v6673_v56, %v6615_v58  ;;  %v6558_v10 = vpop.f32.mrf.mxu0 }
 0xbc0   :  { %v6617_v47 = vpop.f32.mrf.mxu1  ;;  %v6559_v14 = vadd.f32 %v6558_v10, %v15443_v62  ;;  %v9628_v62 = vld [vmem:[%s15936_s3 + $0xf0] sm:$0xff] }
 0xbc1   :  { %v15641_v19 = vmax.f32 %v17021_v59, %v6674_v45  ;;  %7521 = vmatpush.bf16.msrb.mxu3 %v9628_v62  ;;  %v17030_v59 = vmax.f32 %v17028_v44, %v17029_v51  ;;  %v9601_v62 = vld [vmem:[%s15936_s3 + $0x18] sm:$0xff] }
 0xbc2   :  { %v6618_v5 = vadd.f32 %v6617_v47, %v6559_v14  ;;  %6803 = vmatmul.bf16.gmra.mxu0 %v17010_v11  ;;  %6862 = vmatmul.bf16.gmra.mxu1 %v14669_v42  ;;  %v17025_v42 = vld [vmem:[#allocation27_spill] sm:$0xff]  ;;  %v17027_v47 = vld [vmem:[#allocation68_spill] sm:$0xff] }
 0xbc3   :  { %6921 = vmatmul.bf16.gmra.mxu2 %v17022_v35  ;;  %v17026_v29 = vmax.f32 %v17024_v31, %v17025_v42  ;;  %7467 = vmatpush.bf16.msrb.mxu0 %v9601_v62  ;;  %v17033_v42 = vld [vmem:[#allocation60_spill] sm:$0xff] }
 0xbc4   :  { %6980 = vmatmul.bf16.gmra.mxu3 %v16947_v9  ;;  %v17037_v62 = vld [vmem:[#allocation4_spill] sm:$0xff] }
 0xbc6   :  { %v6676_v26 = vpop.f32.mrf.mxu2 }
 0xbc7   :  { %v15653_v55 = vpop.f32.mrf.mxu3  ;;  %v6677_v37 = vadd.f32 %v6676_v26, %v6618_v5  ;;  %v6560_v63 = vpop.f32.mrf.mxu0  ;;  %v17031_v26 = vld [vmem:[#allocation17_spill] sm:$0xff] }
 0xbc8   :  { %v6619_v27 = vpop.f32.mrf.mxu1  ;;  %v6561_v11 = vadd.f32 %v6560_v63, %v17023_v28 }
 0xbc9   :  { %v15659_v50 = vmax.f32 %v17026_v29, %v6677_v37  ;;  %v17034_v29 = vld [vmem:[#allocation69_spill] sm:$0xff] }
 0xbca   :  { %v6620_v49 = vadd.f32 %v6619_v27, %v6561_v11  ;;  %v9600_v27 = vld [vmem:[%s15936_s3 + $0x10] sm:$0xff]  ;;  %v17035_v43 = vmax.f32 %v17033_v42, %v17034_v29 }
 0xbcb   :  { %7468 = vmatpush.bf16.msrb.mxu0 %v9600_v27 }
 0xbce   :  { %v6678_v58 = vpop.f32.mrf.mxu2 }
 0xbcf   :  { %v15664_v13 = vpop.f32.mrf.mxu3  ;;  %v6679_v56 = vadd.f32 %v6678_v58, %v6620_v49  ;;  %v6563_v45 = vpop.f32.mrf.mxu0  ;;  %v9599_v58 = vld [vmem:[%s15936_s3 + $0x8] sm:$0xff] }
 0xbd0   :  { %v6622_v10 = vpop.f32.mrf.mxu1  ;;  %v6564_v14 = vadd.f32 %v6563_v45, %v17027_v47  ;;  %7469 = vmatpush.bf16.msrb.mxu0 %v9599_v58  ;;  %v9612_v45 = vld [vmem:[%s15936_s3 + $0x70] sm:$0xff]  ;;  %v9611_v58 = vld [vmem:[%s15936_s3 + $0x68] sm:$0xff] }
 0xbd1   :  { %v15673_v1 = vmax.f32 %v17030_v59, %v6679_v56  ;;  %v9620_v56 = vld [vmem:[%s15936_s3 + $0xb0] sm:$0xff]  ;;  %7483 = vmatpush.bf16.msrb.mxu1 %v9612_v45 }
 0xbd2   :  { %v6623_v5 = vadd.f32 %v6622_v10, %v6564_v14  ;;  %6808 = vmatmul.bf16.gmra.mxu0 %v17014_v23  ;;  %6867 = vmatmul.bf16.gmra.mxu1 %v16939_v39  ;;  %v17032_v39 = vld [vmem:[#allocation71_spill] sm:$0xff]  ;;  %v9598_v14 = vld [vmem:[%s15936_s3] sm:$0xff] }
 0xbd3   :  { %6926 = vmatmul.bf16.gmra.mxu2 %v17031_v26 }
 0xbd4   :  { %6985 = vmatmul.bf16.gmra.mxu3 %v16954_v8  ;;  %7502 = vmatpush.bf16.msrb.mxu2 %v9620_v56 }
 0xbd5   :  { %7470 = vmatpush.bf16.msrb.mxu0 %v9598_v14  ;;  %7484 = vmatpush.bf16.msrb.mxu1 %v9611_v58  ;;  %v9610_v14 = vld [vmem:[%s15936_s3 + $0x60] sm:$0xff] }
 0xbd6   :  { %v6681_v37 = vpop.f32.mrf.mxu2  ;;  %v9626_v58 = vld [vmem:[%s15936_s3 + $0xe0] sm:$0xff] }
 0xbd7   :  { %v15682_v63 = vpop.f32.mrf.mxu3  ;;  %v6682_v28 = vadd.f32 %v6681_v37, %v6623_v5  ;;  %v6565_v23 = vpop.f32.mrf.mxu0  ;;  %v17036_v5 = vld [vmem:[#allocation65_spill] sm:$0xff] }
 0xbd8   :  { %v6624_v11 = vpop.f32.mrf.mxu1  ;;  %v6566_v31 = vadd.f32 %v6565_v23, %v17032_v39  ;;  %v17038_v37 = vmax.f32 %v17036_v5, %v17037_v62  ;;  %v17040_v39 = vld [vmem:[#allocation39_spill] sm:$0xff]  ;;  %v9609_v62 = vld [vmem:[%s15936_s3 + $0x58] sm:$0xff] }
 0xbd9   :  { %v15691_v49 = vmax.f32 %v17035_v43, %v6682_v28  ;;  %v17039_v28 = vld [vmem:[#allocation37_spill] sm:$0xff]  ;;  %7485 = vmatpush.bf16.msrb.mxu1 %v9610_v14 }
 0xbda   :  { %v6625_v34 = vadd.f32 %v6624_v11, %v6566_v31  ;;  %v9627_v11 = vld [vmem:[%s15936_s3 + $0xe8] sm:$0xff]  ;;  %v17041_v31 = vld [vmem:[#allocation26_spill] sm:$0xff] }
 0xbdb   :  { %7522 = vmatpush.bf16.msrb.mxu3 %v9627_v11 }
 0xbdd   :  { %7486 = vmatpush.bf16.msrb.mxu1 %v9609_v62 }
 0xbde   :  { %v6683_v10 = vpop.f32.mrf.mxu2 }
 0xbdf   :  { %v15702_v47 = vpop.f32.mrf.mxu3  ;;  %v6684_v44 = vadd.f32 %v6683_v10, %v6625_v34  ;;  %v6774_v51 = vpop.f32.mrf.mxu0  ;;  %7523 = vmatpush.bf16.msrb.mxu3 %v9626_v58 }
 0xbe0   :  { %v6833_v59 = vpop.f32.mrf.mxu1  ;;  %v6775_v23 = vadd.f32 %v6774_v51, %v17039_v28  ;;  %v15734_v51 = vld [vmem:[%s15934_s6 + $0x1] ss:$0 sm:$0xff] }
 0xbe1   :  { %v15710_v27 = vmax.f32 %v17038_v37, %v6684_v44 }
 0xbe2   :  { %6813 = vmatmul.bf16.gmra.mxu0 %v17022_v35  ;;  %6872 = vmatmul.bf16.gmra.mxu1 %v16947_v9  ;;  %v6834_v42 = vadd.f32 %v6833_v59, %v6775_v23  ;;  %v9619_v9 = vld [vmem:[%s15936_s3 + $0xa8] sm:$0xff] }
 0xbe3   :  { %6931 = vmatmul.bf16.gmra.mxu2 %v17040_v39 }
 0xbe4   :  { %6990 = vmatmul.bf16.gmra.mxu3 %v17041_v31  ;;  %7503 = vmatpush.bf16.msrb.mxu2 %v9619_v9  ;;  %v9608_v31 = vld [vmem:[%s15936_s3 + $0x50] sm:$0xff] }
 0xbe5   :  { %7487 = vmatpush.bf16.msrb.mxu1 %v9608_v31 }
 0xbe6   :  { %v6892_v29 = vpop.f32.mrf.mxu2 }
 0xbe7   :  { %v6951_v43 = vpop.f32.mrf.mxu3  ;;  %v6893_v34 = vadd.f32 %v6892_v29, %v6834_v42  ;;  %v6776_v56 = vpop.f32.mrf.mxu0 }
 0xbe8   :  { %v6835_v45 = vpop.f32.mrf.mxu1  ;;  %v6777_v35 = vadd.f32 %v6776_v56, %v15483_v15  ;;  %v9607_v56 = vld [vmem:[%s15936_s3 + $0x48] sm:$0xff] }
 0xbe9   :  { %v6952_v10 = vadd.f32 %v6951_v43, %v6893_v34  ;;  %v17042_v43 = vld [vmem:[#allocation20_spill] sm:$0xff]  ;;  %7488 = vmatpush.bf16.msrb.mxu1 %v9607_v56 }
 0xbea   :  { %v6836_v59 = vadd.f32 %v6835_v45, %v6777_v35 }
 0xbeb   :  { %v7001_v44 = vmax.f32 %v15481_v4, %v6952_v10 }
 0xbed   :  { %v7022_v37 = vadd.f32 %v15734_v51, %v7001_v44 }
 0xbee   :  { %v6894_v5 = vpop.f32.mrf.mxu2 }
 0xbef   :  { %v6953_v15 = vpop.f32.mrf.mxu3  ;;  %v6895_v28 = vadd.f32 %v6894_v5, %v6836_v59  ;;  %v6779_v23 = vpop.f32.mrf.mxu0  ;;  %v7042_v42 = vmax.f32 %v7022_v37, 0.0  ;;  %v9606_v59 = vld [vmem:[%s15936_s3 + $0x40] sm:$0xff] }
 0xbf0   :  { %v6838_v11 = vpop.f32.mrf.mxu1  ;;  %v6780_v39 = vadd.f32 %v6779_v23, %v15495_v36  ;;  %7489 = vmatpush.bf16.msrb.mxu1 %v9606_v59 }
 0xbf1   :  { %v6954_v4 = vadd.f32 %v6953_v15, %v6895_v28 }
 0xbf2   :  { %6818 = vmatmul.bf16.gmra.mxu0 %v17031_v26  ;;  %6877 = vmatmul.bf16.gmra.mxu1 %v16954_v8  ;;  %v6839_v26 = vadd.f32 %v6838_v11, %v6780_v39 }
 0xbf3   :  { %v7002_v29 = vmax.f32 %v15489_v0, %v6954_v4  ;;  %6936 = vmatmul.bf16.gmra.mxu2 %v16989_v30  ;;  %v7062_v0 = vpack.c.bf16 %v7042_v42, %v7042_v42 }
 0xbf4   :  { %6995 = vmatmul.bf16.gmra.mxu3 %v17042_v43  ;;  %v9618_v43 = vld [vmem:[%s15936_s3 + $0xa0] sm:$0xff] }
 0xbf5   :  { %v7023_v36 = vadd.f32 %v15734_v51, %v7002_v29  ;;  %v7086_v5 = vunpack.c.l.b16 %v7062_v0  ;;  %7504 = vmatpush.bf16.msrb.mxu2 %v9618_v43 }
 0xbf6   :  { %v6897_v8 = vpop.f32.mrf.mxu2 }
 0xbf7   :  { %v6956_v34 = vpop.f32.mrf.mxu3  ;;  %v7043_v45 = vmax.f32 %v7023_v36, 0.0  ;;  %v6898_v30 = vadd.f32 %v6897_v8, %v6839_v26  ;;  %v6781_v10 = vpop.f32.mrf.mxu0 }
 0xbf8   :  { %v6840_v35 = vpop.f32.mrf.mxu1  ;;  %v6782_v44 = vadd.f32 %v6781_v10, %v15503_v38 }
 0xbf9   :  { %v7063_v9 = vpack.c.bf16 %v7043_v45, %v7043_v45  ;;  %v6957_v14 = vadd.f32 %v6956_v34, %v6898_v30 }
 0xbfa   :  { %v6841_v28 = vadd.f32 %v6840_v35, %v6782_v44 }
 0xbfb   :  { %v7087_v15 = vunpack.c.l.b16 %v7063_v9  ;;  %v7003_v62 = vmax.f32 %v15501_v40, %v6957_v14  ;;  %v9625_v14 = vld [vmem:[%s15936_s3 + $0xd8] sm:$0xff] }
 0xbfc   :  { %7524 = vmatpush.bf16.msrb.mxu3 %v9625_v14 }
 0xbfd   :  { %v7090_v37 = vpack.c.b16 %v7087_v15, %v7086_v5  ;;  %v7024_v4 = vadd.f32 %v15734_v51, %v7003_v62 }
 0xbfe   :  { %v6899_v23 = vpop.f32.mrf.mxu2 }
 0xbff   :  { %v6958_v11 = vpop.f32.mrf.mxu3  ;;  %v6900_v39 = vadd.f32 %v6899_v23, %v6841_v28  ;;  %v6784_v31 = vpop.f32.mrf.mxu0  ;;  %v7044_v58 = vmax.f32 %v7024_v4, 0.0  ;;  %v9617_v28 = vld [vmem:[%s15936_s3 + $0x98] sm:$0xff] }
 0xc00   :  { %v6843_v42 = vpop.f32.mrf.mxu1  ;;  %v6785_v38 = vadd.f32 %v6784_v31, %v15515_v25  ;;  %7505 = vmatpush.bf16.msrb.mxu2 %v9617_v28  ;;  %v9616_v31 = vld [vmem:[%s15936_s3 + $0x90] sm:$0xff] }
 0xc01   :  { %v6959_v29 = vadd.f32 %v6958_v11, %v6900_v39  ;;  %v7064_v56 = vpack.c.bf16 %v7044_v58, %v7044_v58 }
 0xc02   :  { %7471 = vmatmul.bf16.vlgmr.msrb.gmra.mxu0 %v7090_v37  ;;  %v6844_v26 = vadd.f32 %v6843_v42, %v6785_v38 }
 0xc03   :  { %v7004_v40 = vmax.f32 %v15509_v17, %v6959_v29  ;;  %v7088_v44 = vunpack.c.l.b16 %v7064_v56 }
 0xc04   :  { %7506 = vmatpush.bf16.msrb.mxu2 %v9616_v31 }
 0xc05   :  { %v7025_v36 = vadd.f32 %v15734_v51, %v7004_v40 }
 0xc06   :  { %v6902_v8 = vpop.f32.mrf.mxu2 }
 0xc07   :  { %v6961_v34 = vpop.f32.mrf.mxu3  ;;  %v7045_v0 = vmax.f32 %v7025_v36, 0.0  ;;  %v6903_v45 = vadd.f32 %v6902_v8, %v6844_v26  ;;  %v6786_v30 = vpop.f32.mrf.mxu0  ;;  %v9615_v36 = vld [vmem:[%s15936_s3 + $0x88] sm:$0xff] }
 0xc08   :  { %v6845_v10 = vpop.f32.mrf.mxu1  ;;  %v6787_v9 = vadd.f32 %v6786_v30, %v15523_v21  ;;  %7507 = vmatpush.bf16.msrb.mxu2 %v9615_v36  ;;  %v9614_v30 = vld [vmem:[%s15936_s3 + $0x80] sm:$0xff] }
 0xc09   :  { %v7065_v25 = vpack.c.bf16 %v7045_v0, %v7045_v0  ;;  %v6962_v35 = vadd.f32 %v6961_v34, %v6903_v45 }
 0xc0a   :  { %v6846_v5 = vadd.f32 %v6845_v10, %v6787_v9 }
 0xc0b   :  { %v7005_v17 = vmax.f32 %v15521_v46, %v6962_v35  ;;  %v7089_v59 = vunpack.c.l.b16 %v7065_v25 }
 0xc0c   :  { %7508 = vmatpush.bf16.msrb.mxu2 %v9614_v30 }
 0xc0d   :  { %v7091_v15 = vpack.c.b16 %v7089_v59, %v7088_v44  ;;  %v7026_v23 = vadd.f32 %v15734_v51, %v7005_v17  ;;  %v9624_v17 = vld [vmem:[%s15936_s3 + $0xd0] sm:$0xff] }
 0xc0e   :  { %v6904_v62 = vpop.f32.mrf.mxu2  ;;  %7525 = vmatpush.bf16.msrb.mxu3 %v9624_v17 }
 0xc0f   :  { %v6963_v37 = vpop.f32.mrf.mxu3  ;;  %v6905_v21 = vadd.f32 %v6904_v62, %v6846_v5  ;;  %v6789_v11 = vpop.f32.mrf.mxu0  ;;  %v7046_v42 = vmax.f32 %v7026_v23, 0.0 }
 0xc10   :  { %v6848_v4 = vpop.f32.mrf.mxu1  ;;  %v6790_v46 = vadd.f32 %v6789_v11, %v15535_v18 }
 0xc11   :  { %v6964_v39 = vadd.f32 %v6963_v37, %v6905_v21  ;;  %v7066_v26 = vpack.c.bf16 %v7046_v42, %v7046_v42 }
 0xc12   :  { %7476 = vmatmul.bf16.gmra.mxu0 %v7091_v15  ;;  %v6849_v43 = vadd.f32 %v6848_v4, %v6790_v46 }
 0xc13   :  { %v7006_v29 = vmax.f32 %v15529_v33, %v6964_v39  ;;  %v7098_v10 = vunpack.c.l.b16 %v7066_v26 }
 0xc15   :  { %v7027_v38 = vadd.f32 %v15734_v51, %v7006_v29 }
 0xc16   :  { %v6907_v58 = vpop.f32.mrf.mxu2 }
 0xc17   :  { %v6966_v40 = vpop.f32.mrf.mxu3  ;;  %v7047_v18 = vmax.f32 %v7027_v38, 0.0  ;;  %v6908_v8 = vadd.f32 %v6907_v58, %v6849_v43  ;;  %v6791_v34 = vpop.f32.mrf.mxu0 }
 0xc18   :  { %v6850_v56 = vpop.f32.mrf.mxu1  ;;  %v6792_v33 = vadd.f32 %v6791_v34, %v15543_v20 }
 0xc19   :  { %v7067_v0 = vpack.c.bf16 %v7047_v18, %v7047_v18  ;;  %v6967_v45 = vadd.f32 %v6966_v40, %v6908_v8 }
 0xc1a   :  { %v6851_v14 = vadd.f32 %v6850_v56, %v6792_v33 }
 0xc1b   :  { %v7099_v25 = vunpack.c.l.b16 %v7067_v0  ;;  %v7007_v35 = vmax.f32 %v15541_v2, %v6967_v45 }
 0xc1d   :  { %v7102_v9 = vpack.c.b16 %v7099_v25, %v7098_v10  ;;  %v7028_v5 = vadd.f32 %v15734_v51, %v7007_v35 }
 0xc1e   :  { %v6909_v44 = vpop.f32.mrf.mxu2 }
 0xc1f   :  { %v6968_v59 = vpop.f32.mrf.mxu3  ;;  %v6910_v20 = vadd.f32 %v6909_v44, %v6851_v14  ;;  %7490 = vmatmul.bf16.vlgmr.msrb.gmra.mxu1 %v7102_v9  ;;  %v6794_v15 = vpop.f32.mrf.mxu0  ;;  %v7048_v2 = vmax.f32 %v7028_v5, 0.0 }
 0xc20   :  { %v6853_v62 = vpop.f32.mrf.mxu1  ;;  %v6795_v28 = vadd.f32 %v6794_v15, %v15555_v60 }
 0xc21   :  { %v6969_v37 = vadd.f32 %v6968_v59, %v6910_v20  ;;  %v7068_v46 = vpack.c.bf16 %v7048_v2, %v7048_v2 }
 0xc22   :  { %v6854_v11 = vadd.f32 %v6853_v62, %v6795_v28 }
 0xc23   :  { %v7008_v23 = vmax.f32 %v15549_v16, %v6969_v37  ;;  %v7100_v60 = vunpack.c.l.b16 %v7068_v46  ;;  %v9637_v46 = vld [vmem:[%s15936_s3 + $0x138] sm:$0xff] }
 0xc24   :  { %7539 = vmatpush.bf16.msra.mxu0 %v9637_v46 }
 0xc25   :  { %v7029_v21 = vadd.f32 %v15734_v51, %v7008_v23 }
 0xc26   :  { %v6912_v4 = vpop.f32.mrf.mxu2 }
 0xc27   :  { %v6971_v39 = vpop.f32.mrf.mxu3  ;;  %v7049_v31 = vmax.f32 %v7029_v21, 0.0  ;;  %v6913_v42 = vadd.f32 %v6912_v4, %v6854_v11  ;;  %v6796_v29 = vpop.f32.mrf.mxu0 }
 0xc28   :  { %v6855_v38 = vpop.f32.mrf.mxu1  ;;  %v6797_v40 = vadd.f32 %v6796_v29, %v15563_v57 }
 0xc29   :  { %v7069_v43 = vpack.c.bf16 %v7049_v31, %v7049_v31  ;;  %v6972_v58 = vadd.f32 %v6971_v39, %v6913_v42 }
 0xc2a   :  { %v6856_v18 = vadd.f32 %v6855_v38, %v6797_v40 }
 0xc2b   :  { %v7009_v36 = vmax.f32 %v15561_v12, %v6972_v58  ;;  %v7101_v26 = vunpack.c.l.b16 %v7069_v43  ;;  %v9623_v12 = vld [vmem:[%s15936_s3 + $0xc8] sm:$0xff]  ;;  %v9636_v43 = vld [vmem:[%s15936_s3 + $0x130] sm:$0xff] }
 0xc2c   :  { %7526 = vmatpush.bf16.msrb.mxu3 %v9623_v12  ;;  %7540 = vmatpush.bf16.msra.mxu0 %v9636_v43 }
 0xc2d   :  { %v7103_v16 = vpack.c.b16 %v7101_v26, %v7100_v60  ;;  %v7030_v56 = vadd.f32 %v15734_v51, %v7009_v36 }
 0xc2e   :  { %v6914_v8 = vpop.f32.mrf.mxu2 }
 0xc2f   :  { %v6973_v34 = vpop.f32.mrf.mxu3  ;;  %v6915_v0 = vadd.f32 %v6914_v8, %v6856_v18  ;;  %7495 = vmatmul.bf16.gmra.mxu1 %v7103_v16  ;;  %v6799_v45 = vpop.f32.mrf.mxu0  ;;  %v7050_v25 = vmax.f32 %v7030_v56, 0.0  ;;  %v9635_v16 = vld [vmem:[%s15936_s3 + $0x128] sm:$0xff] }
 0xc30   :  { %v6858_v33 = vpop.f32.mrf.mxu1  ;;  %v6800_v10 = vadd.f32 %v6799_v45, %v15575_v48  ;;  %7541 = vmatpush.bf16.msra.mxu0 %v9635_v16 }
 0xc31   :  { %v6974_v30 = vadd.f32 %v6973_v34, %v6915_v0  ;;  %v7070_v44 = vpack.c.bf16 %v7050_v25, %v7050_v25 }
 0xc32   :  { %v6859_v9 = vadd.f32 %v6858_v33, %v6800_v10 }
 0xc33   :  { %v7010_v57 = vmax.f32 %v15569_v54, %v6974_v30  ;;  %v9622_v54 = vld [vmem:[%s15936_s3 + $0xc0] sm:$0xff]  ;;  %v7110_v28 = vunpack.c.l.b16 %v7070_v44 }
 0xc34   :  { %7527 = vmatpush.bf16.msrb.mxu3 %v9622_v54  ;;  %v9634_v30 = vld [vmem:[%s15936_s3 + $0x120] sm:$0xff] }
 0xc35   :  { %v7031_v35 = vadd.f32 %v15734_v51, %v7010_v57  ;;  %7542 = vmatpush.bf16.msra.mxu0 %v9634_v30 }
 0xc36   :  { %v6917_v14 = vpop.f32.mrf.mxu2 }
 0xc37   :  { %v6976_v17 = vpop.f32.mrf.mxu3  ;;  %v7051_v59 = vmax.f32 %v7031_v35, 0.0  ;;  %v6918_v5 = vadd.f32 %v6917_v14, %v6859_v9  ;;  %v6801_v20 = vpop.f32.mrf.mxu0 }
 0xc38   :  { %v6860_v15 = vpop.f32.mrf.mxu1  ;;  %v6802_v37 = vadd.f32 %v6801_v20, %v15583_v3  ;;  %9654 = vmatpush.bf16.msra.mxu3 %v9637_v46 }
 0xc39   :  { %v7071_v62 = vpack.c.bf16 %v7051_v59, %v7051_v59  ;;  %v6977_v48 = vadd.f32 %v6976_v17, %v6918_v5  ;;  %v9633_v17 = vld [vmem:[%s15936_s3 + $0x118] sm:$0xff] }
 0xc3a   :  { %v6861_v11 = vadd.f32 %v6860_v15, %v6802_v37  ;;  %7543 = vmatpush.bf16.msra.mxu0 %v9633_v17  ;;  %v9632_v15 = vld [vmem:[%s15936_s3 + $0x110] sm:$0xff] }
 0xc3b   :  { %v7111_v2 = vunpack.c.l.b16 %v7071_v62  ;;  %v7011_v23 = vmax.f32 %v15581_v41, %v6977_v48 }
 0xc3c   :  { %9655 = vmatpush.bf16.msra.mxu3 %v9636_v43 }
 0xc3d   :  { %v7114_v21 = vpack.c.b16 %v7111_v2, %v7110_v28  ;;  %v7032_v31 = vadd.f32 %v15734_v51, %v7011_v23  ;;  %v9631_v23 = vld [vmem:[%s15936_s3 + $0x108] sm:$0xff] }
 0xc3e   :  { %v6919_v4 = vpop.f32.mrf.mxu2  ;;  %7544 = vmatpush.bf16.msra.mxu0 %v9632_v15 }
 0xc3f   :  { %v6978_v39 = vpop.f32.mrf.mxu3  ;;  %v6920_v3 = vadd.f32 %v6919_v4, %v6861_v11  ;;  %7509 = vmatmul.bf16.vlgmr.msrb.gmra.mxu2 %v7114_v21  ;;  %v6804_v42 = vpop.f32.mrf.mxu0  ;;  %v7052_v58 = vmax.f32 %v7032_v31, 0.0 }
 0xc40   :  { %v6863_v29 = vpop.f32.mrf.mxu1  ;;  %v6805_v41 = vadd.f32 %v6804_v42, %v15598_v22  ;;  %9656 = vmatpush.bf16.msra.mxu3 %v9635_v16 }
 0xc41   :  { %v6979_v38 = vadd.f32 %v6978_v39, %v6920_v3  ;;  %v7072_v8 = vpack.c.bf16 %v7052_v58, %v7052_v58  ;;  %v9630_v3 = vld [vmem:[%s15936_s3 + $0x100] sm:$0xff] }
 0xc42   :  { %v6864_v60 = vadd.f32 %v6863_v29, %v6805_v41  ;;  %7545 = vmatpush.bf16.msra.mxu0 %v9631_v23 }
 0xc43   :  { %v7012_v40 = vmax.f32 %v15589_v32, %v6979_v38  ;;  %v7112_v25 = vunpack.c.l.b16 %v7072_v8 }
 0xc44   :  { %9657 = vmatpush.bf16.msra.mxu3 %v9634_v30 }
 0xc45   :  { %v7033_v36 = vadd.f32 %v15734_v51, %v7012_v40 }
 0xc46   :  { %v6922_v26 = vpop.f32.mrf.mxu2  ;;  %7546 = vmatpush.bf16.msra.mxu0 %v9630_v3 }
 0xc47   :  { %v6981_v18 = vpop.f32.mrf.mxu3  ;;  %v7053_v22 = vmax.f32 %v7033_v36, 0.0  ;;  %v6923_v34 = vadd.f32 %v6922_v26, %v6864_v60  ;;  %v6806_v56 = vpop.f32.mrf.mxu0 }
 0xc48   :  { %v6865_v0 = vpop.f32.mrf.mxu1  ;;  %v6807_v33 = vadd.f32 %v6806_v56, %v15606_v6  ;;  %9658 = vmatpush.bf16.msra.mxu3 %v9633_v17 }
 0xc49   :  { %v7073_v45 = vpack.c.bf16 %v7053_v22, %v7053_v22  ;;  %v6982_v32 = vadd.f32 %v6981_v18, %v6923_v34 }
 0xc4a   :  { %v6866_v12 = vadd.f32 %v6865_v0, %v6807_v33 }
 0xc4b   :  { %v7013_v10 = vmax.f32 %v15604_v61, %v6982_v32  ;;  %v7113_v57 = vunpack.c.l.b16 %v7073_v45 }
 0xc4c   :  { %9659 = vmatpush.bf16.msra.mxu3 %v9632_v15 }
 0xc4d   :  { %v7115_v35 = vpack.c.b16 %v7113_v57, %v7112_v25  ;;  %v7034_v6 = vadd.f32 %v15734_v51, %v7013_v10 }
 0xc4e   :  { %v6924_v9 = vpop.f32.mrf.mxu2 }
 0xc4f   :  { %v6983_v14 = vpop.f32.mrf.mxu3  ;;  %v6925_v44 = vadd.f32 %v6924_v9, %v6866_v12  ;;  %7514 = vmatmul.bf16.gmra.mxu2 %v7115_v35  ;;  %v6809_v59 = vpop.f32.mrf.mxu0  ;;  %v7054_v62 = vmax.f32 %v7034_v6, 0.0 }
 0xc50   :  { %v6868_v5 = vpop.f32.mrf.mxu1  ;;  %v6810_v20 = vadd.f32 %v6809_v59, %v15621_v53  ;;  %9660 = vmatpush.bf16.msra.mxu3 %v9631_v23 }
 0xc51   :  { %v6984_v61 = vadd.f32 %v6983_v14, %v6925_v44  ;;  %v7074_v21 = vpack.c.bf16 %v7054_v62, %v7054_v62 }
 0xc52   :  { %v6869_v54 = vadd.f32 %v6868_v5, %v6810_v20 }
 0xc53   :  { %v7014_v48 = vmax.f32 %v15612_v52, %v6984_v61  ;;  %v7122_v42 = vunpack.c.l.b16 %v7074_v21 }
 0xc54   :  { %9661 = vmatpush.bf16.msra.mxu3 %v9630_v3 }
 0xc55   :  { %v7035_v37 = vadd.f32 %v15734_v51, %v7014_v48 }
 0xc56   :  { %v6927_v28 = vpop.f32.mrf.mxu2 }
 0xc57   :  { %v6986_v2 = vpop.f32.mrf.mxu3  ;;  %v7055_v53 = vmax.f32 %v7035_v37, 0.0  ;;  %v6928_v11 = vadd.f32 %v6927_v28, %v6869_v54  ;;  %v6811_v4 = vpop.f32.mrf.mxu0 }
 0xc58   :  { %v6870_v39 = vpop.f32.mrf.mxu1  ;;  %v6812_v31 = vadd.f32 %v6811_v4, %v15635_v24 }
 0xc59   :  { %v7075_v46 = vpack.c.bf16 %v7055_v53, %v7055_v53  ;;  %v6987_v52 = vadd.f32 %v6986_v2, %v6928_v11 }
 0xc5a   :  { %v6871_v43 = vadd.f32 %v6870_v39, %v6812_v31 }
 0xc5b   :  { %v7123_v29 = vunpack.c.l.b16 %v7075_v46  ;;  %v7015_v38 = vmax.f32 %v15627_v7, %v6987_v52 }
 0xc5d   :  { %v7126_v41 = vpack.c.b16 %v7123_v29, %v7122_v42  ;;  %v7036_v36 = vadd.f32 %v15734_v51, %v7015_v38 }
 0xc5e   :  { %v6929_v58 = vpop.f32.mrf.mxu2 }
 0xc5f   :  { %v6988_v40 = vpop.f32.mrf.mxu3  ;;  %v6930_v60 = vadd.f32 %v6929_v58, %v6871_v43  ;;  %7528 = vmatmul.bf16.vlgmr.msrb.gmra.mxu3 %v7126_v41  ;;  %v6814_v26 = vpop.f32.mrf.mxu0  ;;  %v7056_v8 = vmax.f32 %v7036_v36, 0.0 }
 0xc60   :  { %v6873_v24 = vpop.f32.mrf.mxu1  ;;  %v6815_v16 = vadd.f32 %v6814_v26, %v15653_v55 }
 0xc61   :  { %v6989_v18 = vadd.f32 %v6988_v40, %v6930_v60  ;;  %v7076_v45 = vpack.c.bf16 %v7056_v8, %v7056_v8 }
 0xc62   :  { %v6874_v34 = vadd.f32 %v6873_v24, %v6815_v16  ;;  %v9644_v16 = vld [vmem:[%s15937_s4 + $0x30] sm:$0xff] }
 0xc63   :  { %v7016_v22 = vmax.f32 %v15641_v19, %v6989_v18  ;;  %v7124_v55 = vunpack.c.l.b16 %v7076_v45  ;;  %v9645_v18 = vld [vmem:[%s15937_s4 + $0x38] sm:$0xff] }
 0xc64   :  { %7629 = vmatpush.bf16.msra.mxu1 %v9645_v18  ;;  %v9665_v18 = vld [vmem:[%s15934_s6 + $0x3] ss:$0 sm:$0xff] }
 0xc65   :  { %v7037_v7 = vadd.f32 %v15734_v51, %v7016_v22  ;;  %v9641_v22 = vld [vmem:[%s15937_s4 + $0x18] sm:$0xff] }
 0xc66   :  { %v6932_v56 = vpop.f32.mrf.mxu2 }
 0xc67   :  { %v6991_v0 = vpop.f32.mrf.mxu3  ;;  %v7057_v32 = vmax.f32 %v7037_v7, 0.0  ;;  %v6933_v33 = vadd.f32 %v6932_v56, %v6874_v34  ;;  %v6816_v30 = vpop.f32.mrf.mxu0  ;;  %v9640_v7 = vld [vmem:[%s15937_s4 + $0x10] sm:$0xff]  ;;  %v9639_v56 = vld [vmem:[%s15937_s4 + $0x8] sm:$0xff] }
 0xc68   :  { %v6875_v10 = vpop.f32.mrf.mxu1  ;;  %v6817_v12 = vadd.f32 %v6816_v30, %v15664_v13  ;;  %7630 = vmatpush.bf16.msra.mxu1 %v9644_v16 }
 0xc69   :  { %v7077_v25 = vpack.c.bf16 %v7057_v32, %v7057_v32  ;;  %v6992_v57 = vadd.f32 %v6991_v0, %v6933_v33  ;;  %v9638_v0 = vld [vmem:[%s15937_s4] sm:$0xff] }
 0xc6a   :  { %v6876_v14 = vadd.f32 %v6875_v10, %v6817_v12 }
 0xc6b   :  { %v7017_v35 = vmax.f32 %v15659_v50, %v6992_v57  ;;  %v7125_v9 = vunpack.c.l.b16 %v7077_v25  ;;  %v9664_v57 = vld [vmem:[%s15934_s6 + $0x2] ss:$0 sm:$0xff] }
 0xc6d   :  { %v7127_v19 = vpack.c.b16 %v7125_v9, %v7124_v55  ;;  %v7038_v44 = vadd.f32 %v15734_v51, %v7017_v35 }
 0xc6e   :  { %v6934_v17 = vpop.f32.mrf.mxu2 }
 0xc6f   :  { %v6993_v6 = vpop.f32.mrf.mxu3  ;;  %v6935_v59 = vadd.f32 %v6934_v17, %v6876_v14  ;;  %7533 = vmatmul.bf16.gmra.mxu3 %v7127_v19  ;;  %v6819_v5 = vpop.f32.mrf.mxu0  ;;  %v7058_v62 = vmax.f32 %v7038_v44, 0.0 }
 0xc70   :  { %v6820_v20 = vadd.f32 %v6819_v5, %v15682_v63  ;;  %v6878_v15 = vpop.f32.mrf.mxu1 }
 0xc71   :  { %v6994_v61 = vadd.f32 %v6993_v6, %v6935_v59  ;;  %v7078_v28 = vpack.c.bf16 %v7058_v62, %v7058_v62  ;;  %v9652_v62 = vld [vmem:[%s15938_s5 + $0x30] sm:$0xff] }
 0xc72   :  { %v6879_v48 = vadd.f32 %v6878_v15, %v6820_v20 }
 0xc73   :  { %v7018_v13 = vmax.f32 %v15673_v1, %v6994_v61  ;;  %v7134_v39 = vunpack.c.l.b16 %v7078_v28  ;;  %v9653_v61 = vld [vmem:[%s15938_s5 + $0x38] sm:$0xff] }
 0xc74   :  { %7719 = vmatpush.bf16.msra.mxu2 %v9653_v61 }
 0xc75   :  { %v7039_v50 = vadd.f32 %v15734_v51, %v7018_v13 }
 0xc76   :  { %v6937_v37 = vpop.f32.mrf.mxu2 }
 0xc77   :  { %v6996_v54 = vpop.f32.mrf.mxu3  ;;  %v7059_v2 = vmax.f32 %v7039_v50, 0.0  ;;  %v6938_v23 = vadd.f32 %v6937_v37, %v6879_v48  ;;  %v6821_v21 = vpop.f32.mrf.mxu0 }
 0xc78   :  { %v6822_v4 = vadd.f32 %v6821_v21, %v15702_v47  ;;  %v6880_v52 = vpop.f32.mrf.mxu1  ;;  %7720 = vmatpush.bf16.msra.mxu2 %v9652_v62 }
 0xc79   :  { %v7079_v53 = vpack.c.bf16 %v7059_v2, %v7059_v2  ;;  %v6997_v11 = vadd.f32 %v6996_v54, %v6938_v23  ;;  %v9651_v54 = vld [vmem:[%s15938_s5 + $0x28] sm:$0xff] }
 0xc7a   :  { %v6881_v1 = vadd.f32 %v6880_v52, %v6822_v4 }
 0xc7b   :  { %v7135_v46 = vunpack.c.l.b16 %v7079_v53  ;;  %v7019_v63 = vmax.f32 %v15691_v49, %v6997_v11  ;;  %v9650_v53 = vld [vmem:[%s15938_s5 + $0x20] sm:$0xff] }
 0xc7c   :  { %7721 = vmatpush.bf16.msra.mxu2 %v9651_v54 }
 0xc7d   :  { %v7138_v31 = vpack.c.b16 %v7135_v46, %v7134_v39  ;;  %v7040_v42 = vadd.f32 %v15734_v51, %v7019_v63 }
 0xc7e   :  { %v6939_v3 = vpop.f32.mrf.mxu2 }
 0xc7f   :  { %v6940_v29 = vadd.f32 %v6939_v3, %v6881_v1  ;;  %7547 = vmatmul.bf16.vlgmr.msra.gmra.mxu0 %v7138_v31  ;;  %v6998_v38 = vpop.f32.mrf.mxu3  ;;  %v7060_v43 = vmax.f32 %v7040_v42, 0.0  ;;  %v7472_v8 = vpop.f32.mrf.mxu0 }
 0xc80   :  { %v7473_v12 = vadd.f32 %v9664_v57, %v7472_v8  ;;  %7722 = vmatpush.bf16.msra.mxu2 %v9650_v53 }
 0xc81   :  { %v6999_v41 = vadd.f32 %v6998_v38, %v6940_v29  ;;  %v7080_v47 = vpack.c.bf16 %v7060_v43, %v7060_v43 }
 0xc83   :  { %v7020_v58 = vmax.f32 %v15710_v27, %v6999_v41  ;;  %v7136_v26 = vunpack.c.l.b16 %v7080_v47  ;;  %v9643_v27 = vld [vmem:[%s15937_s4 + $0x28] sm:$0xff] }
 0xc84   :  { %7631 = vmatpush.bf16.msra.mxu1 %v9643_v27 }
 0xc85   :  { %v7041_v40 = vadd.f32 %v15734_v51, %v7020_v58  ;;  %v9642_v51 = vld [vmem:[%s15937_s4 + $0x20] sm:$0xff] }
 0xc87   :  { %v7061_v36 = vmax.f32 %v7041_v40, 0.0  ;;  %v7474_v34 = vpop.f32.mrf.mxu0 }
 0xc88   :  { %7632 = vmatpush.bf16.msra.mxu1 %v9642_v51  ;;  %v7475_v9 = vadd.f32 %v9664_v57, %v7474_v34 }
 0xc89   :  { %v7081_v60 = vpack.c.bf16 %v7061_v36, %v7061_v36  ;;  %v9649_v36 = vld [vmem:[%s15938_s5 + $0x18] sm:$0xff] }
 0xc8a   :  { %7723 = vmatpush.bf16.msra.mxu2 %v9649_v36 }
 0xc8b   :  { %v7137_v49 = vunpack.c.l.b16 %v7081_v60  ;;  %v9648_v60 = vld [vmem:[%s15938_s5 + $0x10] sm:$0xff] }
 0xc8c   :  { %7633 = vmatpush.bf16.msra.mxu1 %v9641_v22 }
 0xc8d   :  { %v7139_v24 = vpack.c.b16 %v7137_v49, %v7136_v26  ;;  %v9647_v26 = vld [vmem:[%s15938_s5 + $0x8] sm:$0xff]  ;;  %v9646_v49 = vld [vmem:[%s15938_s5] sm:$0xff] }
 0xc8e   :  { %7724 = vmatpush.bf16.msra.mxu2 %v9648_v60 }
 0xc8f   :  { %7552 = vmatmul.bf16.vlgmr.msra.gmra.mxu3 %v7139_v24  ;;  %v7477_v45 = vpop.f32.mrf.mxu0 }
 0xc90   :  { %7634 = vmatpush.bf16.msra.mxu1 %v9640_v7  ;;  %v7478_v11 = vadd.f32 %v9664_v57, %v7477_v45 }
 0xc92   :  { %7725 = vmatpush.bf16.msra.mxu2 %v9647_v26 }
 0xc94   :  { %7635 = vmatpush.bf16.msra.mxu1 %v9639_v56 }
 0xc96   :  { %7726 = vmatpush.bf16.msra.mxu2 %v9646_v49 }
 0xc97   :  { %v7479_v30 = vpop.f32.mrf.mxu0 }
 0xc98   :  { %7636 = vmatpush.bf16.msra.mxu1 %v9638_v0  ;;  %v7480_v46 = vadd.f32 %v9664_v57, %v7479_v30 }
 0xc9c   :  { %v7491_v33 = vpop.f32.mrf.mxu1 }
 0xc9d   :  { %v7492_v14 = vadd.f32 %v7491_v33, %v7473_v12 }
 0xca4   :  { %v7493_v35 = vpop.f32.mrf.mxu1 }
 0xca5   :  { %v7494_v17 = vadd.f32 %v7493_v35, %v7475_v9 }
 0xcac   :  { %v7496_v28 = vpop.f32.mrf.mxu1 }
 0xcad   :  { %v7497_v63 = vadd.f32 %v7496_v28, %v7478_v11 }
 0xcb4   :  { %v7498_v4 = vpop.f32.mrf.mxu1 }
 0xcb5   :  { %v7499_v31 = vadd.f32 %v7498_v4, %v7480_v46 }
 0xcc2   :  { %v7510_v10 = vpop.f32.mrf.mxu2 }
 0xcc3   :  { %v7511_v6 = vadd.f32 %v7510_v10, %v7492_v14  ;;  %v9666_v10 = vld [vmem:[%s15934_s6 + $0x4] ss:$0 sm:$0xff] }
 0xcca   :  { %v7512_v19 = vpop.f32.mrf.mxu2 }
 0xccb   :  { %v7513_v59 = vadd.f32 %v7512_v19, %v7494_v17 }
 0xcd2   :  { %v7515_v23 = vpop.f32.mrf.mxu2 }
 0xcd3   :  { %v7516_v1 = vadd.f32 %v7515_v23, %v7497_v63 }
 0xcda   :  { %v7517_v52 = vpop.f32.mrf.mxu2 }
 0xcdb   :  { %v7518_v3 = vadd.f32 %v7517_v52, %v7499_v31 }
 0xce2   :  { %v7529_v32 = vpop.f32.mrf.mxu3 }
 0xce3   :  { %v7530_v5 = vadd.f32 %v7529_v32, %v7511_v6 }
 0xcea   :  { %v7531_v25 = vpop.f32.mrf.mxu3 }
 0xceb   :  { %v7532_v20 = vadd.f32 %v7531_v25, %v7513_v59 }
 0xcf2   :  { %v7534_v44 = vpop.f32.mrf.mxu3 }
 0xcf3   :  { %v7535_v42 = vadd.f32 %v7534_v44, %v7516_v1 }
 0xcfa   :  { %v7536_v21 = vpop.f32.mrf.mxu3 }
 0xcfb   :  { %v7537_v29 = vadd.f32 %v7536_v21, %v7518_v3 }
 0xcfc   :  { %v7548_v55 = vpop.f32.mrf.mxu0 }
 0xcfd   :  { %v7549_v15 = vadd.f32 %v7548_v55, %v7530_v5 }
 0xcff   :  { %v7558_v48 = vmax.f32 %v7549_v15, 0.0 }
 0xd04   :  { %v7550_v13 = vpop.f32.mrf.mxu0 }
 0xd05   :  { %v7551_v50 = vadd.f32 %v7550_v13, %v7532_v20 }
 0xd07   :  { %v7559_v37 = vmax.f32 %v7551_v50, 0.0 }
 0xd09   :  { %v7562_v2 = vpack.c.bf16 %v7559_v37, %v7558_v48 }
 0xd0b   :  { %7637 = vmatmul.bf16.vlgmr.msra.gmra.mxu1 %v7562_v2 }
 0xd12   :  { %v7553_v39 = vpop.f32.mrf.mxu3 }
 0xd13   :  { %v7554_v38 = vadd.f32 %v7553_v39, %v7535_v42 }
 0xd15   :  { %v7560_v58 = vmax.f32 %v7554_v38, 0.0 }
 0xd1a   :  { %v7555_v41 = vpop.f32.mrf.mxu3 }
 0xd1b   :  { %v7556_v43 = vadd.f32 %v7555_v41, %v7537_v29 }
 0xd1d   :  { %v7561_v40 = vmax.f32 %v7556_v43, 0.0 }
 0xd1f   :  { %v7563_v47 = vpack.c.bf16 %v7561_v40, %v7560_v58 }
 0xd21   :  { %7642 = vmatmul.bf16.gmra.mxu1 %v7563_v47 }
 0xd88   :  { %v7638_v24 = vpop.f32.mrf.mxu1 }
 0xd89   :  { %v7639_v16 = vadd.f32 %v9665_v18, %v7638_v24 }
 0xd8b   :  { %v7648_v8 = vmax.f32 %v7639_v16, 0.0 }
 0xd90   :  { %v7640_v27 = vpop.f32.mrf.mxu1 }
 0xd91   :  { %v7641_v51 = vadd.f32 %v9665_v18, %v7640_v27 }
 0xd93   :  { %v7649_v22 = vmax.f32 %v7641_v51, 0.0 }
 0xd95   :  { %v7652_v7 = vpack.c.bf16 %v7649_v22, %v7648_v8 }
 0xd97   :  { %7727 = vmatmul.bf16.vlgmr.msra.gmra.mxu2 %v7652_v7 }
 0xd9e   :  { %v7643_v34 = vpop.f32.mrf.mxu1 }
 0xd9f   :  { %v7644_v56 = vadd.f32 %v9665_v18, %v7643_v34 }
 0xda1   :  { %v7650_v32 = vmax.f32 %v7644_v56, 0.0 }
 0xda6   :  { %v7645_v0 = vpop.f32.mrf.mxu1 }
 0xda7   :  { %v7646_v45 = vadd.f32 %v9665_v18, %v7645_v0 }
 0xda9   :  { %v7651_v33 = vmax.f32 %v7646_v45, 0.0 }
 0xdab   :  { %v7653_v30 = vpack.c.bf16 %v7651_v33, %v7650_v32 }
 0xdad   :  { %7732 = vmatmul.bf16.gmra.mxu2 %v7653_v30 }
 0xe1a   :  { %v7728_v25 = vpop.f32.mrf.mxu2 }
 0xe1b   :  { %v7729_v57 = vadd.f32 %v9666_v10, %v7728_v25 }
 0xe1d   :  { %7738 = vst [vmem:[%s15939_s7] sm:$0xff] %v7729_v57 }
 0xe22   :  { %v7730_v12 = vpop.f32.mrf.mxu2 }
 0xe23   :  { %v7731_v35 = vadd.f32 %v9666_v10, %v7730_v12 }
 0xe25   :  { %7739 = vst [vmem:[%s15939_s7 + $0x8] sm:$0xff] %v7731_v35 }
 0xe30   :  { %v7733_v55 = vpop.f32.mrf.mxu2 }
 0xe31   :  { %v7734_v9 = vadd.f32 %v9666_v10, %v7733_v55 }
 0xe33   :  { %7740 = vst [vmem:[%s15939_s7 + $0x10] sm:$0xff] %v7734_v9 }
 0xe38   :  { %v7735_v14 = vpop.f32.mrf.mxu2 }
 0xe39   :  { %v7736_v19 = vadd.f32 %v9666_v10, %v7735_v14 }
 0xe3b   :  { %7741 = vst [vmem:[%s15939_s7 + $0x18] sm:$0xff] %v7736_v19 }

</bundles_post_ra>
